<compile_context>
chip_gen: v7x
topology: tpu7x:2x2x1
jax: 0.10.0
libtpu: 0.0.40
codegen_flags: <defaults>
</compile_context>

<pallas_src>
import functools

import jax
import jax.numpy as jnp
from jax import lax
from jax.experimental import pallas as pl
from jax.experimental.pallas import tpu as pltpu

SQRT_2_OVER_PI = 0.7978845608028654


def _gelu_tanh(x):
    # matches F.gelu(x, approximate='tanh')
    return 0.5 * x * (1.0 + jnp.tanh(SQRT_2_OVER_PI * (x + 0.044715 * x * x * x)))


# ----------------------------------------------------------------------------
# Fused kernel: conv2..conv5 + LayerNorm/projection + 3-layer GRU + head,
# for one batch block per grid step.
# ----------------------------------------------------------------------------

def _fused_kernel(a1_ref, w2_ref, w3_ref, w4_ref, w5_ref,
                  lng_ref, lnb_ref, fpw_ref, fpb_ref,
                  wih_ref, whh_ref, bih_ref, bhh_ref,
                  hw_ref, hb_ref,
                  phone_ref, stats_ref,
                  *scratch, dims, n_layers):
    BB, T2, T3, T4, T5, H = dims
    f32 = jnp.float32
    bf16 = jnp.bfloat16

    buf1, buf2, buf3, buf4 = scratch[0:4]
    xp_refs = scratch[4:4 + BB]                  # per-batch (T5, H) projection out
    sq_refs = scratch[4 + BB:4 + 2 * BB]         # per-batch (T5, H) GRU layer out
    gi_refs = scratch[4 + 2 * BB:4 + 3 * BB]     # per-batch (T5, 3H) input gates

    def mm(a, b):
        # bf16 MXU operands, f32 accumulation.
        return jnp.dot(a.astype(bf16), b, preferred_element_type=f32)

    def conv_k3s2(src_ref, w_ref, t_out):
        acc = mm(src_ref[pl.ds(0, t_out, stride=2), :], w_ref[0])
        acc = acc + mm(src_ref[pl.ds(1, t_out, stride=2), :], w_ref[1])
        acc = acc + mm(src_ref[pl.ds(2, t_out, stride=2), :], w_ref[2])
        return _gelu_tanh(acc)

    ln_g = lng_ref[...]
    ln_b = lnb_ref[...]
    fp_w = fpw_ref[...]
    fp_b = fpb_ref[...]

    f_acc = jnp.zeros((1, 1), f32)

    # ---- FeatureExtractor conv2..conv5 + FeatureProjection (per batch row) ---
    for b in range(BB):
        buf1[...] = a1_ref[b]                                     # (T1, C1)
        buf2[...] = conv_k3s2(buf1, w2_ref, T2)
        buf3[...] = conv_k3s2(buf2, w3_ref, T3)
        buf4[...] = conv_k3s2(buf3, w4_ref, T4)
        # conv5: kernel 2, stride 2
        feat = _gelu_tanh(mm(buf4[pl.ds(0, T5, stride=2), :], w5_ref[0]) +
                          mm(buf4[pl.ds(1, T5, stride=2), :], w5_ref[1]))  # (T5,H)

        # feature_norm partial: sum_t ||feat[t, :]||_2
        f_acc = f_acc + jnp.sum(
            jnp.sqrt(jnp.sum(feat * feat, axis=-1, keepdims=True)),
            axis=0, keepdims=True)

        # LayerNorm(C) + 1x1 projection (dropout = identity at inference)
        mu = jnp.mean(feat, axis=-1, keepdims=True)
        var = jnp.mean(jnp.square(feat - mu), axis=-1, keepdims=True)
        xn = (feat - mu) * lax.rsqrt(var + 1e-5) * ln_g + ln_b
        xp_refs[b][...] = mm(xn, fp_w) + fp_b                     # (T5, H)

    # ---- speaker encoder: 3-layer GRU, batched (BB, H) state, fused gates ----
    # PyTorch gate order along the fused 3H axis: [r | z | n].
    for l in range(n_layers):
        w_i = wih_ref[l]          # (H, 3H) bf16
        w_h = whh_ref[l]          # (H, 3H) bf16
        b_i = bih_ref[l]          # (1, 3H) f32
        b_h = bhh_ref[l]          # (1, 3H) f32

        # all input gates for this layer in one big dot (off the serial path)
        for b in range(BB):
            src = xp_refs[b] if l == 0 else sq_refs[b]
            gi_refs[b][...] = mm(src[...], w_i) + b_i             # (T5, 3H)

        def step(t, h_prev, _wh=w_h, _bh=b_h):
            gi_t = jnp.concatenate(
                [gi_refs[b][pl.ds(t, 1), :] for b in range(BB)], axis=0)  # (BB,3H)
            gh = mm(h_prev, _wh) + _bh                                     # (BB,3H)
            r = jax.nn.sigmoid(gi_t[:, 0:H] + gh[:, 0:H])
            z = jax.nn.sigmoid(gi_t[:, H:2 * H] + gh[:, H:2 * H])
            n = jnp.tanh(gi_t[:, 2 * H:3 * H] + r * gh[:, 2 * H:3 * H])
            h_new = (1.0 - z) * n + z * h_prev
            for b in range(BB):
                sq_refs[b][pl.ds(t, 1), :] = h_new[b:b + 1, :]
            return h_new

        lax.fori_loop(0, T5, step, jnp.zeros((BB, H), f32),
                      unroll=bool(T5 <= 16))

    # ---- residual + head (computed in (P, T) orientation), per batch row ----
    hw = hw_ref[...]                                 # (P, H) bf16
    hb = hb_ref[...]                                 # (P, 1) f32
    c_acc = jnp.zeros((1, 1), f32)
    for b in range(BB):
        y = xp_refs[b][...] + sq_refs[b][...]        # (T5, H)
        # TODO(synk): ConvNeXtStack backbone definition not provided -> identity.
        gy = _gelu_tanh(y).astype(jnp.bfloat16)
        ph = lax.dot_general(hw, gy, (((1,), (1,)), ((), ())),
                             preferred_element_type=f32) + hb     # (P, T5)
        phone_ref[b] = ph
        # code_norm partial: sum_t ||ph[:, t]||_2
        c_acc = c_acc + jnp.sum(
            jnp.sqrt(jnp.sum(ph * ph, axis=0, keepdims=True)),
            axis=1, keepdims=True)

    stats_ref[0, :, 0:1] = f_acc
    stats_ref[0, :, 1:2] = c_acc


# ----------------------------------------------------------------------------
# Parameter init / packing (done once, outside the per-call path)
# ----------------------------------------------------------------------------

def init_params(key, hidden=32, phone=32, n_gru_layers=3):
    """PyTorch-layout parameters (weight_norm at init == raw weight)."""
    params = {}
    cnt = [0]

    def rnd(shape, scale=0.1):
        k = jax.random.fold_in(key, cnt[0])
        cnt[0] += 1
        return scale * jax.random.normal(k, shape, jnp.float32)

    params["conv0"] = rnd((hidden // 8, 1, 10))
    params["conv1"] = rnd((hidden // 4, hidden // 8, 3))
    params["conv2"] = rnd((hidden // 2, hidden // 4, 3))
    params["conv3"] = rnd((hidden, hidden // 2, 3))
    params["conv4"] = rnd((hidden, hidden, 3))
    params["conv5"] = rnd((hidden, hidden, 2))
    params["fp_ln_g"] = jnp.ones((hidden,), jnp.float32)
    params["fp_ln_b"] = jnp.zeros((hidden,), jnp.float32)
    params["fp_w"] = rnd((hidden, hidden, 1))
    params["fp_b"] = rnd((hidden,))
    for l in range(n_gru_layers):
        params[f"gru_w_ih_{l}"] = rnd((3 * hidden, hidden))
        params[f"gru_w_hh_{l}"] = rnd((3 * hidden, hidden))
        params[f"gru_b_ih_{l}"] = rnd((3 * hidden,))
        params[f"gru_b_hh_{l}"] = rnd((3 * hidden,))
    params["head_w"] = rnd((phone, hidden, 1))
    params["head_b"] = rnd((phone,))
    return params


def pack_params(p, n_gru_layers=3):
    """Reshape PyTorch-layout params into kernel-ready (mostly bf16) operands."""
    H = p["fp_w"].shape[0]
    f32, bf16 = jnp.float32, jnp.bfloat16
    packed = {}
    # conv0 / conv1 stay in PyTorch conv layout: they run in plain XLA.
    packed["conv0_w"] = p["conv0"].astype(f32)            # (C0, 1, 10)
    packed["conv1_w"] = p["conv1"].astype(f32)            # (C1, C0, 3)
    for i in range(2, 6):                                  # (Cout,Cin,K)->(K,Cin,Cout)
        packed[f"w{i}"] = jnp.transpose(p[f"conv{i}"], (2, 1, 0)).astype(bf16)
    packed["ln_g"] = p["fp_ln_g"].reshape(1, H).astype(f32)
    packed["ln_b"] = p["fp_ln_b"].reshape(1, H).astype(f32)
    packed["fp_w"] = p["fp_w"][:, :, 0].T.astype(bf16)     # (Hin, Hout)
    packed["fp_b"] = p["fp_b"].reshape(1, H).astype(f32)
    # GRU: fused (H, 3H) slabs, gate order [r | z | n] along the 3H axis.
    packed["wih"] = jnp.stack(
        [p[f"gru_w_ih_{l}"].T for l in range(n_gru_layers)]).astype(bf16)   # (L,H,3H)
    packed["whh"] = jnp.stack(
        [p[f"gru_w_hh_{l}"].T for l in range(n_gru_layers)]).astype(bf16)   # (L,H,3H)
    packed["bih"] = jnp.stack(
        [p[f"gru_b_ih_{l}"].reshape(1, 3 * H) for l in range(n_gru_layers)]).astype(f32)
    packed["bhh"] = jnp.stack(
        [p[f"gru_b_hh_{l}"].reshape(1, 3 * H) for l in range(n_gru_layers)]).astype(f32)
    packed["head_w"] = p["head_w"][:, :, 0].astype(bf16)   # (P, H)  (lhs of NT dot)
    packed["head_b"] = p["head_b"].reshape(-1, 1).astype(f32)   # (P, 1)
    return packed


# ----------------------------------------------------------------------------
# Forward wrapper
# ----------------------------------------------------------------------------

def _padded_bytes(shape, dtype):
    """Conservative (8,128)-padded VMEM size of a buffer."""
    item = jnp.dtype(dtype).itemsize
    if len(shape) == 0:
        return 4
    if len(shape) == 1:
        return max(512, -(-int(shape[0]) * item // 512) * 512)
    lanes = -(-int(shape[-1]) // 128) * 128
    sub = -(-int(shape[-2]) // 8) * 8
    lead = 1
    for d in shape[:-2]:
        lead *= int(d)
    return lead * sub * lanes * item


def phone_extractor_forward(wav_bcl, pp, n_gru_layers=3, batch_block=None):
    """wav: (B, 1, L) float32 (PyTorch NCL).  Returns (phone (B, P, T), stats)."""
    B, _, L = wav_bcl.shape
    H = pp["fp_w"].shape[0]
    P = pp["head_w"].shape[0]

    # ---- conv0 / conv1 in plain XLA (tiny channel counts; avoids the 5-lane
    #      input layout and the two largest time-length VMEM buffers) ---------
    x = jnp.pad(wav_bcl.astype(jnp.float32), ((0, 0), (0, 0), (40, 40)))
    a0 = _gelu_tanh(lax.conv_general_dilated(
        x, pp["conv0_w"], window_strides=(5,), padding="VALID",
        dimension_numbers=("NCH", "OIH", "NCH")))                 # (B, C0, T0)
    a1 = _gelu_tanh(lax.conv_general_dilated(
        a0, pp["conv1_w"], window_strides=(2,), padding="VALID",
        dimension_numbers=("NCH", "OIH", "NHC")))                 # (B, T1, C1)
    _, T1, C1 = a1.shape

    T2 = (T1 - 3) // 2 + 1
    T3 = (T2 - 3) // 2 + 1
    T4 = (T3 - 3) // 2 + 1
    T5 = (T4 - 2) // 2 + 1

    BB = B if batch_block is None else batch_block   # v7x: use batch_block = B // 2
    assert B % BB == 0, "batch_block must divide batch size"
    n_blocks = B // BB

    C2 = pp["w2"].shape[-1]
    C3 = pp["w3"].shape[-1]
    C4 = pp["w4"].shape[-1]

    weights = [pp["w2"], pp["w3"], pp["w4"], pp["w5"],
               pp["ln_g"], pp["ln_b"], pp["fp_w"], pp["fp_b"],
               pp["wih"], pp["whh"], pp["bih"], pp["bhh"],
               pp["head_w"], pp["head_b"]]

    def const_spec(arr):
        zeros = (0,) * arr.ndim
        return pl.BlockSpec(arr.shape, lambda i, _z=zeros: _z)

    in_specs = ([pl.BlockSpec((BB, T1, C1), lambda i: (i, 0, 0))] +
                [const_spec(w) for w in weights])
    out_specs = [pl.BlockSpec((BB, P, T5), lambda i: (i, 0, 0)),
                 pl.BlockSpec((1, 1, 2), lambda i: (i, 0, 0))]

    scratch_shapes = ([pltpu.VMEM((T1, C1), jnp.float32),
                       pltpu.VMEM((T2, C2), jnp.float32),
                       pltpu.VMEM((T3, C3), jnp.float32),
                       pltpu.VMEM((T4, C4), jnp.float32)] +
                      [pltpu.VMEM((T5, H), jnp.float32) for _ in range(BB)] +       # xp
                      [pltpu.VMEM((T5, H), jnp.float32) for _ in range(BB)] +       # GRU out
                      [pltpu.VMEM((T5, 3 * H), jnp.float32) for _ in range(BB)])    # gates

    # explicit VMEM budget (review): double-buffered blocks + weights + scratch.
    vmem = 2 * _padded_bytes((BB, T1, C1), jnp.float32)
    vmem += sum(2 * _padded_bytes(w.shape, w.dtype) for w in weights)
    vmem += 2 * _padded_bytes((BB, P, T5), jnp.float32)
    vmem += 2 * _padded_bytes((1, 1, 2), jnp.float32)
    vmem += (_padded_bytes((T1, C1), jnp.float32) + _padded_bytes((T2, C2), jnp.float32) +
             _padded_bytes((T3, C3), jnp.float32) + _padded_bytes((T4, C4), jnp.float32))
    vmem += BB * (2 * _padded_bytes((T5, H), jnp.float32) +
                  _padded_bytes((T5, 3 * H), jnp.float32))
    vmem_limit = int(min(100 * 2**20, max(32 * 2**20, int(1.5 * vmem) + (4 << 20))))

    kernel = functools.partial(_fused_kernel,
                               dims=(BB, T2, T3, T4, T5, H),
                               n_layers=n_gru_layers)

    phone, stats_raw = pl.pallas_call(
        kernel,
        out_shape=(jax.ShapeDtypeStruct((B, P, T5), jnp.float32),
                   jax.ShapeDtypeStruct((n_blocks, 1, 2), jnp.float32)),
        grid_spec=pltpu.PrefetchScalarGridSpec(
            num_scalar_prefetch=0,
            grid=(n_blocks,),
            in_specs=in_specs,
            out_specs=out_specs,
            scratch_shapes=scratch_shapes),
        compiler_params=pltpu.CompilerParams(
            dimension_semantics=("parallel",),
            vmem_limit_bytes=vmem_limit),
    )(a1, *weights)

    denom = jnp.float32(B * T5)
    stats = {
        "feature_norm": jnp.sum(stats_raw[:, 0, 0]) / denom,   # mean over batch & time
        "code_norm": jnp.sum(stats_raw[:, 0, 1]) / denom,
    }
    return phone, stats                                        # phone: (B, P, T5)


# ----------------------------------------------------------------------------

if __name__ == "__main__":
    key = jax.random.PRNGKey(0)
    hidden_channels = 32
    phone_channels = 32
    B = 2
    L = 160 * 8                                  # wav_length % 160 == 0 -> T = 8

    params = init_params(jax.random.fold_in(key, 1),
                         hidden=hidden_channels, phone=phone_channels)
    packed = pack_params(params)                 # one-time packing, not per call
    wav = jax.random.normal(jax.random.fold_in(key, 2), (B, 1, L), jnp.float32)

    fwd = jax.jit(phone_extractor_forward)
    phone, stats = fwd(wav, packed)
    phone = jax.block_until_ready(phone)
    _ = jax.block_until_ready(stats["feature_norm"])
    _ = jax.block_until_ready(stats["code_norm"])

    assert phone.shape == (B, phone_channels, L // 160), phone.shape
    assert bool(jnp.all(jnp.isfinite(phone)))
    print("KERNEL_OK")
</pallas_src>

<mosaic_0001>
module attributes {stable_mosaic.version = 11 : i64} {
  func.func @_fused_kernel(%arg0: i32, %arg1: memref<2x135x8xf32, #tpu.memory_space<vmem>>, %arg2: memref<3x8x16xbf16, #tpu.memory_space<vmem>>, %arg3: memref<3x16x32xbf16, #tpu.memory_space<vmem>>, %arg4: memref<3x32x32xbf16, #tpu.memory_space<vmem>>, %arg5: memref<2x32x32xbf16, #tpu.memory_space<vmem>>, %arg6: memref<1x32xf32, #tpu.memory_space<vmem>>, %arg7: memref<1x32xf32, #tpu.memory_space<vmem>>, %arg8: memref<32x32xbf16, #tpu.memory_space<vmem>>, %arg9: memref<1x32xf32, #tpu.memory_space<vmem>>, %arg10: memref<3x32x96xbf16, #tpu.memory_space<vmem>>, %arg11: memref<3x32x96xbf16, #tpu.memory_space<vmem>>, %arg12: memref<3x1x96xf32, #tpu.memory_space<vmem>>, %arg13: memref<3x1x96xf32, #tpu.memory_space<vmem>>, %arg14: memref<32x32xbf16, #tpu.memory_space<vmem>>, %arg15: memref<32x1xf32, #tpu.memory_space<vmem>>, %arg16: memref<2x32x8xf32, #tpu.memory_space<vmem>>, %arg17: memref<1x1x2xf32, #tpu.memory_space<vmem>>, %arg18: memref<135x8xf32, #tpu.memory_space<vmem>>, %arg19: memref<67x16xf32, #tpu.memory_space<vmem>>, %arg20: memref<33x32xf32, #tpu.memory_space<vmem>>, %arg21: memref<16x32xf32, #tpu.memory_space<vmem>>, %arg22: memref<8x32xf32, #tpu.memory_space<vmem>>, %arg23: memref<8x32xf32, #tpu.memory_space<vmem>>, %arg24: memref<8x32xf32, #tpu.memory_space<vmem>>, %arg25: memref<8x32xf32, #tpu.memory_space<vmem>>, %arg26: memref<8x96xf32, #tpu.memory_space<vmem>>, %arg27: memref<8x96xf32, #tpu.memory_space<vmem>>) attributes {dimension_semantics = [#tpu.dimension_semantics<parallel>], iteration_bounds = array<i64: 1>, scalar_prefetch = 0 : i64, scratch_operands = 10 : i64, tpu.core_type = #tpu.core_type<tc>, window_params = [{transform_indices = @transform_0, window_bounds = array<i64: 2, 135, 8>}, {pipeline_mode = #tpu.pipeline_mode<synchronous>, transform_indices = @transform_1, window_bounds = array<i64: 3, 8, 16>}, {pipeline_mode = #tpu.pipeline_mode<synchronous>, transform_indices = @transform_2, window_bounds = array<i64: 3, 16, 32>}, {pipeline_mode = #tpu.pipeline_mode<synchronous>, transform_indices = @transform_3, window_bounds = array<i64: 3, 32, 32>}, {pipeline_mode = #tpu.pipeline_mode<synchronous>, transform_indices = @transform_4, window_bounds = array<i64: 2, 32, 32>}, {pipeline_mode = #tpu.pipeline_mode<synchronous>, transform_indices = @transform_5, window_bounds = array<i64: 1, 32>}, {pipeline_mode = #tpu.pipeline_mode<synchronous>, transform_indices = @transform_6, window_bounds = array<i64: 1, 32>}, {pipeline_mode = #tpu.pipeline_mode<synchronous>, transform_indices = @transform_7, window_bounds = array<i64: 32, 32>}, {pipeline_mode = #tpu.pipeline_mode<synchronous>, transform_indices = @transform_8, window_bounds = array<i64: 1, 32>}, {pipeline_mode = #tpu.pipeline_mode<synchronous>, transform_indices = @transform_9, window_bounds = array<i64: 3, 32, 96>}, {pipeline_mode = #tpu.pipeline_mode<synchronous>, transform_indices = @transform_10, window_bounds = array<i64: 3, 32, 96>}, {pipeline_mode = #tpu.pipeline_mode<synchronous>, transform_indices = @transform_11, window_bounds = array<i64: 3, 1, 96>}, {pipeline_mode = #tpu.pipeline_mode<synchronous>, transform_indices = @transform_12, window_bounds = array<i64: 3, 1, 96>}, {pipeline_mode = #tpu.pipeline_mode<synchronous>, transform_indices = @transform_13, window_bounds = array<i64: 32, 32>}, {pipeline_mode = #tpu.pipeline_mode<synchronous>, transform_indices = @transform_14, window_bounds = array<i64: 32, 1>}, {transform_indices = @transform_15, window_bounds = array<i64: 2, 32, 8>}, {transform_indices = @transform_16, window_bounds = array<i64: 1, 1, 2>}]} {
    %c0 = arith.constant 0 : index
    %c0_0 = arith.constant 0 : index
    %0 = vector.load %arg6[%c0, %c0_0] : memref<1x32xf32, #tpu.memory_space<vmem>>, vector<1x32xf32>
    %c0_1 = arith.constant 0 : index
    %c0_2 = arith.constant 0 : index
    %1 = vector.load %arg7[%c0_1, %c0_2] : memref<1x32xf32, #tpu.memory_space<vmem>>, vector<1x32xf32>
    %c0_3 = arith.constant 0 : index
    %c0_4 = arith.constant 0 : index
    %2 = vector.load %arg8[%c0_3, %c0_4] : memref<32x32xbf16, #tpu.memory_space<vmem>>, vector<32x32xbf16>
    %c0_5 = arith.constant 0 : index
    %c0_6 = arith.constant 0 : index
    %3 = vector.load %arg9[%c0_5, %c0_6] : memref<1x32xf32, #tpu.memory_space<vmem>>, vector<1x32xf32>
    %cst = arith.constant 0.000000e+00 : f32
    %4 = vector.broadcast %cst : f32 to vector<1x1xf32>
    %c0_7 = arith.constant 0 : index
    %c0_8 = arith.constant 0 : index
    %c0_9 = arith.constant 0 : index
    %5 = vector.load %arg1[%c0_7, %c0_8, %c0_9] : memref<2x135x8xf32, #tpu.memory_space<vmem>>, vector<1x135x8xf32>
    %6 = vector.shape_cast %5 : vector<1x135x8xf32> to vector<135x8xf32>
    %c0_10 = arith.constant 0 : index
    %c0_11 = arith.constant 0 : index
    %7 = vector.load %arg18[%c0_10, %c0_11] : memref<135x8xf32, #tpu.memory_space<vmem>>, vector<135x8xf32>
    tpu.vector_store %arg18[%c0_10, %c0_11], %6 {strides = array<i32>} : memref<135x8xf32, #tpu.memory_space<vmem>>, vector<135x8xf32>,
    %c0_12 = arith.constant 0 : index
    %c0_13 = arith.constant 0 : index
    %8 = tpu.strided_load %arg18[%c0_12, %c0_13] {strides = array<i32: 2, 1>} : memref<135x8xf32, #tpu.memory_space<vmem>>, vector<67x8xf32>
    %c0_14 = arith.constant 0 : index
    %c0_15 = arith.constant 0 : index
    %c0_16 = arith.constant 0 : index
    %9 = vector.load %arg2[%c0_14, %c0_15, %c0_16] : memref<3x8x16xbf16, #tpu.memory_space<vmem>>, vector<1x8x16xbf16>
    %10 = vector.shape_cast %9 : vector<1x8x16xbf16> to vector<8x16xbf16>
    %11 = arith.truncf %8 : vector<67x8xf32> to vector<67x8xbf16>
    %cst_17 = arith.constant dense<0.000000e+00> : vector<67x16xf32>
    %12 = tpu.matmul %11, %10, %cst_17 {dimension_numbers = #tpu.dot_dimension_numbers<[1], [0], [0], [1], [0, 0, 1, 1], [], []>} : vector<67x8xbf16>, vector<8x16xbf16>, vector<67x16xf32> -> vector<67x16xf32>
    %c1 = arith.constant 1 : index
    %c0_18 = arith.constant 0 : index
    %13 = tpu.strided_load %arg18[%c1, %c0_18] {strides = array<i32: 2, 1>} : memref<135x8xf32, #tpu.memory_space<vmem>>, vector<67x8xf32>
    %c1_19 = arith.constant 1 : index
    %c0_20 = arith.constant 0 : index
    %c0_21 = arith.constant 0 : index
    %14 = vector.load %arg2[%c1_19, %c0_20, %c0_21] : memref<3x8x16xbf16, #tpu.memory_space<vmem>>, vector<1x8x16xbf16>
    %15 = vector.shape_cast %14 : vector<1x8x16xbf16> to vector<8x16xbf16>
    %16 = arith.truncf %13 : vector<67x8xf32> to vector<67x8xbf16>
    %cst_22 = arith.constant dense<0.000000e+00> : vector<67x16xf32>
    %17 = tpu.matmul %16, %15, %cst_22 {dimension_numbers = #tpu.dot_dimension_numbers<[1], [0], [0], [1], [0, 0, 1, 1], [], []>} : vector<67x8xbf16>, vector<8x16xbf16>, vector<67x16xf32> -> vector<67x16xf32>
    %18 = arith.addf %12, %17 : vector<67x16xf32>
    %c2 = arith.constant 2 : index
    %c0_23 = arith.constant 0 : index
    %19 = tpu.strided_load %arg18[%c2, %c0_23] {strides = array<i32: 2, 1>} : memref<135x8xf32, #tpu.memory_space<vmem>>, vector<67x8xf32>
    %c2_24 = arith.constant 2 : index
    %c0_25 = arith.constant 0 : index
    %c0_26 = arith.constant 0 : index
    %20 = vector.load %arg2[%c2_24, %c0_25, %c0_26] : memref<3x8x16xbf16, #tpu.memory_space<vmem>>, vector<1x8x16xbf16>
    %21 = vector.shape_cast %20 : vector<1x8x16xbf16> to vector<8x16xbf16>
    %22 = arith.truncf %19 : vector<67x8xf32> to vector<67x8xbf16>
    %cst_27 = arith.constant dense<0.000000e+00> : vector<67x16xf32>
    %23 = tpu.matmul %22, %21, %cst_27 {dimension_numbers = #tpu.dot_dimension_numbers<[1], [0], [0], [1], [0, 0, 1, 1], [], []>} : vector<67x8xbf16>, vector<8x16xbf16>, vector<67x16xf32> -> vector<67x16xf32>
    %24 = arith.addf %18, %23 : vector<67x16xf32>
    %cst_28 = arith.constant 5.000000e-01 : f32
    %25 = vector.broadcast %cst_28 : f32 to vector<67x16xf32>
    %26 = arith.mulf %25, %24 : vector<67x16xf32>
    %cst_29 = arith.constant 4.471500e-02 : f32
    %27 = vector.broadcast %cst_29 : f32 to vector<67x16xf32>
    %28 = arith.mulf %27, %24 : vector<67x16xf32>
    %29 = arith.mulf %28, %24 : vector<67x16xf32>
    %30 = arith.mulf %29, %24 : vector<67x16xf32>
    %31 = arith.addf %24, %30 : vector<67x16xf32>
    %cst_30 = arith.constant 0.797884583 : f32
    %32 = vector.broadcast %cst_30 : f32 to vector<67x16xf32>
    %33 = arith.mulf %32, %31 : vector<67x16xf32>
    %34 = math.tanh %33 : vector<67x16xf32>
    %cst_31 = arith.constant 1.000000e+00 : f32
    %35 = vector.broadcast %cst_31 : f32 to vector<67x16xf32>
    %36 = arith.addf %35, %34 : vector<67x16xf32>
    %37 = arith.mulf %26, %36 : vector<67x16xf32>
    %c0_32 = arith.constant 0 : index
    %c0_33 = arith.constant 0 : index
    %38 = vector.load %arg19[%c0_32, %c0_33] : memref<67x16xf32, #tpu.memory_space<vmem>>, vector<67x16xf32>
    tpu.vector_store %arg19[%c0_32, %c0_33], %37 {strides = array<i32>} : memref<67x16xf32, #tpu.memory_space<vmem>>, vector<67x16xf32>,
    %c0_34 = arith.constant 0 : index
    %c0_35 = arith.constant 0 : index
    %39 = tpu.strided_load %arg19[%c0_34, %c0_35] {strides = array<i32: 2, 1>} : memref<67x16xf32, #tpu.memory_space<vmem>>, vector<33x16xf32>
    %c0_36 = arith.constant 0 : index
    %c0_37 = arith.constant 0 : index
    %c0_38 = arith.constant 0 : index
    %40 = vector.load %arg3[%c0_36, %c0_37, %c0_38] : memref<3x16x32xbf16, #tpu.memory_space<vmem>>, vector<1x16x32xbf16>
    %41 = vector.shape_cast %40 : vector<1x16x32xbf16> to vector<16x32xbf16>
    %42 = arith.truncf %39 : vector<33x16xf32> to vector<33x16xbf16>
    %cst_39 = arith.constant dense<0.000000e+00> : vector<33x32xf32>
    %43 = tpu.matmul %42, %41, %cst_39 {dimension_numbers = #tpu.dot_dimension_numbers<[1], [0], [0], [1], [0, 0, 1, 1], [], []>} : vector<33x16xbf16>, vector<16x32xbf16>, vector<33x32xf32> -> vector<33x32xf32>
    %c1_40 = arith.constant 1 : index
    %c0_41 = arith.constant 0 : index
    %44 = tpu.strided_load %arg19[%c1_40, %c0_41] {strides = array<i32: 2, 1>} : memref<67x16xf32, #tpu.memory_space<vmem>>, vector<33x16xf32>
    %c1_42 = arith.constant 1 : index
    %c0_43 = arith.constant 0 : index
    %c0_44 = arith.constant 0 : index
    %45 = vector.load %arg3[%c1_42, %c0_43, %c0_44] : memref<3x16x32xbf16, #tpu.memory_space<vmem>>, vector<1x16x32xbf16>
    %46 = vector.shape_cast %45 : vector<1x16x32xbf16> to vector<16x32xbf16>
    %47 = arith.truncf %44 : vector<33x16xf32> to vector<33x16xbf16>
    %cst_45 = arith.constant dense<0.000000e+00> : vector<33x32xf32>
    %48 = tpu.matmul %47, %46, %cst_45 {dimension_numbers = #tpu.dot_dimension_numbers<[1], [0], [0], [1], [0, 0, 1, 1], [], []>} : vector<33x16xbf16>, vector<16x32xbf16>, vector<33x32xf32> -> vector<33x32xf32>
    %49 = arith.addf %43, %48 : vector<33x32xf32>
    %c2_46 = arith.constant 2 : index
    %c0_47 = arith.constant 0 : index
    %50 = tpu.strided_load %arg19[%c2_46, %c0_47] {strides = array<i32: 2, 1>} : memref<67x16xf32, #tpu.memory_space<vmem>>, vector<33x16xf32>
    %c2_48 = arith.constant 2 : index
    %c0_49 = arith.constant 0 : index
    %c0_50 = arith.constant 0 : index
    %51 = vector.load %arg3[%c2_48, %c0_49, %c0_50] : memref<3x16x32xbf16, #tpu.memory_space<vmem>>, vector<1x16x32xbf16>
    %52 = vector.shape_cast %51 : vector<1x16x32xbf16> to vector<16x32xbf16>
    %53 = arith.truncf %50 : vector<33x16xf32> to vector<33x16xbf16>
    %cst_51 = arith.constant dense<0.000000e+00> : vector<33x32xf32>
    %54 = tpu.matmul %53, %52, %cst_51 {dimension_numbers = #tpu.dot_dimension_numbers<[1], [0], [0], [1], [0, 0, 1, 1], [], []>} : vector<33x16xbf16>, vector<16x32xbf16>, vector<33x32xf32> -> vector<33x32xf32>
    %55 = arith.addf %49, %54 : vector<33x32xf32>
    %cst_52 = arith.constant 5.000000e-01 : f32
    %56 = vector.broadcast %cst_52 : f32 to vector<33x32xf32>
    %57 = arith.mulf %56, %55 : vector<33x32xf32>
    %cst_53 = arith.constant 4.471500e-02 : f32
    %58 = vector.broadcast %cst_53 : f32 to vector<33x32xf32>
    %59 = arith.mulf %58, %55 : vector<33x32xf32>
    %60 = arith.mulf %59, %55 : vector<33x32xf32>
    %61 = arith.mulf %60, %55 : vector<33x32xf32>
    %62 = arith.addf %55, %61 : vector<33x32xf32>
    %cst_54 = arith.constant 0.797884583 : f32
    %63 = vector.broadcast %cst_54 : f32 to vector<33x32xf32>
    %64 = arith.mulf %63, %62 : vector<33x32xf32>
    %65 = math.tanh %64 : vector<33x32xf32>
    %cst_55 = arith.constant 1.000000e+00 : f32
    %66 = vector.broadcast %cst_55 : f32 to vector<33x32xf32>
    %67 = arith.addf %66, %65 : vector<33x32xf32>
    %68 = arith.mulf %57, %67 : vector<33x32xf32>
    %c0_56 = arith.constant 0 : index
    %c0_57 = arith.constant 0 : index
    %69 = vector.load %arg20[%c0_56, %c0_57] : memref<33x32xf32, #tpu.memory_space<vmem>>, vector<33x32xf32>
    tpu.vector_store %arg20[%c0_56, %c0_57], %68 {strides = array<i32>} : memref<33x32xf32, #tpu.memory_space<vmem>>, vector<33x32xf32>,
    %c0_58 = arith.constant 0 : index
    %c0_59 = arith.constant 0 : index
    %70 = tpu.strided_load %arg20[%c0_58, %c0_59] {strides = array<i32: 2, 1>} : memref<33x32xf32, #tpu.memory_space<vmem>>, vector<16x32xf32>
    %c0_60 = arith.constant 0 : index
    %c0_61 = arith.constant 0 : index
    %c0_62 = arith.constant 0 : index
    %71 = vector.load %arg4[%c0_60, %c0_61, %c0_62] : memref<3x32x32xbf16, #tpu.memory_space<vmem>>, vector<1x32x32xbf16>
    %72 = vector.shape_cast %71 : vector<1x32x32xbf16> to vector<32x32xbf16>
    %73 = arith.truncf %70 : vector<16x32xf32> to vector<16x32xbf16>
    %cst_63 = arith.constant dense<0.000000e+00> : vector<16x32xf32>
    %74 = tpu.matmul %73, %72, %cst_63 {dimension_numbers = #tpu.dot_dimension_numbers<[1], [0], [0], [1], [0, 0, 1, 1], [], []>} : vector<16x32xbf16>, vector<32x32xbf16>, vector<16x32xf32> -> vector<16x32xf32>
    %c1_64 = arith.constant 1 : index
    %c0_65 = arith.constant 0 : index
    %75 = tpu.strided_load %arg20[%c1_64, %c0_65] {strides = array<i32: 2, 1>} : memref<33x32xf32, #tpu.memory_space<vmem>>, vector<16x32xf32>
    %c1_66 = arith.constant 1 : index
    %c0_67 = arith.constant 0 : index
    %c0_68 = arith.constant 0 : index
    %76 = vector.load %arg4[%c1_66, %c0_67, %c0_68] : memref<3x32x32xbf16, #tpu.memory_space<vmem>>, vector<1x32x32xbf16>
    %77 = vector.shape_cast %76 : vector<1x32x32xbf16> to vector<32x32xbf16>
    %78 = arith.truncf %75 : vector<16x32xf32> to vector<16x32xbf16>
    %cst_69 = arith.constant dense<0.000000e+00> : vector<16x32xf32>
    %79 = tpu.matmul %78, %77, %cst_69 {dimension_numbers = #tpu.dot_dimension_numbers<[1], [0], [0], [1], [0, 0, 1, 1], [], []>} : vector<16x32xbf16>, vector<32x32xbf16>, vector<16x32xf32> -> vector<16x32xf32>
    %80 = arith.addf %74, %79 : vector<16x32xf32>
    %c2_70 = arith.constant 2 : index
    %c0_71 = arith.constant 0 : index
    %81 = tpu.strided_load %arg20[%c2_70, %c0_71] {strides = array<i32: 2, 1>} : memref<33x32xf32, #tpu.memory_space<vmem>>, vector<16x32xf32>
    %c2_72 = arith.constant 2 : index
    %c0_73 = arith.constant 0 : index
    %c0_74 = arith.constant 0 : index
    %82 = vector.load %arg4[%c2_72, %c0_73, %c0_74] : memref<3x32x32xbf16, #tpu.memory_space<vmem>>, vector<1x32x32xbf16>
    %83 = vector.shape_cast %82 : vector<1x32x32xbf16> to vector<32x32xbf16>
    %84 = arith.truncf %81 : vector<16x32xf32> to vector<16x32xbf16>
    %cst_75 = arith.constant dense<0.000000e+00> : vector<16x32xf32>
    %85 = tpu.matmul %84, %83, %cst_75 {dimension_numbers = #tpu.dot_dimension_numbers<[1], [0], [0], [1], [0, 0, 1, 1], [], []>} : vector<16x32xbf16>, vector<32x32xbf16>, vector<16x32xf32> -> vector<16x32xf32>
    %86 = arith.addf %80, %85 : vector<16x32xf32>
    %cst_76 = arith.constant 5.000000e-01 : f32
    %87 = vector.broadcast %cst_76 : f32 to vector<16x32xf32>
    %88 = arith.mulf %87, %86 : vector<16x32xf32>
    %cst_77 = arith.constant 4.471500e-02 : f32
    %89 = vector.broadcast %cst_77 : f32 to vector<16x32xf32>
    %90 = arith.mulf %89, %86 : vector<16x32xf32>
    %91 = arith.mulf %90, %86 : vector<16x32xf32>
    %92 = arith.mulf %91, %86 : vector<16x32xf32>
    %93 = arith.addf %86, %92 : vector<16x32xf32>
    %cst_78 = arith.constant 0.797884583 : f32
    %94 = vector.broadcast %cst_78 : f32 to vector<16x32xf32>
    %95 = arith.mulf %94, %93 : vector<16x32xf32>
    %96 = math.tanh %95 : vector<16x32xf32>
    %cst_79 = arith.constant 1.000000e+00 : f32
    %97 = vector.broadcast %cst_79 : f32 to vector<16x32xf32>
    %98 = arith.addf %97, %96 : vector<16x32xf32>
    %99 = arith.mulf %88, %98 : vector<16x32xf32>
    %c0_80 = arith.constant 0 : index
    %c0_81 = arith.constant 0 : index
    %100 = vector.load %arg21[%c0_80, %c0_81] : memref<16x32xf32, #tpu.memory_space<vmem>>, vector<16x32xf32>
    tpu.vector_store %arg21[%c0_80, %c0_81], %99 {strides = array<i32>} : memref<16x32xf32, #tpu.memory_space<vmem>>, vector<16x32xf32>,
    %c0_82 = arith.constant 0 : index
    %c0_83 = arith.constant 0 : index
    %101 = tpu.strided_load %arg21[%c0_82, %c0_83] {strides = array<i32: 2, 1>} : memref<16x32xf32, #tpu.memory_space<vmem>>, vector<8x32xf32>
    %c0_84 = arith.constant 0 : index
    %c0_85 = arith.constant 0 : index
    %c0_86 = arith.constant 0 : index
    %102 = vector.load %arg5[%c0_84, %c0_85, %c0_86] : memref<2x32x32xbf16, #tpu.memory_space<vmem>>, vector<1x32x32xbf16>
    %103 = vector.shape_cast %102 : vector<1x32x32xbf16> to vector<32x32xbf16>
    %104 = arith.truncf %101 : vector<8x32xf32> to vector<8x32xbf16>
    %cst_87 = arith.constant dense<0.000000e+00> : vector<8x32xf32>
    %105 = tpu.matmul %104, %103, %cst_87 {dimension_numbers = #tpu.dot_dimension_numbers<[1], [0], [0], [1], [0, 0, 1, 1], [], []>} : vector<8x32xbf16>, vector<32x32xbf16>, vector<8x32xf32> -> vector<8x32xf32>
    %c1_88 = arith.constant 1 : index
    %c0_89 = arith.constant 0 : index
    %106 = tpu.strided_load %arg21[%c1_88, %c0_89] {strides = array<i32: 2, 1>} : memref<16x32xf32, #tpu.memory_space<vmem>>, vector<8x32xf32>
    %c1_90 = arith.constant 1 : index
    %c0_91 = arith.constant 0 : index
    %c0_92 = arith.constant 0 : index
    %107 = vector.load %arg5[%c1_90, %c0_91, %c0_92] : memref<2x32x32xbf16, #tpu.memory_space<vmem>>, vector<1x32x32xbf16>
    %108 = vector.shape_cast %107 : vector<1x32x32xbf16> to vector<32x32xbf16>
    %109 = arith.truncf %106 : vector<8x32xf32> to vector<8x32xbf16>
    %cst_93 = arith.constant dense<0.000000e+00> : vector<8x32xf32>
    %110 = tpu.matmul %109, %108, %cst_93 {dimension_numbers = #tpu.dot_dimension_numbers<[1], [0], [0], [1], [0, 0, 1, 1], [], []>} : vector<8x32xbf16>, vector<32x32xbf16>, vector<8x32xf32> -> vector<8x32xf32>
    %111 = arith.addf %105, %110 : vector<8x32xf32>
    %cst_94 = arith.constant 5.000000e-01 : f32
    %112 = vector.broadcast %cst_94 : f32 to vector<8x32xf32>
    %113 = arith.mulf %112, %111 : vector<8x32xf32>
    %cst_95 = arith.constant 4.471500e-02 : f32
    %114 = vector.broadcast %cst_95 : f32 to vector<8x32xf32>
    %115 = arith.mulf %114, %111 : vector<8x32xf32>
    %116 = arith.mulf %115, %111 : vector<8x32xf32>
    %117 = arith.mulf %116, %111 : vector<8x32xf32>
    %118 = arith.addf %111, %117 : vector<8x32xf32>
    %cst_96 = arith.constant 0.797884583 : f32
    %119 = vector.broadcast %cst_96 : f32 to vector<8x32xf32>
    %120 = arith.mulf %119, %118 : vector<8x32xf32>
    %121 = math.tanh %120 : vector<8x32xf32>
    %cst_97 = arith.constant 1.000000e+00 : f32
    %122 = vector.broadcast %cst_97 : f32 to vector<8x32xf32>
    %123 = arith.addf %122, %121 : vector<8x32xf32>
    %124 = arith.mulf %113, %123 : vector<8x32xf32>
    %125 = arith.mulf %124, %124 : vector<8x32xf32>
    %cst_98 = arith.constant dense<0.000000e+00> : vector<8xf32>
    %126 = vector.multi_reduction <add>, %125, %cst_98 [1] : vector<8x32xf32> to vector<8xf32>
    %127 = vector.shape_cast %126 : vector<8xf32> to vector<8x1xf32>
    %128 = math.sqrt %127 : vector<8x1xf32>
    %cst_99 = arith.constant dense<0.000000e+00> : vector<1xf32>
    %129 = vector.multi_reduction <add>, %128, %cst_99 [0] : vector<8x1xf32> to vector<1xf32>
    %130 = vector.shape_cast %129 : vector<1xf32> to vector<1x1xf32>
    %131 = arith.addf %4, %130 : vector<1x1xf32>
    %cst_100 = arith.constant dense<0.000000e+00> : vector<8xf32>
    %132 = vector.multi_reduction <add>, %124, %cst_100 [1] : vector<8x32xf32> to vector<8xf32>
    %133 = vector.shape_cast %132 : vector<8xf32> to vector<8x1xf32>
    %cst_101 = arith.constant 3.200000e+01 : f32
    %134 = vector.broadcast %cst_101 : f32 to vector<8x1xf32>
    %135 = arith.divf %133, %134 : vector<8x1xf32>
    %136 = vector.broadcast %135 : vector<8x1xf32> to vector<8x32xf32>
    %137 = arith.subf %124, %136 : vector<8x32xf32>
    %138 = arith.mulf %137, %137 : vector<8x32xf32>
    %cst_102 = arith.constant dense<0.000000e+00> : vector<8xf32>
    %139 = vector.multi_reduction <add>, %138, %cst_102 [1] : vector<8x32xf32> to vector<8xf32>
    %140 = vector.shape_cast %139 : vector<8xf32> to vector<8x1xf32>
    %cst_103 = arith.constant 3.200000e+01 : f32
    %141 = vector.broadcast %cst_103 : f32 to vector<8x1xf32>
    %142 = arith.divf %140, %141 : vector<8x1xf32>
    %143 = vector.broadcast %135 : vector<8x1xf32> to vector<8x32xf32>
    %144 = arith.subf %124, %143 : vector<8x32xf32>
    %cst_104 = arith.constant 9.99999974E-6 : f32
    %145 = vector.broadcast %cst_104 : f32 to vector<8x1xf32>
    %146 = arith.addf %142, %145 : vector<8x1xf32>
    %147 = math.rsqrt %146 : vector<8x1xf32>
    %148 = vector.broadcast %147 : vector<8x1xf32> to vector<8x32xf32>
    %149 = arith.mulf %144, %148 : vector<8x32xf32>
    %150 = vector.broadcast %0 : vector<1x32xf32> to vector<8x32xf32>
    %151 = arith.mulf %149, %150 : vector<8x32xf32>
    %152 = vector.broadcast %1 : vector<1x32xf32> to vector<8x32xf32>
    %153 = arith.addf %151, %152 : vector<8x32xf32>
    %154 = arith.truncf %153 : vector<8x32xf32> to vector<8x32xbf16>
    %cst_105 = arith.constant dense<0.000000e+00> : vector<8x32xf32>
    %155 = tpu.matmul %154, %2, %cst_105 {dimension_numbers = #tpu.dot_dimension_numbers<[1], [0], [0], [1], [0, 0, 1, 1], [], []>} : vector<8x32xbf16>, vector<32x32xbf16>, vector<8x32xf32> -> vector<8x32xf32>
    %156 = vector.broadcast %3 : vector<1x32xf32> to vector<8x32xf32>
    %157 = arith.addf %155, %156 : vector<8x32xf32>
    %c0_106 = arith.constant 0 : index
    %c0_107 = arith.constant 0 : index
    %158 = vector.load %arg22[%c0_106, %c0_107] : memref<8x32xf32, #tpu.memory_space<vmem>>, vector<8x32xf32>
    tpu.vector_store %arg22[%c0_106, %c0_107], %157 {strides = array<i32>} : memref<8x32xf32, #tpu.memory_space<vmem>>, vector<8x32xf32>,
    %c1_108 = arith.constant 1 : index
    %c0_109 = arith.constant 0 : index
    %c0_110 = arith.constant 0 : index
    %159 = vector.load %arg1[%c1_108, %c0_109, %c0_110] : memref<2x135x8xf32, #tpu.memory_space<vmem>>, vector<1x135x8xf32>
    %160 = vector.shape_cast %159 : vector<1x135x8xf32> to vector<135x8xf32>
    %c0_111 = arith.constant 0 : index
    %c0_112 = arith.constant 0 : index
    %161 = vector.load %arg18[%c0_111, %c0_112] : memref<135x8xf32, #tpu.memory_space<vmem>>, vector<135x8xf32>
    tpu.vector_store %arg18[%c0_111, %c0_112], %160 {strides = array<i32>} : memref<135x8xf32, #tpu.memory_space<vmem>>, vector<135x8xf32>,
    %c0_113 = arith.constant 0 : index
    %c0_114 = arith.constant 0 : index
    %162 = tpu.strided_load %arg18[%c0_113, %c0_114] {strides = array<i32: 2, 1>} : memref<135x8xf32, #tpu.memory_space<vmem>>, vector<67x8xf32>
    %c0_115 = arith.constant 0 : index
    %c0_116 = arith.constant 0 : index
    %c0_117 = arith.constant 0 : index
    %163 = vector.load %arg2[%c0_115, %c0_116, %c0_117] : memref<3x8x16xbf16, #tpu.memory_space<vmem>>, vector<1x8x16xbf16>
    %164 = vector.shape_cast %163 : vector<1x8x16xbf16> to vector<8x16xbf16>
    %165 = arith.truncf %162 : vector<67x8xf32> to vector<67x8xbf16>
    %cst_118 = arith.constant dense<0.000000e+00> : vector<67x16xf32>
    %166 = tpu.matmul %165, %164, %cst_118 {dimension_numbers = #tpu.dot_dimension_numbers<[1], [0], [0], [1], [0, 0, 1, 1], [], []>} : vector<67x8xbf16>, vector<8x16xbf16>, vector<67x16xf32> -> vector<67x16xf32>
    %c1_119 = arith.constant 1 : index
    %c0_120 = arith.constant 0 : index
    %167 = tpu.strided_load %arg18[%c1_119, %c0_120] {strides = array<i32: 2, 1>} : memref<135x8xf32, #tpu.memory_space<vmem>>, vector<67x8xf32>
    %c1_121 = arith.constant 1 : index
    %c0_122 = arith.constant 0 : index
    %c0_123 = arith.constant 0 : index
    %168 = vector.load %arg2[%c1_121, %c0_122, %c0_123] : memref<3x8x16xbf16, #tpu.memory_space<vmem>>, vector<1x8x16xbf16>
    %169 = vector.shape_cast %168 : vector<1x8x16xbf16> to vector<8x16xbf16>
    %170 = arith.truncf %167 : vector<67x8xf32> to vector<67x8xbf16>
    %cst_124 = arith.constant dense<0.000000e+00> : vector<67x16xf32>
    %171 = tpu.matmul %170, %169, %cst_124 {dimension_numbers = #tpu.dot_dimension_numbers<[1], [0], [0], [1], [0, 0, 1, 1], [], []>} : vector<67x8xbf16>, vector<8x16xbf16>, vector<67x16xf32> -> vector<67x16xf32>
    %172 = arith.addf %166, %171 : vector<67x16xf32>
    %c2_125 = arith.constant 2 : index
    %c0_126 = arith.constant 0 : index
    %173 = tpu.strided_load %arg18[%c2_125, %c0_126] {strides = array<i32: 2, 1>} : memref<135x8xf32, #tpu.memory_space<vmem>>, vector<67x8xf32>
    %c2_127 = arith.constant 2 : index
    %c0_128 = arith.constant 0 : index
    %c0_129 = arith.constant 0 : index
    %174 = vector.load %arg2[%c2_127, %c0_128, %c0_129] : memref<3x8x16xbf16, #tpu.memory_space<vmem>>, vector<1x8x16xbf16>
    %175 = vector.shape_cast %174 : vector<1x8x16xbf16> to vector<8x16xbf16>
    %176 = arith.truncf %173 : vector<67x8xf32> to vector<67x8xbf16>
    %cst_130 = arith.constant dense<0.000000e+00> : vector<67x16xf32>
    %177 = tpu.matmul %176, %175, %cst_130 {dimension_numbers = #tpu.dot_dimension_numbers<[1], [0], [0], [1], [0, 0, 1, 1], [], []>} : vector<67x8xbf16>, vector<8x16xbf16>, vector<67x16xf32> -> vector<67x16xf32>
    %178 = arith.addf %172, %177 : vector<67x16xf32>
    %cst_131 = arith.constant 5.000000e-01 : f32
    %179 = vector.broadcast %cst_131 : f32 to vector<67x16xf32>
    %180 = arith.mulf %179, %178 : vector<67x16xf32>
    %cst_132 = arith.constant 4.471500e-02 : f32
    %181 = vector.broadcast %cst_132 : f32 to vector<67x16xf32>
    %182 = arith.mulf %181, %178 : vector<67x16xf32>
    %183 = arith.mulf %182, %178 : vector<67x16xf32>
    %184 = arith.mulf %183, %178 : vector<67x16xf32>
    %185 = arith.addf %178, %184 : vector<67x16xf32>
    %cst_133 = arith.constant 0.797884583 : f32
    %186 = vector.broadcast %cst_133 : f32 to vector<67x16xf32>
    %187 = arith.mulf %186, %185 : vector<67x16xf32>
    %188 = math.tanh %187 : vector<67x16xf32>
    %cst_134 = arith.constant 1.000000e+00 : f32
    %189 = vector.broadcast %cst_134 : f32 to vector<67x16xf32>
    %190 = arith.addf %189, %188 : vector<67x16xf32>
    %191 = arith.mulf %180, %190 : vector<67x16xf32>
    %c0_135 = arith.constant 0 : index
    %c0_136 = arith.constant 0 : index
    %192 = vector.load %arg19[%c0_135, %c0_136] : memref<67x16xf32, #tpu.memory_space<vmem>>, vector<67x16xf32>
    tpu.vector_store %arg19[%c0_135, %c0_136], %191 {strides = array<i32>} : memref<67x16xf32, #tpu.memory_space<vmem>>, vector<67x16xf32>,
    %c0_137 = arith.constant 0 : index
    %c0_138 = arith.constant 0 : index
    %193 = tpu.strided_load %arg19[%c0_137, %c0_138] {strides = array<i32: 2, 1>} : memref<67x16xf32, #tpu.memory_space<vmem>>, vector<33x16xf32>
    %c0_139 = arith.constant 0 : index
    %c0_140 = arith.constant 0 : index
    %c0_141 = arith.constant 0 : index
    %194 = vector.load %arg3[%c0_139, %c0_140, %c0_141] : memref<3x16x32xbf16, #tpu.memory_space<vmem>>, vector<1x16x32xbf16>
    %195 = vector.shape_cast %194 : vector<1x16x32xbf16> to vector<16x32xbf16>
    %196 = arith.truncf %193 : vector<33x16xf32> to vector<33x16xbf16>
    %cst_142 = arith.constant dense<0.000000e+00> : vector<33x32xf32>
    %197 = tpu.matmul %196, %195, %cst_142 {dimension_numbers = #tpu.dot_dimension_numbers<[1], [0], [0], [1], [0, 0, 1, 1], [], []>} : vector<33x16xbf16>, vector<16x32xbf16>, vector<33x32xf32> -> vector<33x32xf32>
    %c1_143 = arith.constant 1 : index
    %c0_144 = arith.constant 0 : index
    %198 = tpu.strided_load %arg19[%c1_143, %c0_144] {strides = array<i32: 2, 1>} : memref<67x16xf32, #tpu.memory_space<vmem>>, vector<33x16xf32>
    %c1_145 = arith.constant 1 : index
    %c0_146 = arith.constant 0 : index
    %c0_147 = arith.constant 0 : index
    %199 = vector.load %arg3[%c1_145, %c0_146, %c0_147] : memref<3x16x32xbf16, #tpu.memory_space<vmem>>, vector<1x16x32xbf16>
    %200 = vector.shape_cast %199 : vector<1x16x32xbf16> to vector<16x32xbf16>
    %201 = arith.truncf %198 : vector<33x16xf32> to vector<33x16xbf16>
    %cst_148 = arith.constant dense<0.000000e+00> : vector<33x32xf32>
    %202 = tpu.matmul %201, %200, %cst_148 {dimension_numbers = #tpu.dot_dimension_numbers<[1], [0], [0], [1], [0, 0, 1, 1], [], []>} : vector<33x16xbf16>, vector<16x32xbf16>, vector<33x32xf32> -> vector<33x32xf32>
    %203 = arith.addf %197, %202 : vector<33x32xf32>
    %c2_149 = arith.constant 2 : index
    %c0_150 = arith.constant 0 : index
    %204 = tpu.strided_load %arg19[%c2_149, %c0_150] {strides = array<i32: 2, 1>} : memref<67x16xf32, #tpu.memory_space<vmem>>, vector<33x16xf32>
    %c2_151 = arith.constant 2 : index
    %c0_152 = arith.constant 0 : index
    %c0_153 = arith.constant 0 : index
    %205 = vector.load %arg3[%c2_151, %c0_152, %c0_153] : memref<3x16x32xbf16, #tpu.memory_space<vmem>>, vector<1x16x32xbf16>
    %206 = vector.shape_cast %205 : vector<1x16x32xbf16> to vector<16x32xbf16>
    %207 = arith.truncf %204 : vector<33x16xf32> to vector<33x16xbf16>
    %cst_154 = arith.constant dense<0.000000e+00> : vector<33x32xf32>
    %208 = tpu.matmul %207, %206, %cst_154 {dimension_numbers = #tpu.dot_dimension_numbers<[1], [0], [0], [1], [0, 0, 1, 1], [], []>} : vector<33x16xbf16>, vector<16x32xbf16>, vector<33x32xf32> -> vector<33x32xf32>
    %209 = arith.addf %203, %208 : vector<33x32xf32>
    %cst_155 = arith.constant 5.000000e-01 : f32
    %210 = vector.broadcast %cst_155 : f32 to vector<33x32xf32>
    %211 = arith.mulf %210, %209 : vector<33x32xf32>
    %cst_156 = arith.constant 4.471500e-02 : f32
    %212 = vector.broadcast %cst_156 : f32 to vector<33x32xf32>
    %213 = arith.mulf %212, %209 : vector<33x32xf32>
    %214 = arith.mulf %213, %209 : vector<33x32xf32>
    %215 = arith.mulf %214, %209 : vector<33x32xf32>
    %216 = arith.addf %209, %215 : vector<33x32xf32>
    %cst_157 = arith.constant 0.797884583 : f32
    %217 = vector.broadcast %cst_157 : f32 to vector<33x32xf32>
    %218 = arith.mulf %217, %216 : vector<33x32xf32>
    %219 = math.tanh %218 : vector<33x32xf32>
    %cst_158 = arith.constant 1.000000e+00 : f32
    %220 = vector.broadcast %cst_158 : f32 to vector<33x32xf32>
    %221 = arith.addf %220, %219 : vector<33x32xf32>
    %222 = arith.mulf %211, %221 : vector<33x32xf32>
    %c0_159 = arith.constant 0 : index
    %c0_160 = arith.constant 0 : index
    %223 = vector.load %arg20[%c0_159, %c0_160] : memref<33x32xf32, #tpu.memory_space<vmem>>, vector<33x32xf32>
    tpu.vector_store %arg20[%c0_159, %c0_160], %222 {strides = array<i32>} : memref<33x32xf32, #tpu.memory_space<vmem>>, vector<33x32xf32>,
    %c0_161 = arith.constant 0 : index
    %c0_162 = arith.constant 0 : index
    %224 = tpu.strided_load %arg20[%c0_161, %c0_162] {strides = array<i32: 2, 1>} : memref<33x32xf32, #tpu.memory_space<vmem>>, vector<16x32xf32>
    %c0_163 = arith.constant 0 : index
    %c0_164 = arith.constant 0 : index
    %c0_165 = arith.constant 0 : index
    %225 = vector.load %arg4[%c0_163, %c0_164, %c0_165] : memref<3x32x32xbf16, #tpu.memory_space<vmem>>, vector<1x32x32xbf16>
    %226 = vector.shape_cast %225 : vector<1x32x32xbf16> to vector<32x32xbf16>
    %227 = arith.truncf %224 : vector<16x32xf32> to vector<16x32xbf16>
    %cst_166 = arith.constant dense<0.000000e+00> : vector<16x32xf32>
    %228 = tpu.matmul %227, %226, %cst_166 {dimension_numbers = #tpu.dot_dimension_numbers<[1], [0], [0], [1], [0, 0, 1, 1], [], []>} : vector<16x32xbf16>, vector<32x32xbf16>, vector<16x32xf32> -> vector<16x32xf32>
    %c1_167 = arith.constant 1 : index
    %c0_168 = arith.constant 0 : index
    %229 = tpu.strided_load %arg20[%c1_167, %c0_168] {strides = array<i32: 2, 1>} : memref<33x32xf32, #tpu.memory_space<vmem>>, vector<16x32xf32>
    %c1_169 = arith.constant 1 : index
    %c0_170 = arith.constant 0 : index
    %c0_171 = arith.constant 0 : index
    %230 = vector.load %arg4[%c1_169, %c0_170, %c0_171] : memref<3x32x32xbf16, #tpu.memory_space<vmem>>, vector<1x32x32xbf16>
    %231 = vector.shape_cast %230 : vector<1x32x32xbf16> to vector<32x32xbf16>
    %232 = arith.truncf %229 : vector<16x32xf32> to vector<16x32xbf16>
    %cst_172 = arith.constant dense<0.000000e+00> : vector<16x32xf32>
    %233 = tpu.matmul %232, %231, %cst_172 {dimension_numbers = #tpu.dot_dimension_numbers<[1], [0], [0], [1], [0, 0, 1, 1], [], []>} : vector<16x32xbf16>, vector<32x32xbf16>, vector<16x32xf32> -> vector<16x32xf32>
    %234 = arith.addf %228, %233 : vector<16x32xf32>
    %c2_173 = arith.constant 2 : index
    %c0_174 = arith.constant 0 : index
    %235 = tpu.strided_load %arg20[%c2_173, %c0_174] {strides = array<i32: 2, 1>} : memref<33x32xf32, #tpu.memory_space<vmem>>, vector<16x32xf32>
    %c2_175 = arith.constant 2 : index
    %c0_176 = arith.constant 0 : index
    %c0_177 = arith.constant 0 : index
    %236 = vector.load %arg4[%c2_175, %c0_176, %c0_177] : memref<3x32x32xbf16, #tpu.memory_space<vmem>>, vector<1x32x32xbf16>
    %237 = vector.shape_cast %236 : vector<1x32x32xbf16> to vector<32x32xbf16>
    %238 = arith.truncf %235 : vector<16x32xf32> to vector<16x32xbf16>
    %cst_178 = arith.constant dense<0.000000e+00> : vector<16x32xf32>
    %239 = tpu.matmul %238, %237, %cst_178 {dimension_numbers = #tpu.dot_dimension_numbers<[1], [0], [0], [1], [0, 0, 1, 1], [], []>} : vector<16x32xbf16>, vector<32x32xbf16>, vector<16x32xf32> -> vector<16x32xf32>
    %240 = arith.addf %234, %239 : vector<16x32xf32>
    %cst_179 = arith.constant 5.000000e-01 : f32
    %241 = vector.broadcast %cst_179 : f32 to vector<16x32xf32>
    %242 = arith.mulf %241, %240 : vector<16x32xf32>
    %cst_180 = arith.constant 4.471500e-02 : f32
    %243 = vector.broadcast %cst_180 : f32 to vector<16x32xf32>
    %244 = arith.mulf %243, %240 : vector<16x32xf32>
    %245 = arith.mulf %244, %240 : vector<16x32xf32>
    %246 = arith.mulf %245, %240 : vector<16x32xf32>
    %247 = arith.addf %240, %246 : vector<16x32xf32>
    %cst_181 = arith.constant 0.797884583 : f32
    %248 = vector.broadcast %cst_181 : f32 to vector<16x32xf32>
    %249 = arith.mulf %248, %247 : vector<16x32xf32>
    %250 = math.tanh %249 : vector<16x32xf32>
    %cst_182 = arith.constant 1.000000e+00 : f32
    %251 = vector.broadcast %cst_182 : f32 to vector<16x32xf32>
    %252 = arith.addf %251, %250 : vector<16x32xf32>
    %253 = arith.mulf %242, %252 : vector<16x32xf32>
    %c0_183 = arith.constant 0 : index
    %c0_184 = arith.constant 0 : index
    %254 = vector.load %arg21[%c0_183, %c0_184] : memref<16x32xf32, #tpu.memory_space<vmem>>, vector<16x32xf32>
    tpu.vector_store %arg21[%c0_183, %c0_184], %253 {strides = array<i32>} : memref<16x32xf32, #tpu.memory_space<vmem>>, vector<16x32xf32>,
    %c0_185 = arith.constant 0 : index
    %c0_186 = arith.constant 0 : index
    %255 = tpu.strided_load %arg21[%c0_185, %c0_186] {strides = array<i32: 2, 1>} : memref<16x32xf32, #tpu.memory_space<vmem>>, vector<8x32xf32>
    %c0_187 = arith.constant 0 : index
    %c0_188 = arith.constant 0 : index
    %c0_189 = arith.constant 0 : index
    %256 = vector.load %arg5[%c0_187, %c0_188, %c0_189] : memref<2x32x32xbf16, #tpu.memory_space<vmem>>, vector<1x32x32xbf16>
    %257 = vector.shape_cast %256 : vector<1x32x32xbf16> to vector<32x32xbf16>
    %258 = arith.truncf %255 : vector<8x32xf32> to vector<8x32xbf16>
    %cst_190 = arith.constant dense<0.000000e+00> : vector<8x32xf32>
    %259 = tpu.matmul %258, %257, %cst_190 {dimension_numbers = #tpu.dot_dimension_numbers<[1], [0], [0], [1], [0, 0, 1, 1], [], []>} : vector<8x32xbf16>, vector<32x32xbf16>, vector<8x32xf32> -> vector<8x32xf32>
    %c1_191 = arith.constant 1 : index
    %c0_192 = arith.constant 0 : index
    %260 = tpu.strided_load %arg21[%c1_191, %c0_192] {strides = array<i32: 2, 1>} : memref<16x32xf32, #tpu.memory_space<vmem>>, vector<8x32xf32>
    %c1_193 = arith.constant 1 : index
    %c0_194 = arith.constant 0 : index
    %c0_195 = arith.constant 0 : index
    %261 = vector.load %arg5[%c1_193, %c0_194, %c0_195] : memref<2x32x32xbf16, #tpu.memory_space<vmem>>, vector<1x32x32xbf16>
    %262 = vector.shape_cast %261 : vector<1x32x32xbf16> to vector<32x32xbf16>
    %263 = arith.truncf %260 : vector<8x32xf32> to vector<8x32xbf16>
    %cst_196 = arith.constant dense<0.000000e+00> : vector<8x32xf32>
    %264 = tpu.matmul %263, %262, %cst_196 {dimension_numbers = #tpu.dot_dimension_numbers<[1], [0], [0], [1], [0, 0, 1, 1], [], []>} : vector<8x32xbf16>, vector<32x32xbf16>, vector<8x32xf32> -> vector<8x32xf32>
    %265 = arith.addf %259, %264 : vector<8x32xf32>
    %cst_197 = arith.constant 5.000000e-01 : f32
    %266 = vector.broadcast %cst_197 : f32 to vector<8x32xf32>
    %267 = arith.mulf %266, %265 : vector<8x32xf32>
    %cst_198 = arith.constant 4.471500e-02 : f32
    %268 = vector.broadcast %cst_198 : f32 to vector<8x32xf32>
    %269 = arith.mulf %268, %265 : vector<8x32xf32>
    %270 = arith.mulf %269, %265 : vector<8x32xf32>
    %271 = arith.mulf %270, %265 : vector<8x32xf32>
    %272 = arith.addf %265, %271 : vector<8x32xf32>
    %cst_199 = arith.constant 0.797884583 : f32
    %273 = vector.broadcast %cst_199 : f32 to vector<8x32xf32>
    %274 = arith.mulf %273, %272 : vector<8x32xf32>
    %275 = math.tanh %274 : vector<8x32xf32>
    %cst_200 = arith.constant 1.000000e+00 : f32
    %276 = vector.broadcast %cst_200 : f32 to vector<8x32xf32>
    %277 = arith.addf %276, %275 : vector<8x32xf32>
    %278 = arith.mulf %267, %277 : vector<8x32xf32>
    %279 = arith.mulf %278, %278 : vector<8x32xf32>
    %cst_201 = arith.constant dense<0.000000e+00> : vector<8xf32>
    %280 = vector.multi_reduction <add>, %279, %cst_201 [1] : vector<8x32xf32> to vector<8xf32>
    %281 = vector.shape_cast %280 : vector<8xf32> to vector<8x1xf32>
    %282 = math.sqrt %281 : vector<8x1xf32>
    %cst_202 = arith.constant dense<0.000000e+00> : vector<1xf32>
    %283 = vector.multi_reduction <add>, %282, %cst_202 [0] : vector<8x1xf32> to vector<1xf32>
    %284 = vector.shape_cast %283 : vector<1xf32> to vector<1x1xf32>
    %285 = arith.addf %131, %284 : vector<1x1xf32>
    %cst_203 = arith.constant dense<0.000000e+00> : vector<8xf32>
    %286 = vector.multi_reduction <add>, %278, %cst_203 [1] : vector<8x32xf32> to vector<8xf32>
    %287 = vector.shape_cast %286 : vector<8xf32> to vector<8x1xf32>
    %cst_204 = arith.constant 3.200000e+01 : f32
    %288 = vector.broadcast %cst_204 : f32 to vector<8x1xf32>
    %289 = arith.divf %287, %288 : vector<8x1xf32>
    %290 = vector.broadcast %289 : vector<8x1xf32> to vector<8x32xf32>
    %291 = arith.subf %278, %290 : vector<8x32xf32>
    %292 = arith.mulf %291, %291 : vector<8x32xf32>
    %cst_205 = arith.constant dense<0.000000e+00> : vector<8xf32>
    %293 = vector.multi_reduction <add>, %292, %cst_205 [1] : vector<8x32xf32> to vector<8xf32>
    %294 = vector.shape_cast %293 : vector<8xf32> to vector<8x1xf32>
    %cst_206 = arith.constant 3.200000e+01 : f32
    %295 = vector.broadcast %cst_206 : f32 to vector<8x1xf32>
    %296 = arith.divf %294, %295 : vector<8x1xf32>
    %297 = vector.broadcast %289 : vector<8x1xf32> to vector<8x32xf32>
    %298 = arith.subf %278, %297 : vector<8x32xf32>
    %cst_207 = arith.constant 9.99999974E-6 : f32
    %299 = vector.broadcast %cst_207 : f32 to vector<8x1xf32>
    %300 = arith.addf %296, %299 : vector<8x1xf32>
    %301 = math.rsqrt %300 : vector<8x1xf32>
    %302 = vector.broadcast %301 : vector<8x1xf32> to vector<8x32xf32>
    %303 = arith.mulf %298, %302 : vector<8x32xf32>
    %304 = vector.broadcast %0 : vector<1x32xf32> to vector<8x32xf32>
    %305 = arith.mulf %303, %304 : vector<8x32xf32>
    %306 = vector.broadcast %1 : vector<1x32xf32> to vector<8x32xf32>
    %307 = arith.addf %305, %306 : vector<8x32xf32>
    %308 = arith.truncf %307 : vector<8x32xf32> to vector<8x32xbf16>
    %cst_208 = arith.constant dense<0.000000e+00> : vector<8x32xf32>
    %309 = tpu.matmul %308, %2, %cst_208 {dimension_numbers = #tpu.dot_dimension_numbers<[1], [0], [0], [1], [0, 0, 1, 1], [], []>} : vector<8x32xbf16>, vector<32x32xbf16>, vector<8x32xf32> -> vector<8x32xf32>
    %310 = vector.broadcast %3 : vector<1x32xf32> to vector<8x32xf32>
    %311 = arith.addf %309, %310 : vector<8x32xf32>
    %c0_209 = arith.constant 0 : index
    %c0_210 = arith.constant 0 : index
    %312 = vector.load %arg23[%c0_209, %c0_210] : memref<8x32xf32, #tpu.memory_space<vmem>>, vector<8x32xf32>
    tpu.vector_store %arg23[%c0_209, %c0_210], %311 {strides = array<i32>} : memref<8x32xf32, #tpu.memory_space<vmem>>, vector<8x32xf32>,
    %c0_211 = arith.constant 0 : index
    %c0_212 = arith.constant 0 : index
    %c0_213 = arith.constant 0 : index
    %313 = vector.load %arg10[%c0_211, %c0_212, %c0_213] : memref<3x32x96xbf16, #tpu.memory_space<vmem>>, vector<1x32x96xbf16>
    %314 = vector.shape_cast %313 : vector<1x32x96xbf16> to vector<32x96xbf16>
    %c0_214 = arith.constant 0 : index
    %c0_215 = arith.constant 0 : index
    %c0_216 = arith.constant 0 : index
    %315 = vector.load %arg11[%c0_214, %c0_215, %c0_216] : memref<3x32x96xbf16, #tpu.memory_space<vmem>>, vector<1x32x96xbf16>
    %316 = vector.shape_cast %315 : vector<1x32x96xbf16> to vector<32x96xbf16>
    %c0_217 = arith.constant 0 : index
    %c0_218 = arith.constant 0 : index
    %c0_219 = arith.constant 0 : index
    %317 = vector.load %arg12[%c0_217, %c0_218, %c0_219] : memref<3x1x96xf32, #tpu.memory_space<vmem>>, vector<1x1x96xf32>
    %318 = vector.shape_cast %317 : vector<1x1x96xf32> to vector<1x96xf32>
    %c0_220 = arith.constant 0 : index
    %c0_221 = arith.constant 0 : index
    %c0_222 = arith.constant 0 : index
    %319 = vector.load %arg13[%c0_220, %c0_221, %c0_222] : memref<3x1x96xf32, #tpu.memory_space<vmem>>, vector<1x1x96xf32>
    %320 = vector.shape_cast %319 : vector<1x1x96xf32> to vector<1x96xf32>
    %c0_223 = arith.constant 0 : index
    %c0_224 = arith.constant 0 : index
    %321 = vector.load %arg22[%c0_223, %c0_224] : memref<8x32xf32, #tpu.memory_space<vmem>>, vector<8x32xf32>
    %322 = arith.truncf %321 : vector<8x32xf32> to vector<8x32xbf16>
    %cst_225 = arith.constant dense<0.000000e+00> : vector<8x96xf32>
    %323 = tpu.matmul %322, %314, %cst_225 {dimension_numbers = #tpu.dot_dimension_numbers<[1], [0], [0], [1], [0, 0, 1, 1], [], []>} : vector<8x32xbf16>, vector<32x96xbf16>, vector<8x96xf32> -> vector<8x96xf32>
    %324 = vector.broadcast %318 : vector<1x96xf32> to vector<8x96xf32>
    %325 = arith.addf %323, %324 : vector<8x96xf32>
    %c0_226 = arith.constant 0 : index
    %c0_227 = arith.constant 0 : index
    %326 = vector.load %arg26[%c0_226, %c0_227] : memref<8x96xf32, #tpu.memory_space<vmem>>, vector<8x96xf32>
    tpu.vector_store %arg26[%c0_226, %c0_227], %325 {strides = array<i32>} : memref<8x96xf32, #tpu.memory_space<vmem>>, vector<8x96xf32>,
    %c0_228 = arith.constant 0 : index
    %c0_229 = arith.constant 0 : index
    %327 = vector.load %arg23[%c0_228, %c0_229] : memref<8x32xf32, #tpu.memory_space<vmem>>, vector<8x32xf32>
    %328 = arith.truncf %327 : vector<8x32xf32> to vector<8x32xbf16>
    %cst_230 = arith.constant dense<0.000000e+00> : vector<8x96xf32>
    %329 = tpu.matmul %328, %314, %cst_230 {dimension_numbers = #tpu.dot_dimension_numbers<[1], [0], [0], [1], [0, 0, 1, 1], [], []>} : vector<8x32xbf16>, vector<32x96xbf16>, vector<8x96xf32> -> vector<8x96xf32>
    %330 = vector.broadcast %318 : vector<1x96xf32> to vector<8x96xf32>
    %331 = arith.addf %329, %330 : vector<8x96xf32>
    %c0_231 = arith.constant 0 : index
    %c0_232 = arith.constant 0 : index
    %332 = vector.load %arg27[%c0_231, %c0_232] : memref<8x96xf32, #tpu.memory_space<vmem>>, vector<8x96xf32>
    tpu.vector_store %arg27[%c0_231, %c0_232], %331 {strides = array<i32>} : memref<8x96xf32, #tpu.memory_space<vmem>>, vector<8x96xf32>,
    %cst_233 = arith.constant 0.000000e+00 : f32
    %333 = vector.broadcast %cst_233 : f32 to vector<2x32xf32>
    %c0_i32 = arith.constant 0 : i32
    %334 = arith.index_cast %c0_i32 : i32 to index
    %c0_234 = arith.constant 0 : index
    %335 = vector.load %arg26[%334, %c0_234] : memref<8x96xf32, #tpu.memory_space<vmem>>, vector<1x96xf32>
    %336 = arith.index_cast %c0_i32 : i32 to index
    %c0_235 = arith.constant 0 : index
    %337 = vector.load %arg27[%336, %c0_235] : memref<8x96xf32, #tpu.memory_space<vmem>>, vector<1x96xf32>
    %338 = tpu.concatenate %335, %337 in 0 : vector<1x96xf32>, vector<1x96xf32> -> vector<2x96xf32>
    %339 = arith.truncf %333 : vector<2x32xf32> to vector<2x32xbf16>
    %cst_236 = arith.constant dense<0.000000e+00> : vector<2x96xf32>
    %340 = tpu.matmul %339, %316, %cst_236 {dimension_numbers = #tpu.dot_dimension_numbers<[1], [0], [0], [1], [0, 0, 1, 1], [], []>} : vector<2x32xbf16>, vector<32x96xbf16>, vector<2x96xf32> -> vector<2x96xf32>
    %341 = vector.broadcast %320 : vector<1x96xf32> to vector<2x96xf32>
    %342 = arith.addf %340, %341 : vector<2x96xf32>
    %343 = vector.extract_strided_slice %338 {offsets = [0, 0], sizes = [2, 32], strides = [1, 1]} : vector<2x96xf32> to vector<2x32xf32>
    %344 = vector.extract_strided_slice %342 {offsets = [0, 0], sizes = [2, 32], strides = [1, 1]} : vector<2x96xf32> to vector<2x32xf32>
    %345 = arith.addf %343, %344 : vector<2x32xf32>
    %346 = arith.negf %345 : vector<2x32xf32>
    %347 = math.exp %346 : vector<2x32xf32>
    %cst_237 = arith.constant 1.000000e+00 : f32
    %348 = vector.broadcast %cst_237 : f32 to vector<2x32xf32>
    %349 = arith.addf %348, %347 : vector<2x32xf32>
    %350 = arith.divf %348, %349 : vector<2x32xf32>
    %351 = vector.extract_strided_slice %338 {offsets = [0, 32], sizes = [2, 32], strides = [1, 1]} : vector<2x96xf32> to vector<2x32xf32>
    %352 = vector.extract_strided_slice %342 {offsets = [0, 32], sizes = [2, 32], strides = [1, 1]} : vector<2x96xf32> to vector<2x32xf32>
    %353 = arith.addf %351, %352 : vector<2x32xf32>
    %354 = arith.negf %353 : vector<2x32xf32>
    %355 = math.exp %354 : vector<2x32xf32>
    %cst_238 = arith.constant 1.000000e+00 : f32
    %356 = vector.broadcast %cst_238 : f32 to vector<2x32xf32>
    %357 = arith.addf %356, %355 : vector<2x32xf32>
    %358 = arith.divf %356, %357 : vector<2x32xf32>
    %359 = vector.extract_strided_slice %338 {offsets = [0, 64], sizes = [2, 32], strides = [1, 1]} : vector<2x96xf32> to vector<2x32xf32>
    %360 = vector.extract_strided_slice %342 {offsets = [0, 64], sizes = [2, 32], strides = [1, 1]} : vector<2x96xf32> to vector<2x32xf32>
    %361 = arith.mulf %350, %360 : vector<2x32xf32>
    %362 = arith.addf %359, %361 : vector<2x32xf32>
    %363 = math.tanh %362 : vector<2x32xf32>
    %cst_239 = arith.constant 1.000000e+00 : f32
    %364 = vector.broadcast %cst_239 : f32 to vector<2x32xf32>
    %365 = arith.subf %364, %358 : vector<2x32xf32>
    %366 = arith.mulf %365, %363 : vector<2x32xf32>
    %367 = arith.mulf %358, %333 : vector<2x32xf32>
    %368 = arith.addf %366, %367 : vector<2x32xf32>
    %369 = vector.extract_strided_slice %368 {offsets = [0, 0], sizes = [1, 32], strides = [1, 1]} : vector<2x32xf32> to vector<1x32xf32>
    %370 = arith.index_cast %c0_i32 : i32 to index
    %c0_240 = arith.constant 0 : index
    %371 = vector.load %arg24[%370, %c0_240] : memref<8x32xf32, #tpu.memory_space<vmem>>, vector<1x32xf32>
    tpu.vector_store %arg24[%370, %c0_240], %369 {strides = array<i32>} : memref<8x32xf32, #tpu.memory_space<vmem>>, vector<1x32xf32>,
    %372 = vector.extract_strided_slice %368 {offsets = [1, 0], sizes = [1, 32], strides = [1, 1]} : vector<2x32xf32> to vector<1x32xf32>
    %373 = arith.index_cast %c0_i32 : i32 to index
    %c0_241 = arith.constant 0 : index
    %374 = vector.load %arg25[%373, %c0_241] : memref<8x32xf32, #tpu.memory_space<vmem>>, vector<1x32xf32>
    tpu.vector_store %arg25[%373, %c0_241], %372 {strides = array<i32>} : memref<8x32xf32, #tpu.memory_space<vmem>>, vector<1x32xf32>,
    %c1_i32 = arith.constant 1 : i32
    %375 = arith.index_cast %c1_i32 : i32 to index
    %c0_242 = arith.constant 0 : index
    %376 = vector.load %arg26[%375, %c0_242] : memref<8x96xf32, #tpu.memory_space<vmem>>, vector<1x96xf32>
    %377 = arith.index_cast %c1_i32 : i32 to index
    %c0_243 = arith.constant 0 : index
    %378 = vector.load %arg27[%377, %c0_243] : memref<8x96xf32, #tpu.memory_space<vmem>>, vector<1x96xf32>
    %379 = tpu.concatenate %376, %378 in 0 : vector<1x96xf32>, vector<1x96xf32> -> vector<2x96xf32>
    %380 = arith.truncf %368 : vector<2x32xf32> to vector<2x32xbf16>
    %cst_244 = arith.constant dense<0.000000e+00> : vector<2x96xf32>
    %381 = tpu.matmul %380, %316, %cst_244 {dimension_numbers = #tpu.dot_dimension_numbers<[1], [0], [0], [1], [0, 0, 1, 1], [], []>} : vector<2x32xbf16>, vector<32x96xbf16>, vector<2x96xf32> -> vector<2x96xf32>
    %382 = vector.broadcast %320 : vector<1x96xf32> to vector<2x96xf32>
    %383 = arith.addf %381, %382 : vector<2x96xf32>
    %384 = vector.extract_strided_slice %379 {offsets = [0, 0], sizes = [2, 32], strides = [1, 1]} : vector<2x96xf32> to vector<2x32xf32>
    %385 = vector.extract_strided_slice %383 {offsets = [0, 0], sizes = [2, 32], strides = [1, 1]} : vector<2x96xf32> to vector<2x32xf32>
    %386 = arith.addf %384, %385 : vector<2x32xf32>
    %387 = arith.negf %386 : vector<2x32xf32>
    %388 = math.exp %387 : vector<2x32xf32>
    %cst_245 = arith.constant 1.000000e+00 : f32
    %389 = vector.broadcast %cst_245 : f32 to vector<2x32xf32>
    %390 = arith.addf %389, %388 : vector<2x32xf32>
    %391 = arith.divf %389, %390 : vector<2x32xf32>
    %392 = vector.extract_strided_slice %379 {offsets = [0, 32], sizes = [2, 32], strides = [1, 1]} : vector<2x96xf32> to vector<2x32xf32>
    %393 = vector.extract_strided_slice %383 {offsets = [0, 32], sizes = [2, 32], strides = [1, 1]} : vector<2x96xf32> to vector<2x32xf32>
    %394 = arith.addf %392, %393 : vector<2x32xf32>
    %395 = arith.negf %394 : vector<2x32xf32>
    %396 = math.exp %395 : vector<2x32xf32>
    %cst_246 = arith.constant 1.000000e+00 : f32
    %397 = vector.broadcast %cst_246 : f32 to vector<2x32xf32>
    %398 = arith.addf %397, %396 : vector<2x32xf32>
    %399 = arith.divf %397, %398 : vector<2x32xf32>
    %400 = vector.extract_strided_slice %379 {offsets = [0, 64], sizes = [2, 32], strides = [1, 1]} : vector<2x96xf32> to vector<2x32xf32>
    %401 = vector.extract_strided_slice %383 {offsets = [0, 64], sizes = [2, 32], strides = [1, 1]} : vector<2x96xf32> to vector<2x32xf32>
    %402 = arith.mulf %391, %401 : vector<2x32xf32>
    %403 = arith.addf %400, %402 : vector<2x32xf32>
    %404 = math.tanh %403 : vector<2x32xf32>
    %cst_247 = arith.constant 1.000000e+00 : f32
    %405 = vector.broadcast %cst_247 : f32 to vector<2x32xf32>
    %406 = arith.subf %405, %399 : vector<2x32xf32>
    %407 = arith.mulf %406, %404 : vector<2x32xf32>
    %408 = arith.mulf %399, %368 : vector<2x32xf32>
    %409 = arith.addf %407, %408 : vector<2x32xf32>
    %410 = vector.extract_strided_slice %409 {offsets = [0, 0], sizes = [1, 32], strides = [1, 1]} : vector<2x32xf32> to vector<1x32xf32>
    %411 = arith.index_cast %c1_i32 : i32 to index
    %c0_248 = arith.constant 0 : index
    %412 = vector.load %arg24[%411, %c0_248] : memref<8x32xf32, #tpu.memory_space<vmem>>, vector<1x32xf32>
    tpu.vector_store %arg24[%411, %c0_248], %410 {strides = array<i32>} : memref<8x32xf32, #tpu.memory_space<vmem>>, vector<1x32xf32>,
    %413 = vector.extract_strided_slice %409 {offsets = [1, 0], sizes = [1, 32], strides = [1, 1]} : vector<2x32xf32> to vector<1x32xf32>
    %414 = arith.index_cast %c1_i32 : i32 to index
    %c0_249 = arith.constant 0 : index
    %415 = vector.load %arg25[%414, %c0_249] : memref<8x32xf32, #tpu.memory_space<vmem>>, vector<1x32xf32>
    tpu.vector_store %arg25[%414, %c0_249], %413 {strides = array<i32>} : memref<8x32xf32, #tpu.memory_space<vmem>>, vector<1x32xf32>,
    %c2_i32 = arith.constant 2 : i32
    %416 = arith.index_cast %c2_i32 : i32 to index
    %c0_250 = arith.constant 0 : index
    %417 = vector.load %arg26[%416, %c0_250] : memref<8x96xf32, #tpu.memory_space<vmem>>, vector<1x96xf32>
    %418 = arith.index_cast %c2_i32 : i32 to index
    %c0_251 = arith.constant 0 : index
    %419 = vector.load %arg27[%418, %c0_251] : memref<8x96xf32, #tpu.memory_space<vmem>>, vector<1x96xf32>
    %420 = tpu.concatenate %417, %419 in 0 : vector<1x96xf32>, vector<1x96xf32> -> vector<2x96xf32>
    %421 = arith.truncf %409 : vector<2x32xf32> to vector<2x32xbf16>
    %cst_252 = arith.constant dense<0.000000e+00> : vector<2x96xf32>
    %422 = tpu.matmul %421, %316, %cst_252 {dimension_numbers = #tpu.dot_dimension_numbers<[1], [0], [0], [1], [0, 0, 1, 1], [], []>} : vector<2x32xbf16>, vector<32x96xbf16>, vector<2x96xf32> -> vector<2x96xf32>
    %423 = vector.broadcast %320 : vector<1x96xf32> to vector<2x96xf32>
    %424 = arith.addf %422, %423 : vector<2x96xf32>
    %425 = vector.extract_strided_slice %420 {offsets = [0, 0], sizes = [2, 32], strides = [1, 1]} : vector<2x96xf32> to vector<2x32xf32>
    %426 = vector.extract_strided_slice %424 {offsets = [0, 0], sizes = [2, 32], strides = [1, 1]} : vector<2x96xf32> to vector<2x32xf32>
    %427 = arith.addf %425, %426 : vector<2x32xf32>
    %428 = arith.negf %427 : vector<2x32xf32>
    %429 = math.exp %428 : vector<2x32xf32>
    %cst_253 = arith.constant 1.000000e+00 : f32
    %430 = vector.broadcast %cst_253 : f32 to vector<2x32xf32>
    %431 = arith.addf %430, %429 : vector<2x32xf32>
    %432 = arith.divf %430, %431 : vector<2x32xf32>
    %433 = vector.extract_strided_slice %420 {offsets = [0, 32], sizes = [2, 32], strides = [1, 1]} : vector<2x96xf32> to vector<2x32xf32>
    %434 = vector.extract_strided_slice %424 {offsets = [0, 32], sizes = [2, 32], strides = [1, 1]} : vector<2x96xf32> to vector<2x32xf32>
    %435 = arith.addf %433, %434 : vector<2x32xf32>
    %436 = arith.negf %435 : vector<2x32xf32>
    %437 = math.exp %436 : vector<2x32xf32>
    %cst_254 = arith.constant 1.000000e+00 : f32
    %438 = vector.broadcast %cst_254 : f32 to vector<2x32xf32>
    %439 = arith.addf %438, %437 : vector<2x32xf32>
    %440 = arith.divf %438, %439 : vector<2x32xf32>
    %441 = vector.extract_strided_slice %420 {offsets = [0, 64], sizes = [2, 32], strides = [1, 1]} : vector<2x96xf32> to vector<2x32xf32>
    %442 = vector.extract_strided_slice %424 {offsets = [0, 64], sizes = [2, 32], strides = [1, 1]} : vector<2x96xf32> to vector<2x32xf32>
    %443 = arith.mulf %432, %442 : vector<2x32xf32>
    %444 = arith.addf %441, %443 : vector<2x32xf32>
    %445 = math.tanh %444 : vector<2x32xf32>
    %cst_255 = arith.constant 1.000000e+00 : f32
    %446 = vector.broadcast %cst_255 : f32 to vector<2x32xf32>
    %447 = arith.subf %446, %440 : vector<2x32xf32>
    %448 = arith.mulf %447, %445 : vector<2x32xf32>
    %449 = arith.mulf %440, %409 : vector<2x32xf32>
    %450 = arith.addf %448, %449 : vector<2x32xf32>
    %451 = vector.extract_strided_slice %450 {offsets = [0, 0], sizes = [1, 32], strides = [1, 1]} : vector<2x32xf32> to vector<1x32xf32>
    %452 = arith.index_cast %c2_i32 : i32 to index
    %c0_256 = arith.constant 0 : index
    %453 = vector.load %arg24[%452, %c0_256] : memref<8x32xf32, #tpu.memory_space<vmem>>, vector<1x32xf32>
    tpu.vector_store %arg24[%452, %c0_256], %451 {strides = array<i32>} : memref<8x32xf32, #tpu.memory_space<vmem>>, vector<1x32xf32>,
    %454 = vector.extract_strided_slice %450 {offsets = [1, 0], sizes = [1, 32], strides = [1, 1]} : vector<2x32xf32> to vector<1x32xf32>
    %455 = arith.index_cast %c2_i32 : i32 to index
    %c0_257 = arith.constant 0 : index
    %456 = vector.load %arg25[%455, %c0_257] : memref<8x32xf32, #tpu.memory_space<vmem>>, vector<1x32xf32>
    tpu.vector_store %arg25[%455, %c0_257], %454 {strides = array<i32>} : memref<8x32xf32, #tpu.memory_space<vmem>>, vector<1x32xf32>,
    %c3_i32 = arith.constant 3 : i32
    %457 = arith.index_cast %c3_i32 : i32 to index
    %c0_258 = arith.constant 0 : index
    %458 = vector.load %arg26[%457, %c0_258] : memref<8x96xf32, #tpu.memory_space<vmem>>, vector<1x96xf32>
    %459 = arith.index_cast %c3_i32 : i32 to index
    %c0_259 = arith.constant 0 : index
    %460 = vector.load %arg27[%459, %c0_259] : memref<8x96xf32, #tpu.memory_space<vmem>>, vector<1x96xf32>
    %461 = tpu.concatenate %458, %460 in 0 : vector<1x96xf32>, vector<1x96xf32> -> vector<2x96xf32>
    %462 = arith.truncf %450 : vector<2x32xf32> to vector<2x32xbf16>
    %cst_260 = arith.constant dense<0.000000e+00> : vector<2x96xf32>
    %463 = tpu.matmul %462, %316, %cst_260 {dimension_numbers = #tpu.dot_dimension_numbers<[1], [0], [0], [1], [0, 0, 1, 1], [], []>} : vector<2x32xbf16>, vector<32x96xbf16>, vector<2x96xf32> -> vector<2x96xf32>
    %464 = vector.broadcast %320 : vector<1x96xf32> to vector<2x96xf32>
    %465 = arith.addf %463, %464 : vector<2x96xf32>
    %466 = vector.extract_strided_slice %461 {offsets = [0, 0], sizes = [2, 32], strides = [1, 1]} : vector<2x96xf32> to vector<2x32xf32>
    %467 = vector.extract_strided_slice %465 {offsets = [0, 0], sizes = [2, 32], strides = [1, 1]} : vector<2x96xf32> to vector<2x32xf32>
    %468 = arith.addf %466, %467 : vector<2x32xf32>
    %469 = arith.negf %468 : vector<2x32xf32>
    %470 = math.exp %469 : vector<2x32xf32>
    %cst_261 = arith.constant 1.000000e+00 : f32
    %471 = vector.broadcast %cst_261 : f32 to vector<2x32xf32>
    %472 = arith.addf %471, %470 : vector<2x32xf32>
    %473 = arith.divf %471, %472 : vector<2x32xf32>
    %474 = vector.extract_strided_slice %461 {offsets = [0, 32], sizes = [2, 32], strides = [1, 1]} : vector<2x96xf32> to vector<2x32xf32>
    %475 = vector.extract_strided_slice %465 {offsets = [0, 32], sizes = [2, 32], strides = [1, 1]} : vector<2x96xf32> to vector<2x32xf32>
    %476 = arith.addf %474, %475 : vector<2x32xf32>
    %477 = arith.negf %476 : vector<2x32xf32>
    %478 = math.exp %477 : vector<2x32xf32>
    %cst_262 = arith.constant 1.000000e+00 : f32
    %479 = vector.broadcast %cst_262 : f32 to vector<2x32xf32>
    %480 = arith.addf %479, %478 : vector<2x32xf32>
    %481 = arith.divf %479, %480 : vector<2x32xf32>
    %482 = vector.extract_strided_slice %461 {offsets = [0, 64], sizes = [2, 32], strides = [1, 1]} : vector<2x96xf32> to vector<2x32xf32>
    %483 = vector.extract_strided_slice %465 {offsets = [0, 64], sizes = [2, 32], strides = [1, 1]} : vector<2x96xf32> to vector<2x32xf32>
    %484 = arith.mulf %473, %483 : vector<2x32xf32>
    %485 = arith.addf %482, %484 : vector<2x32xf32>
    %486 = math.tanh %485 : vector<2x32xf32>
    %cst_263 = arith.constant 1.000000e+00 : f32
    %487 = vector.broadcast %cst_263 : f32 to vector<2x32xf32>
    %488 = arith.subf %487, %481 : vector<2x32xf32>
    %489 = arith.mulf %488, %486 : vector<2x32xf32>
    %490 = arith.mulf %481, %450 : vector<2x32xf32>
    %491 = arith.addf %489, %490 : vector<2x32xf32>
    %492 = vector.extract_strided_slice %491 {offsets = [0, 0], sizes = [1, 32], strides = [1, 1]} : vector<2x32xf32> to vector<1x32xf32>
    %493 = arith.index_cast %c3_i32 : i32 to index
    %c0_264 = arith.constant 0 : index
    %494 = vector.load %arg24[%493, %c0_264] : memref<8x32xf32, #tpu.memory_space<vmem>>, vector<1x32xf32>
    tpu.vector_store %arg24[%493, %c0_264], %492 {strides = array<i32>} : memref<8x32xf32, #tpu.memory_space<vmem>>, vector<1x32xf32>,
    %495 = vector.extract_strided_slice %491 {offsets = [1, 0], sizes = [1, 32], strides = [1, 1]} : vector<2x32xf32> to vector<1x32xf32>
    %496 = arith.index_cast %c3_i32 : i32 to index
    %c0_265 = arith.constant 0 : index
    %497 = vector.load %arg25[%496, %c0_265] : memref<8x32xf32, #tpu.memory_space<vmem>>, vector<1x32xf32>
    tpu.vector_store %arg25[%496, %c0_265], %495 {strides = array<i32>} : memref<8x32xf32, #tpu.memory_space<vmem>>, vector<1x32xf32>,
    %c4_i32 = arith.constant 4 : i32
    %498 = arith.index_cast %c4_i32 : i32 to index
    %c0_266 = arith.constant 0 : index
    %499 = vector.load %arg26[%498, %c0_266] : memref<8x96xf32, #tpu.memory_space<vmem>>, vector<1x96xf32>
    %500 = arith.index_cast %c4_i32 : i32 to index
    %c0_267 = arith.constant 0 : index
    %501 = vector.load %arg27[%500, %c0_267] : memref<8x96xf32, #tpu.memory_space<vmem>>, vector<1x96xf32>
    %502 = tpu.concatenate %499, %501 in 0 : vector<1x96xf32>, vector<1x96xf32> -> vector<2x96xf32>
    %503 = arith.truncf %491 : vector<2x32xf32> to vector<2x32xbf16>
    %cst_268 = arith.constant dense<0.000000e+00> : vector<2x96xf32>
    %504 = tpu.matmul %503, %316, %cst_268 {dimension_numbers = #tpu.dot_dimension_numbers<[1], [0], [0], [1], [0, 0, 1, 1], [], []>} : vector<2x32xbf16>, vector<32x96xbf16>, vector<2x96xf32> -> vector<2x96xf32>
    %505 = vector.broadcast %320 : vector<1x96xf32> to vector<2x96xf32>
    %506 = arith.addf %504, %505 : vector<2x96xf32>
    %507 = vector.extract_strided_slice %502 {offsets = [0, 0], sizes = [2, 32], strides = [1, 1]} : vector<2x96xf32> to vector<2x32xf32>
    %508 = vector.extract_strided_slice %506 {offsets = [0, 0], sizes = [2, 32], strides = [1, 1]} : vector<2x96xf32> to vector<2x32xf32>
    %509 = arith.addf %507, %508 : vector<2x32xf32>
    %510 = arith.negf %509 : vector<2x32xf32>
    %511 = math.exp %510 : vector<2x32xf32>
    %cst_269 = arith.constant 1.000000e+00 : f32
    %512 = vector.broadcast %cst_269 : f32 to vector<2x32xf32>
    %513 = arith.addf %512, %511 : vector<2x32xf32>
    %514 = arith.divf %512, %513 : vector<2x32xf32>
    %515 = vector.extract_strided_slice %502 {offsets = [0, 32], sizes = [2, 32], strides = [1, 1]} : vector<2x96xf32> to vector<2x32xf32>
    %516 = vector.extract_strided_slice %506 {offsets = [0, 32], sizes = [2, 32], strides = [1, 1]} : vector<2x96xf32> to vector<2x32xf32>
    %517 = arith.addf %515, %516 : vector<2x32xf32>
    %518 = arith.negf %517 : vector<2x32xf32>
    %519 = math.exp %518 : vector<2x32xf32>
    %cst_270 = arith.constant 1.000000e+00 : f32
    %520 = vector.broadcast %cst_270 : f32 to vector<2x32xf32>
    %521 = arith.addf %520, %519 : vector<2x32xf32>
    %522 = arith.divf %520, %521 : vector<2x32xf32>
    %523 = vector.extract_strided_slice %502 {offsets = [0, 64], sizes = [2, 32], strides = [1, 1]} : vector<2x96xf32> to vector<2x32xf32>
    %524 = vector.extract_strided_slice %506 {offsets = [0, 64], sizes = [2, 32], strides = [1, 1]} : vector<2x96xf32> to vector<2x32xf32>
    %525 = arith.mulf %514, %524 : vector<2x32xf32>
    %526 = arith.addf %523, %525 : vector<2x32xf32>
    %527 = math.tanh %526 : vector<2x32xf32>
    %cst_271 = arith.constant 1.000000e+00 : f32
    %528 = vector.broadcast %cst_271 : f32 to vector<2x32xf32>
    %529 = arith.subf %528, %522 : vector<2x32xf32>
    %530 = arith.mulf %529, %527 : vector<2x32xf32>
    %531 = arith.mulf %522, %491 : vector<2x32xf32>
    %532 = arith.addf %530, %531 : vector<2x32xf32>
    %533 = vector.extract_strided_slice %532 {offsets = [0, 0], sizes = [1, 32], strides = [1, 1]} : vector<2x32xf32> to vector<1x32xf32>
    %534 = arith.index_cast %c4_i32 : i32 to index
    %c0_272 = arith.constant 0 : index
    %535 = vector.load %arg24[%534, %c0_272] : memref<8x32xf32, #tpu.memory_space<vmem>>, vector<1x32xf32>
    tpu.vector_store %arg24[%534, %c0_272], %533 {strides = array<i32>} : memref<8x32xf32, #tpu.memory_space<vmem>>, vector<1x32xf32>,
    %536 = vector.extract_strided_slice %532 {offsets = [1, 0], sizes = [1, 32], strides = [1, 1]} : vector<2x32xf32> to vector<1x32xf32>
    %537 = arith.index_cast %c4_i32 : i32 to index
    %c0_273 = arith.constant 0 : index
    %538 = vector.load %arg25[%537, %c0_273] : memref<8x32xf32, #tpu.memory_space<vmem>>, vector<1x32xf32>
    tpu.vector_store %arg25[%537, %c0_273], %536 {strides = array<i32>} : memref<8x32xf32, #tpu.memory_space<vmem>>, vector<1x32xf32>,
    %c5_i32 = arith.constant 5 : i32
    %539 = arith.index_cast %c5_i32 : i32 to index
    %c0_274 = arith.constant 0 : index
    %540 = vector.load %arg26[%539, %c0_274] : memref<8x96xf32, #tpu.memory_space<vmem>>, vector<1x96xf32>
    %541 = arith.index_cast %c5_i32 : i32 to index
    %c0_275 = arith.constant 0 : index
    %542 = vector.load %arg27[%541, %c0_275] : memref<8x96xf32, #tpu.memory_space<vmem>>, vector<1x96xf32>
    %543 = tpu.concatenate %540, %542 in 0 : vector<1x96xf32>, vector<1x96xf32> -> vector<2x96xf32>
    %544 = arith.truncf %532 : vector<2x32xf32> to vector<2x32xbf16>
    %cst_276 = arith.constant dense<0.000000e+00> : vector<2x96xf32>
    %545 = tpu.matmul %544, %316, %cst_276 {dimension_numbers = #tpu.dot_dimension_numbers<[1], [0], [0], [1], [0, 0, 1, 1], [], []>} : vector<2x32xbf16>, vector<32x96xbf16>, vector<2x96xf32> -> vector<2x96xf32>
    %546 = vector.broadcast %320 : vector<1x96xf32> to vector<2x96xf32>
    %547 = arith.addf %545, %546 : vector<2x96xf32>
    %548 = vector.extract_strided_slice %543 {offsets = [0, 0], sizes = [2, 32], strides = [1, 1]} : vector<2x96xf32> to vector<2x32xf32>
    %549 = vector.extract_strided_slice %547 {offsets = [0, 0], sizes = [2, 32], strides = [1, 1]} : vector<2x96xf32> to vector<2x32xf32>
    %550 = arith.addf %548, %549 : vector<2x32xf32>
    %551 = arith.negf %550 : vector<2x32xf32>
    %552 = math.exp %551 : vector<2x32xf32>
    %cst_277 = arith.constant 1.000000e+00 : f32
    %553 = vector.broadcast %cst_277 : f32 to vector<2x32xf32>
    %554 = arith.addf %553, %552 : vector<2x32xf32>
    %555 = arith.divf %553, %554 : vector<2x32xf32>
    %556 = vector.extract_strided_slice %543 {offsets = [0, 32], sizes = [2, 32], strides = [1, 1]} : vector<2x96xf32> to vector<2x32xf32>
    %557 = vector.extract_strided_slice %547 {offsets = [0, 32], sizes = [2, 32], strides = [1, 1]} : vector<2x96xf32> to vector<2x32xf32>
    %558 = arith.addf %556, %557 : vector<2x32xf32>
    %559 = arith.negf %558 : vector<2x32xf32>
    %560 = math.exp %559 : vector<2x32xf32>
    %cst_278 = arith.constant 1.000000e+00 : f32
    %561 = vector.broadcast %cst_278 : f32 to vector<2x32xf32>
    %562 = arith.addf %561, %560 : vector<2x32xf32>
    %563 = arith.divf %561, %562 : vector<2x32xf32>
    %564 = vector.extract_strided_slice %543 {offsets = [0, 64], sizes = [2, 32], strides = [1, 1]} : vector<2x96xf32> to vector<2x32xf32>
    %565 = vector.extract_strided_slice %547 {offsets = [0, 64], sizes = [2, 32], strides = [1, 1]} : vector<2x96xf32> to vector<2x32xf32>
    %566 = arith.mulf %555, %565 : vector<2x32xf32>
    %567 = arith.addf %564, %566 : vector<2x32xf32>
    %568 = math.tanh %567 : vector<2x32xf32>
    %cst_279 = arith.constant 1.000000e+00 : f32
    %569 = vector.broadcast %cst_279 : f32 to vector<2x32xf32>
    %570 = arith.subf %569, %563 : vector<2x32xf32>
    %571 = arith.mulf %570, %568 : vector<2x32xf32>
    %572 = arith.mulf %563, %532 : vector<2x32xf32>
    %573 = arith.addf %571, %572 : vector<2x32xf32>
    %574 = vector.extract_strided_slice %573 {offsets = [0, 0], sizes = [1, 32], strides = [1, 1]} : vector<2x32xf32> to vector<1x32xf32>
    %575 = arith.index_cast %c5_i32 : i32 to index
    %c0_280 = arith.constant 0 : index
    %576 = vector.load %arg24[%575, %c0_280] : memref<8x32xf32, #tpu.memory_space<vmem>>, vector<1x32xf32>
    tpu.vector_store %arg24[%575, %c0_280], %574 {strides = array<i32>} : memref<8x32xf32, #tpu.memory_space<vmem>>, vector<1x32xf32>,
    %577 = vector.extract_strided_slice %573 {offsets = [1, 0], sizes = [1, 32], strides = [1, 1]} : vector<2x32xf32> to vector<1x32xf32>
    %578 = arith.index_cast %c5_i32 : i32 to index
    %c0_281 = arith.constant 0 : index
    %579 = vector.load %arg25[%578, %c0_281] : memref<8x32xf32, #tpu.memory_space<vmem>>, vector<1x32xf32>
    tpu.vector_store %arg25[%578, %c0_281], %577 {strides = array<i32>} : memref<8x32xf32, #tpu.memory_space<vmem>>, vector<1x32xf32>,
    %c6_i32 = arith.constant 6 : i32
    %580 = arith.index_cast %c6_i32 : i32 to index
    %c0_282 = arith.constant 0 : index
    %581 = vector.load %arg26[%580, %c0_282] : memref<8x96xf32, #tpu.memory_space<vmem>>, vector<1x96xf32>
    %582 = arith.index_cast %c6_i32 : i32 to index
    %c0_283 = arith.constant 0 : index
    %583 = vector.load %arg27[%582, %c0_283] : memref<8x96xf32, #tpu.memory_space<vmem>>, vector<1x96xf32>
    %584 = tpu.concatenate %581, %583 in 0 : vector<1x96xf32>, vector<1x96xf32> -> vector<2x96xf32>
    %585 = arith.truncf %573 : vector<2x32xf32> to vector<2x32xbf16>
    %cst_284 = arith.constant dense<0.000000e+00> : vector<2x96xf32>
    %586 = tpu.matmul %585, %316, %cst_284 {dimension_numbers = #tpu.dot_dimension_numbers<[1], [0], [0], [1], [0, 0, 1, 1], [], []>} : vector<2x32xbf16>, vector<32x96xbf16>, vector<2x96xf32> -> vector<2x96xf32>
    %587 = vector.broadcast %320 : vector<1x96xf32> to vector<2x96xf32>
    %588 = arith.addf %586, %587 : vector<2x96xf32>
    %589 = vector.extract_strided_slice %584 {offsets = [0, 0], sizes = [2, 32], strides = [1, 1]} : vector<2x96xf32> to vector<2x32xf32>
    %590 = vector.extract_strided_slice %588 {offsets = [0, 0], sizes = [2, 32], strides = [1, 1]} : vector<2x96xf32> to vector<2x32xf32>
    %591 = arith.addf %589, %590 : vector<2x32xf32>
    %592 = arith.negf %591 : vector<2x32xf32>
    %593 = math.exp %592 : vector<2x32xf32>
    %cst_285 = arith.constant 1.000000e+00 : f32
    %594 = vector.broadcast %cst_285 : f32 to vector<2x32xf32>
    %595 = arith.addf %594, %593 : vector<2x32xf32>
    %596 = arith.divf %594, %595 : vector<2x32xf32>
    %597 = vector.extract_strided_slice %584 {offsets = [0, 32], sizes = [2, 32], strides = [1, 1]} : vector<2x96xf32> to vector<2x32xf32>
    %598 = vector.extract_strided_slice %588 {offsets = [0, 32], sizes = [2, 32], strides = [1, 1]} : vector<2x96xf32> to vector<2x32xf32>
    %599 = arith.addf %597, %598 : vector<2x32xf32>
    %600 = arith.negf %599 : vector<2x32xf32>
    %601 = math.exp %600 : vector<2x32xf32>
    %cst_286 = arith.constant 1.000000e+00 : f32
    %602 = vector.broadcast %cst_286 : f32 to vector<2x32xf32>
    %603 = arith.addf %602, %601 : vector<2x32xf32>
    %604 = arith.divf %602, %603 : vector<2x32xf32>
    %605 = vector.extract_strided_slice %584 {offsets = [0, 64], sizes = [2, 32], strides = [1, 1]} : vector<2x96xf32> to vector<2x32xf32>
    %606 = vector.extract_strided_slice %588 {offsets = [0, 64], sizes = [2, 32], strides = [1, 1]} : vector<2x96xf32> to vector<2x32xf32>
    %607 = arith.mulf %596, %606 : vector<2x32xf32>
    %608 = arith.addf %605, %607 : vector<2x32xf32>
    %609 = math.tanh %608 : vector<2x32xf32>
    %cst_287 = arith.constant 1.000000e+00 : f32
    %610 = vector.broadcast %cst_287 : f32 to vector<2x32xf32>
    %611 = arith.subf %610, %604 : vector<2x32xf32>
    %612 = arith.mulf %611, %609 : vector<2x32xf32>
    %613 = arith.mulf %604, %573 : vector<2x32xf32>
    %614 = arith.addf %612, %613 : vector<2x32xf32>
    %615 = vector.extract_strided_slice %614 {offsets = [0, 0], sizes = [1, 32], strides = [1, 1]} : vector<2x32xf32> to vector<1x32xf32>
    %616 = arith.index_cast %c6_i32 : i32 to index
    %c0_288 = arith.constant 0 : index
    %617 = vector.load %arg24[%616, %c0_288] : memref<8x32xf32, #tpu.memory_space<vmem>>, vector<1x32xf32>
    tpu.vector_store %arg24[%616, %c0_288], %615 {strides = array<i32>} : memref<8x32xf32, #tpu.memory_space<vmem>>, vector<1x32xf32>,
    %618 = vector.extract_strided_slice %614 {offsets = [1, 0], sizes = [1, 32], strides = [1, 1]} : vector<2x32xf32> to vector<1x32xf32>
    %619 = arith.index_cast %c6_i32 : i32 to index
    %c0_289 = arith.constant 0 : index
    %620 = vector.load %arg25[%619, %c0_289] : memref<8x32xf32, #tpu.memory_space<vmem>>, vector<1x32xf32>
    tpu.vector_store %arg25[%619, %c0_289], %618 {strides = array<i32>} : memref<8x32xf32, #tpu.memory_space<vmem>>, vector<1x32xf32>,
    %c7_i32 = arith.constant 7 : i32
    %621 = arith.index_cast %c7_i32 : i32 to index
    %c0_290 = arith.constant 0 : index
    %622 = vector.load %arg26[%621, %c0_290] : memref<8x96xf32, #tpu.memory_space<vmem>>, vector<1x96xf32>
    %623 = arith.index_cast %c7_i32 : i32 to index
    %c0_291 = arith.constant 0 : index
    %624 = vector.load %arg27[%623, %c0_291] : memref<8x96xf32, #tpu.memory_space<vmem>>, vector<1x96xf32>
    %625 = tpu.concatenate %622, %624 in 0 : vector<1x96xf32>, vector<1x96xf32> -> vector<2x96xf32>
    %626 = arith.truncf %614 : vector<2x32xf32> to vector<2x32xbf16>
    %cst_292 = arith.constant dense<0.000000e+00> : vector<2x96xf32>
    %627 = tpu.matmul %626, %316, %cst_292 {dimension_numbers = #tpu.dot_dimension_numbers<[1], [0], [0], [1], [0, 0, 1, 1], [], []>} : vector<2x32xbf16>, vector<32x96xbf16>, vector<2x96xf32> -> vector<2x96xf32>
    %628 = vector.broadcast %320 : vector<1x96xf32> to vector<2x96xf32>
    %629 = arith.addf %627, %628 : vector<2x96xf32>
    %630 = vector.extract_strided_slice %625 {offsets = [0, 0], sizes = [2, 32], strides = [1, 1]} : vector<2x96xf32> to vector<2x32xf32>
    %631 = vector.extract_strided_slice %629 {offsets = [0, 0], sizes = [2, 32], strides = [1, 1]} : vector<2x96xf32> to vector<2x32xf32>
    %632 = arith.addf %630, %631 : vector<2x32xf32>
    %633 = arith.negf %632 : vector<2x32xf32>
    %634 = math.exp %633 : vector<2x32xf32>
    %cst_293 = arith.constant 1.000000e+00 : f32
    %635 = vector.broadcast %cst_293 : f32 to vector<2x32xf32>
    %636 = arith.addf %635, %634 : vector<2x32xf32>
    %637 = arith.divf %635, %636 : vector<2x32xf32>
    %638 = vector.extract_strided_slice %625 {offsets = [0, 32], sizes = [2, 32], strides = [1, 1]} : vector<2x96xf32> to vector<2x32xf32>
    %639 = vector.extract_strided_slice %629 {offsets = [0, 32], sizes = [2, 32], strides = [1, 1]} : vector<2x96xf32> to vector<2x32xf32>
    %640 = arith.addf %638, %639 : vector<2x32xf32>
    %641 = arith.negf %640 : vector<2x32xf32>
    %642 = math.exp %641 : vector<2x32xf32>
    %cst_294 = arith.constant 1.000000e+00 : f32
    %643 = vector.broadcast %cst_294 : f32 to vector<2x32xf32>
    %644 = arith.addf %643, %642 : vector<2x32xf32>
    %645 = arith.divf %643, %644 : vector<2x32xf32>
    %646 = vector.extract_strided_slice %625 {offsets = [0, 64], sizes = [2, 32], strides = [1, 1]} : vector<2x96xf32> to vector<2x32xf32>
    %647 = vector.extract_strided_slice %629 {offsets = [0, 64], sizes = [2, 32], strides = [1, 1]} : vector<2x96xf32> to vector<2x32xf32>
    %648 = arith.mulf %637, %647 : vector<2x32xf32>
    %649 = arith.addf %646, %648 : vector<2x32xf32>
    %650 = math.tanh %649 : vector<2x32xf32>
    %cst_295 = arith.constant 1.000000e+00 : f32
    %651 = vector.broadcast %cst_295 : f32 to vector<2x32xf32>
    %652 = arith.subf %651, %645 : vector<2x32xf32>
    %653 = arith.mulf %652, %650 : vector<2x32xf32>
    %654 = arith.mulf %645, %614 : vector<2x32xf32>
    %655 = arith.addf %653, %654 : vector<2x32xf32>
    %656 = vector.extract_strided_slice %655 {offsets = [0, 0], sizes = [1, 32], strides = [1, 1]} : vector<2x32xf32> to vector<1x32xf32>
    %657 = arith.index_cast %c7_i32 : i32 to index
    %c0_296 = arith.constant 0 : index
    %658 = vector.load %arg24[%657, %c0_296] : memref<8x32xf32, #tpu.memory_space<vmem>>, vector<1x32xf32>
    tpu.vector_store %arg24[%657, %c0_296], %656 {strides = array<i32>} : memref<8x32xf32, #tpu.memory_space<vmem>>, vector<1x32xf32>,
    %659 = vector.extract_strided_slice %655 {offsets = [1, 0], sizes = [1, 32], strides = [1, 1]} : vector<2x32xf32> to vector<1x32xf32>
    %660 = arith.index_cast %c7_i32 : i32 to index
    %c0_297 = arith.constant 0 : index
    %661 = vector.load %arg25[%660, %c0_297] : memref<8x32xf32, #tpu.memory_space<vmem>>, vector<1x32xf32>
    tpu.vector_store %arg25[%660, %c0_297], %659 {strides = array<i32>} : memref<8x32xf32, #tpu.memory_space<vmem>>, vector<1x32xf32>,
    %c8_i32 = arith.constant 8 : i32
    %c1_298 = arith.constant 1 : index
    %c0_299 = arith.constant 0 : index
    %c0_300 = arith.constant 0 : index
    %662 = vector.load %arg10[%c1_298, %c0_299, %c0_300] : memref<3x32x96xbf16, #tpu.memory_space<vmem>>, vector<1x32x96xbf16>
    %663 = vector.shape_cast %662 : vector<1x32x96xbf16> to vector<32x96xbf16>
    %c1_301 = arith.constant 1 : index
    %c0_302 = arith.constant 0 : index
    %c0_303 = arith.constant 0 : index
    %664 = vector.load %arg11[%c1_301, %c0_302, %c0_303] : memref<3x32x96xbf16, #tpu.memory_space<vmem>>, vector<1x32x96xbf16>
    %665 = vector.shape_cast %664 : vector<1x32x96xbf16> to vector<32x96xbf16>
    %c1_304 = arith.constant 1 : index
    %c0_305 = arith.constant 0 : index
    %c0_306 = arith.constant 0 : index
    %666 = vector.load %arg12[%c1_304, %c0_305, %c0_306] : memref<3x1x96xf32, #tpu.memory_space<vmem>>, vector<1x1x96xf32>
    %667 = vector.shape_cast %666 : vector<1x1x96xf32> to vector<1x96xf32>
    %c1_307 = arith.constant 1 : index
    %c0_308 = arith.constant 0 : index
    %c0_309 = arith.constant 0 : index
    %668 = vector.load %arg13[%c1_307, %c0_308, %c0_309] : memref<3x1x96xf32, #tpu.memory_space<vmem>>, vector<1x1x96xf32>
    %669 = vector.shape_cast %668 : vector<1x1x96xf32> to vector<1x96xf32>
    %c0_310 = arith.constant 0 : index
    %c0_311 = arith.constant 0 : index
    %670 = vector.load %arg24[%c0_310, %c0_311] : memref<8x32xf32, #tpu.memory_space<vmem>>, vector<8x32xf32>
    %671 = arith.truncf %670 : vector<8x32xf32> to vector<8x32xbf16>
    %cst_312 = arith.constant dense<0.000000e+00> : vector<8x96xf32>
    %672 = tpu.matmul %671, %663, %cst_312 {dimension_numbers = #tpu.dot_dimension_numbers<[1], [0], [0], [1], [0, 0, 1, 1], [], []>} : vector<8x32xbf16>, vector<32x96xbf16>, vector<8x96xf32> -> vector<8x96xf32>
    %673 = vector.broadcast %667 : vector<1x96xf32> to vector<8x96xf32>
    %674 = arith.addf %672, %673 : vector<8x96xf32>
    %c0_313 = arith.constant 0 : index
    %c0_314 = arith.constant 0 : index
    %675 = vector.load %arg26[%c0_313, %c0_314] : memref<8x96xf32, #tpu.memory_space<vmem>>, vector<8x96xf32>
    tpu.vector_store %arg26[%c0_313, %c0_314], %674 {strides = array<i32>} : memref<8x96xf32, #tpu.memory_space<vmem>>, vector<8x96xf32>,
    %c0_315 = arith.constant 0 : index
    %c0_316 = arith.constant 0 : index
    %676 = vector.load %arg25[%c0_315, %c0_316] : memref<8x32xf32, #tpu.memory_space<vmem>>, vector<8x32xf32>
    %677 = arith.truncf %676 : vector<8x32xf32> to vector<8x32xbf16>
    %cst_317 = arith.constant dense<0.000000e+00> : vector<8x96xf32>
    %678 = tpu.matmul %677, %663, %cst_317 {dimension_numbers = #tpu.dot_dimension_numbers<[1], [0], [0], [1], [0, 0, 1, 1], [], []>} : vector<8x32xbf16>, vector<32x96xbf16>, vector<8x96xf32> -> vector<8x96xf32>
    %679 = vector.broadcast %667 : vector<1x96xf32> to vector<8x96xf32>
    %680 = arith.addf %678, %679 : vector<8x96xf32>
    %c0_318 = arith.constant 0 : index
    %c0_319 = arith.constant 0 : index
    %681 = vector.load %arg27[%c0_318, %c0_319] : memref<8x96xf32, #tpu.memory_space<vmem>>, vector<8x96xf32>
    tpu.vector_store %arg27[%c0_318, %c0_319], %680 {strides = array<i32>} : memref<8x96xf32, #tpu.memory_space<vmem>>, vector<8x96xf32>,
    %cst_320 = arith.constant 0.000000e+00 : f32
    %682 = vector.broadcast %cst_320 : f32 to vector<2x32xf32>
    %c0_i32_321 = arith.constant 0 : i32
    %683 = arith.index_cast %c0_i32_321 : i32 to index
    %c0_322 = arith.constant 0 : index
    %684 = vector.load %arg26[%683, %c0_322] : memref<8x96xf32, #tpu.memory_space<vmem>>, vector<1x96xf32>
    %685 = arith.index_cast %c0_i32_321 : i32 to index
    %c0_323 = arith.constant 0 : index
    %686 = vector.load %arg27[%685, %c0_323] : memref<8x96xf32, #tpu.memory_space<vmem>>, vector<1x96xf32>
    %687 = tpu.concatenate %684, %686 in 0 : vector<1x96xf32>, vector<1x96xf32> -> vector<2x96xf32>
    %688 = arith.truncf %682 : vector<2x32xf32> to vector<2x32xbf16>
    %cst_324 = arith.constant dense<0.000000e+00> : vector<2x96xf32>
    %689 = tpu.matmul %688, %665, %cst_324 {dimension_numbers = #tpu.dot_dimension_numbers<[1], [0], [0], [1], [0, 0, 1, 1], [], []>} : vector<2x32xbf16>, vector<32x96xbf16>, vector<2x96xf32> -> vector<2x96xf32>
    %690 = vector.broadcast %669 : vector<1x96xf32> to vector<2x96xf32>
    %691 = arith.addf %689, %690 : vector<2x96xf32>
    %692 = vector.extract_strided_slice %687 {offsets = [0, 0], sizes = [2, 32], strides = [1, 1]} : vector<2x96xf32> to vector<2x32xf32>
    %693 = vector.extract_strided_slice %691 {offsets = [0, 0], sizes = [2, 32], strides = [1, 1]} : vector<2x96xf32> to vector<2x32xf32>
    %694 = arith.addf %692, %693 : vector<2x32xf32>
    %695 = arith.negf %694 : vector<2x32xf32>
    %696 = math.exp %695 : vector<2x32xf32>
    %cst_325 = arith.constant 1.000000e+00 : f32
    %697 = vector.broadcast %cst_325 : f32 to vector<2x32xf32>
    %698 = arith.addf %697, %696 : vector<2x32xf32>
    %699 = arith.divf %697, %698 : vector<2x32xf32>
    %700 = vector.extract_strided_slice %687 {offsets = [0, 32], sizes = [2, 32], strides = [1, 1]} : vector<2x96xf32> to vector<2x32xf32>
    %701 = vector.extract_strided_slice %691 {offsets = [0, 32], sizes = [2, 32], strides = [1, 1]} : vector<2x96xf32> to vector<2x32xf32>
    %702 = arith.addf %700, %701 : vector<2x32xf32>
    %703 = arith.negf %702 : vector<2x32xf32>
    %704 = math.exp %703 : vector<2x32xf32>
    %cst_326 = arith.constant 1.000000e+00 : f32
    %705 = vector.broadcast %cst_326 : f32 to vector<2x32xf32>
    %706 = arith.addf %705, %704 : vector<2x32xf32>
    %707 = arith.divf %705, %706 : vector<2x32xf32>
    %708 = vector.extract_strided_slice %687 {offsets = [0, 64], sizes = [2, 32], strides = [1, 1]} : vector<2x96xf32> to vector<2x32xf32>
    %709 = vector.extract_strided_slice %691 {offsets = [0, 64], sizes = [2, 32], strides = [1, 1]} : vector<2x96xf32> to vector<2x32xf32>
    %710 = arith.mulf %699, %709 : vector<2x32xf32>
    %711 = arith.addf %708, %710 : vector<2x32xf32>
    %712 = math.tanh %711 : vector<2x32xf32>
    %cst_327 = arith.constant 1.000000e+00 : f32
    %713 = vector.broadcast %cst_327 : f32 to vector<2x32xf32>
    %714 = arith.subf %713, %707 : vector<2x32xf32>
    %715 = arith.mulf %714, %712 : vector<2x32xf32>
    %716 = arith.mulf %707, %682 : vector<2x32xf32>
    %717 = arith.addf %715, %716 : vector<2x32xf32>
    %718 = vector.extract_strided_slice %717 {offsets = [0, 0], sizes = [1, 32], strides = [1, 1]} : vector<2x32xf32> to vector<1x32xf32>
    %719 = arith.index_cast %c0_i32_321 : i32 to index
    %c0_328 = arith.constant 0 : index
    %720 = vector.load %arg24[%719, %c0_328] : memref<8x32xf32, #tpu.memory_space<vmem>>, vector<1x32xf32>
    tpu.vector_store %arg24[%719, %c0_328], %718 {strides = array<i32>} : memref<8x32xf32, #tpu.memory_space<vmem>>, vector<1x32xf32>,
    %721 = vector.extract_strided_slice %717 {offsets = [1, 0], sizes = [1, 32], strides = [1, 1]} : vector<2x32xf32> to vector<1x32xf32>
    %722 = arith.index_cast %c0_i32_321 : i32 to index
    %c0_329 = arith.constant 0 : index
    %723 = vector.load %arg25[%722, %c0_329] : memref<8x32xf32, #tpu.memory_space<vmem>>, vector<1x32xf32>
    tpu.vector_store %arg25[%722, %c0_329], %721 {strides = array<i32>} : memref<8x32xf32, #tpu.memory_space<vmem>>, vector<1x32xf32>,
    %c1_i32_330 = arith.constant 1 : i32
    %724 = arith.index_cast %c1_i32_330 : i32 to index
    %c0_331 = arith.constant 0 : index
    %725 = vector.load %arg26[%724, %c0_331] : memref<8x96xf32, #tpu.memory_space<vmem>>, vector<1x96xf32>
    %726 = arith.index_cast %c1_i32_330 : i32 to index
    %c0_332 = arith.constant 0 : index
    %727 = vector.load %arg27[%726, %c0_332] : memref<8x96xf32, #tpu.memory_space<vmem>>, vector<1x96xf32>
    %728 = tpu.concatenate %725, %727 in 0 : vector<1x96xf32>, vector<1x96xf32> -> vector<2x96xf32>
    %729 = arith.truncf %717 : vector<2x32xf32> to vector<2x32xbf16>
    %cst_333 = arith.constant dense<0.000000e+00> : vector<2x96xf32>
    %730 = tpu.matmul %729, %665, %cst_333 {dimension_numbers = #tpu.dot_dimension_numbers<[1], [0], [0], [1], [0, 0, 1, 1], [], []>} : vector<2x32xbf16>, vector<32x96xbf16>, vector<2x96xf32> -> vector<2x96xf32>
    %731 = vector.broadcast %669 : vector<1x96xf32> to vector<2x96xf32>
    %732 = arith.addf %730, %731 : vector<2x96xf32>
    %733 = vector.extract_strided_slice %728 {offsets = [0, 0], sizes = [2, 32], strides = [1, 1]} : vector<2x96xf32> to vector<2x32xf32>
    %734 = vector.extract_strided_slice %732 {offsets = [0, 0], sizes = [2, 32], strides = [1, 1]} : vector<2x96xf32> to vector<2x32xf32>
    %735 = arith.addf %733, %734 : vector<2x32xf32>
    %736 = arith.negf %735 : vector<2x32xf32>
    %737 = math.exp %736 : vector<2x32xf32>
    %cst_334 = arith.constant 1.000000e+00 : f32
    %738 = vector.broadcast %cst_334 : f32 to vector<2x32xf32>
    %739 = arith.addf %738, %737 : vector<2x32xf32>
    %740 = arith.divf %738, %739 : vector<2x32xf32>
    %741 = vector.extract_strided_slice %728 {offsets = [0, 32], sizes = [2, 32], strides = [1, 1]} : vector<2x96xf32> to vector<2x32xf32>
    %742 = vector.extract_strided_slice %732 {offsets = [0, 32], sizes = [2, 32], strides = [1, 1]} : vector<2x96xf32> to vector<2x32xf32>
    %743 = arith.addf %741, %742 : vector<2x32xf32>
    %744 = arith.negf %743 : vector<2x32xf32>
    %745 = math.exp %744 : vector<2x32xf32>
    %cst_335 = arith.constant 1.000000e+00 : f32
    %746 = vector.broadcast %cst_335 : f32 to vector<2x32xf32>
    %747 = arith.addf %746, %745 : vector<2x32xf32>
    %748 = arith.divf %746, %747 : vector<2x32xf32>
    %749 = vector.extract_strided_slice %728 {offsets = [0, 64], sizes = [2, 32], strides = [1, 1]} : vector<2x96xf32> to vector<2x32xf32>
    %750 = vector.extract_strided_slice %732 {offsets = [0, 64], sizes = [2, 32], strides = [1, 1]} : vector<2x96xf32> to vector<2x32xf32>
    %751 = arith.mulf %740, %750 : vector<2x32xf32>
    %752 = arith.addf %749, %751 : vector<2x32xf32>
    %753 = math.tanh %752 : vector<2x32xf32>
    %cst_336 = arith.constant 1.000000e+00 : f32
    %754 = vector.broadcast %cst_336 : f32 to vector<2x32xf32>
    %755 = arith.subf %754, %748 : vector<2x32xf32>
    %756 = arith.mulf %755, %753 : vector<2x32xf32>
    %757 = arith.mulf %748, %717 : vector<2x32xf32>
    %758 = arith.addf %756, %757 : vector<2x32xf32>
    %759 = vector.extract_strided_slice %758 {offsets = [0, 0], sizes = [1, 32], strides = [1, 1]} : vector<2x32xf32> to vector<1x32xf32>
    %760 = arith.index_cast %c1_i32_330 : i32 to index
    %c0_337 = arith.constant 0 : index
    %761 = vector.load %arg24[%760, %c0_337] : memref<8x32xf32, #tpu.memory_space<vmem>>, vector<1x32xf32>
    tpu.vector_store %arg24[%760, %c0_337], %759 {strides = array<i32>} : memref<8x32xf32, #tpu.memory_space<vmem>>, vector<1x32xf32>,
    %762 = vector.extract_strided_slice %758 {offsets = [1, 0], sizes = [1, 32], strides = [1, 1]} : vector<2x32xf32> to vector<1x32xf32>
    %763 = arith.index_cast %c1_i32_330 : i32 to index
    %c0_338 = arith.constant 0 : index
    %764 = vector.load %arg25[%763, %c0_338] : memref<8x32xf32, #tpu.memory_space<vmem>>, vector<1x32xf32>
    tpu.vector_store %arg25[%763, %c0_338], %762 {strides = array<i32>} : memref<8x32xf32, #tpu.memory_space<vmem>>, vector<1x32xf32>,
    %c2_i32_339 = arith.constant 2 : i32
    %765 = arith.index_cast %c2_i32_339 : i32 to index
    %c0_340 = arith.constant 0 : index
    %766 = vector.load %arg26[%765, %c0_340] : memref<8x96xf32, #tpu.memory_space<vmem>>, vector<1x96xf32>
    %767 = arith.index_cast %c2_i32_339 : i32 to index
    %c0_341 = arith.constant 0 : index
    %768 = vector.load %arg27[%767, %c0_341] : memref<8x96xf32, #tpu.memory_space<vmem>>, vector<1x96xf32>
    %769 = tpu.concatenate %766, %768 in 0 : vector<1x96xf32>, vector<1x96xf32> -> vector<2x96xf32>
    %770 = arith.truncf %758 : vector<2x32xf32> to vector<2x32xbf16>
    %cst_342 = arith.constant dense<0.000000e+00> : vector<2x96xf32>
    %771 = tpu.matmul %770, %665, %cst_342 {dimension_numbers = #tpu.dot_dimension_numbers<[1], [0], [0], [1], [0, 0, 1, 1], [], []>} : vector<2x32xbf16>, vector<32x96xbf16>, vector<2x96xf32> -> vector<2x96xf32>
    %772 = vector.broadcast %669 : vector<1x96xf32> to vector<2x96xf32>
    %773 = arith.addf %771, %772 : vector<2x96xf32>
    %774 = vector.extract_strided_slice %769 {offsets = [0, 0], sizes = [2, 32], strides = [1, 1]} : vector<2x96xf32> to vector<2x32xf32>
    %775 = vector.extract_strided_slice %773 {offsets = [0, 0], sizes = [2, 32], strides = [1, 1]} : vector<2x96xf32> to vector<2x32xf32>
    %776 = arith.addf %774, %775 : vector<2x32xf32>
    %777 = arith.negf %776 : vector<2x32xf32>
    %778 = math.exp %777 : vector<2x32xf32>
    %cst_343 = arith.constant 1.000000e+00 : f32
    %779 = vector.broadcast %cst_343 : f32 to vector<2x32xf32>
    %780 = arith.addf %779, %778 : vector<2x32xf32>
    %781 = arith.divf %779, %780 : vector<2x32xf32>
    %782 = vector.extract_strided_slice %769 {offsets = [0, 32], sizes = [2, 32], strides = [1, 1]} : vector<2x96xf32> to vector<2x32xf32>
    %783 = vector.extract_strided_slice %773 {offsets = [0, 32], sizes = [2, 32], strides = [1, 1]} : vector<2x96xf32> to vector<2x32xf32>
    %784 = arith.addf %782, %783 : vector<2x32xf32>
    %785 = arith.negf %784 : vector<2x32xf32>
    %786 = math.exp %785 : vector<2x32xf32>
    %cst_344 = arith.constant 1.000000e+00 : f32
    %787 = vector.broadcast %cst_344 : f32 to vector<2x32xf32>
    %788 = arith.addf %787, %786 : vector<2x32xf32>
    %789 = arith.divf %787, %788 : vector<2x32xf32>
    %790 = vector.extract_strided_slice %769 {offsets = [0, 64], sizes = [2, 32], strides = [1, 1]} : vector<2x96xf32> to vector<2x32xf32>
    %791 = vector.extract_strided_slice %773 {offsets = [0, 64], sizes = [2, 32], strides = [1, 1]} : vector<2x96xf32> to vector<2x32xf32>
    %792 = arith.mulf %781, %791 : vector<2x32xf32>
    %793 = arith.addf %790, %792 : vector<2x32xf32>
    %794 = math.tanh %793 : vector<2x32xf32>
    %cst_345 = arith.constant 1.000000e+00 : f32
    %795 = vector.broadcast %cst_345 : f32 to vector<2x32xf32>
    %796 = arith.subf %795, %789 : vector<2x32xf32>
    %797 = arith.mulf %796, %794 : vector<2x32xf32>
    %798 = arith.mulf %789, %758 : vector<2x32xf32>
    %799 = arith.addf %797, %798 : vector<2x32xf32>
    %800 = vector.extract_strided_slice %799 {offsets = [0, 0], sizes = [1, 32], strides = [1, 1]} : vector<2x32xf32> to vector<1x32xf32>
    %801 = arith.index_cast %c2_i32_339 : i32 to index
    %c0_346 = arith.constant 0 : index
    %802 = vector.load %arg24[%801, %c0_346] : memref<8x32xf32, #tpu.memory_space<vmem>>, vector<1x32xf32>
    tpu.vector_store %arg24[%801, %c0_346], %800 {strides = array<i32>} : memref<8x32xf32, #tpu.memory_space<vmem>>, vector<1x32xf32>,
    %803 = vector.extract_strided_slice %799 {offsets = [1, 0], sizes = [1, 32], strides = [1, 1]} : vector<2x32xf32> to vector<1x32xf32>
    %804 = arith.index_cast %c2_i32_339 : i32 to index
    %c0_347 = arith.constant 0 : index
    %805 = vector.load %arg25[%804, %c0_347] : memref<8x32xf32, #tpu.memory_space<vmem>>, vector<1x32xf32>
    tpu.vector_store %arg25[%804, %c0_347], %803 {strides = array<i32>} : memref<8x32xf32, #tpu.memory_space<vmem>>, vector<1x32xf32>,
    %c3_i32_348 = arith.constant 3 : i32
    %806 = arith.index_cast %c3_i32_348 : i32 to index
    %c0_349 = arith.constant 0 : index
    %807 = vector.load %arg26[%806, %c0_349] : memref<8x96xf32, #tpu.memory_space<vmem>>, vector<1x96xf32>
    %808 = arith.index_cast %c3_i32_348 : i32 to index
    %c0_350 = arith.constant 0 : index
    %809 = vector.load %arg27[%808, %c0_350] : memref<8x96xf32, #tpu.memory_space<vmem>>, vector<1x96xf32>
    %810 = tpu.concatenate %807, %809 in 0 : vector<1x96xf32>, vector<1x96xf32> -> vector<2x96xf32>
    %811 = arith.truncf %799 : vector<2x32xf32> to vector<2x32xbf16>
    %cst_351 = arith.constant dense<0.000000e+00> : vector<2x96xf32>
    %812 = tpu.matmul %811, %665, %cst_351 {dimension_numbers = #tpu.dot_dimension_numbers<[1], [0], [0], [1], [0, 0, 1, 1], [], []>} : vector<2x32xbf16>, vector<32x96xbf16>, vector<2x96xf32> -> vector<2x96xf32>
    %813 = vector.broadcast %669 : vector<1x96xf32> to vector<2x96xf32>
    %814 = arith.addf %812, %813 : vector<2x96xf32>
    %815 = vector.extract_strided_slice %810 {offsets = [0, 0], sizes = [2, 32], strides = [1, 1]} : vector<2x96xf32> to vector<2x32xf32>
    %816 = vector.extract_strided_slice %814 {offsets = [0, 0], sizes = [2, 32], strides = [1, 1]} : vector<2x96xf32> to vector<2x32xf32>
    %817 = arith.addf %815, %816 : vector<2x32xf32>
    %818 = arith.negf %817 : vector<2x32xf32>
    %819 = math.exp %818 : vector<2x32xf32>
    %cst_352 = arith.constant 1.000000e+00 : f32
    %820 = vector.broadcast %cst_352 : f32 to vector<2x32xf32>
    %821 = arith.addf %820, %819 : vector<2x32xf32>
    %822 = arith.divf %820, %821 : vector<2x32xf32>
    %823 = vector.extract_strided_slice %810 {offsets = [0, 32], sizes = [2, 32], strides = [1, 1]} : vector<2x96xf32> to vector<2x32xf32>
    %824 = vector.extract_strided_slice %814 {offsets = [0, 32], sizes = [2, 32], strides = [1, 1]} : vector<2x96xf32> to vector<2x32xf32>
    %825 = arith.addf %823, %824 : vector<2x32xf32>
    %826 = arith.negf %825 : vector<2x32xf32>
    %827 = math.exp %826 : vector<2x32xf32>
    %cst_353 = arith.constant 1.000000e+00 : f32
    %828 = vector.broadcast %cst_353 : f32 to vector<2x32xf32>
    %829 = arith.addf %828, %827 : vector<2x32xf32>
    %830 = arith.divf %828, %829 : vector<2x32xf32>
    %831 = vector.extract_strided_slice %810 {offsets = [0, 64], sizes = [2, 32], strides = [1, 1]} : vector<2x96xf32> to vector<2x32xf32>
    %832 = vector.extract_strided_slice %814 {offsets = [0, 64], sizes = [2, 32], strides = [1, 1]} : vector<2x96xf32> to vector<2x32xf32>
    %833 = arith.mulf %822, %832 : vector<2x32xf32>
    %834 = arith.addf %831, %833 : vector<2x32xf32>
    %835 = math.tanh %834 : vector<2x32xf32>
    %cst_354 = arith.constant 1.000000e+00 : f32
    %836 = vector.broadcast %cst_354 : f32 to vector<2x32xf32>
    %837 = arith.subf %836, %830 : vector<2x32xf32>
    %838 = arith.mulf %837, %835 : vector<2x32xf32>
    %839 = arith.mulf %830, %799 : vector<2x32xf32>
    %840 = arith.addf %838, %839 : vector<2x32xf32>
    %841 = vector.extract_strided_slice %840 {offsets = [0, 0], sizes = [1, 32], strides = [1, 1]} : vector<2x32xf32> to vector<1x32xf32>
    %842 = arith.index_cast %c3_i32_348 : i32 to index
    %c0_355 = arith.constant 0 : index
    %843 = vector.load %arg24[%842, %c0_355] : memref<8x32xf32, #tpu.memory_space<vmem>>, vector<1x32xf32>
    tpu.vector_store %arg24[%842, %c0_355], %841 {strides = array<i32>} : memref<8x32xf32, #tpu.memory_space<vmem>>, vector<1x32xf32>,
    %844 = vector.extract_strided_slice %840 {offsets = [1, 0], sizes = [1, 32], strides = [1, 1]} : vector<2x32xf32> to vector<1x32xf32>
    %845 = arith.index_cast %c3_i32_348 : i32 to index
    %c0_356 = arith.constant 0 : index
    %846 = vector.load %arg25[%845, %c0_356] : memref<8x32xf32, #tpu.memory_space<vmem>>, vector<1x32xf32>
    tpu.vector_store %arg25[%845, %c0_356], %844 {strides = array<i32>} : memref<8x32xf32, #tpu.memory_space<vmem>>, vector<1x32xf32>,
    %c4_i32_357 = arith.constant 4 : i32
    %847 = arith.index_cast %c4_i32_357 : i32 to index
    %c0_358 = arith.constant 0 : index
    %848 = vector.load %arg26[%847, %c0_358] : memref<8x96xf32, #tpu.memory_space<vmem>>, vector<1x96xf32>
    %849 = arith.index_cast %c4_i32_357 : i32 to index
    %c0_359 = arith.constant 0 : index
    %850 = vector.load %arg27[%849, %c0_359] : memref<8x96xf32, #tpu.memory_space<vmem>>, vector<1x96xf32>
    %851 = tpu.concatenate %848, %850 in 0 : vector<1x96xf32>, vector<1x96xf32> -> vector<2x96xf32>
    %852 = arith.truncf %840 : vector<2x32xf32> to vector<2x32xbf16>
    %cst_360 = arith.constant dense<0.000000e+00> : vector<2x96xf32>
    %853 = tpu.matmul %852, %665, %cst_360 {dimension_numbers = #tpu.dot_dimension_numbers<[1], [0], [0], [1], [0, 0, 1, 1], [], []>} : vector<2x32xbf16>, vector<32x96xbf16>, vector<2x96xf32> -> vector<2x96xf32>
    %854 = vector.broadcast %669 : vector<1x96xf32> to vector<2x96xf32>
    %855 = arith.addf %853, %854 : vector<2x96xf32>
    %856 = vector.extract_strided_slice %851 {offsets = [0, 0], sizes = [2, 32], strides = [1, 1]} : vector<2x96xf32> to vector<2x32xf32>
    %857 = vector.extract_strided_slice %855 {offsets = [0, 0], sizes = [2, 32], strides = [1, 1]} : vector<2x96xf32> to vector<2x32xf32>
    %858 = arith.addf %856, %857 : vector<2x32xf32>
    %859 = arith.negf %858 : vector<2x32xf32>
    %860 = math.exp %859 : vector<2x32xf32>
    %cst_361 = arith.constant 1.000000e+00 : f32
    %861 = vector.broadcast %cst_361 : f32 to vector<2x32xf32>
    %862 = arith.addf %861, %860 : vector<2x32xf32>
    %863 = arith.divf %861, %862 : vector<2x32xf32>
    %864 = vector.extract_strided_slice %851 {offsets = [0, 32], sizes = [2, 32], strides = [1, 1]} : vector<2x96xf32> to vector<2x32xf32>
    %865 = vector.extract_strided_slice %855 {offsets = [0, 32], sizes = [2, 32], strides = [1, 1]} : vector<2x96xf32> to vector<2x32xf32>
    %866 = arith.addf %864, %865 : vector<2x32xf32>
    %867 = arith.negf %866 : vector<2x32xf32>
    %868 = math.exp %867 : vector<2x32xf32>
    %cst_362 = arith.constant 1.000000e+00 : f32
    %869 = vector.broadcast %cst_362 : f32 to vector<2x32xf32>
    %870 = arith.addf %869, %868 : vector<2x32xf32>
    %871 = arith.divf %869, %870 : vector<2x32xf32>
    %872 = vector.extract_strided_slice %851 {offsets = [0, 64], sizes = [2, 32], strides = [1, 1]} : vector<2x96xf32> to vector<2x32xf32>
    %873 = vector.extract_strided_slice %855 {offsets = [0, 64], sizes = [2, 32], strides = [1, 1]} : vector<2x96xf32> to vector<2x32xf32>
    %874 = arith.mulf %863, %873 : vector<2x32xf32>
    %875 = arith.addf %872, %874 : vector<2x32xf32>
    %876 = math.tanh %875 : vector<2x32xf32>
    %cst_363 = arith.constant 1.000000e+00 : f32
    %877 = vector.broadcast %cst_363 : f32 to vector<2x32xf32>
    %878 = arith.subf %877, %871 : vector<2x32xf32>
    %879 = arith.mulf %878, %876 : vector<2x32xf32>
    %880 = arith.mulf %871, %840 : vector<2x32xf32>
    %881 = arith.addf %879, %880 : vector<2x32xf32>
    %882 = vector.extract_strided_slice %881 {offsets = [0, 0], sizes = [1, 32], strides = [1, 1]} : vector<2x32xf32> to vector<1x32xf32>
    %883 = arith.index_cast %c4_i32_357 : i32 to index
    %c0_364 = arith.constant 0 : index
    %884 = vector.load %arg24[%883, %c0_364] : memref<8x32xf32, #tpu.memory_space<vmem>>, vector<1x32xf32>
    tpu.vector_store %arg24[%883, %c0_364], %882 {strides = array<i32>} : memref<8x32xf32, #tpu.memory_space<vmem>>, vector<1x32xf32>,
    %885 = vector.extract_strided_slice %881 {offsets = [1, 0], sizes = [1, 32], strides = [1, 1]} : vector<2x32xf32> to vector<1x32xf32>
    %886 = arith.index_cast %c4_i32_357 : i32 to index
    %c0_365 = arith.constant 0 : index
    %887 = vector.load %arg25[%886, %c0_365] : memref<8x32xf32, #tpu.memory_space<vmem>>, vector<1x32xf32>
    tpu.vector_store %arg25[%886, %c0_365], %885 {strides = array<i32>} : memref<8x32xf32, #tpu.memory_space<vmem>>, vector<1x32xf32>,
    %c5_i32_366 = arith.constant 5 : i32
    %888 = arith.index_cast %c5_i32_366 : i32 to index
    %c0_367 = arith.constant 0 : index
    %889 = vector.load %arg26[%888, %c0_367] : memref<8x96xf32, #tpu.memory_space<vmem>>, vector<1x96xf32>
    %890 = arith.index_cast %c5_i32_366 : i32 to index
    %c0_368 = arith.constant 0 : index
    %891 = vector.load %arg27[%890, %c0_368] : memref<8x96xf32, #tpu.memory_space<vmem>>, vector<1x96xf32>
    %892 = tpu.concatenate %889, %891 in 0 : vector<1x96xf32>, vector<1x96xf32> -> vector<2x96xf32>
    %893 = arith.truncf %881 : vector<2x32xf32> to vector<2x32xbf16>
    %cst_369 = arith.constant dense<0.000000e+00> : vector<2x96xf32>
    %894 = tpu.matmul %893, %665, %cst_369 {dimension_numbers = #tpu.dot_dimension_numbers<[1], [0], [0], [1], [0, 0, 1, 1], [], []>} : vector<2x32xbf16>, vector<32x96xbf16>, vector<2x96xf32> -> vector<2x96xf32>
    %895 = vector.broadcast %669 : vector<1x96xf32> to vector<2x96xf32>
    %896 = arith.addf %894, %895 : vector<2x96xf32>
    %897 = vector.extract_strided_slice %892 {offsets = [0, 0], sizes = [2, 32], strides = [1, 1]} : vector<2x96xf32> to vector<2x32xf32>
    %898 = vector.extract_strided_slice %896 {offsets = [0, 0], sizes = [2, 32], strides = [1, 1]} : vector<2x96xf32> to vector<2x32xf32>
    %899 = arith.addf %897, %898 : vector<2x32xf32>
    %900 = arith.negf %899 : vector<2x32xf32>
    %901 = math.exp %900 : vector<2x32xf32>
    %cst_370 = arith.constant 1.000000e+00 : f32
    %902 = vector.broadcast %cst_370 : f32 to vector<2x32xf32>
    %903 = arith.addf %902, %901 : vector<2x32xf32>
    %904 = arith.divf %902, %903 : vector<2x32xf32>
    %905 = vector.extract_strided_slice %892 {offsets = [0, 32], sizes = [2, 32], strides = [1, 1]} : vector<2x96xf32> to vector<2x32xf32>
    %906 = vector.extract_strided_slice %896 {offsets = [0, 32], sizes = [2, 32], strides = [1, 1]} : vector<2x96xf32> to vector<2x32xf32>
    %907 = arith.addf %905, %906 : vector<2x32xf32>
    %908 = arith.negf %907 : vector<2x32xf32>
    %909 = math.exp %908 : vector<2x32xf32>
    %cst_371 = arith.constant 1.000000e+00 : f32
    %910 = vector.broadcast %cst_371 : f32 to vector<2x32xf32>
    %911 = arith.addf %910, %909 : vector<2x32xf32>
    %912 = arith.divf %910, %911 : vector<2x32xf32>
    %913 = vector.extract_strided_slice %892 {offsets = [0, 64], sizes = [2, 32], strides = [1, 1]} : vector<2x96xf32> to vector<2x32xf32>
    %914 = vector.extract_strided_slice %896 {offsets = [0, 64], sizes = [2, 32], strides = [1, 1]} : vector<2x96xf32> to vector<2x32xf32>
    %915 = arith.mulf %904, %914 : vector<2x32xf32>
    %916 = arith.addf %913, %915 : vector<2x32xf32>
    %917 = math.tanh %916 : vector<2x32xf32>
    %cst_372 = arith.constant 1.000000e+00 : f32
    %918 = vector.broadcast %cst_372 : f32 to vector<2x32xf32>
    %919 = arith.subf %918, %912 : vector<2x32xf32>
    %920 = arith.mulf %919, %917 : vector<2x32xf32>
    %921 = arith.mulf %912, %881 : vector<2x32xf32>
    %922 = arith.addf %920, %921 : vector<2x32xf32>
    %923 = vector.extract_strided_slice %922 {offsets = [0, 0], sizes = [1, 32], strides = [1, 1]} : vector<2x32xf32> to vector<1x32xf32>
    %924 = arith.index_cast %c5_i32_366 : i32 to index
    %c0_373 = arith.constant 0 : index
    %925 = vector.load %arg24[%924, %c0_373] : memref<8x32xf32, #tpu.memory_space<vmem>>, vector<1x32xf32>
    tpu.vector_store %arg24[%924, %c0_373], %923 {strides = array<i32>} : memref<8x32xf32, #tpu.memory_space<vmem>>, vector<1x32xf32>,
    %926 = vector.extract_strided_slice %922 {offsets = [1, 0], sizes = [1, 32], strides = [1, 1]} : vector<2x32xf32> to vector<1x32xf32>
    %927 = arith.index_cast %c5_i32_366 : i32 to index
    %c0_374 = arith.constant 0 : index
    %928 = vector.load %arg25[%927, %c0_374] : memref<8x32xf32, #tpu.memory_space<vmem>>, vector<1x32xf32>
    tpu.vector_store %arg25[%927, %c0_374], %926 {strides = array<i32>} : memref<8x32xf32, #tpu.memory_space<vmem>>, vector<1x32xf32>,
    %c6_i32_375 = arith.constant 6 : i32
    %929 = arith.index_cast %c6_i32_375 : i32 to index
    %c0_376 = arith.constant 0 : index
    %930 = vector.load %arg26[%929, %c0_376] : memref<8x96xf32, #tpu.memory_space<vmem>>, vector<1x96xf32>
    %931 = arith.index_cast %c6_i32_375 : i32 to index
    %c0_377 = arith.constant 0 : index
    %932 = vector.load %arg27[%931, %c0_377] : memref<8x96xf32, #tpu.memory_space<vmem>>, vector<1x96xf32>
    %933 = tpu.concatenate %930, %932 in 0 : vector<1x96xf32>, vector<1x96xf32> -> vector<2x96xf32>
    %934 = arith.truncf %922 : vector<2x32xf32> to vector<2x32xbf16>
    %cst_378 = arith.constant dense<0.000000e+00> : vector<2x96xf32>
    %935 = tpu.matmul %934, %665, %cst_378 {dimension_numbers = #tpu.dot_dimension_numbers<[1], [0], [0], [1], [0, 0, 1, 1], [], []>} : vector<2x32xbf16>, vector<32x96xbf16>, vector<2x96xf32> -> vector<2x96xf32>
    %936 = vector.broadcast %669 : vector<1x96xf32> to vector<2x96xf32>
    %937 = arith.addf %935, %936 : vector<2x96xf32>
    %938 = vector.extract_strided_slice %933 {offsets = [0, 0], sizes = [2, 32], strides = [1, 1]} : vector<2x96xf32> to vector<2x32xf32>
    %939 = vector.extract_strided_slice %937 {offsets = [0, 0], sizes = [2, 32], strides = [1, 1]} : vector<2x96xf32> to vector<2x32xf32>
    %940 = arith.addf %938, %939 : vector<2x32xf32>
    %941 = arith.negf %940 : vector<2x32xf32>
    %942 = math.exp %941 : vector<2x32xf32>
    %cst_379 = arith.constant 1.000000e+00 : f32
    %943 = vector.broadcast %cst_379 : f32 to vector<2x32xf32>
    %944 = arith.addf %943, %942 : vector<2x32xf32>
    %945 = arith.divf %943, %944 : vector<2x32xf32>
    %946 = vector.extract_strided_slice %933 {offsets = [0, 32], sizes = [2, 32], strides = [1, 1]} : vector<2x96xf32> to vector<2x32xf32>
    %947 = vector.extract_strided_slice %937 {offsets = [0, 32], sizes = [2, 32], strides = [1, 1]} : vector<2x96xf32> to vector<2x32xf32>
    %948 = arith.addf %946, %947 : vector<2x32xf32>
    %949 = arith.negf %948 : vector<2x32xf32>
    %950 = math.exp %949 : vector<2x32xf32>
    %cst_380 = arith.constant 1.000000e+00 : f32
    %951 = vector.broadcast %cst_380 : f32 to vector<2x32xf32>
    %952 = arith.addf %951, %950 : vector<2x32xf32>
    %953 = arith.divf %951, %952 : vector<2x32xf32>
    %954 = vector.extract_strided_slice %933 {offsets = [0, 64], sizes = [2, 32], strides = [1, 1]} : vector<2x96xf32> to vector<2x32xf32>
    %955 = vector.extract_strided_slice %937 {offsets = [0, 64], sizes = [2, 32], strides = [1, 1]} : vector<2x96xf32> to vector<2x32xf32>
    %956 = arith.mulf %945, %955 : vector<2x32xf32>
    %957 = arith.addf %954, %956 : vector<2x32xf32>
    %958 = math.tanh %957 : vector<2x32xf32>
    %cst_381 = arith.constant 1.000000e+00 : f32
    %959 = vector.broadcast %cst_381 : f32 to vector<2x32xf32>
    %960 = arith.subf %959, %953 : vector<2x32xf32>
    %961 = arith.mulf %960, %958 : vector<2x32xf32>
    %962 = arith.mulf %953, %922 : vector<2x32xf32>
    %963 = arith.addf %961, %962 : vector<2x32xf32>
    %964 = vector.extract_strided_slice %963 {offsets = [0, 0], sizes = [1, 32], strides = [1, 1]} : vector<2x32xf32> to vector<1x32xf32>
    %965 = arith.index_cast %c6_i32_375 : i32 to index
    %c0_382 = arith.constant 0 : index
    %966 = vector.load %arg24[%965, %c0_382] : memref<8x32xf32, #tpu.memory_space<vmem>>, vector<1x32xf32>
    tpu.vector_store %arg24[%965, %c0_382], %964 {strides = array<i32>} : memref<8x32xf32, #tpu.memory_space<vmem>>, vector<1x32xf32>,
    %967 = vector.extract_strided_slice %963 {offsets = [1, 0], sizes = [1, 32], strides = [1, 1]} : vector<2x32xf32> to vector<1x32xf32>
    %968 = arith.index_cast %c6_i32_375 : i32 to index
    %c0_383 = arith.constant 0 : index
    %969 = vector.load %arg25[%968, %c0_383] : memref<8x32xf32, #tpu.memory_space<vmem>>, vector<1x32xf32>
    tpu.vector_store %arg25[%968, %c0_383], %967 {strides = array<i32>} : memref<8x32xf32, #tpu.memory_space<vmem>>, vector<1x32xf32>,
    %c7_i32_384 = arith.constant 7 : i32
    %970 = arith.index_cast %c7_i32_384 : i32 to index
    %c0_385 = arith.constant 0 : index
    %971 = vector.load %arg26[%970, %c0_385] : memref<8x96xf32, #tpu.memory_space<vmem>>, vector<1x96xf32>
    %972 = arith.index_cast %c7_i32_384 : i32 to index
    %c0_386 = arith.constant 0 : index
    %973 = vector.load %arg27[%972, %c0_386] : memref<8x96xf32, #tpu.memory_space<vmem>>, vector<1x96xf32>
    %974 = tpu.concatenate %971, %973 in 0 : vector<1x96xf32>, vector<1x96xf32> -> vector<2x96xf32>
    %975 = arith.truncf %963 : vector<2x32xf32> to vector<2x32xbf16>
    %cst_387 = arith.constant dense<0.000000e+00> : vector<2x96xf32>
    %976 = tpu.matmul %975, %665, %cst_387 {dimension_numbers = #tpu.dot_dimension_numbers<[1], [0], [0], [1], [0, 0, 1, 1], [], []>} : vector<2x32xbf16>, vector<32x96xbf16>, vector<2x96xf32> -> vector<2x96xf32>
    %977 = vector.broadcast %669 : vector<1x96xf32> to vector<2x96xf32>
    %978 = arith.addf %976, %977 : vector<2x96xf32>
    %979 = vector.extract_strided_slice %974 {offsets = [0, 0], sizes = [2, 32], strides = [1, 1]} : vector<2x96xf32> to vector<2x32xf32>
    %980 = vector.extract_strided_slice %978 {offsets = [0, 0], sizes = [2, 32], strides = [1, 1]} : vector<2x96xf32> to vector<2x32xf32>
    %981 = arith.addf %979, %980 : vector<2x32xf32>
    %982 = arith.negf %981 : vector<2x32xf32>
    %983 = math.exp %982 : vector<2x32xf32>
    %cst_388 = arith.constant 1.000000e+00 : f32
    %984 = vector.broadcast %cst_388 : f32 to vector<2x32xf32>
    %985 = arith.addf %984, %983 : vector<2x32xf32>
    %986 = arith.divf %984, %985 : vector<2x32xf32>
    %987 = vector.extract_strided_slice %974 {offsets = [0, 32], sizes = [2, 32], strides = [1, 1]} : vector<2x96xf32> to vector<2x32xf32>
    %988 = vector.extract_strided_slice %978 {offsets = [0, 32], sizes = [2, 32], strides = [1, 1]} : vector<2x96xf32> to vector<2x32xf32>
    %989 = arith.addf %987, %988 : vector<2x32xf32>
    %990 = arith.negf %989 : vector<2x32xf32>
    %991 = math.exp %990 : vector<2x32xf32>
    %cst_389 = arith.constant 1.000000e+00 : f32
    %992 = vector.broadcast %cst_389 : f32 to vector<2x32xf32>
    %993 = arith.addf %992, %991 : vector<2x32xf32>
    %994 = arith.divf %992, %993 : vector<2x32xf32>
    %995 = vector.extract_strided_slice %974 {offsets = [0, 64], sizes = [2, 32], strides = [1, 1]} : vector<2x96xf32> to vector<2x32xf32>
    %996 = vector.extract_strided_slice %978 {offsets = [0, 64], sizes = [2, 32], strides = [1, 1]} : vector<2x96xf32> to vector<2x32xf32>
    %997 = arith.mulf %986, %996 : vector<2x32xf32>
    %998 = arith.addf %995, %997 : vector<2x32xf32>
    %999 = math.tanh %998 : vector<2x32xf32>
    %cst_390 = arith.constant 1.000000e+00 : f32
    %1000 = vector.broadcast %cst_390 : f32 to vector<2x32xf32>
    %1001 = arith.subf %1000, %994 : vector<2x32xf32>
    %1002 = arith.mulf %1001, %999 : vector<2x32xf32>
    %1003 = arith.mulf %994, %963 : vector<2x32xf32>
    %1004 = arith.addf %1002, %1003 : vector<2x32xf32>
    %1005 = vector.extract_strided_slice %1004 {offsets = [0, 0], sizes = [1, 32], strides = [1, 1]} : vector<2x32xf32> to vector<1x32xf32>
    %1006 = arith.index_cast %c7_i32_384 : i32 to index
    %c0_391 = arith.constant 0 : index
    %1007 = vector.load %arg24[%1006, %c0_391] : memref<8x32xf32, #tpu.memory_space<vmem>>, vector<1x32xf32>
    tpu.vector_store %arg24[%1006, %c0_391], %1005 {strides = array<i32>} : memref<8x32xf32, #tpu.memory_space<vmem>>, vector<1x32xf32>,
    %1008 = vector.extract_strided_slice %1004 {offsets = [1, 0], sizes = [1, 32], strides = [1, 1]} : vector<2x32xf32> to vector<1x32xf32>
    %1009 = arith.index_cast %c7_i32_384 : i32 to index
    %c0_392 = arith.constant 0 : index
    %1010 = vector.load %arg25[%1009, %c0_392] : memref<8x32xf32, #tpu.memory_space<vmem>>, vector<1x32xf32>
    tpu.vector_store %arg25[%1009, %c0_392], %1008 {strides = array<i32>} : memref<8x32xf32, #tpu.memory_space<vmem>>, vector<1x32xf32>,
    %c8_i32_393 = arith.constant 8 : i32
    %c2_394 = arith.constant 2 : index
    %c0_395 = arith.constant 0 : index
    %c0_396 = arith.constant 0 : index
    %1011 = vector.load %arg10[%c2_394, %c0_395, %c0_396] : memref<3x32x96xbf16, #tpu.memory_space<vmem>>, vector<1x32x96xbf16>
    %1012 = vector.shape_cast %1011 : vector<1x32x96xbf16> to vector<32x96xbf16>
    %c2_397 = arith.constant 2 : index
    %c0_398 = arith.constant 0 : index
    %c0_399 = arith.constant 0 : index
    %1013 = vector.load %arg11[%c2_397, %c0_398, %c0_399] : memref<3x32x96xbf16, #tpu.memory_space<vmem>>, vector<1x32x96xbf16>
    %1014 = vector.shape_cast %1013 : vector<1x32x96xbf16> to vector<32x96xbf16>
    %c2_400 = arith.constant 2 : index
    %c0_401 = arith.constant 0 : index
    %c0_402 = arith.constant 0 : index
    %1015 = vector.load %arg12[%c2_400, %c0_401, %c0_402] : memref<3x1x96xf32, #tpu.memory_space<vmem>>, vector<1x1x96xf32>
    %1016 = vector.shape_cast %1015 : vector<1x1x96xf32> to vector<1x96xf32>
    %c2_403 = arith.constant 2 : index
    %c0_404 = arith.constant 0 : index
    %c0_405 = arith.constant 0 : index
    %1017 = vector.load %arg13[%c2_403, %c0_404, %c0_405] : memref<3x1x96xf32, #tpu.memory_space<vmem>>, vector<1x1x96xf32>
    %1018 = vector.shape_cast %1017 : vector<1x1x96xf32> to vector<1x96xf32>
    %c0_406 = arith.constant 0 : index
    %c0_407 = arith.constant 0 : index
    %1019 = vector.load %arg24[%c0_406, %c0_407] : memref<8x32xf32, #tpu.memory_space<vmem>>, vector<8x32xf32>
    %1020 = arith.truncf %1019 : vector<8x32xf32> to vector<8x32xbf16>
    %cst_408 = arith.constant dense<0.000000e+00> : vector<8x96xf32>
    %1021 = tpu.matmul %1020, %1012, %cst_408 {dimension_numbers = #tpu.dot_dimension_numbers<[1], [0], [0], [1], [0, 0, 1, 1], [], []>} : vector<8x32xbf16>, vector<32x96xbf16>, vector<8x96xf32> -> vector<8x96xf32>
    %1022 = vector.broadcast %1016 : vector<1x96xf32> to vector<8x96xf32>
    %1023 = arith.addf %1021, %1022 : vector<8x96xf32>
    %c0_409 = arith.constant 0 : index
    %c0_410 = arith.constant 0 : index
    %1024 = vector.load %arg26[%c0_409, %c0_410] : memref<8x96xf32, #tpu.memory_space<vmem>>, vector<8x96xf32>
    tpu.vector_store %arg26[%c0_409, %c0_410], %1023 {strides = array<i32>} : memref<8x96xf32, #tpu.memory_space<vmem>>, vector<8x96xf32>,
    %c0_411 = arith.constant 0 : index
    %c0_412 = arith.constant 0 : index
    %1025 = vector.load %arg25[%c0_411, %c0_412] : memref<8x32xf32, #tpu.memory_space<vmem>>, vector<8x32xf32>
    %1026 = arith.truncf %1025 : vector<8x32xf32> to vector<8x32xbf16>
    %cst_413 = arith.constant dense<0.000000e+00> : vector<8x96xf32>
    %1027 = tpu.matmul %1026, %1012, %cst_413 {dimension_numbers = #tpu.dot_dimension_numbers<[1], [0], [0], [1], [0, 0, 1, 1], [], []>} : vector<8x32xbf16>, vector<32x96xbf16>, vector<8x96xf32> -> vector<8x96xf32>
    %1028 = vector.broadcast %1016 : vector<1x96xf32> to vector<8x96xf32>
    %1029 = arith.addf %1027, %1028 : vector<8x96xf32>
    %c0_414 = arith.constant 0 : index
    %c0_415 = arith.constant 0 : index
    %1030 = vector.load %arg27[%c0_414, %c0_415] : memref<8x96xf32, #tpu.memory_space<vmem>>, vector<8x96xf32>
    tpu.vector_store %arg27[%c0_414, %c0_415], %1029 {strides = array<i32>} : memref<8x96xf32, #tpu.memory_space<vmem>>, vector<8x96xf32>,
    %cst_416 = arith.constant 0.000000e+00 : f32
    %1031 = vector.broadcast %cst_416 : f32 to vector<2x32xf32>
    %c0_i32_417 = arith.constant 0 : i32
    %1032 = arith.index_cast %c0_i32_417 : i32 to index
    %c0_418 = arith.constant 0 : index
    %1033 = vector.load %arg26[%1032, %c0_418] : memref<8x96xf32, #tpu.memory_space<vmem>>, vector<1x96xf32>
    %1034 = arith.index_cast %c0_i32_417 : i32 to index
    %c0_419 = arith.constant 0 : index
    %1035 = vector.load %arg27[%1034, %c0_419] : memref<8x96xf32, #tpu.memory_space<vmem>>, vector<1x96xf32>
    %1036 = tpu.concatenate %1033, %1035 in 0 : vector<1x96xf32>, vector<1x96xf32> -> vector<2x96xf32>
    %1037 = arith.truncf %1031 : vector<2x32xf32> to vector<2x32xbf16>
    %cst_420 = arith.constant dense<0.000000e+00> : vector<2x96xf32>
    %1038 = tpu.matmul %1037, %1014, %cst_420 {dimension_numbers = #tpu.dot_dimension_numbers<[1], [0], [0], [1], [0, 0, 1, 1], [], []>} : vector<2x32xbf16>, vector<32x96xbf16>, vector<2x96xf32> -> vector<2x96xf32>
    %1039 = vector.broadcast %1018 : vector<1x96xf32> to vector<2x96xf32>
    %1040 = arith.addf %1038, %1039 : vector<2x96xf32>
    %1041 = vector.extract_strided_slice %1036 {offsets = [0, 0], sizes = [2, 32], strides = [1, 1]} : vector<2x96xf32> to vector<2x32xf32>
    %1042 = vector.extract_strided_slice %1040 {offsets = [0, 0], sizes = [2, 32], strides = [1, 1]} : vector<2x96xf32> to vector<2x32xf32>
    %1043 = arith.addf %1041, %1042 : vector<2x32xf32>
    %1044 = arith.negf %1043 : vector<2x32xf32>
    %1045 = math.exp %1044 : vector<2x32xf32>
    %cst_421 = arith.constant 1.000000e+00 : f32
    %1046 = vector.broadcast %cst_421 : f32 to vector<2x32xf32>
    %1047 = arith.addf %1046, %1045 : vector<2x32xf32>
    %1048 = arith.divf %1046, %1047 : vector<2x32xf32>
    %1049 = vector.extract_strided_slice %1036 {offsets = [0, 32], sizes = [2, 32], strides = [1, 1]} : vector<2x96xf32> to vector<2x32xf32>
    %1050 = vector.extract_strided_slice %1040 {offsets = [0, 32], sizes = [2, 32], strides = [1, 1]} : vector<2x96xf32> to vector<2x32xf32>
    %1051 = arith.addf %1049, %1050 : vector<2x32xf32>
    %1052 = arith.negf %1051 : vector<2x32xf32>
    %1053 = math.exp %1052 : vector<2x32xf32>
    %cst_422 = arith.constant 1.000000e+00 : f32
    %1054 = vector.broadcast %cst_422 : f32 to vector<2x32xf32>
    %1055 = arith.addf %1054, %1053 : vector<2x32xf32>
    %1056 = arith.divf %1054, %1055 : vector<2x32xf32>
    %1057 = vector.extract_strided_slice %1036 {offsets = [0, 64], sizes = [2, 32], strides = [1, 1]} : vector<2x96xf32> to vector<2x32xf32>
    %1058 = vector.extract_strided_slice %1040 {offsets = [0, 64], sizes = [2, 32], strides = [1, 1]} : vector<2x96xf32> to vector<2x32xf32>
    %1059 = arith.mulf %1048, %1058 : vector<2x32xf32>
    %1060 = arith.addf %1057, %1059 : vector<2x32xf32>
    %1061 = math.tanh %1060 : vector<2x32xf32>
    %cst_423 = arith.constant 1.000000e+00 : f32
    %1062 = vector.broadcast %cst_423 : f32 to vector<2x32xf32>
    %1063 = arith.subf %1062, %1056 : vector<2x32xf32>
    %1064 = arith.mulf %1063, %1061 : vector<2x32xf32>
    %1065 = arith.mulf %1056, %1031 : vector<2x32xf32>
    %1066 = arith.addf %1064, %1065 : vector<2x32xf32>
    %1067 = vector.extract_strided_slice %1066 {offsets = [0, 0], sizes = [1, 32], strides = [1, 1]} : vector<2x32xf32> to vector<1x32xf32>
    %1068 = arith.index_cast %c0_i32_417 : i32 to index
    %c0_424 = arith.constant 0 : index
    %1069 = vector.load %arg24[%1068, %c0_424] : memref<8x32xf32, #tpu.memory_space<vmem>>, vector<1x32xf32>
    tpu.vector_store %arg24[%1068, %c0_424], %1067 {strides = array<i32>} : memref<8x32xf32, #tpu.memory_space<vmem>>, vector<1x32xf32>,
    %1070 = vector.extract_strided_slice %1066 {offsets = [1, 0], sizes = [1, 32], strides = [1, 1]} : vector<2x32xf32> to vector<1x32xf32>
    %1071 = arith.index_cast %c0_i32_417 : i32 to index
    %c0_425 = arith.constant 0 : index
    %1072 = vector.load %arg25[%1071, %c0_425] : memref<8x32xf32, #tpu.memory_space<vmem>>, vector<1x32xf32>
    tpu.vector_store %arg25[%1071, %c0_425], %1070 {strides = array<i32>} : memref<8x32xf32, #tpu.memory_space<vmem>>, vector<1x32xf32>,
    %c1_i32_426 = arith.constant 1 : i32
    %1073 = arith.index_cast %c1_i32_426 : i32 to index
    %c0_427 = arith.constant 0 : index
    %1074 = vector.load %arg26[%1073, %c0_427] : memref<8x96xf32, #tpu.memory_space<vmem>>, vector<1x96xf32>
    %1075 = arith.index_cast %c1_i32_426 : i32 to index
    %c0_428 = arith.constant 0 : index
    %1076 = vector.load %arg27[%1075, %c0_428] : memref<8x96xf32, #tpu.memory_space<vmem>>, vector<1x96xf32>
    %1077 = tpu.concatenate %1074, %1076 in 0 : vector<1x96xf32>, vector<1x96xf32> -> vector<2x96xf32>
    %1078 = arith.truncf %1066 : vector<2x32xf32> to vector<2x32xbf16>
    %cst_429 = arith.constant dense<0.000000e+00> : vector<2x96xf32>
    %1079 = tpu.matmul %1078, %1014, %cst_429 {dimension_numbers = #tpu.dot_dimension_numbers<[1], [0], [0], [1], [0, 0, 1, 1], [], []>} : vector<2x32xbf16>, vector<32x96xbf16>, vector<2x96xf32> -> vector<2x96xf32>
    %1080 = vector.broadcast %1018 : vector<1x96xf32> to vector<2x96xf32>
    %1081 = arith.addf %1079, %1080 : vector<2x96xf32>
    %1082 = vector.extract_strided_slice %1077 {offsets = [0, 0], sizes = [2, 32], strides = [1, 1]} : vector<2x96xf32> to vector<2x32xf32>
    %1083 = vector.extract_strided_slice %1081 {offsets = [0, 0], sizes = [2, 32], strides = [1, 1]} : vector<2x96xf32> to vector<2x32xf32>
    %1084 = arith.addf %1082, %1083 : vector<2x32xf32>
    %1085 = arith.negf %1084 : vector<2x32xf32>
    %1086 = math.exp %1085 : vector<2x32xf32>
    %cst_430 = arith.constant 1.000000e+00 : f32
    %1087 = vector.broadcast %cst_430 : f32 to vector<2x32xf32>
    %1088 = arith.addf %1087, %1086 : vector<2x32xf32>
    %1089 = arith.divf %1087, %1088 : vector<2x32xf32>
    %1090 = vector.extract_strided_slice %1077 {offsets = [0, 32], sizes = [2, 32], strides = [1, 1]} : vector<2x96xf32> to vector<2x32xf32>
    %1091 = vector.extract_strided_slice %1081 {offsets = [0, 32], sizes = [2, 32], strides = [1, 1]} : vector<2x96xf32> to vector<2x32xf32>
    %1092 = arith.addf %1090, %1091 : vector<2x32xf32>
    %1093 = arith.negf %1092 : vector<2x32xf32>
    %1094 = math.exp %1093 : vector<2x32xf32>
    %cst_431 = arith.constant 1.000000e+00 : f32
    %1095 = vector.broadcast %cst_431 : f32 to vector<2x32xf32>
    %1096 = arith.addf %1095, %1094 : vector<2x32xf32>
    %1097 = arith.divf %1095, %1096 : vector<2x32xf32>
    %1098 = vector.extract_strided_slice %1077 {offsets = [0, 64], sizes = [2, 32], strides = [1, 1]} : vector<2x96xf32> to vector<2x32xf32>
    %1099 = vector.extract_strided_slice %1081 {offsets = [0, 64], sizes = [2, 32], strides = [1, 1]} : vector<2x96xf32> to vector<2x32xf32>
    %1100 = arith.mulf %1089, %1099 : vector<2x32xf32>
    %1101 = arith.addf %1098, %1100 : vector<2x32xf32>
    %1102 = math.tanh %1101 : vector<2x32xf32>
    %cst_432 = arith.constant 1.000000e+00 : f32
    %1103 = vector.broadcast %cst_432 : f32 to vector<2x32xf32>
    %1104 = arith.subf %1103, %1097 : vector<2x32xf32>
    %1105 = arith.mulf %1104, %1102 : vector<2x32xf32>
    %1106 = arith.mulf %1097, %1066 : vector<2x32xf32>
    %1107 = arith.addf %1105, %1106 : vector<2x32xf32>
    %1108 = vector.extract_strided_slice %1107 {offsets = [0, 0], sizes = [1, 32], strides = [1, 1]} : vector<2x32xf32> to vector<1x32xf32>
    %1109 = arith.index_cast %c1_i32_426 : i32 to index
    %c0_433 = arith.constant 0 : index
    %1110 = vector.load %arg24[%1109, %c0_433] : memref<8x32xf32, #tpu.memory_space<vmem>>, vector<1x32xf32>
    tpu.vector_store %arg24[%1109, %c0_433], %1108 {strides = array<i32>} : memref<8x32xf32, #tpu.memory_space<vmem>>, vector<1x32xf32>,
    %1111 = vector.extract_strided_slice %1107 {offsets = [1, 0], sizes = [1, 32], strides = [1, 1]} : vector<2x32xf32> to vector<1x32xf32>
    %1112 = arith.index_cast %c1_i32_426 : i32 to index
    %c0_434 = arith.constant 0 : index
    %1113 = vector.load %arg25[%1112, %c0_434] : memref<8x32xf32, #tpu.memory_space<vmem>>, vector<1x32xf32>
    tpu.vector_store %arg25[%1112, %c0_434], %1111 {strides = array<i32>} : memref<8x32xf32, #tpu.memory_space<vmem>>, vector<1x32xf32>,
    %c2_i32_435 = arith.constant 2 : i32
    %1114 = arith.index_cast %c2_i32_435 : i32 to index
    %c0_436 = arith.constant 0 : index
    %1115 = vector.load %arg26[%1114, %c0_436] : memref<8x96xf32, #tpu.memory_space<vmem>>, vector<1x96xf32>
    %1116 = arith.index_cast %c2_i32_435 : i32 to index
    %c0_437 = arith.constant 0 : index
    %1117 = vector.load %arg27[%1116, %c0_437] : memref<8x96xf32, #tpu.memory_space<vmem>>, vector<1x96xf32>
    %1118 = tpu.concatenate %1115, %1117 in 0 : vector<1x96xf32>, vector<1x96xf32> -> vector<2x96xf32>
    %1119 = arith.truncf %1107 : vector<2x32xf32> to vector<2x32xbf16>
    %cst_438 = arith.constant dense<0.000000e+00> : vector<2x96xf32>
    %1120 = tpu.matmul %1119, %1014, %cst_438 {dimension_numbers = #tpu.dot_dimension_numbers<[1], [0], [0], [1], [0, 0, 1, 1], [], []>} : vector<2x32xbf16>, vector<32x96xbf16>, vector<2x96xf32> -> vector<2x96xf32>
    %1121 = vector.broadcast %1018 : vector<1x96xf32> to vector<2x96xf32>
    %1122 = arith.addf %1120, %1121 : vector<2x96xf32>
    %1123 = vector.extract_strided_slice %1118 {offsets = [0, 0], sizes = [2, 32], strides = [1, 1]} : vector<2x96xf32> to vector<2x32xf32>
    %1124 = vector.extract_strided_slice %1122 {offsets = [0, 0], sizes = [2, 32], strides = [1, 1]} : vector<2x96xf32> to vector<2x32xf32>
    %1125 = arith.addf %1123, %1124 : vector<2x32xf32>
    %1126 = arith.negf %1125 : vector<2x32xf32>
    %1127 = math.exp %1126 : vector<2x32xf32>
    %cst_439 = arith.constant 1.000000e+00 : f32
    %1128 = vector.broadcast %cst_439 : f32 to vector<2x32xf32>
    %1129 = arith.addf %1128, %1127 : vector<2x32xf32>
    %1130 = arith.divf %1128, %1129 : vector<2x32xf32>
    %1131 = vector.extract_strided_slice %1118 {offsets = [0, 32], sizes = [2, 32], strides = [1, 1]} : vector<2x96xf32> to vector<2x32xf32>
    %1132 = vector.extract_strided_slice %1122 {offsets = [0, 32], sizes = [2, 32], strides = [1, 1]} : vector<2x96xf32> to vector<2x32xf32>
    %1133 = arith.addf %1131, %1132 : vector<2x32xf32>
    %1134 = arith.negf %1133 : vector<2x32xf32>
    %1135 = math.exp %1134 : vector<2x32xf32>
    %cst_440 = arith.constant 1.000000e+00 : f32
    %1136 = vector.broadcast %cst_440 : f32 to vector<2x32xf32>
    %1137 = arith.addf %1136, %1135 : vector<2x32xf32>
    %1138 = arith.divf %1136, %1137 : vector<2x32xf32>
    %1139 = vector.extract_strided_slice %1118 {offsets = [0, 64], sizes = [2, 32], strides = [1, 1]} : vector<2x96xf32> to vector<2x32xf32>
    %1140 = vector.extract_strided_slice %1122 {offsets = [0, 64], sizes = [2, 32], strides = [1, 1]} : vector<2x96xf32> to vector<2x32xf32>
    %1141 = arith.mulf %1130, %1140 : vector<2x32xf32>
    %1142 = arith.addf %1139, %1141 : vector<2x32xf32>
    %1143 = math.tanh %1142 : vector<2x32xf32>
    %cst_441 = arith.constant 1.000000e+00 : f32
    %1144 = vector.broadcast %cst_441 : f32 to vector<2x32xf32>
    %1145 = arith.subf %1144, %1138 : vector<2x32xf32>
    %1146 = arith.mulf %1145, %1143 : vector<2x32xf32>
    %1147 = arith.mulf %1138, %1107 : vector<2x32xf32>
    %1148 = arith.addf %1146, %1147 : vector<2x32xf32>
    %1149 = vector.extract_strided_slice %1148 {offsets = [0, 0], sizes = [1, 32], strides = [1, 1]} : vector<2x32xf32> to vector<1x32xf32>
    %1150 = arith.index_cast %c2_i32_435 : i32 to index
    %c0_442 = arith.constant 0 : index
    %1151 = vector.load %arg24[%1150, %c0_442] : memref<8x32xf32, #tpu.memory_space<vmem>>, vector<1x32xf32>
    tpu.vector_store %arg24[%1150, %c0_442], %1149 {strides = array<i32>} : memref<8x32xf32, #tpu.memory_space<vmem>>, vector<1x32xf32>,
    %1152 = vector.extract_strided_slice %1148 {offsets = [1, 0], sizes = [1, 32], strides = [1, 1]} : vector<2x32xf32> to vector<1x32xf32>
    %1153 = arith.index_cast %c2_i32_435 : i32 to index
    %c0_443 = arith.constant 0 : index
    %1154 = vector.load %arg25[%1153, %c0_443] : memref<8x32xf32, #tpu.memory_space<vmem>>, vector<1x32xf32>
    tpu.vector_store %arg25[%1153, %c0_443], %1152 {strides = array<i32>} : memref<8x32xf32, #tpu.memory_space<vmem>>, vector<1x32xf32>,
    %c3_i32_444 = arith.constant 3 : i32
    %1155 = arith.index_cast %c3_i32_444 : i32 to index
    %c0_445 = arith.constant 0 : index
    %1156 = vector.load %arg26[%1155, %c0_445] : memref<8x96xf32, #tpu.memory_space<vmem>>, vector<1x96xf32>
    %1157 = arith.index_cast %c3_i32_444 : i32 to index
    %c0_446 = arith.constant 0 : index
    %1158 = vector.load %arg27[%1157, %c0_446] : memref<8x96xf32, #tpu.memory_space<vmem>>, vector<1x96xf32>
    %1159 = tpu.concatenate %1156, %1158 in 0 : vector<1x96xf32>, vector<1x96xf32> -> vector<2x96xf32>
    %1160 = arith.truncf %1148 : vector<2x32xf32> to vector<2x32xbf16>
    %cst_447 = arith.constant dense<0.000000e+00> : vector<2x96xf32>
    %1161 = tpu.matmul %1160, %1014, %cst_447 {dimension_numbers = #tpu.dot_dimension_numbers<[1], [0], [0], [1], [0, 0, 1, 1], [], []>} : vector<2x32xbf16>, vector<32x96xbf16>, vector<2x96xf32> -> vector<2x96xf32>
    %1162 = vector.broadcast %1018 : vector<1x96xf32> to vector<2x96xf32>
    %1163 = arith.addf %1161, %1162 : vector<2x96xf32>
    %1164 = vector.extract_strided_slice %1159 {offsets = [0, 0], sizes = [2, 32], strides = [1, 1]} : vector<2x96xf32> to vector<2x32xf32>
    %1165 = vector.extract_strided_slice %1163 {offsets = [0, 0], sizes = [2, 32], strides = [1, 1]} : vector<2x96xf32> to vector<2x32xf32>
    %1166 = arith.addf %1164, %1165 : vector<2x32xf32>
    %1167 = arith.negf %1166 : vector<2x32xf32>
    %1168 = math.exp %1167 : vector<2x32xf32>
    %cst_448 = arith.constant 1.000000e+00 : f32
    %1169 = vector.broadcast %cst_448 : f32 to vector<2x32xf32>
    %1170 = arith.addf %1169, %1168 : vector<2x32xf32>
    %1171 = arith.divf %1169, %1170 : vector<2x32xf32>
    %1172 = vector.extract_strided_slice %1159 {offsets = [0, 32], sizes = [2, 32], strides = [1, 1]} : vector<2x96xf32> to vector<2x32xf32>
    %1173 = vector.extract_strided_slice %1163 {offsets = [0, 32], sizes = [2, 32], strides = [1, 1]} : vector<2x96xf32> to vector<2x32xf32>
    %1174 = arith.addf %1172, %1173 : vector<2x32xf32>
    %1175 = arith.negf %1174 : vector<2x32xf32>
    %1176 = math.exp %1175 : vector<2x32xf32>
    %cst_449 = arith.constant 1.000000e+00 : f32
    %1177 = vector.broadcast %cst_449 : f32 to vector<2x32xf32>
    %1178 = arith.addf %1177, %1176 : vector<2x32xf32>
    %1179 = arith.divf %1177, %1178 : vector<2x32xf32>
    %1180 = vector.extract_strided_slice %1159 {offsets = [0, 64], sizes = [2, 32], strides = [1, 1]} : vector<2x96xf32> to vector<2x32xf32>
    %1181 = vector.extract_strided_slice %1163 {offsets = [0, 64], sizes = [2, 32], strides = [1, 1]} : vector<2x96xf32> to vector<2x32xf32>
    %1182 = arith.mulf %1171, %1181 : vector<2x32xf32>
    %1183 = arith.addf %1180, %1182 : vector<2x32xf32>
    %1184 = math.tanh %1183 : vector<2x32xf32>
    %cst_450 = arith.constant 1.000000e+00 : f32
    %1185 = vector.broadcast %cst_450 : f32 to vector<2x32xf32>
    %1186 = arith.subf %1185, %1179 : vector<2x32xf32>
    %1187 = arith.mulf %1186, %1184 : vector<2x32xf32>
    %1188 = arith.mulf %1179, %1148 : vector<2x32xf32>
    %1189 = arith.addf %1187, %1188 : vector<2x32xf32>
    %1190 = vector.extract_strided_slice %1189 {offsets = [0, 0], sizes = [1, 32], strides = [1, 1]} : vector<2x32xf32> to vector<1x32xf32>
    %1191 = arith.index_cast %c3_i32_444 : i32 to index
    %c0_451 = arith.constant 0 : index
    %1192 = vector.load %arg24[%1191, %c0_451] : memref<8x32xf32, #tpu.memory_space<vmem>>, vector<1x32xf32>
    tpu.vector_store %arg24[%1191, %c0_451], %1190 {strides = array<i32>} : memref<8x32xf32, #tpu.memory_space<vmem>>, vector<1x32xf32>,
    %1193 = vector.extract_strided_slice %1189 {offsets = [1, 0], sizes = [1, 32], strides = [1, 1]} : vector<2x32xf32> to vector<1x32xf32>
    %1194 = arith.index_cast %c3_i32_444 : i32 to index
    %c0_452 = arith.constant 0 : index
    %1195 = vector.load %arg25[%1194, %c0_452] : memref<8x32xf32, #tpu.memory_space<vmem>>, vector<1x32xf32>
    tpu.vector_store %arg25[%1194, %c0_452], %1193 {strides = array<i32>} : memref<8x32xf32, #tpu.memory_space<vmem>>, vector<1x32xf32>,
    %c4_i32_453 = arith.constant 4 : i32
    %1196 = arith.index_cast %c4_i32_453 : i32 to index
    %c0_454 = arith.constant 0 : index
    %1197 = vector.load %arg26[%1196, %c0_454] : memref<8x96xf32, #tpu.memory_space<vmem>>, vector<1x96xf32>
    %1198 = arith.index_cast %c4_i32_453 : i32 to index
    %c0_455 = arith.constant 0 : index
    %1199 = vector.load %arg27[%1198, %c0_455] : memref<8x96xf32, #tpu.memory_space<vmem>>, vector<1x96xf32>
    %1200 = tpu.concatenate %1197, %1199 in 0 : vector<1x96xf32>, vector<1x96xf32> -> vector<2x96xf32>
    %1201 = arith.truncf %1189 : vector<2x32xf32> to vector<2x32xbf16>
    %cst_456 = arith.constant dense<0.000000e+00> : vector<2x96xf32>
    %1202 = tpu.matmul %1201, %1014, %cst_456 {dimension_numbers = #tpu.dot_dimension_numbers<[1], [0], [0], [1], [0, 0, 1, 1], [], []>} : vector<2x32xbf16>, vector<32x96xbf16>, vector<2x96xf32> -> vector<2x96xf32>
    %1203 = vector.broadcast %1018 : vector<1x96xf32> to vector<2x96xf32>
    %1204 = arith.addf %1202, %1203 : vector<2x96xf32>
    %1205 = vector.extract_strided_slice %1200 {offsets = [0, 0], sizes = [2, 32], strides = [1, 1]} : vector<2x96xf32> to vector<2x32xf32>
    %1206 = vector.extract_strided_slice %1204 {offsets = [0, 0], sizes = [2, 32], strides = [1, 1]} : vector<2x96xf32> to vector<2x32xf32>
    %1207 = arith.addf %1205, %1206 : vector<2x32xf32>
    %1208 = arith.negf %1207 : vector<2x32xf32>
    %1209 = math.exp %1208 : vector<2x32xf32>
    %cst_457 = arith.constant 1.000000e+00 : f32
    %1210 = vector.broadcast %cst_457 : f32 to vector<2x32xf32>
    %1211 = arith.addf %1210, %1209 : vector<2x32xf32>
    %1212 = arith.divf %1210, %1211 : vector<2x32xf32>
    %1213 = vector.extract_strided_slice %1200 {offsets = [0, 32], sizes = [2, 32], strides = [1, 1]} : vector<2x96xf32> to vector<2x32xf32>
    %1214 = vector.extract_strided_slice %1204 {offsets = [0, 32], sizes = [2, 32], strides = [1, 1]} : vector<2x96xf32> to vector<2x32xf32>
    %1215 = arith.addf %1213, %1214 : vector<2x32xf32>
    %1216 = arith.negf %1215 : vector<2x32xf32>
    %1217 = math.exp %1216 : vector<2x32xf32>
    %cst_458 = arith.constant 1.000000e+00 : f32
    %1218 = vector.broadcast %cst_458 : f32 to vector<2x32xf32>
    %1219 = arith.addf %1218, %1217 : vector<2x32xf32>
    %1220 = arith.divf %1218, %1219 : vector<2x32xf32>
    %1221 = vector.extract_strided_slice %1200 {offsets = [0, 64], sizes = [2, 32], strides = [1, 1]} : vector<2x96xf32> to vector<2x32xf32>
    %1222 = vector.extract_strided_slice %1204 {offsets = [0, 64], sizes = [2, 32], strides = [1, 1]} : vector<2x96xf32> to vector<2x32xf32>
    %1223 = arith.mulf %1212, %1222 : vector<2x32xf32>
    %1224 = arith.addf %1221, %1223 : vector<2x32xf32>
    %1225 = math.tanh %1224 : vector<2x32xf32>
    %cst_459 = arith.constant 1.000000e+00 : f32
    %1226 = vector.broadcast %cst_459 : f32 to vector<2x32xf32>
    %1227 = arith.subf %1226, %1220 : vector<2x32xf32>
    %1228 = arith.mulf %1227, %1225 : vector<2x32xf32>
    %1229 = arith.mulf %1220, %1189 : vector<2x32xf32>
    %1230 = arith.addf %1228, %1229 : vector<2x32xf32>
    %1231 = vector.extract_strided_slice %1230 {offsets = [0, 0], sizes = [1, 32], strides = [1, 1]} : vector<2x32xf32> to vector<1x32xf32>
    %1232 = arith.index_cast %c4_i32_453 : i32 to index
    %c0_460 = arith.constant 0 : index
    %1233 = vector.load %arg24[%1232, %c0_460] : memref<8x32xf32, #tpu.memory_space<vmem>>, vector<1x32xf32>
    tpu.vector_store %arg24[%1232, %c0_460], %1231 {strides = array<i32>} : memref<8x32xf32, #tpu.memory_space<vmem>>, vector<1x32xf32>,
    %1234 = vector.extract_strided_slice %1230 {offsets = [1, 0], sizes = [1, 32], strides = [1, 1]} : vector<2x32xf32> to vector<1x32xf32>
    %1235 = arith.index_cast %c4_i32_453 : i32 to index
    %c0_461 = arith.constant 0 : index
    %1236 = vector.load %arg25[%1235, %c0_461] : memref<8x32xf32, #tpu.memory_space<vmem>>, vector<1x32xf32>
    tpu.vector_store %arg25[%1235, %c0_461], %1234 {strides = array<i32>} : memref<8x32xf32, #tpu.memory_space<vmem>>, vector<1x32xf32>,
    %c5_i32_462 = arith.constant 5 : i32
    %1237 = arith.index_cast %c5_i32_462 : i32 to index
    %c0_463 = arith.constant 0 : index
    %1238 = vector.load %arg26[%1237, %c0_463] : memref<8x96xf32, #tpu.memory_space<vmem>>, vector<1x96xf32>
    %1239 = arith.index_cast %c5_i32_462 : i32 to index
    %c0_464 = arith.constant 0 : index
    %1240 = vector.load %arg27[%1239, %c0_464] : memref<8x96xf32, #tpu.memory_space<vmem>>, vector<1x96xf32>
    %1241 = tpu.concatenate %1238, %1240 in 0 : vector<1x96xf32>, vector<1x96xf32> -> vector<2x96xf32>
    %1242 = arith.truncf %1230 : vector<2x32xf32> to vector<2x32xbf16>
    %cst_465 = arith.constant dense<0.000000e+00> : vector<2x96xf32>
    %1243 = tpu.matmul %1242, %1014, %cst_465 {dimension_numbers = #tpu.dot_dimension_numbers<[1], [0], [0], [1], [0, 0, 1, 1], [], []>} : vector<2x32xbf16>, vector<32x96xbf16>, vector<2x96xf32> -> vector<2x96xf32>
    %1244 = vector.broadcast %1018 : vector<1x96xf32> to vector<2x96xf32>
    %1245 = arith.addf %1243, %1244 : vector<2x96xf32>
    %1246 = vector.extract_strided_slice %1241 {offsets = [0, 0], sizes = [2, 32], strides = [1, 1]} : vector<2x96xf32> to vector<2x32xf32>
    %1247 = vector.extract_strided_slice %1245 {offsets = [0, 0], sizes = [2, 32], strides = [1, 1]} : vector<2x96xf32> to vector<2x32xf32>
    %1248 = arith.addf %1246, %1247 : vector<2x32xf32>
    %1249 = arith.negf %1248 : vector<2x32xf32>
    %1250 = math.exp %1249 : vector<2x32xf32>
    %cst_466 = arith.constant 1.000000e+00 : f32
    %1251 = vector.broadcast %cst_466 : f32 to vector<2x32xf32>
    %1252 = arith.addf %1251, %1250 : vector<2x32xf32>
    %1253 = arith.divf %1251, %1252 : vector<2x32xf32>
    %1254 = vector.extract_strided_slice %1241 {offsets = [0, 32], sizes = [2, 32], strides = [1, 1]} : vector<2x96xf32> to vector<2x32xf32>
    %1255 = vector.extract_strided_slice %1245 {offsets = [0, 32], sizes = [2, 32], strides = [1, 1]} : vector<2x96xf32> to vector<2x32xf32>
    %1256 = arith.addf %1254, %1255 : vector<2x32xf32>
    %1257 = arith.negf %1256 : vector<2x32xf32>
    %1258 = math.exp %1257 : vector<2x32xf32>
    %cst_467 = arith.constant 1.000000e+00 : f32
    %1259 = vector.broadcast %cst_467 : f32 to vector<2x32xf32>
    %1260 = arith.addf %1259, %1258 : vector<2x32xf32>
    %1261 = arith.divf %1259, %1260 : vector<2x32xf32>
    %1262 = vector.extract_strided_slice %1241 {offsets = [0, 64], sizes = [2, 32], strides = [1, 1]} : vector<2x96xf32> to vector<2x32xf32>
    %1263 = vector.extract_strided_slice %1245 {offsets = [0, 64], sizes = [2, 32], strides = [1, 1]} : vector<2x96xf32> to vector<2x32xf32>
    %1264 = arith.mulf %1253, %1263 : vector<2x32xf32>
    %1265 = arith.addf %1262, %1264 : vector<2x32xf32>
    %1266 = math.tanh %1265 : vector<2x32xf32>
    %cst_468 = arith.constant 1.000000e+00 : f32
    %1267 = vector.broadcast %cst_468 : f32 to vector<2x32xf32>
    %1268 = arith.subf %1267, %1261 : vector<2x32xf32>
    %1269 = arith.mulf %1268, %1266 : vector<2x32xf32>
    %1270 = arith.mulf %1261, %1230 : vector<2x32xf32>
    %1271 = arith.addf %1269, %1270 : vector<2x32xf32>
    %1272 = vector.extract_strided_slice %1271 {offsets = [0, 0], sizes = [1, 32], strides = [1, 1]} : vector<2x32xf32> to vector<1x32xf32>
    %1273 = arith.index_cast %c5_i32_462 : i32 to index
    %c0_469 = arith.constant 0 : index
    %1274 = vector.load %arg24[%1273, %c0_469] : memref<8x32xf32, #tpu.memory_space<vmem>>, vector<1x32xf32>
    tpu.vector_store %arg24[%1273, %c0_469], %1272 {strides = array<i32>} : memref<8x32xf32, #tpu.memory_space<vmem>>, vector<1x32xf32>,
    %1275 = vector.extract_strided_slice %1271 {offsets = [1, 0], sizes = [1, 32], strides = [1, 1]} : vector<2x32xf32> to vector<1x32xf32>
    %1276 = arith.index_cast %c5_i32_462 : i32 to index
    %c0_470 = arith.constant 0 : index
    %1277 = vector.load %arg25[%1276, %c0_470] : memref<8x32xf32, #tpu.memory_space<vmem>>, vector<1x32xf32>
    tpu.vector_store %arg25[%1276, %c0_470], %1275 {strides = array<i32>} : memref<8x32xf32, #tpu.memory_space<vmem>>, vector<1x32xf32>,
    %c6_i32_471 = arith.constant 6 : i32
    %1278 = arith.index_cast %c6_i32_471 : i32 to index
    %c0_472 = arith.constant 0 : index
    %1279 = vector.load %arg26[%1278, %c0_472] : memref<8x96xf32, #tpu.memory_space<vmem>>, vector<1x96xf32>
    %1280 = arith.index_cast %c6_i32_471 : i32 to index
    %c0_473 = arith.constant 0 : index
    %1281 = vector.load %arg27[%1280, %c0_473] : memref<8x96xf32, #tpu.memory_space<vmem>>, vector<1x96xf32>
    %1282 = tpu.concatenate %1279, %1281 in 0 : vector<1x96xf32>, vector<1x96xf32> -> vector<2x96xf32>
    %1283 = arith.truncf %1271 : vector<2x32xf32> to vector<2x32xbf16>
    %cst_474 = arith.constant dense<0.000000e+00> : vector<2x96xf32>
    %1284 = tpu.matmul %1283, %1014, %cst_474 {dimension_numbers = #tpu.dot_dimension_numbers<[1], [0], [0], [1], [0, 0, 1, 1], [], []>} : vector<2x32xbf16>, vector<32x96xbf16>, vector<2x96xf32> -> vector<2x96xf32>
    %1285 = vector.broadcast %1018 : vector<1x96xf32> to vector<2x96xf32>
    %1286 = arith.addf %1284, %1285 : vector<2x96xf32>
    %1287 = vector.extract_strided_slice %1282 {offsets = [0, 0], sizes = [2, 32], strides = [1, 1]} : vector<2x96xf32> to vector<2x32xf32>
    %1288 = vector.extract_strided_slice %1286 {offsets = [0, 0], sizes = [2, 32], strides = [1, 1]} : vector<2x96xf32> to vector<2x32xf32>
    %1289 = arith.addf %1287, %1288 : vector<2x32xf32>
    %1290 = arith.negf %1289 : vector<2x32xf32>
    %1291 = math.exp %1290 : vector<2x32xf32>
    %cst_475 = arith.constant 1.000000e+00 : f32
    %1292 = vector.broadcast %cst_475 : f32 to vector<2x32xf32>
    %1293 = arith.addf %1292, %1291 : vector<2x32xf32>
    %1294 = arith.divf %1292, %1293 : vector<2x32xf32>
    %1295 = vector.extract_strided_slice %1282 {offsets = [0, 32], sizes = [2, 32], strides = [1, 1]} : vector<2x96xf32> to vector<2x32xf32>
    %1296 = vector.extract_strided_slice %1286 {offsets = [0, 32], sizes = [2, 32], strides = [1, 1]} : vector<2x96xf32> to vector<2x32xf32>
    %1297 = arith.addf %1295, %1296 : vector<2x32xf32>
    %1298 = arith.negf %1297 : vector<2x32xf32>
    %1299 = math.exp %1298 : vector<2x32xf32>
    %cst_476 = arith.constant 1.000000e+00 : f32
    %1300 = vector.broadcast %cst_476 : f32 to vector<2x32xf32>
    %1301 = arith.addf %1300, %1299 : vector<2x32xf32>
    %1302 = arith.divf %1300, %1301 : vector<2x32xf32>
    %1303 = vector.extract_strided_slice %1282 {offsets = [0, 64], sizes = [2, 32], strides = [1, 1]} : vector<2x96xf32> to vector<2x32xf32>
    %1304 = vector.extract_strided_slice %1286 {offsets = [0, 64], sizes = [2, 32], strides = [1, 1]} : vector<2x96xf32> to vector<2x32xf32>
    %1305 = arith.mulf %1294, %1304 : vector<2x32xf32>
    %1306 = arith.addf %1303, %1305 : vector<2x32xf32>
    %1307 = math.tanh %1306 : vector<2x32xf32>
    %cst_477 = arith.constant 1.000000e+00 : f32
    %1308 = vector.broadcast %cst_477 : f32 to vector<2x32xf32>
    %1309 = arith.subf %1308, %1302 : vector<2x32xf32>
    %1310 = arith.mulf %1309, %1307 : vector<2x32xf32>
    %1311 = arith.mulf %1302, %1271 : vector<2x32xf32>
    %1312 = arith.addf %1310, %1311 : vector<2x32xf32>
    %1313 = vector.extract_strided_slice %1312 {offsets = [0, 0], sizes = [1, 32], strides = [1, 1]} : vector<2x32xf32> to vector<1x32xf32>
    %1314 = arith.index_cast %c6_i32_471 : i32 to index
    %c0_478 = arith.constant 0 : index
    %1315 = vector.load %arg24[%1314, %c0_478] : memref<8x32xf32, #tpu.memory_space<vmem>>, vector<1x32xf32>
    tpu.vector_store %arg24[%1314, %c0_478], %1313 {strides = array<i32>} : memref<8x32xf32, #tpu.memory_space<vmem>>, vector<1x32xf32>,
    %1316 = vector.extract_strided_slice %1312 {offsets = [1, 0], sizes = [1, 32], strides = [1, 1]} : vector<2x32xf32> to vector<1x32xf32>
    %1317 = arith.index_cast %c6_i32_471 : i32 to index
    %c0_479 = arith.constant 0 : index
    %1318 = vector.load %arg25[%1317, %c0_479] : memref<8x32xf32, #tpu.memory_space<vmem>>, vector<1x32xf32>
    tpu.vector_store %arg25[%1317, %c0_479], %1316 {strides = array<i32>} : memref<8x32xf32, #tpu.memory_space<vmem>>, vector<1x32xf32>,
    %c7_i32_480 = arith.constant 7 : i32
    %1319 = arith.index_cast %c7_i32_480 : i32 to index
    %c0_481 = arith.constant 0 : index
    %1320 = vector.load %arg26[%1319, %c0_481] : memref<8x96xf32, #tpu.memory_space<vmem>>, vector<1x96xf32>
    %1321 = arith.index_cast %c7_i32_480 : i32 to index
    %c0_482 = arith.constant 0 : index
    %1322 = vector.load %arg27[%1321, %c0_482] : memref<8x96xf32, #tpu.memory_space<vmem>>, vector<1x96xf32>
    %1323 = tpu.concatenate %1320, %1322 in 0 : vector<1x96xf32>, vector<1x96xf32> -> vector<2x96xf32>
    %1324 = arith.truncf %1312 : vector<2x32xf32> to vector<2x32xbf16>
    %cst_483 = arith.constant dense<0.000000e+00> : vector<2x96xf32>
    %1325 = tpu.matmul %1324, %1014, %cst_483 {dimension_numbers = #tpu.dot_dimension_numbers<[1], [0], [0], [1], [0, 0, 1, 1], [], []>} : vector<2x32xbf16>, vector<32x96xbf16>, vector<2x96xf32> -> vector<2x96xf32>
    %1326 = vector.broadcast %1018 : vector<1x96xf32> to vector<2x96xf32>
    %1327 = arith.addf %1325, %1326 : vector<2x96xf32>
    %1328 = vector.extract_strided_slice %1323 {offsets = [0, 0], sizes = [2, 32], strides = [1, 1]} : vector<2x96xf32> to vector<2x32xf32>
    %1329 = vector.extract_strided_slice %1327 {offsets = [0, 0], sizes = [2, 32], strides = [1, 1]} : vector<2x96xf32> to vector<2x32xf32>
    %1330 = arith.addf %1328, %1329 : vector<2x32xf32>
    %1331 = arith.negf %1330 : vector<2x32xf32>
    %1332 = math.exp %1331 : vector<2x32xf32>
    %cst_484 = arith.constant 1.000000e+00 : f32
    %1333 = vector.broadcast %cst_484 : f32 to vector<2x32xf32>
    %1334 = arith.addf %1333, %1332 : vector<2x32xf32>
    %1335 = arith.divf %1333, %1334 : vector<2x32xf32>
    %1336 = vector.extract_strided_slice %1323 {offsets = [0, 32], sizes = [2, 32], strides = [1, 1]} : vector<2x96xf32> to vector<2x32xf32>
    %1337 = vector.extract_strided_slice %1327 {offsets = [0, 32], sizes = [2, 32], strides = [1, 1]} : vector<2x96xf32> to vector<2x32xf32>
    %1338 = arith.addf %1336, %1337 : vector<2x32xf32>
    %1339 = arith.negf %1338 : vector<2x32xf32>
    %1340 = math.exp %1339 : vector<2x32xf32>
    %cst_485 = arith.constant 1.000000e+00 : f32
    %1341 = vector.broadcast %cst_485 : f32 to vector<2x32xf32>
    %1342 = arith.addf %1341, %1340 : vector<2x32xf32>
    %1343 = arith.divf %1341, %1342 : vector<2x32xf32>
    %1344 = vector.extract_strided_slice %1323 {offsets = [0, 64], sizes = [2, 32], strides = [1, 1]} : vector<2x96xf32> to vector<2x32xf32>
    %1345 = vector.extract_strided_slice %1327 {offsets = [0, 64], sizes = [2, 32], strides = [1, 1]} : vector<2x96xf32> to vector<2x32xf32>
    %1346 = arith.mulf %1335, %1345 : vector<2x32xf32>
    %1347 = arith.addf %1344, %1346 : vector<2x32xf32>
    %1348 = math.tanh %1347 : vector<2x32xf32>
    %cst_486 = arith.constant 1.000000e+00 : f32
    %1349 = vector.broadcast %cst_486 : f32 to vector<2x32xf32>
    %1350 = arith.subf %1349, %1343 : vector<2x32xf32>
    %1351 = arith.mulf %1350, %1348 : vector<2x32xf32>
    %1352 = arith.mulf %1343, %1312 : vector<2x32xf32>
    %1353 = arith.addf %1351, %1352 : vector<2x32xf32>
    %1354 = vector.extract_strided_slice %1353 {offsets = [0, 0], sizes = [1, 32], strides = [1, 1]} : vector<2x32xf32> to vector<1x32xf32>
    %1355 = arith.index_cast %c7_i32_480 : i32 to index
    %c0_487 = arith.constant 0 : index
    %1356 = vector.load %arg24[%1355, %c0_487] : memref<8x32xf32, #tpu.memory_space<vmem>>, vector<1x32xf32>
    tpu.vector_store %arg24[%1355, %c0_487], %1354 {strides = array<i32>} : memref<8x32xf32, #tpu.memory_space<vmem>>, vector<1x32xf32>,
    %1357 = vector.extract_strided_slice %1353 {offsets = [1, 0], sizes = [1, 32], strides = [1, 1]} : vector<2x32xf32> to vector<1x32xf32>
    %1358 = arith.index_cast %c7_i32_480 : i32 to index
    %c0_488 = arith.constant 0 : index
    %1359 = vector.load %arg25[%1358, %c0_488] : memref<8x32xf32, #tpu.memory_space<vmem>>, vector<1x32xf32>
    tpu.vector_store %arg25[%1358, %c0_488], %1357 {strides = array<i32>} : memref<8x32xf32, #tpu.memory_space<vmem>>, vector<1x32xf32>,
    %c8_i32_489 = arith.constant 8 : i32
    %c0_490 = arith.constant 0 : index
    %c0_491 = arith.constant 0 : index
    %1360 = vector.load %arg14[%c0_490, %c0_491] : memref<32x32xbf16, #tpu.memory_space<vmem>>, vector<32x32xbf16>
    %c0_492 = arith.constant 0 : index
    %c0_493 = arith.constant 0 : index
    %1361 = vector.load %arg15[%c0_492, %c0_493] : memref<32x1xf32, #tpu.memory_space<vmem>>, vector<32x1xf32>
    %cst_494 = arith.constant 0.000000e+00 : f32
    %1362 = vector.broadcast %cst_494 : f32 to vector<1x1xf32>
    %c0_495 = arith.constant 0 : index
    %c0_496 = arith.constant 0 : index
    %1363 = vector.load %arg22[%c0_495, %c0_496] : memref<8x32xf32, #tpu.memory_space<vmem>>, vector<8x32xf32>
    %c0_497 = arith.constant 0 : index
    %c0_498 = arith.constant 0 : index
    %1364 = vector.load %arg24[%c0_497, %c0_498] : memref<8x32xf32, #tpu.memory_space<vmem>>, vector<8x32xf32>
    %1365 = arith.addf %1363, %1364 : vector<8x32xf32>
    %cst_499 = arith.constant 5.000000e-01 : f32
    %1366 = vector.broadcast %cst_499 : f32 to vector<8x32xf32>
    %1367 = arith.mulf %1366, %1365 : vector<8x32xf32>
    %cst_500 = arith.constant 4.471500e-02 : f32
    %1368 = vector.broadcast %cst_500 : f32 to vector<8x32xf32>
    %1369 = arith.mulf %1368, %1365 : vector<8x32xf32>
    %1370 = arith.mulf %1369, %1365 : vector<8x32xf32>
    %1371 = arith.mulf %1370, %1365 : vector<8x32xf32>
    %1372 = arith.addf %1365, %1371 : vector<8x32xf32>
    %cst_501 = arith.constant 0.797884583 : f32
    %1373 = vector.broadcast %cst_501 : f32 to vector<8x32xf32>
    %1374 = arith.mulf %1373, %1372 : vector<8x32xf32>
    %1375 = math.tanh %1374 : vector<8x32xf32>
    %cst_502 = arith.constant 1.000000e+00 : f32
    %1376 = vector.broadcast %cst_502 : f32 to vector<8x32xf32>
    %1377 = arith.addf %1376, %1375 : vector<8x32xf32>
    %1378 = arith.mulf %1367, %1377 : vector<8x32xf32>
    %1379 = arith.truncf %1378 : vector<8x32xf32> to vector<8x32xbf16>
    %cst_503 = arith.constant dense<0.000000e+00> : vector<32x8xf32>
    %1380 = tpu.matmul %1360, %1379, %cst_503 {dimension_numbers = #tpu.dot_dimension_numbers<[1], [1], [0], [0], [0, 0, 1, 0], [], []>} : vector<32x32xbf16>, vector<8x32xbf16>, vector<32x8xf32> -> vector<32x8xf32>
    %1381 = vector.broadcast %1361 : vector<32x1xf32> to vector<32x8xf32>
    %1382 = arith.addf %1380, %1381 : vector<32x8xf32>
    %c0_504 = arith.constant 0 : index
    %c0_505 = arith.constant 0 : index
    %c0_506 = arith.constant 0 : index
    %1383 = vector.load %arg16[%c0_504, %c0_505, %c0_506] : memref<2x32x8xf32, #tpu.memory_space<vmem>>, vector<1x32x8xf32>
    %1384 = vector.shape_cast %1383 : vector<1x32x8xf32> to vector<32x8xf32>
    %1385 = vector.shape_cast %1382 : vector<32x8xf32> to vector<1x32x8xf32>
    tpu.vector_store %arg16[%c0_504, %c0_505, %c0_506], %1385 {strides = array<i32>} : memref<2x32x8xf32, #tpu.memory_space<vmem>>, vector<1x32x8xf32>,
    %1386 = arith.mulf %1382, %1382 : vector<32x8xf32>
    %cst_507 = arith.constant dense<0.000000e+00> : vector<8xf32>
    %1387 = vector.multi_reduction <add>, %1386, %cst_507 [0] : vector<32x8xf32> to vector<8xf32>
    %1388 = vector.shape_cast %1387 : vector<8xf32> to vector<1x8xf32>
    %1389 = math.sqrt %1388 : vector<1x8xf32>
    %cst_508 = arith.constant dense<0.000000e+00> : vector<1xf32>
    %1390 = vector.multi_reduction <add>, %1389, %cst_508 [1] : vector<1x8xf32> to vector<1xf32>
    %1391 = vector.shape_cast %1390 : vector<1xf32> to vector<1x1xf32>
    %1392 = arith.addf %1362, %1391 : vector<1x1xf32>
    %c0_509 = arith.constant 0 : index
    %c0_510 = arith.constant 0 : index
    %1393 = vector.load %arg23[%c0_509, %c0_510] : memref<8x32xf32, #tpu.memory_space<vmem>>, vector<8x32xf32>
    %c0_511 = arith.constant 0 : index
    %c0_512 = arith.constant 0 : index
    %1394 = vector.load %arg25[%c0_511, %c0_512] : memref<8x32xf32, #tpu.memory_space<vmem>>, vector<8x32xf32>
    %1395 = arith.addf %1393, %1394 : vector<8x32xf32>
    %cst_513 = arith.constant 5.000000e-01 : f32
    %1396 = vector.broadcast %cst_513 : f32 to vector<8x32xf32>
    %1397 = arith.mulf %1396, %1395 : vector<8x32xf32>
    %cst_514 = arith.constant 4.471500e-02 : f32
    %1398 = vector.broadcast %cst_514 : f32 to vector<8x32xf32>
    %1399 = arith.mulf %1398, %1395 : vector<8x32xf32>
    %1400 = arith.mulf %1399, %1395 : vector<8x32xf32>
    %1401 = arith.mulf %1400, %1395 : vector<8x32xf32>
    %1402 = arith.addf %1395, %1401 : vector<8x32xf32>
    %cst_515 = arith.constant 0.797884583 : f32
    %1403 = vector.broadcast %cst_515 : f32 to vector<8x32xf32>
    %1404 = arith.mulf %1403, %1402 : vector<8x32xf32>
    %1405 = math.tanh %1404 : vector<8x32xf32>
    %cst_516 = arith.constant 1.000000e+00 : f32
    %1406 = vector.broadcast %cst_516 : f32 to vector<8x32xf32>
    %1407 = arith.addf %1406, %1405 : vector<8x32xf32>
    %1408 = arith.mulf %1397, %1407 : vector<8x32xf32>
    %1409 = arith.truncf %1408 : vector<8x32xf32> to vector<8x32xbf16>
    %cst_517 = arith.constant dense<0.000000e+00> : vector<32x8xf32>
    %1410 = tpu.matmul %1360, %1409, %cst_517 {dimension_numbers = #tpu.dot_dimension_numbers<[1], [1], [0], [0], [0, 0, 1, 0], [], []>} : vector<32x32xbf16>, vector<8x32xbf16>, vector<32x8xf32> -> vector<32x8xf32>
    %1411 = vector.broadcast %1361 : vector<32x1xf32> to vector<32x8xf32>
    %1412 = arith.addf %1410, %1411 : vector<32x8xf32>
    %c1_518 = arith.constant 1 : index
    %c0_519 = arith.constant 0 : index
    %c0_520 = arith.constant 0 : index
    %1413 = vector.load %arg16[%c1_518, %c0_519, %c0_520] : memref<2x32x8xf32, #tpu.memory_space<vmem>>, vector<1x32x8xf32>
    %1414 = vector.shape_cast %1413 : vector<1x32x8xf32> to vector<32x8xf32>
    %1415 = vector.shape_cast %1412 : vector<32x8xf32> to vector<1x32x8xf32>
    tpu.vector_store %arg16[%c1_518, %c0_519, %c0_520], %1415 {strides = array<i32>} : memref<2x32x8xf32, #tpu.memory_space<vmem>>, vector<1x32x8xf32>,
    %1416 = arith.mulf %1412, %1412 : vector<32x8xf32>
    %cst_521 = arith.constant dense<0.000000e+00> : vector<8xf32>
    %1417 = vector.multi_reduction <add>, %1416, %cst_521 [0] : vector<32x8xf32> to vector<8xf32>
    %1418 = vector.shape_cast %1417 : vector<8xf32> to vector<1x8xf32>
    %1419 = math.sqrt %1418 : vector<1x8xf32>
    %cst_522 = arith.constant dense<0.000000e+00> : vector<1xf32>
    %1420 = vector.multi_reduction <add>, %1419, %cst_522 [1] : vector<1x8xf32> to vector<1xf32>
    %1421 = vector.shape_cast %1420 : vector<1xf32> to vector<1x1xf32>
    %1422 = arith.addf %1392, %1421 : vector<1x1xf32>
    %c0_523 = arith.constant 0 : index
    %c0_524 = arith.constant 0 : index
    %c0_525 = arith.constant 0 : index
    %1423 = vector.load %arg17[%c0_523, %c0_524, %c0_525] : memref<1x1x2xf32, #tpu.memory_space<vmem>>, vector<1x1x1xf32>
    %1424 = vector.shape_cast %1423 : vector<1x1x1xf32> to vector<1x1xf32>
    %1425 = vector.shape_cast %285 : vector<1x1xf32> to vector<1x1x1xf32>
    tpu.vector_store %arg17[%c0_523, %c0_524, %c0_525], %1425 {strides = array<i32>} : memref<1x1x2xf32, #tpu.memory_space<vmem>>, vector<1x1x1xf32>,
    %c0_526 = arith.constant 0 : index
    %c0_527 = arith.constant 0 : index
    %c1_528 = arith.constant 1 : index
    %1426 = vector.load %arg17[%c0_526, %c0_527, %c1_528] : memref<1x1x2xf32, #tpu.memory_space<vmem>>, vector<1x1x1xf32>
    %1427 = vector.shape_cast %1426 : vector<1x1x1xf32> to vector<1x1xf32>
    %1428 = vector.shape_cast %1422 : vector<1x1xf32> to vector<1x1x1xf32>
    tpu.vector_store %arg17[%c0_526, %c0_527, %c1_528], %1428 {strides = array<i32>} : memref<1x1x2xf32, #tpu.memory_space<vmem>>, vector<1x1x1xf32>,
    return
  }
  func.func @transform_0(%arg0: i32) -> (i32, i32, i32) {
    %c0_i32 = arith.constant 0 : i32
    %c0_i32_0 = arith.constant 0 : i32
    %c0_i32_1 = arith.constant 0 : i32
    return %arg0, %c0_i32, %c0_i32_0 : i32, i32, i32
  }
  func.func @transform_1(%arg0: i32) -> (i32, i32, i32) {
    %c0_i32 = arith.constant 0 : i32
    %c0_i32_0 = arith.constant 0 : i32
    %c0_i32_1 = arith.constant 0 : i32
    %c0_i32_2 = arith.constant 0 : i32
    return %c0_i32, %c0_i32_0, %c0_i32_1 : i32, i32, i32
  }
  func.func @transform_2(%arg0: i32) -> (i32, i32, i32) {
    %c0_i32 = arith.constant 0 : i32
    %c0_i32_0 = arith.constant 0 : i32
    %c0_i32_1 = arith.constant 0 : i32
    %c0_i32_2 = arith.constant 0 : i32
    return %c0_i32, %c0_i32_0, %c0_i32_1 : i32, i32, i32
  }
  func.func @transform_3(%arg0: i32) -> (i32, i32, i32) {
    %c0_i32 = arith.constant 0 : i32
    %c0_i32_0 = arith.constant 0 : i32
    %c0_i32_1 = arith.constant 0 : i32
    %c0_i32_2 = arith.constant 0 : i32
    return %c0_i32, %c0_i32_0, %c0_i32_1 : i32, i32, i32
  }
  func.func @transform_4(%arg0: i32) -> (i32, i32, i32) {
    %c0_i32 = arith.constant 0 : i32
    %c0_i32_0 = arith.constant 0 : i32
    %c0_i32_1 = arith.constant 0 : i32
    %c0_i32_2 = arith.constant 0 : i32
    return %c0_i32, %c0_i32_0, %c0_i32_1 : i32, i32, i32
  }
  func.func @transform_5(%arg0: i32) -> (i32, i32) {
    %c0_i32 = arith.constant 0 : i32
    %c0_i32_0 = arith.constant 0 : i32
    %c0_i32_1 = arith.constant 0 : i32
    return %c0_i32, %c0_i32_0 : i32, i32
  }
  func.func @transform_6(%arg0: i32) -> (i32, i32) {
    %c0_i32 = arith.constant 0 : i32
    %c0_i32_0 = arith.constant 0 : i32
    %c0_i32_1 = arith.constant 0 : i32
    return %c0_i32, %c0_i32_0 : i32, i32
  }
  func.func @transform_7(%arg0: i32) -> (i32, i32) {
    %c0_i32 = arith.constant 0 : i32
    %c0_i32_0 = arith.constant 0 : i32
    %c0_i32_1 = arith.constant 0 : i32
    return %c0_i32, %c0_i32_0 : i32, i32
  }
  func.func @transform_8(%arg0: i32) -> (i32, i32) {
    %c0_i32 = arith.constant 0 : i32
    %c0_i32_0 = arith.constant 0 : i32
    %c0_i32_1 = arith.constant 0 : i32
    return %c0_i32, %c0_i32_0 : i32, i32
  }
  func.func @transform_9(%arg0: i32) -> (i32, i32, i32) {
    %c0_i32 = arith.constant 0 : i32
    %c0_i32_0 = arith.constant 0 : i32
    %c0_i32_1 = arith.constant 0 : i32
    %c0_i32_2 = arith.constant 0 : i32
    return %c0_i32, %c0_i32_0, %c0_i32_1 : i32, i32, i32
  }
  func.func @transform_10(%arg0: i32) -> (i32, i32, i32) {
    %c0_i32 = arith.constant 0 : i32
    %c0_i32_0 = arith.constant 0 : i32
    %c0_i32_1 = arith.constant 0 : i32
    %c0_i32_2 = arith.constant 0 : i32
    return %c0_i32, %c0_i32_0, %c0_i32_1 : i32, i32, i32
  }
  func.func @transform_11(%arg0: i32) -> (i32, i32, i32) {
    %c0_i32 = arith.constant 0 : i32
    %c0_i32_0 = arith.constant 0 : i32
    %c0_i32_1 = arith.constant 0 : i32
    %c0_i32_2 = arith.constant 0 : i32
    return %c0_i32, %c0_i32_0, %c0_i32_1 : i32, i32, i32
  }
  func.func @transform_12(%arg0: i32) -> (i32, i32, i32) {
    %c0_i32 = arith.constant 0 : i32
    %c0_i32_0 = arith.constant 0 : i32
    %c0_i32_1 = arith.constant 0 : i32
    %c0_i32_2 = arith.constant 0 : i32
    return %c0_i32, %c0_i32_0, %c0_i32_1 : i32, i32, i32
  }
  func.func @transform_13(%arg0: i32) -> (i32, i32) {
    %c0_i32 = arith.constant 0 : i32
    %c0_i32_0 = arith.constant 0 : i32
    %c0_i32_1 = arith.constant 0 : i32
    return %c0_i32, %c0_i32_0 : i32, i32
  }
  func.func @transform_14(%arg0: i32) -> (i32, i32) {
    %c0_i32 = arith.constant 0 : i32
    %c0_i32_0 = arith.constant 0 : i32
    %c0_i32_1 = arith.constant 0 : i32
    return %c0_i32, %c0_i32_0 : i32, i32
  }
  func.func @transform_15(%arg0: i32) -> (i32, i32, i32) {
    %c0_i32 = arith.constant 0 : i32
    %c0_i32_0 = arith.constant 0 : i32
    %c0_i32_1 = arith.constant 0 : i32
    return %arg0, %c0_i32, %c0_i32_0 : i32, i32, i32
  }
  func.func @transform_16(%arg0: i32) -> (i32, i32, i32) {
    %c0_i32 = arith.constant 0 : i32
    %c0_i32_0 = arith.constant 0 : i32
    %c0_i32_1 = arith.constant 0 : i32
    return %arg0, %c0_i32, %c0_i32_0 : i32, i32, i32
  }
}

</mosaic_0001>

<bundles_post_ra>
// kernel: phone_extractor_forward.1
= control target key start
LH: loop header
LB: loop body
LE: loop exit
PB: predicated region body
PF: predicated region fallthrough
CT: control target
= control target key end

     0   :  { %vm159_vm0 = vcmask 1043456   ;;  %vm77_vm1 = vcmask 64512   ;;  %v6612_v0 = vmov 0.0   ;;  %vm6613_vm2 = vmmov 0   ;;  %s6615_s30 = smov 64   ;;  %s8022_s1 = inlined_call_operand.vmem [shape: bf16[3,8,16], index: 1, kind: input, shape index: {}]   ;;  %s8023_s0 = inlined_call_operand.vmem [shape: f32[2,135,8], index: 0, kind: input, shape index: {}]   ;;  %s8024_s2 = inlined_call_operand.vmem [shape: bf16[3,16,32], index: 2, kind: input, shape index: {}]   ;;  %s8025_s3 = inlined_call_operand.vmem [shape: bf16[3,32,32], index: 3, kind: input, shape index: {}]   ;;  %s8026_s4 = inlined_call_operand.vmem [shape: bf16[2,32,32], index: 4, kind: input, shape index: {}]   ;;  %s8027_s7 = inlined_call_operand.vmem [shape: bf16[32,32], index: 7, kind: input, shape index: {}]   ;;  %s8028_s5 = inlined_call_operand.vmem [shape: f32[1,32], index: 5, kind: input, shape index: {}]   ;;  %s8029_s6 = inlined_call_operand.vmem [shape: f32[1,32], index: 6, kind: input, shape index: {}]   ;;  %s8030_s9 = inlined_call_operand.vmem [shape: bf16[3,32,96], index: 9, kind: input, shape index: {}]   ;;  %s8031_s8 = inlined_call_operand.vmem [shape: f32[1,32], index: 8, kind: input, shape index: {}]   ;;  %s8032_s11 = inlined_call_operand.vmem [shape: f32[3,1,96], index: 11, kind: input, shape index: {}]   ;;  %s8033_s10 = inlined_call_operand.vmem [shape: bf16[3,32,96], index: 10, kind: input, shape index: {}]   ;;  %s8034_s12 = inlined_call_operand.vmem [shape: f32[3,1,96], index: 12, kind: input, shape index: {}]   ;;  %s8035_s14 = inlined_call_operand.vmem [shape: f32[32,1], index: 14, kind: input, shape index: {}]   ;;  %s8036_s13 = inlined_call_operand.vmem [shape: bf16[32,32], index: 13, kind: input, shape index: {}]   ;;  %s8037_s16 = inlined_call_operand.vmem [shape: f32[1,1,2], index: 16, kind: output, shape index: {1}]   ;;  %s8038_s15 = inlined_call_operand.vmem [shape: f32[2,32,8], index: 15, kind: output, shape index: {0}]  }
   0x1   :  { %8040 = sst [smem:[#allocation12_spill]] %s8022_s1  ;;  %5617 = vmatprep.subr.bf16.mxu0 %v6612_v0  ;;  %5619 = vmatprep.mubr.msk.bf16.mxu0 %vm6613_vm2, %v6612_v0  ;;  %v60_v2 = vld [vmem:[%s8023_s0] sm:$0xff]  ;;  %v61_v3 = vld [vmem:[%s8023_s0 + $0x8] sm:$0xff]  ;;  %v62_v5 = vld [vmem:[%s8023_s0 + $0x10] sm:$0xff]  ;;  %vm94_vm3 = vcmask 63488   ;;  %vm530_vm4 = vcmask 130048  }
   0x2   :  { %s8041_s23 = sld [smem:[#allocation12_spill]]  ;;  %v63_v6 = vld [vmem:[%s8023_s0 + $0x18] sm:$0xff]  ;;  %v64_v7 = vld [vmem:[%s8023_s0 + $0x20] sm:$0xff]  ;;  %78 = vst.msk [vmem:[#allocation2] sm:$0xff] %vm77_vm1, %v60_v2  ;;  %79 = vst.msk [vmem:[#allocation2 + $0x8] sm:$0xff] %vm77_vm1, %v61_v3  ;;  %5683 = vmatprep.subr.bf16.mxu1 %v6612_v0  ;;  %5685 = vmatprep.mubr.msk.bf16.mxu1 %vm6613_vm2, %v6612_v0  ;;  %vm539_vm5 = vcmask 124928  }
   0x3   :  { %80 = vst.msk [vmem:[#allocation2 + $0x10] sm:$0xff] %vm77_vm1, %v62_v5  ;;  %81 = vst.msk [vmem:[#allocation2 + $0x18] sm:$0xff] %vm77_vm1, %v63_v6  ;;  %v65_v8 = vld [vmem:[%s8023_s0 + $0x28] sm:$0xff]  ;;  %v66_v9 = vld [vmem:[%s8023_s0 + $0x30] sm:$0xff]  ;;  %vm850_vm6 = vcmask 261120   ;;  %vm855_vm7 = vcmask 253952  }
   0x4   :  { %82 = vst.msk [vmem:[#allocation2 + $0x20] sm:$0xff] %vm77_vm1, %v64_v7  ;;  %v67_v10 = vld [vmem:[%s8023_s0 + $0x38] sm:$0xff]  ;;  %83 = vst.msk [vmem:[#allocation2 + $0x28] sm:$0xff] %vm77_vm1, %v65_v8  ;;  %v68_v11 = vld [vmem:[%s8023_s0 + $0x40] sm:$0xff]  ;;  %vm2557_vm8 = vcmask 785408   ;;  %vm2610_vm9 = vcmask 1040384  }
   0x5   :  { %v5248_v12 = vld [vmem:[%s8023_s0 + $0x88] sm:$0xff]  ;;  %v5249_v13 = vld [vmem:[%s8023_s0 + $0x90] sm:$0xff]  ;;  %84 = vst.msk [vmem:[#allocation2 + $0x30] sm:$0xff] %vm77_vm1, %v66_v9  ;;  %85 = vst.msk [vmem:[#allocation2 + $0x38] sm:$0xff] %vm77_vm1, %v67_v10  ;;  %s6616_s1 = smov 96   ;;  %vm2704_vm10 = vcmask 254977  }
   0x6   :  { %v69_v14 = vld [vmem:[%s8023_s0 + $0x48] sm:$0xff]  ;;  %v70_v15 = vld [vmem:[%s8023_s0 + $0x50] sm:$0xff]  ;;  %v71_v16 = vld [vmem:[%s8023_s0 + $0x58] sm:$0xff]  ;;  %86 = vst.msk [vmem:[#allocation2 + $0x40] sm:$0xff] %vm77_vm1, %v68_v11  ;;  %vm5170_vm15 = vcmask 0  }
   0x7   :  { %v5250_v17 = vld [vmem:[%s8023_s0 + $0x98] sm:$0xff]  ;;  %87 = vst.msk [vmem:[#allocation2 + $0x48] sm:$0xff] %vm77_vm1, %v69_v14  ;;  %88 = vst.msk [vmem:[#allocation2 + $0x50] sm:$0xff] %vm77_vm1, %v70_v15  ;;  %v72_v18 = vld [vmem:[%s8023_s0 + $0x60] sm:$0xff] }
   0x8   :  { %v5182_v1 = vld [vmem:[%s8041_s23 + $0x4] sm:$0xf]  ;;  %89 = vst.msk [vmem:[#allocation2 + $0x58] sm:$0xff] %vm77_vm1, %v71_v16  ;;  %v73_v19 = vld [vmem:[%s8023_s0 + $0x68] sm:$0xff]  ;;  %v74_v20 = vld [vmem:[%s8023_s0 + $0x70] sm:$0xff] }
   0x9   :  { %v161_v4 = vsel %vm159_vm0, %v5182_v1, 0  ;;  %v113_v21 = vld [vmem:[%s8041_s23] sm:$0xf]  ;;  %v75_v22 = vld [vmem:[%s8023_s0 + $0x78] sm:$0xff]  ;;  %90 = vst.msk [vmem:[#allocation2 + $0x60] sm:$0xff] %vm77_vm1, %v72_v18  ;;  %91 = vst.msk [vmem:[#allocation2 + $0x68] sm:$0xff] %vm77_vm1, %v73_v19 }
   0xa   :  { %5618 = vmatpush3.bf16.msra.mxu0 %v161_v4  ;;  %92 = vst.msk [vmem:[#allocation2 + $0x70] sm:$0xff] %vm77_vm1, %v74_v20  ;;  %v76_v23 = vld [vmem:[%s8023_s0 + $0x80] sm:$0x7f]  ;;  %93 = vst.msk [vmem:[#allocation2 + $0x78] sm:$0xff] %vm77_vm1, %v75_v22  ;;  %v122_v27 = vld [vmem:[#allocation2 + $0x11] ss:$2 sm:$0xff] }
   0xb   :  { %5639 = vmatprep.subr.bf16.mxu0 %v6612_v0  ;;  %v6791_v24 = vld [vmem:[#allocation2] ss:$2 sm:$0xff]  ;;  %v120_v25 = vld [vmem:[#allocation2 + $0x1] ss:$2 sm:$0xff]  ;;  %95 = vst.msk [vmem:[#allocation2 + $0x80] sm:$0x7f] %vm94_vm3, %v76_v23 }
   0xc   :  { %v5251_v26 = vld [vmem:[%s8023_s0 + $0xa0] sm:$0xff]  ;;  %v5252_v29 = vld [vmem:[%s8023_s0 + $0xa8] sm:$0xff]  ;;  %v6803_v30 = vld [vmem:[#allocation2 + $0x10] ss:$2 sm:$0xff]  ;;  %v139_v31 = vpack.c.bf16 %v122_v27, %v120_v25  ;;  %v251_v33 = vsel %vm159_vm0, %v113_v21, 0 }
   0xd   :  { %v6798_v28 = vld [vmem:[#allocation2 + $0x2] ss:$2 sm:$0xff]  ;;  %v6805_v32 = vld [vmem:[#allocation2 + $0x12] ss:$2 sm:$0xff]  ;;  %v124_v36 = vld [vmem:[#allocation2 + $0x21] ss:$2 sm:$0xff] }
   0xe   :  { %1335 = vst.msk [vmem:[#allocation2] sm:$0xff] %vm77_vm1, %v5248_v12  ;;  %1336 = vst.msk [vmem:[#allocation2 + $0x8] sm:$0xff] %vm77_vm1, %v5249_v13  ;;  %v5253_v34 = vld [vmem:[%s8023_s0 + $0xb0] sm:$0xff]  ;;  %v345_v35 = vpack.c.bf16 %v6805_v32, %v6798_v28  ;;  %5620 = vmatmul.mubr.msk.bf16.vlgmr.msra.gmra.mrb[0].mxu0 %vm77_vm1, %v139_v31  ;;  %v6818_v37 = vld [vmem:[#allocation2 + $0x20] ss:$2 sm:$0xff]  ;;  %v114_v13 = vpack.c.bf16 %v6803_v30, %v6791_v24 }
   0xf   :  { %1337 = vst.msk [vmem:[#allocation2 + $0x10] sm:$0xff] %vm77_vm1, %v5250_v17  ;;  %1338 = vst.msk [vmem:[#allocation2 + $0x18] sm:$0xff] %vm77_vm1, %v5251_v26  ;;  %v6820_v38 = vld [vmem:[#allocation2 + $0x22] ss:$2 sm:$0xff]  ;;  %5640 = vmatpush3.bf16.msra.mxu0 %v251_v33  ;;  %5623 = vmatprep.mubr.msk.bf16.mxu0 %vm6613_vm2, %v6612_v0  ;;  %v126_v39 = vld [vmem:[#allocation2 + $0x31] ss:$2 sm:$0xff] }
  0x10   :  { %1339 = vst.msk [vmem:[#allocation2 + $0x20] sm:$0xff] %vm77_vm1, %v5252_v29  ;;  %1340 = vst.msk [vmem:[#allocation2 + $0x28] sm:$0xff] %vm77_vm1, %v5253_v34  ;;  %5661 = vmatprep.subr.bf16.mxu0 %v6612_v0  ;;  %v5254_v40 = vld [vmem:[%s8023_s0 + $0xb8] sm:$0xff]  ;;  %v5255_v41 = vld [vmem:[%s8023_s0 + $0xc0] sm:$0xff]  ;;  %v140_v45 = vpack.c.bf16 %v126_v39, %v124_v36 }
  0x11   :  { %v128_v42 = vld [vmem:[#allocation2 + $0x41] ss:$2 sm:$0xff]  ;;  %v102_v43 = vld [vmem:[#allocation2 + $0x30] ss:$2 sm:$0xff]  ;;  %v130_v46 = vld [vmem:[#allocation2 + $0x51] ss:$2 sm:$0xff] }
  0x12   :  { %v5256_v44 = vld [vmem:[%s8023_s0 + $0xc8] sm:$0xff]  ;;  %v106_v48 = vld [vmem:[#allocation2 + $0x50] ss:$2 sm:$0xff]  ;;  %v134_v55 = vld [vmem:[#allocation2 + $0x71] ss:$2 sm:$0xff]  ;;  %v141_v9 = vpack.c.bf16 %v130_v46, %v128_v42  ;;  %v115_v15 = vpack.c.bf16 %v102_v43, %v6818_v37 }
  0x13   :  { %v104_v47 = vld [vmem:[#allocation2 + $0x40] ss:$2 sm:$0xff]  ;;  %v5257_v49 = vld [vmem:[%s8023_s0 + $0xd0] sm:$0xff]  ;;  %v132_v50 = vld [vmem:[#allocation2 + $0x61] ss:$2 sm:$0xff] }
  0x14   :  { %v108_v51 = vld [vmem:[#allocation2 + $0x60] ss:$2 sm:$0xff]  ;;  %v110_v56 = vld [vmem:[#allocation2 + $0x70] ss:$2 sm:$0xff]  ;;  %v142_v10 = vpack.c.bf16 %v134_v55, %v132_v50  ;;  %v116_v16 = vpack.c.bf16 %v106_v48, %v104_v47 }
  0x15   :  { %v6839_v52 = vld [vmem:[#allocation2 + $0x32] ss:$2 sm:$0xff]  ;;  %v6841_v53 = vld [vmem:[#allocation2 + $0x42] ss:$2 sm:$0xff]  ;;  %v117_v17 = vpack.c.bf16 %v110_v56, %v108_v51 }
  0x16   :  { %v6843_v54 = vld [vmem:[#allocation2 + $0x52] ss:$2 sm:$0xff]  ;;  %v346_v57 = vpack.c.bf16 %v6839_v52, %v6820_v38  ;;  %1341 = vst.msk [vmem:[#allocation2 + $0x30] sm:$0xff] %vm77_vm1, %v5254_v40  ;;  %1342 = vst.msk [vmem:[#allocation2 + $0x38] sm:$0xff] %vm77_vm1, %v5255_v41  ;;  %v338_v61 = vld [vmem:[#allocation2 + $0x62] ss:$2 sm:$0xff]  ;;  %5624 = vmatmul.mubr.msk.bf16.gmra.mrb[4].mxu0 %vm77_vm1, %v140_v45 }
  0x17   :  { %v347_v58 = vpack.c.bf16 %v6843_v54, %v6841_v53  ;;  %v5258_v59 = vld [vmem:[%s8023_s0 + $0xd8] sm:$0xff]  ;;  %v5259_v60 = vld [vmem:[%s8023_s0 + $0xe0] sm:$0xff]  ;;  %1343 = vst.msk [vmem:[#allocation2 + $0x40] sm:$0xff] %vm77_vm1, %v5256_v44  ;;  %1344 = vst.msk [vmem:[#allocation2 + $0x48] sm:$0xff] %vm77_vm1, %v5257_v49  ;;  %5627 = vmatprep.mubr.msk.bf16.mxu0 %vm6613_vm2, %v6612_v0 }
  0x18   :  { %v136_v62 = vld [vmem:[#allocation2 + $0x81] ss:$2 sm:$0x7]  ;;  %1345 = vst.msk [vmem:[#allocation2 + $0x50] sm:$0xff] %vm77_vm1, %v5258_v59  ;;  %1346 = vst.msk [vmem:[#allocation2 + $0x58] sm:$0xff] %vm77_vm1, %v5259_v60  ;;  %v5260_v1 = vld [vmem:[%s8023_s0 + $0xe8] sm:$0xff] }
  0x19   :  { %v340_v63 = vld [vmem:[#allocation2 + $0x72] ss:$2 sm:$0xff]  ;;  %1347 = vst.msk [vmem:[#allocation2 + $0x60] sm:$0xff] %vm77_vm1, %v5260_v1  ;;  %v342_v7 = vld [vmem:[#allocation2 + $0x82] ss:$2 sm:$0x7]  ;;  %v143_v11 = vpack.c.bf16 %v136_v62, %v136_v62 }
  0x1a   :  { %v5261_v2 = vld [vmem:[%s8023_s0 + $0xf0] sm:$0xff]  ;;  %v112_v3 = vld [vmem:[#allocation2 + $0x80] ss:$2 sm:$0x7]  ;;  %v348_v4 = vpack.c.bf16 %v340_v63, %v338_v61  ;;  %v5262_v5 = vld [vmem:[%s8023_s0 + $0xf8] sm:$0xff]  ;;  %v349_v19 = vpack.c.bf16 %v342_v7, %v342_v7 }
  0x1b   :  { %v5263_v6 = vld [vmem:[%s8023_s0 + $0x100] sm:$0xff]  ;;  %1348 = vst.msk [vmem:[#allocation2 + $0x68] sm:$0xff] %vm77_vm1, %v5261_v2  ;;  %1349 = vst.msk [vmem:[#allocation2 + $0x70] sm:$0xff] %vm77_vm1, %v5262_v5  ;;  %v5264_v8 = vld [vmem:[%s8023_s0 + $0x108] sm:$0x7f]  ;;  %v118_v18 = vpack.c.bf16 %v112_v3, %v112_v3 }
  0x1c   :  { %1350 = vst.msk [vmem:[#allocation2 + $0x78] sm:$0xff] %vm77_vm1, %v5263_v6  ;;  %v5193_v12 = vld [vmem:[%s8041_s23 + $0x8] sm:$0xf] }
  0x1d   :  { %1351 = vst.msk [vmem:[#allocation2 + $0x80] sm:$0x7f] %vm94_vm3, %v5264_v8  ;;  %v366_v14 = vsel %vm159_vm0, %v5193_v12, 0  ;;  %v6342_v20 = vld [vmem:[%s8024_s2 + $0x8] sm:$0xff]  }
  0x1e   :  { %5628 = vmatmul.mubr.msk.bf16.gmra.mrb[8].mxu0 %vm77_vm1, %v141_v9  ;;  %5684 = vmatpush3.bf16.msra.mxu1 %v6342_v20 }
  0x1f   :  { %5631 = vmatprep.mubr.msk.bf16.mxu0 %vm6613_vm2, %v6612_v0  ;;  %5697 = vmatprep.subr.bf16.mxu1 %v6612_v0 }
  0x26   :  { %5632 = vmatmul.mubr.msk.bf16.gmra.mrb[12].mxu0 %vm77_vm1, %v142_v10 }
  0x27   :  { %5635 = vmatprep.mubr.msk.bf16.mxu0 %vm6613_vm2, %v6612_v0 }
  0x2e   :  { %5636 = vmatmul.mubr.msk.bf16.gmra.mrb[16].mxu0 %vm77_vm1, %v143_v11 }
  0x2f   :  { %5641 = vmatprep.mubr.msk.bf16.mxu0 %vm6613_vm2, %v6612_v0 }
  0x36   :  { %5642 = vmatmul.mubr.msk.bf16.vlgmr.msra.gmra.mrb[0].mxu0 %vm77_vm1, %v114_v13 }
  0x37   :  { %5662 = vmatpush3.bf16.msra.mxu0 %v366_v14  ;;  %5645 = vmatprep.mubr.msk.bf16.mxu0 %vm6613_vm2, %v6612_v0 }
  0x38   :  { %5773 = vmatprep.subr.bf16.mxu0 %v6612_v0 }
  0x3e   :  { %5646 = vmatmul.mubr.msk.bf16.gmra.mrb[4].mxu0 %vm77_vm1, %v115_v15 }
  0x3f   :  { %5649 = vmatprep.mubr.msk.bf16.mxu0 %vm6613_vm2, %v6612_v0 }
  0x46   :  { %5650 = vmatmul.mubr.msk.bf16.gmra.mrb[8].mxu0 %vm77_vm1, %v116_v16 }
  0x47   :  { %5653 = vmatprep.mubr.msk.bf16.mxu0 %vm6613_vm2, %v6612_v0 }
  0x4e   :  { %5654 = vmatmul.mubr.msk.bf16.gmra.mrb[12].mxu0 %vm77_vm1, %v117_v17 }
  0x4f   :  { %5657 = vmatprep.mubr.msk.bf16.mxu0 %vm6613_vm2, %v6612_v0 }
  0x56   :  { %5658 = vmatmul.mubr.msk.bf16.gmra.mrb[16].mxu0 %vm77_vm1, %v118_v18 }
  0x57   :  { %5663 = vmatprep.mubr.msk.bf16.mxu0 %vm6613_vm2, %v6612_v0 }
  0x5e   :  { %5664 = vmatmul.mubr.msk.bf16.vlgmr.msra.gmra.mrb[0].mxu0 %vm77_vm1, %v345_v35 }
  0x5f   :  { %5667 = vmatprep.mubr.msk.bf16.mxu0 %vm6613_vm2, %v6612_v0 }
  0x66   :  { %5668 = vmatmul.mubr.msk.bf16.gmra.mrb[4].mxu0 %vm77_vm1, %v346_v57 }
  0x67   :  { %5671 = vmatprep.mubr.msk.bf16.mxu0 %vm6613_vm2, %v6612_v0 }
  0x6e   :  { %5672 = vmatmul.mubr.msk.bf16.gmra.mrb[8].mxu0 %vm77_vm1, %v347_v58 }
  0x6f   :  { %5675 = vmatprep.mubr.msk.bf16.mxu0 %vm6613_vm2, %v6612_v0 }
  0x76   :  { %5676 = vmatmul.mubr.msk.bf16.gmra.mrb[12].mxu0 %vm77_vm1, %v348_v4 }
  0x77   :  { %5679 = vmatprep.mubr.msk.bf16.mxu0 %vm6613_vm2, %v6612_v0 }
  0x7e   :  { %5680 = vmatmul.mubr.msk.bf16.gmra.mrb[16].mxu0 %vm77_vm1, %v349_v19 }
  0x7f   :  { %5775 = vmatprep.mubr.msk.bf16.mxu0 %vm6613_vm2, %v6612_v0 }
 0x131   :  { %v402_v21 = vpop.f32.mrb[0].mxu0 }
 0x132   :  { %v458_v22 = vmul.f32 0.044715, %v402_v21  ;;  %v5665_v23 = vpop.f32.mrb[1].mxu0  ;;  %v449_v59 = vmul.f32 0.5, %v402_v21 }
 0x133   :  { %v405_v24 = vpop.f32.mrb[2].mxu0 }
 0x134   :  { %v467_v25 = vmul.f32 %v458_v22, %v402_v21  ;;  %v459_v26 = vmul.f32 0.044715, %v405_v24  ;;  %v5666_v27 = vpop.f32.mrb[3].mxu0  ;;  %v450_v2 = vmul.f32 0.5, %v405_v24 }
 0x136   :  { %v476_v28 = vmul.f32 %v467_v25, %v402_v21  ;;  %v468_v29 = vmul.f32 %v459_v26, %v405_v24 }
 0x138   :  { %v485_v30 = vadd.f32 %v476_v28, %v402_v21  ;;  %v477_v31 = vmul.f32 %v468_v29, %v405_v24 }
 0x139   :  { %v410_v32 = vpop.f32.mrb[4].mxu0 }
 0x13a   :  { %v494_v33 = vmul.f32 0.7978846, %v485_v30  ;;  %v486_v34 = vadd.f32 %v477_v31, %v405_v24  ;;  %v460_v35 = vmul.f32 0.044715, %v410_v32  ;;  %v5669_v36 = vpop.f32.mrb[5].mxu0  ;;  %v451_v17 = vmul.f32 0.5, %v410_v32 }
 0x13b   :  { %v413_v37 = vpop.f32.mrb[6].mxu0 }
 0x13c   :  { %6384 = vtanh.f32 %v494_v33  ;;  %v495_v38 = vmul.f32 0.7978846, %v486_v34  ;;  %v469_v39 = vmul.f32 %v460_v35, %v410_v32  ;;  %v5670_v40 = vpop.f32.mrb[7].mxu0  ;;  %v461_v41 = vmul.f32 0.044715, %v413_v37 }
 0x13d   :  { %v452_v25 = vmul.f32 0.5, %v413_v37 }
 0x13e   :  { %6386 = vtanh.f32 %v495_v38  ;;  %v478_v42 = vmul.f32 %v469_v39, %v410_v32  ;;  %v470_v43 = vmul.f32 %v461_v41, %v413_v37 }
 0x140   :  { %v487_v44 = vadd.f32 %v478_v42, %v410_v32  ;;  %v479_v45 = vmul.f32 %v470_v43, %v413_v37 }
 0x141   :  { %v6938_v46 = vpop.f32.mrb[8].mxu0 }
 0x142   :  { %v496_v47 = vmul.f32 0.7978846, %v487_v44  ;;  %v462_v48 = vmul.f32 0.044715, %v6938_v46  ;;  %v5673_v49 = vpop.f32.mrb[9].mxu0  ;;  %v488_v50 = vadd.f32 %v479_v45, %v413_v37  ;;  %v453_v39 = vmul.f32 0.5, %v6938_v46 }
 0x143   :  { %v6941_v51 = vpop.f32.mrb[10].mxu0 }
 0x144   :  { %6388 = vtanh.f32 %v496_v47  ;;  %v471_v52 = vmul.f32 %v462_v48, %v6938_v46  ;;  %v463_v53 = vmul.f32 0.044715, %v6941_v51  ;;  %v5674_v54 = vpop.f32.mrb[11].mxu0  ;;  %v497_v55 = vmul.f32 0.7978846, %v488_v50 }
 0x145   :  { %v454_v43 = vmul.f32 0.5, %v6941_v51 }
 0x146   :  { %v6385_v56 = vpop.eup %6384  ;;  %v480_v57 = vmul.f32 %v471_v52, %v6938_v46  ;;  %v472_v58 = vmul.f32 %v463_v53, %v6941_v51  ;;  %6390 = vtanh.f32 %v497_v55 }
 0x147   :  { %v512_v60 = vadd.f32 1.0, %v6385_v56 }
 0x148   :  { %v6387_v61 = vpop.eup %6386  ;;  %v489_v62 = vadd.f32 %v480_v57, %v6938_v46  ;;  %v481_v63 = vmul.f32 %v472_v58, %v6941_v51  ;;  %v6343_v46 = vld [vmem:[%s8024_s2] sm:$0xff]  }
 0x149   :  { %v521_v1 = vmul.f32 %v512_v60, %v449_v59  ;;  %v513_v3 = vadd.f32 1.0, %v6387_v61  ;;  %v426_v4 = vpop.f32.mrb[12].mxu0 }
 0x14a   :  { %v498_v5 = vmul.f32 0.7978846, %v489_v62  ;;  %v490_v6 = vadd.f32 %v481_v63, %v6941_v51  ;;  %v464_v7 = vmul.f32 0.044715, %v426_v4  ;;  %v5677_v8 = vpop.f32.mrb[13].mxu0  ;;  %v455_v53 = vmul.f32 0.5, %v426_v4 }
 0x14b   :  { %531 = vst.msk [vmem:[#allocation3] sm:$0xff] %vm530_vm4, %v521_v1  ;;  %v522_v9 = vmul.f32 %v513_v3, %v450_v2  ;;  %v429_v10 = vpop.f32.mrb[14].mxu0 }
 0x14c   :  { %6392 = vtanh.f32 %v498_v5  ;;  %v499_v11 = vmul.f32 0.7978846, %v490_v6  ;;  %v473_v12 = vmul.f32 %v464_v7, %v426_v4  ;;  %v5678_v13 = vpop.f32.mrb[15].mxu0  ;;  %v465_v14 = vmul.f32 0.044715, %v429_v10  ;;  %v6344_v7 = vld [vmem:[%s8024_s2 + $0x10] sm:$0xff]  }
 0x14d   :  { %532 = vst.msk [vmem:[#allocation3 + $0x8] sm:$0xff] %vm530_vm4, %v522_v9  ;;  %v456_v56 = vmul.f32 0.5, %v429_v10 }
 0x14e   :  { %v6389_v15 = vpop.eup %6388  ;;  %6394 = vtanh.f32 %v499_v11  ;;  %v482_v16 = vmul.f32 %v473_v12, %v426_v4  ;;  %v474_v19 = vmul.f32 %v465_v14, %v429_v10 }
 0x14f   :  { %v514_v18 = vadd.f32 1.0, %v6389_v15 }
 0x150   :  { %v491_v20 = vadd.f32 %v482_v16, %v426_v4  ;;  %v6391_v21 = vpop.eup %6390  ;;  %v483_v23 = vmul.f32 %v474_v19, %v429_v10 }
 0x151   :  { %v523_v22 = vmul.f32 %v514_v18, %v451_v17  ;;  %v434_v24 = vpop.f32.mrb[16].mxu0  ;;  %v515_v26 = vadd.f32 1.0, %v6391_v21 }
 0x152   :  { %v500_v27 = vmul.f32 0.7978846, %v491_v20  ;;  %v466_v28 = vmul.f32 0.044715, %v434_v24  ;;  %v492_v29 = vadd.f32 %v483_v23, %v429_v10  ;;  %v5681_v30 = vpop.f32.mrb[17].mxu0  ;;  %v457_v60 = vmul.f32 0.5, %v434_v24 }
 0x153   :  { %533 = vst.msk [vmem:[#allocation3 + $0x10] sm:$0xff] %vm530_vm4, %v523_v22  ;;  %v524_v31 = vmul.f32 %v515_v26, %v452_v25  ;;  %v437_v34 = vpop.f32.mrb[18].mxu0  ;;  %v6345_v22 = vld [vmem:[%s8025_s3 + $0x10] sm:$0xff]   ;;  %v6346_v23 = vld [vmem:[%s8025_s3 + $0x18] sm:$0xff]  }
 0x154   :  { %6396 = vtanh.f32 %v500_v27  ;;  %v475_v33 = vmul.f32 %v466_v28, %v434_v24  ;;  %v501_v32 = vmul.f32 0.7978846, %v492_v29  ;;  %v5682_v35 = vpop.f32.mrb[19].mxu0  ;;  %v556_v48 = vld [vmem:[#allocation3 + $0x1] ss:$2 sm:$0xff] }
 0x155   :  { %534 = vst.msk [vmem:[#allocation3 + $0x18] sm:$0xff] %vm530_vm4, %v524_v31  ;;  %v541_v6 = vld [vmem:[#allocation3] ss:$2 sm:$0xff] }
 0x156   :  { %v6393_v36 = vpop.eup %6392  ;;  %v484_v38 = vmul.f32 %v475_v33, %v434_v24  ;;  %6398 = vtanh.f32 %v501_v32 }
 0x157   :  { %v516_v37 = vadd.f32 1.0, %v6393_v36 }
 0x158   :  { %v6395_v40 = vpop.eup %6394  ;;  %v493_v41 = vadd.f32 %v484_v38, %v434_v24 }
 0x159   :  { %v525_v42 = vmul.f32 %v516_v37, %v453_v39  ;;  %v517_v44 = vadd.f32 1.0, %v6395_v40 }
 0x15a   :  { %v502_v45 = vmul.f32 0.7978846, %v493_v41  ;;  %v714_v15 = vld [vmem:[#allocation3 + $0x2] ss:$2 sm:$0xff] }
 0x15b   :  { %535 = vst.msk [vmem:[#allocation3 + $0x20] sm:$0xff] %vm530_vm4, %v525_v42  ;;  %v526_v47 = vmul.f32 %v517_v44, %v454_v43 }
 0x15c   :  { %6400 = vtanh.f32 %v502_v45  ;;  %v558_v49 = vld [vmem:[#allocation3 + $0x11] ss:$2 sm:$0xff]  ;;  %v543_v5 = vld [vmem:[#allocation3 + $0x10] ss:$2 sm:$0xff] }
 0x15d   :  { %536 = vst.msk [vmem:[#allocation3 + $0x28] sm:$0xff] %vm530_vm4, %v526_v47  ;;  %v568_v52 = vpack.c.bf16 %v558_v49, %v556_v48  ;;  %v552_v8 = vpack.c.bf16 %v543_v5, %v541_v6 }
 0x15e   :  { %v6397_v50 = vpop.eup %6396 }
 0x15f   :  { %v518_v54 = vadd.f32 1.0, %v6397_v50  ;;  %5686 = vmatmul.mubr.msk.bf16.vlgmr.msra.gmra.mrb[0].mxu1 %vm530_vm4, %v568_v52 }
 0x160   :  { %v6399_v51 = vpop.eup %6398  ;;  %5698 = vmatpush3.bf16.msra.mxu1 %v6343_v46  ;;  %5689 = vmatprep.mubr.msk.bf16.mxu1 %vm6613_vm2, %v6612_v0 }
 0x161   :  { %v527_v55 = vmul.f32 %v518_v54, %v455_v53  ;;  %v519_v57 = vadd.f32 1.0, %v6399_v51  ;;  %5711 = vmatprep.subr.bf16.mxu1 %v6612_v0 }
 0x162   :  { %v716_v14 = vld [vmem:[#allocation3 + $0x12] ss:$2 sm:$0xff] }
 0x163   :  { %537 = vst.msk [vmem:[#allocation3 + $0x30] sm:$0xff] %vm530_vm4, %v527_v55  ;;  %v528_v58 = vmul.f32 %v519_v57, %v456_v56  ;;  %v726_v16 = vpack.c.bf16 %v716_v14, %v714_v15 }
 0x164   :  { %v560_v63 = vld [vmem:[#allocation3 + $0x21] ss:$2 sm:$0xff]  ;;  %v545_v10 = vld [vmem:[#allocation3 + $0x20] ss:$2 sm:$0xff] }
 0x165   :  { %538 = vst.msk [vmem:[#allocation3 + $0x38] sm:$0xff] %vm530_vm4, %v528_v58 }
 0x166   :  { %v6401_v59 = vpop.eup %6400 }
 0x167   :  { %v520_v61 = vadd.f32 1.0, %v6401_v59 }
 0x169   :  { %v529_v62 = vmul.f32 %v520_v61, %v457_v60 }
 0x16a   :  { %v718_v18 = vld [vmem:[#allocation3 + $0x22] ss:$2 sm:$0xff] }
 0x16b   :  { %540 = vst.msk [vmem:[#allocation3 + $0x40] sm:$0x7] %vm539_vm5, %v529_v62 }
 0x16c   :  { %v562_v1 = vld [vmem:[#allocation3 + $0x31] ss:$2 sm:$0xff]  ;;  %v547_v9 = vld [vmem:[#allocation3 + $0x30] ss:$2 sm:$0xff] }
 0x16d   :  { %v569_v2 = vpack.c.bf16 %v562_v1, %v560_v63  ;;  %v553_v11 = vpack.c.bf16 %v547_v9, %v545_v10 }
 0x16f   :  { %5690 = vmatmul.mubr.msk.bf16.gmra.mrb[4].mxu1 %vm530_vm4, %v569_v2 }
 0x170   :  { %5693 = vmatprep.mubr.msk.bf16.mxu1 %vm6613_vm2, %v6612_v0 }
 0x172   :  { %v564_v3 = vld [vmem:[#allocation3 + $0x41] ss:$2 sm:$0x1]  ;;  %v549_v12 = vld [vmem:[#allocation3 + $0x40] ss:$2 sm:$0x1] }
 0x173   :  { %v570_v4 = vpack.c.bf16 %v564_v3, %v564_v3  ;;  %v554_v13 = vpack.c.bf16 %v549_v12, %v549_v12  ;;  %v720_v17 = vld [vmem:[#allocation3 + $0x32] ss:$2 sm:$0xff]  ;;  %v722_v20 = vld [vmem:[#allocation3 + $0x42] ss:$2 sm:$0x1] }
 0x174   :  { %v727_v19 = vpack.c.bf16 %v720_v17, %v718_v18  ;;  %v728_v21 = vpack.c.bf16 %v722_v20, %v722_v20  ;;  %v6347_v20 = vld [vmem:[%s8025_s3] sm:$0xff]  }
 0x177   :  { %5694 = vmatmul.mubr.msk.bf16.gmra.mrb[8].mxu1 %vm530_vm4, %v570_v4 }
 0x178   :  { %5699 = vmatprep.mubr.msk.bf16.mxu1 %vm6613_vm2, %v6612_v0 }
 0x17f   :  { %5700 = vmatmul.mubr.msk.bf16.vlgmr.msra.gmra.mrb[0].mxu1 %vm530_vm4, %v552_v8 }
 0x180   :  { %5712 = vmatpush3.bf16.msra.mxu1 %v6344_v7  ;;  %5703 = vmatprep.mubr.msk.bf16.mxu1 %vm6613_vm2, %v6612_v0 }
 0x181   :  { %5725 = vmatprep.subr.bf16.mxu1 %v6612_v0 }
 0x187   :  { %5704 = vmatmul.mubr.msk.bf16.gmra.mrb[4].mxu1 %vm530_vm4, %v553_v11 }
 0x188   :  { %5707 = vmatprep.mubr.msk.bf16.mxu1 %vm6613_vm2, %v6612_v0 }
 0x18f   :  { %5708 = vmatmul.mubr.msk.bf16.gmra.mrb[8].mxu1 %vm530_vm4, %v554_v13 }
 0x190   :  { %5713 = vmatprep.mubr.msk.bf16.mxu1 %vm6613_vm2, %v6612_v0 }
 0x197   :  { %5714 = vmatmul.mubr.msk.bf16.vlgmr.msra.gmra.mrb[0].mxu1 %vm530_vm4, %v726_v16 }
 0x198   :  { %5717 = vmatprep.mubr.msk.bf16.mxu1 %vm6613_vm2, %v6612_v0  ;;  %5726 = vmatpush3.bf16.msra.mxu1 %v6345_v22  ;;  %v6348_v22 = vld [vmem:[%s8025_s3 + $0x8] sm:$0xff]  }
 0x199   :  { %5727 = vmatprep.subr.bf16.mxu1 %v6612_v0 }
 0x19c   :  { %5728 = vmatpush3.bf16.msra.mxu1 %v6346_v23 }
 0x19d   :  { %5733 = vmatprep.subr.bf16.mxu1 %v6612_v0 }
 0x19f   :  { %5718 = vmatmul.mubr.msk.bf16.gmra.mrb[4].mxu1 %vm530_vm4, %v727_v19 }
 0x1a0   :  { %5721 = vmatprep.mubr.msk.bf16.mxu1 %vm6613_vm2, %v6612_v0 }
 0x1a7   :  { %5722 = vmatmul.mubr.msk.bf16.gmra.mrb[8].mxu1 %vm530_vm4, %v728_v21 }
 0x1a8   :  { %5729 = vmatprep.mubr.msk.bf16.mxu1 %vm6613_vm2, %v6612_v0 }
 0x26a   :  { %v778_v24 = vpop.f32.mrb[0].mxu1 }
 0x26b   :  { %v810_v25 = vmul.f32 0.044715, %v778_v24  ;;  %v5715_v26 = vpop.f32.mrb[1].mxu1  ;;  %v805_v60 = vmul.f32 0.5, %v778_v24 }
 0x26c   :  { %v781_v27 = vpop.f32.mrb[2].mxu1 }
 0x26d   :  { %v815_v28 = vmul.f32 %v810_v25, %v778_v24  ;;  %v811_v29 = vmul.f32 0.044715, %v781_v27  ;;  %v5716_v30 = vpop.f32.mrb[3].mxu1  ;;  %v806_v2 = vmul.f32 0.5, %v781_v27  ;;  %v6349_v25 = vld [vmem:[%s8025_s3 + $0x20] sm:$0xff]  }
 0x26f   :  { %v820_v31 = vmul.f32 %v815_v28, %v778_v24  ;;  %v816_v33 = vmul.f32 %v811_v29, %v781_v27 }
 0x271   :  { %v825_v34 = vadd.f32 %v820_v31, %v778_v24  ;;  %v821_v32 = vmul.f32 %v816_v33, %v781_v27  ;;  %v6351_v31 = vld [vmem:[%s8026_s4 + $0x10] sm:$0xff]   ;;  %v6352_v33 = vld [vmem:[%s8026_s4 + $0x18] sm:$0xff]  }
 0x272   :  { %v786_v35 = vpop.f32.mrb[4].mxu1 }
 0x273   :  { %v830_v36 = vmul.f32 0.7978846, %v825_v34  ;;  %v826_v38 = vadd.f32 %v821_v32, %v781_v27  ;;  %v812_v39 = vmul.f32 0.044715, %v786_v35  ;;  %v5719_v37 = vpop.f32.mrb[5].mxu1  ;;  %v807_v7 = vmul.f32 0.5, %v786_v35 }
 0x274   :  { %v789_v40 = vpop.f32.mrb[6].mxu1  ;;  %v6350_v27 = vld [vmem:[%s8025_s3 + $0x28] sm:$0xff]   ;;  %v5265_v34 = vld [vmem:[%s8041_s23 + $0x4] sm:$0xf] }
 0x275   :  { %6402 = vtanh.f32 %v830_v36  ;;  %v831_v41 = vmul.f32 0.7978846, %v826_v38  ;;  %v817_v42 = vmul.f32 %v812_v39, %v786_v35  ;;  %v5720_v43 = vpop.f32.mrb[7].mxu1  ;;  %v813_v44 = vmul.f32 0.044715, %v789_v40 }
 0x276   :  { %v808_v11 = vmul.f32 0.5, %v789_v40  ;;  %v1367_v32 = vld [vmem:[#allocation2 + $0x1] ss:$2 sm:$0xff]  ;;  %v1398_v36 = vsel %vm159_vm0, %v5265_v34, 0 }
 0x277   :  { %6404 = vtanh.f32 %v831_v41  ;;  %v822_v45 = vmul.f32 %v817_v42, %v786_v35  ;;  %v818_v47 = vmul.f32 %v813_v44, %v789_v40  ;;  %5774 = vmatpush3.bf16.msra.mxu0 %v1398_v36  ;;  %v1361_v39 = vld [vmem:[%s8041_s23] sm:$0xf]  ;;  %v1370_v41 = vld [vmem:[#allocation2 + $0x31] ss:$2 sm:$0xff] }
 0x278   :  { %5795 = vmatprep.subr.bf16.mxu0 %v6612_v0  ;;  %v1488_v37 = vsel %vm159_vm0, %v1361_v39, 0  ;;  %v1371_v43 = vld [vmem:[#allocation2 + $0x41] ss:$2 sm:$0xff]  ;;  %v1372_v44 = vld [vmem:[#allocation2 + $0x51] ss:$2 sm:$0xff] }
 0x279   :  { %v827_v48 = vadd.f32 %v822_v45, %v786_v35  ;;  %v823_v49 = vmul.f32 %v818_v47, %v789_v40  ;;  %v1368_v35 = vld [vmem:[#allocation2 + $0x11] ss:$2 sm:$0xff]  ;;  %v1379_v45 = vpack.c.bf16 %v1372_v44, %v1371_v43  ;;  %v1373_v47 = vld [vmem:[#allocation2 + $0x61] ss:$2 sm:$0xff] }
 0x27a   :  { %v794_v46 = vpop.f32.mrb[8].mxu1  ;;  %v1377_v38 = vpack.c.bf16 %v1368_v35, %v1367_v32  ;;  %v1568_v32 = vld [vmem:[#allocation2 + $0x62] ss:$2 sm:$0xff]  ;;  %v1569_v35 = vld [vmem:[#allocation2 + $0x72] ss:$2 sm:$0xff] }
 0x27b   :  { %v832_v50 = vmul.f32 0.7978846, %v827_v48  ;;  %v814_v52 = vmul.f32 0.044715, %v794_v46  ;;  %v5723_v53 = vpop.f32.mrb[9].mxu1  ;;  %v828_v54 = vadd.f32 %v823_v49, %v789_v40  ;;  %v809_v15 = vmul.f32 0.5, %v794_v46 }
 0x27c   :  { %v797_v51 = vpop.f32.mrb[10].mxu1  ;;  %5776 = vmatmul.mubr.msk.bf16.vlgmr.msra.gmra.mrb[20].mxu0 %vm77_vm1, %v1377_v38  ;;  %v1369_v40 = vld [vmem:[#allocation2 + $0x21] ss:$2 sm:$0xff]  ;;  %v1374_v48 = vld [vmem:[#allocation2 + $0x71] ss:$2 sm:$0xff]  ;;  %v1575_v38 = vpack.c.bf16 %v1569_v35, %v1568_v32 }
 0x27d   :  { %6406 = vtanh.f32 %v832_v50  ;;  %v819_v55 = vmul.f32 %v814_v52, %v794_v46  ;;  %v5724_v56 = vpop.f32.mrb[11].mxu1  ;;  %v833_v57 = vmul.f32 0.7978846, %v828_v54  ;;  %5779 = vmatprep.mubr.msk.bf16.mxu0 %vm6613_vm2, %v6612_v0  ;;  %5796 = vmatpush3.bf16.msra.mxu0 %v1488_v37  ;;  %v1378_v42 = vpack.c.bf16 %v1370_v41, %v1369_v40  ;;  %v1352_v52 = vld [vmem:[#allocation2] ss:$2 sm:$0xff] }
 0x27e   :  { %5817 = vmatprep.subr.bf16.mxu0 %v6612_v0  ;;  %v1380_v49 = vpack.c.bf16 %v1374_v48, %v1373_v47  ;;  %v1353_v53 = vld [vmem:[#allocation2 + $0x10] ss:$2 sm:$0xff]  ;;  %v5276_v54 = vld [vmem:[%s8041_s23 + $0x8] sm:$0xf]  ;;  %v6353_v40 = vld [vmem:[%s8026_s4] sm:$0xff]  }
 0x27f   :  { %v6403_v58 = vpop.eup %6402  ;;  %v824_v59 = vmul.f32 %v819_v55, %v794_v46  ;;  %6408 = vtanh.f32 %v833_v57  ;;  %v1362_v51 = vpack.c.bf16 %v1353_v53, %v1352_v52  ;;  %v1593_v55 = vsel %vm159_vm0, %v5276_v54, 0  ;;  %v1354_v56 = vld [vmem:[#allocation2 + $0x20] ss:$2 sm:$0xff]  ;;  %v1355_v57 = vld [vmem:[#allocation2 + $0x30] ss:$2 sm:$0xff] }
 0x280   :  { %v840_v61 = vadd.f32 1.0, %v6403_v58  ;;  %v1363_v58 = vpack.c.bf16 %v1355_v57, %v1354_v56  ;;  %v1570_v39 = vld [vmem:[#allocation2 + $0x82] ss:$2 sm:$0x7]  ;;  %v6354_v43 = vld [vmem:[%s8026_s4 + $0x8] sm:$0xff]  }
 0x281   :  { %v6405_v62 = vpop.eup %6404  ;;  %v829_v63 = vadd.f32 %v824_v59, %v794_v46  ;;  %v1375_v46 = vld [vmem:[#allocation2 + $0x81] ss:$2 sm:$0x7]  ;;  %v1356_v59 = vld [vmem:[#allocation2 + $0x40] ss:$2 sm:$0xff] }
 0x282   :  { %v845_v1 = vmul.f32 %v840_v61, %v805_v60  ;;  %v841_v3 = vadd.f32 1.0, %v6405_v62  ;;  %v1381_v50 = vpack.c.bf16 %v1375_v46, %v1375_v46  ;;  %v1357_v60 = vld [vmem:[#allocation2 + $0x50] ss:$2 sm:$0xff]  ;;  %v1358_v62 = vld [vmem:[#allocation2 + $0x60] ss:$2 sm:$0xff] }
 0x283   :  { %v834_v4 = vmul.f32 0.7978846, %v829_v63  ;;  %v1364_v61 = vpack.c.bf16 %v1357_v60, %v1356_v59  ;;  %v1359_v63 = vld [vmem:[#allocation2 + $0x70] ss:$2 sm:$0xff] }
 0x284   :  { %851 = vst.msk [vmem:[#allocation4] sm:$0xff] %vm850_vm6, %v845_v1  ;;  %v846_v5 = vmul.f32 %v841_v3, %v806_v2  ;;  %5780 = vmatmul.mubr.msk.bf16.gmra.mrb[24].mxu0 %vm77_vm1, %v1378_v42  ;;  %v1365_v1 = vpack.c.bf16 %v1359_v63, %v1358_v62  ;;  %v1360_v2 = vld [vmem:[#allocation2 + $0x80] ss:$2 sm:$0x7]  ;;  %v1576_v42 = vpack.c.bf16 %v1570_v39, %v1570_v39 }
 0x285   :  { %6410 = vtanh.f32 %v834_v4  ;;  %5783 = vmatprep.mubr.msk.bf16.mxu0 %vm6613_vm2, %v6612_v0  ;;  %v1366_v3 = vpack.c.bf16 %v1360_v2, %v1360_v2 }
 0x286   :  { %852 = vst.msk [vmem:[#allocation4 + $0x8] sm:$0xff] %vm850_vm6, %v846_v5  ;;  %v1562_v5 = vld [vmem:[#allocation2 + $0x2] ss:$2 sm:$0xff] }
 0x287   :  { %v6407_v6 = vpop.eup %6406 }
 0x288   :  { %v842_v8 = vadd.f32 1.0, %v6407_v6  ;;  %v1563_v6 = vld [vmem:[#allocation2 + $0x12] ss:$2 sm:$0xff] }
 0x289   :  { %v6409_v9 = vpop.eup %6408 }
 0x28a   :  { %v847_v10 = vmul.f32 %v842_v8, %v807_v7  ;;  %v843_v12 = vadd.f32 1.0, %v6409_v9 }
 0x28c   :  { %853 = vst.msk [vmem:[#allocation4 + $0x10] sm:$0xff] %vm850_vm6, %v847_v10  ;;  %v848_v13 = vmul.f32 %v843_v12, %v808_v11  ;;  %5784 = vmatmul.mubr.msk.bf16.gmra.mrb[28].mxu0 %vm77_vm1, %v1379_v45 }
 0x28d   :  { %v866_v18 = vld [vmem:[#allocation4 + $0x1] ss:$2 sm:$0xff]  ;;  %v857_v24 = vld [vmem:[#allocation4] ss:$2 sm:$0xff]  ;;  %5787 = vmatprep.mubr.msk.bf16.mxu0 %vm6613_vm2, %v6612_v0 }
 0x28e   :  { %854 = vst.msk [vmem:[#allocation4 + $0x18] sm:$0xff] %vm850_vm6, %v848_v13  ;;  %v1572_v13 = vpack.c.bf16 %v1563_v6, %v1562_v5 }
 0x28f   :  { %v6411_v14 = vpop.eup %6410 }
 0x290   :  { %v844_v16 = vadd.f32 1.0, %v6411_v14 }
 0x292   :  { %v849_v17 = vmul.f32 %v844_v16, %v809_v15 }
 0x293   :  { %v988_v29 = vld [vmem:[#allocation4 + $0x2] ss:$2 sm:$0xff] }
 0x294   :  { %856 = vst.msk [vmem:[#allocation4 + $0x20] sm:$0x1] %vm855_vm7, %v849_v17  ;;  %5788 = vmatmul.mubr.msk.bf16.gmra.mrb[32].mxu0 %vm77_vm1, %v1380_v49 }
 0x295   :  { %v868_v19 = vld [vmem:[#allocation4 + $0x11] ss:$2 sm:$0xff]  ;;  %v859_v23 = vld [vmem:[#allocation4 + $0x10] ss:$2 sm:$0xff]  ;;  %5791 = vmatprep.mubr.msk.bf16.mxu0 %vm6613_vm2, %v6612_v0 }
 0x296   :  { %v874_v21 = vpack.c.bf16 %v868_v19, %v866_v18  ;;  %v864_v26 = vpack.c.bf16 %v859_v23, %v857_v24  ;;  %v1564_v18 = vld [vmem:[#allocation2 + $0x22] ss:$2 sm:$0xff]  ;;  %v1565_v19 = vld [vmem:[#allocation2 + $0x32] ss:$2 sm:$0xff] }
 0x297   :  { %v1573_v23 = vpack.c.bf16 %v1565_v19, %v1564_v18  ;;  %v1566_v24 = vld [vmem:[#allocation2 + $0x42] ss:$2 sm:$0xff] }
 0x298   :  { %5730 = vmatmul.mubr.msk.bf16.vlgmr.msra.gmra.mrb[12].mxu1 %vm850_vm6, %v874_v21 }
 0x299   :  { %5734 = vmatpush3.bf16.msra.mxu1 %v6347_v20  ;;  %5737 = vmatprep.mubr.msk.bf16.mxu1 %vm6613_vm2, %v6612_v0 }
 0x29a   :  { %5735 = vmatprep.subr.bf16.mxu1 %v6612_v0 }
 0x29b   :  { %v990_v28 = vld [vmem:[#allocation4 + $0x12] ss:$2 sm:$0xff] }
 0x29c   :  { %v996_v30 = vpack.c.bf16 %v990_v28, %v988_v29  ;;  %5792 = vmatmul.mubr.msk.bf16.gmra.mrb[36].mxu0 %vm77_vm1, %v1381_v50 }
 0x29d   :  { %5736 = vmatpush3.bf16.msra.mxu1 %v6348_v22  ;;  %5797 = vmatprep.mubr.msk.bf16.mxu0 %vm6613_vm2, %v6612_v0 }
 0x29e   :  { %5741 = vmatprep.subr.bf16.mxu1 %v6612_v0 }
 0x2a4   :  { %5738 = vmatmul.mubr.msk.bf16.vlgmr.msra.gmra.mrb[12].mxu1 %vm850_vm6, %v864_v26  ;;  %5798 = vmatmul.mubr.msk.bf16.vlgmr.msra.gmra.mrb[20].mxu0 %vm77_vm1, %v1362_v51 }
 0x2a5   :  { %5742 = vmatpush3.bf16.msra.mxu1 %v6349_v25  ;;  %5745 = vmatprep.mubr.msk.bf16.mxu1 %vm6613_vm2, %v6612_v0  ;;  %v1567_v25 = vld [vmem:[#allocation2 + $0x52] ss:$2 sm:$0xff] }
 0x2a6   :  { %5743 = vmatprep.subr.bf16.mxu1 %v6612_v0  ;;  %5801 = vmatprep.mubr.msk.bf16.mxu0 %vm6613_vm2, %v6612_v0  ;;  %v1574_v26 = vpack.c.bf16 %v1567_v25, %v1566_v24 }
 0x2a7   :  { %5818 = vmatpush3.bf16.msra.mxu0 %v1593_v55 }
 0x2a8   :  { %5929 = vmatprep.subr.bf16.mxu0 %v6612_v0 }
 0x2a9   :  { %5744 = vmatpush3.bf16.msra.mxu1 %v6350_v27 }
 0x2aa   :  { %5749 = vmatprep.subr.bf16.mxu1 %v6612_v0 }
 0x2ac   :  { %5802 = vmatmul.mubr.msk.bf16.gmra.mrb[24].mxu0 %vm77_vm1, %v1363_v58 }
 0x2ad   :  { %5805 = vmatprep.mubr.msk.bf16.mxu0 %vm6613_vm2, %v6612_v0 }
 0x2b0   :  { %5746 = vmatmul.mubr.msk.bf16.vlgmr.msra.gmra.mrb[12].mxu1 %vm850_vm6, %v996_v30 }
 0x2b1   :  { %5753 = vmatprep.mubr.msk.bf16.mxu1 %vm6613_vm2, %v6612_v0  ;;  %5750 = vmatpush3.bf16.msra.mxu1 %v6351_v31 }
 0x2b2   :  { %5751 = vmatprep.subr.bf16.mxu1 %v6612_v0 }
 0x2b4   :  { %5806 = vmatmul.mubr.msk.bf16.gmra.mrb[28].mxu0 %vm77_vm1, %v1364_v61 }
 0x2b5   :  { %5752 = vmatpush3.bf16.msra.mxu1 %v6352_v33  ;;  %5809 = vmatprep.mubr.msk.bf16.mxu0 %vm6613_vm2, %v6612_v0 }
 0x2b6   :  { %5757 = vmatprep.subr.bf16.mxu1 %v6612_v0 }
 0x2bc   :  { %5810 = vmatmul.mubr.msk.bf16.gmra.mrb[32].mxu0 %vm77_vm1, %v1365_v1 }
 0x2bd   :  { %5813 = vmatprep.mubr.msk.bf16.mxu0 %vm6613_vm2, %v6612_v0 }
 0x2c4   :  { %5814 = vmatmul.mubr.msk.bf16.gmra.mrb[36].mxu0 %vm77_vm1, %v1366_v3 }
 0x2c5   :  { %5819 = vmatprep.mubr.msk.bf16.mxu0 %vm6613_vm2, %v6612_v0 }
 0x2cc   :  { %5820 = vmatmul.mubr.msk.bf16.vlgmr.msra.gmra.mrb[20].mxu0 %vm77_vm1, %v1572_v13 }
 0x2cd   :  { %5823 = vmatprep.mubr.msk.bf16.mxu0 %vm6613_vm2, %v6612_v0 }
 0x2d4   :  { %5824 = vmatmul.mubr.msk.bf16.gmra.mrb[24].mxu0 %vm77_vm1, %v1573_v23 }
 0x2d5   :  { %5827 = vmatprep.mubr.msk.bf16.mxu0 %vm6613_vm2, %v6612_v0 }
 0x2dc   :  { %5828 = vmatmul.mubr.msk.bf16.gmra.mrb[28].mxu0 %vm77_vm1, %v1574_v26 }
 0x2dd   :  { %5831 = vmatprep.mubr.msk.bf16.mxu0 %vm6613_vm2, %v6612_v0 }
 0x2e4   :  { %5832 = vmatmul.mubr.msk.bf16.gmra.mrb[32].mxu0 %vm77_vm1, %v1575_v38 }
 0x2e5   :  { %5835 = vmatprep.mubr.msk.bf16.mxu0 %vm6613_vm2, %v6612_v0 }
 0x2ec   :  { %5836 = vmatmul.mubr.msk.bf16.gmra.mrb[36].mxu0 %vm77_vm1, %v1576_v42 }
 0x2ed   :  { %5933 = vmatprep.mubr.msk.bf16.mxu0 %vm6613_vm2, %v6612_v0 }
 0x383   :  { %v1046_v4 = vpop.f32.mrb[12].mxu1 }
 0x384   :  { %v1057_v7 = vmul.f32 0.044715, %v1046_v4  ;;  %v5747_v8 = vpop.f32.mrb[13].mxu1  ;;  %v1055_v28 = vmul.f32 0.5, %v1046_v4 }
 0x385   :  { %v1049_v9 = vpop.f32.mrb[14].mxu1 }
 0x386   :  { %v1059_v10 = vmul.f32 %v1057_v7, %v1046_v4  ;;  %v1058_v11 = vmul.f32 0.044715, %v1049_v9  ;;  %v5748_v12 = vpop.f32.mrb[15].mxu1  ;;  %v1056_v33 = vmul.f32 0.5, %v1049_v9 }
 0x388   :  { %v1061_v14 = vmul.f32 %v1059_v10, %v1046_v4  ;;  %v1060_v15 = vmul.f32 %v1058_v11, %v1049_v9 }
 0x38a   :  { %v1063_v16 = vadd.f32 %v1061_v14, %v1046_v4  ;;  %v1062_v17 = vmul.f32 %v1060_v15, %v1049_v9 }
 0x38c   :  { %v1065_v20 = vmul.f32 0.7978846, %v1063_v16  ;;  %v1064_v21 = vadd.f32 %v1062_v17, %v1049_v9 }
 0x38e   :  { %6412 = vtanh.f32 %v1065_v20  ;;  %v1066_v22 = vmul.f32 0.7978846, %v1064_v21 }
 0x390   :  { %6414 = vtanh.f32 %v1066_v22 }
 0x398   :  { %v6413_v27 = vpop.eup %6412 }
 0x399   :  { %v1069_v29 = vadd.f32 1.0, %v6413_v27 }
 0x39a   :  { %v6415_v30 = vpop.eup %6414 }
 0x39b   :  { %v1071_v31 = vmul.f32 %v1069_v29, %v1055_v28  ;;  %v1070_v34 = vadd.f32 1.0, %v6415_v30 }
 0x39d   :  { %1073 = vst.msk [vmem:[#allocation5] sm:$0xff] %vm850_vm6, %v1071_v31  ;;  %v1072_v36 = vmul.f32 %v1070_v34, %v1056_v33 }
 0x39f   :  { %1074 = vst.msk [vmem:[#allocation5 + $0x8] sm:$0xff] %vm850_vm6, %v1072_v36  ;;  %v1629_v60 = vpop.f32.mrb[20].mxu0 }
 0x3a0   :  { %v1685_v61 = vmul.f32 0.044715, %v1629_v60  ;;  %v5821_v62 = vpop.f32.mrb[21].mxu0 }
 0x3a1   :  { %v7122_v63 = vpop.f32.mrb[22].mxu0 }
 0x3a2   :  { %v1694_v1 = vmul.f32 %v1685_v61, %v1629_v60  ;;  %v1686_v2 = vmul.f32 0.044715, %v7122_v63  ;;  %v5822_v3 = vpop.f32.mrb[23].mxu0 }
 0x3a4   :  { %v1703_v5 = vmul.f32 %v1694_v1, %v1629_v60  ;;  %v1695_v6 = vmul.f32 %v1686_v2, %v7122_v63  ;;  %v1677_v2 = vmul.f32 0.5, %v7122_v63 }
 0x3a6   :  { %v1082_v37 = vld [vmem:[#allocation5 + $0x1] ss:$2 sm:$0xff]  ;;  %v1075_v44 = vld [vmem:[#allocation5] ss:$2 sm:$0xff]  ;;  %v1712_v10 = vadd.f32 %v1703_v5, %v1629_v60  ;;  %v1704_v11 = vmul.f32 %v1695_v6, %v7122_v63 }
 0x3a7   :  { %v1088_v41 = vpack.c.bf16 %v1082_v37, %v1082_v37  ;;  %v1080_v45 = vpack.c.bf16 %v1075_v44, %v1075_v44  ;;  %v7125_v4 = vpop.f32.mrb[24].mxu0 }
 0x3a8   :  { %v1687_v7 = vmul.f32 0.044715, %v7125_v4  ;;  %v5825_v8 = vpop.f32.mrb[25].mxu0  ;;  %v1721_v16 = vmul.f32 0.7978846, %v1712_v10  ;;  %v1713_v17 = vadd.f32 %v1704_v11, %v7122_v63  ;;  %v1678_v10 = vmul.f32 0.5, %v7125_v4 }
 0x3a9   :  { %5754 = vmatmul.mubr.msk.bf16.vlgmr.msra.gmra.mrb[16].mxu1 %vm850_vm6, %v1088_v41  ;;  %v7129_v9 = vpop.f32.mrb[26].mxu0 }
 0x3aa   :  { %5758 = vmatpush3.bf16.msra.mxu1 %v6353_v40  ;;  %5761 = vmatprep.mubr.msk.bf16.mxu1 %vm6613_vm2, %v6612_v0  ;;  %v1696_v12 = vmul.f32 %v1687_v7, %v7125_v4  ;;  %v5826_v13 = vpop.f32.mrb[27].mxu0  ;;  %v1688_v14 = vmul.f32 0.044715, %v7129_v9  ;;  %v1722_v23 = vmul.f32 0.7978846, %v1713_v17 }
 0x3ab   :  { %5759 = vmatprep.subr.bf16.mxu1 %v6612_v0 }
 0x3ac   :  { %v1705_v18 = vmul.f32 %v1696_v12, %v7125_v4  ;;  %v1697_v20 = vmul.f32 %v1688_v14, %v7129_v9  ;;  %v1679_v14 = vmul.f32 0.5, %v7129_v9 }
 0x3ae   :  { %5760 = vmatpush3.bf16.msra.mxu1 %v6354_v43  ;;  %v1714_v24 = vadd.f32 %v1705_v18, %v7125_v4  ;;  %v1706_v26 = vmul.f32 %v1697_v20, %v7129_v9 }
 0x3af   :  { %5765 = vmatprep.subr.bf16.mxu1 %v6612_v0  ;;  %v7134_v15 = vpop.f32.mrb[28].mxu0 }
 0x3b0   :  { %v5829_v19 = vpop.f32.mrb[29].mxu0  ;;  %v1689_v21 = vmul.f32 0.044715, %v7134_v15  ;;  %v1723_v30 = vmul.f32 0.7978846, %v1714_v24  ;;  %v1715_v34 = vadd.f32 %v1706_v26, %v7129_v9  ;;  %v1680_v18 = vmul.f32 0.5, %v7134_v15 }
 0x3b1   :  { %v7140_v22 = vpop.f32.mrb[30].mxu0 }
 0x3b2   :  { %v5830_v25 = vpop.f32.mrb[31].mxu0  ;;  %v1698_v27 = vmul.f32 %v1689_v21, %v7134_v15  ;;  %v1690_v28 = vmul.f32 0.044715, %v7140_v22  ;;  %v1724_v40 = vmul.f32 0.7978846, %v1715_v34  ;;  %v1681_v21 = vmul.f32 0.5, %v7140_v22 }
 0x3b4   :  { %v1707_v32 = vmul.f32 %v1698_v27, %v7134_v15  ;;  %v1699_v35 = vmul.f32 %v1690_v28, %v7140_v22 }
 0x3b5   :  { %5762 = vmatmul.mubr.msk.bf16.vlgmr.msra.gmra.mrb[16].mxu1 %vm850_vm6, %v1080_v45 }
 0x3b6   :  { %5769 = vmatprep.mubr.msk.bf16.mxu1 %vm6613_vm2, %v6612_v0  ;;  %v1716_v41 = vadd.f32 %v1707_v32, %v7134_v15  ;;  %v1708_v42 = vmul.f32 %v1699_v35, %v7140_v22 }
 0x3b7   :  { %v7146_v29 = vpop.f32.mrb[32].mxu0 }
 0x3b8   :  { %v1691_v31 = vmul.f32 0.044715, %v7146_v29  ;;  %v5833_v33 = vpop.f32.mrb[33].mxu0  ;;  %v1682_v24 = vmul.f32 0.5, %v7146_v29 }
 0x3b9   :  { %v1656_v36 = vpop.f32.mrb[34].mxu0 }
 0x3ba   :  { %v1700_v38 = vmul.f32 %v1691_v31, %v7146_v29  ;;  %v1692_v39 = vmul.f32 0.044715, %v1656_v36  ;;  %v5834_v37 = vpop.f32.mrb[35].mxu0  ;;  %v1683_v28 = vmul.f32 0.5, %v1656_v36 }
 0x3bc   :  { %v1709_v44 = vmul.f32 %v1700_v38, %v7146_v29  ;;  %v1701_v45 = vmul.f32 %v1692_v39, %v1656_v36 }
 0x3bf   :  { %v1661_v43 = vpop.f32.mrb[36].mxu0 }
 0x3c0   :  { %v1684_v34 = vmul.f32 0.5, %v1661_v43 }
 0x488   :  { %v1193_v47 = vpop.f32.mrb[16].mxu1 }
 0x489   :  { %v1200_v48 = vmul.f32 0.044715, %v1193_v47  ;;  %v5763_v49 = vpop.f32.mrb[17].mxu1  ;;  %v1199_v56 = vmul.f32 0.5, %v1193_v47 }
 0x48a   :  { %v1196_v46 = vpop.f32.mrb[18].mxu1  ;;  %v1725_v49 = vmul.f32 0.7978846, %v1716_v41  ;;  %v7178_v41 = vld [vmem:[%s8027_s7] sm:$0xff]  }
 0x48b   :  { %v1201_v50 = vmul.f32 %v1200_v48, %v1193_v47  ;;  %v5764_v52 = vpop.f32.mrb[19].mxu1  ;;  %v5837_v48 = vpop.f32.mrb[37].mxu0  ;;  %v1717_v46 = vadd.f32 %v1708_v42, %v7140_v22  ;;  %5766 = vmatpush3.bf16.msra.mxu1 %v7178_v41  ;;  %v7184_v42 = vld [vmem:[%s8027_s7 + $0x8] sm:$0xff]  }
 0x48c   :  { %v1718_v52 = vadd.f32 %v1709_v44, %v7146_v29  ;;  %5767 = vmatprep.subr.bf16.mxu1 %v6612_v0  ;;  %v7192_v48 = vld [vmem:[%s8028_s5] ss:$0 sm:$0xff] }
 0x48d   :  { %v1202_v53 = vmul.f32 %v1201_v50, %v1193_v47  ;;  %v1664_v50 = vpop.f32.mrb[38].mxu0 }
 0x48f   :  { %v1203_v54 = vadd.f32 %v1202_v53, %v1193_v47  ;;  %v1693_v47 = vmul.f32 0.044715, %v1661_v43  ;;  %v1710_v53 = vmul.f32 %v1701_v45, %v1656_v36  ;;  %5768 = vmatpush3.bf16.msra.mxu1 %v7184_v42 }
 0x490   :  { %5839 = vmatprep.subr.bf16.mxu1 %v6612_v0 }
 0x491   :  { %v1204_v51 = vmul.f32 0.7978846, %v1203_v54  ;;  %v1702_v54 = vmul.f32 %v1693_v47, %v1661_v43  ;;  %v1719_v61 = vadd.f32 %v1710_v53, %v1656_v36  ;;  %v6357_v53 = vld [vmem:[%s8024_s2 + $0x8] sm:$0xff]  }
 0x493   :  { %6416 = vtanh.f32 %v1204_v51  ;;  %v5838_v51 = vpop.f32.mrb[39].mxu0  ;;  %v1711_v62 = vmul.f32 %v1702_v54, %v1661_v43  ;;  %v1728_v5 = vmul.f32 0.7978846, %v1719_v61 }
 0x494   :  { %6418 = vtanh.f32 %v1721_v16 }
 0x495   :  { %6420 = vtanh.f32 %v1722_v23  ;;  %v1720_v6 = vadd.f32 %v1711_v62, %v1661_v43 }
 0x496   :  { %6422 = vtanh.f32 %v1723_v30 }
 0x497   :  { %6424 = vtanh.f32 %v1724_v40 }
 0x498   :  { %6426 = vtanh.f32 %v1725_v49 }
 0x49d   :  { %v6417_v55 = vpop.eup %6416 }
 0x49e   :  { %v1206_v57 = vadd.f32 1.0, %v6417_v55  ;;  %v1676_v55 = vmul.f32 0.5, %v1629_v60  ;;  %v1729_v60 = vmul.f32 0.7978846, %v1720_v6  ;;  %v6359_v6 = vld [vmem:[%s8024_s2 + $0x10] sm:$0xff]  }
 0x4a0   :  { %v7118_v58 = vmul.f32 %v1206_v57, %v1199_v56  ;;  %v1726_v56 = vmul.f32 0.7978846, %v1717_v46  ;;  %v6419_v57 = vpop.eup %6418  ;;  %v7197_v46 = vld [vmem:[%s8029_s6] ss:$0 sm:$0xff] }
 0x4a1   :  { %v1739_v1 = vadd.f32 1.0, %v6419_v57  ;;  %v6421_v3 = vpop.eup %6420 }
 0x4a2   :  { %v1226_v59 = vsel %vm850_vm6, %v7118_v58, 0.0  ;;  %6428 = vtanh.f32 %v1726_v56  ;;  %v1740_v8 = vadd.f32 1.0, %v6421_v3  ;;  %v6423_v11 = vpop.eup %6422  ;;  %v6358_v56 = vld [vmem:[%s8024_s2] sm:$0xff]  }
 0x4a3   :  { %1227 = vadd.xlane.f32.xlu0 %v1226_v59  ;;  %v1727_v59 = vmul.f32 0.7978846, %v1718_v52  ;;  %v1748_v7 = vmul.f32 %v1739_v1, %v1676_v55  ;;  %v1741_v13 = vadd.f32 1.0, %v6423_v11  ;;  %v6425_v63 = vpop.eup %6424 }
 0x4a4   :  { %v1749_v12 = vmul.f32 %v1740_v8, %v1677_v2  ;;  %v1742_v17 = vadd.f32 1.0, %v6425_v63  ;;  %v6427_v19 = vpop.eup %6426 }
 0x4a5   :  { %6430 = vtanh.f32 %v1727_v59  ;;  %1757 = vst.msk [vmem:[#allocation3] sm:$0xff] %vm530_vm4, %v1748_v7  ;;  %v1750_v16 = vmul.f32 %v1741_v13, %v1678_v10  ;;  %v1743_v20 = vadd.f32 1.0, %v6427_v19 }
 0x4a6   :  { %6432 = vtanh.f32 %v1728_v5  ;;  %1758 = vst.msk [vmem:[#allocation3 + $0x8] sm:$0xff] %vm530_vm4, %v1749_v12  ;;  %v1751_v4 = vmul.f32 %v1742_v17, %v1679_v14 }
 0x4a7   :  { %6434 = vtanh.f32 %v1729_v60  ;;  %1759 = vst.msk [vmem:[#allocation3 + $0x10] sm:$0xff] %vm530_vm4, %v1750_v16  ;;  %v1752_v9 = vmul.f32 %v1743_v20, %v1680_v18  ;;  %v7246_v20 = vld [vmem:[%s8030_s9] sm:$0xff]  }
 0x4a8   :  { %1760 = vst.msk [vmem:[#allocation3 + $0x18] sm:$0xff] %vm530_vm4, %v1751_v4  ;;  %5930 = vmatpush3.bf16.msra.mxu0 %v7246_v20 }
 0x4a9   :  { %1761 = vst.msk [vmem:[#allocation3 + $0x20] sm:$0xff] %vm530_vm4, %v1752_v9  ;;  %5931 = vmatprep.subr.bf16.mxu0 %v6612_v0 }
 0x4ac   :  { %v6429_v23 = vpop.eup %6428 }
 0x4ad   :  { %v1744_v26 = vadd.f32 1.0, %v6429_v23  ;;  %v1776_v51 = vld [vmem:[#allocation3 + $0x1] ss:$2 sm:$0xff]  ;;  %v1766_v3 = vld [vmem:[#allocation3] ss:$2 sm:$0xff] }
 0x4ae   :  { %v1928_v13 = vld [vmem:[#allocation3 + $0x2] ss:$2 sm:$0xff] }
 0x4af   :  { %v6431_v25 = vpop.eup %6430  ;;  %v1753_v15 = vmul.f32 %v1744_v26, %v1681_v21  ;;  %v1777_v55 = vld [vmem:[#allocation3 + $0x11] ss:$2 sm:$0xff]  ;;  %v1767_v5 = vld [vmem:[#allocation3 + $0x10] ss:$2 sm:$0xff]  ;;  %v7251_v21 = vld [vmem:[%s8030_s9 + $0x8] sm:$0xff]  }
 0x4b0   :  { %v1745_v27 = vadd.f32 1.0, %v6431_v25  ;;  %v6433_v30 = vpop.eup %6432  ;;  %v1783_v57 = vpack.c.bf16 %v1777_v55, %v1776_v51  ;;  %v1773_v7 = vpack.c.bf16 %v1767_v5, %v1766_v3  ;;  %v1929_v14 = vld [vmem:[#allocation3 + $0x12] ss:$2 sm:$0xff]  ;;  %5932 = vmatpush3.bf16.msra.mxu0 %v7251_v21  ;;  %v6362_v23 = vld [vmem:[%s8025_s3 + $0x10] sm:$0xff]  }
 0x4b1   :  { %v1746_v33 = vadd.f32 1.0, %v6433_v30  ;;  %v6435_v32 = vpop.eup %6434  ;;  %1762 = vst.msk [vmem:[#allocation3 + $0x28] sm:$0xff] %vm530_vm4, %v1753_v15  ;;  %v1935_v63 = vpack.c.bf16 %v1929_v14, %v1928_v13  ;;  %5945 = vmatprep.subr.bf16.mxu0 %v6612_v0  ;;  %v7268_v25 = vld [vmem:[%s8031_s8] ss:$0 sm:$0xff] }
 0x4b2   :  { %v1754_v31 = vmul.f32 %v1745_v27, %v1682_v24  ;;  %v1747_v29 = vadd.f32 1.0, %v6435_v32  ;;  %v6363_v24 = vld [vmem:[%s8025_s3 + $0x18] sm:$0xff]  }
 0x4b3   :  { %v1755_v22 = vmul.f32 %v1746_v33, %v1683_v28 }
 0x4b4   :  { %1763 = vst.msk [vmem:[#allocation3 + $0x30] sm:$0xff] %vm530_vm4, %v1754_v31  ;;  %v1756_v35 = vmul.f32 %v1747_v29, %v1684_v34 }
 0x4b5   :  { %1764 = vst.msk [vmem:[#allocation3 + $0x38] sm:$0xff] %vm530_vm4, %v1755_v22 }
 0x4b6   :  { %1765 = vst.msk [vmem:[#allocation3 + $0x40] sm:$0x7] %vm539_vm5, %v1756_v35  ;;  %vm5172_vm5 = vcmask 8200  }
 0x4b8   :  { %v1778_v59 = vld [vmem:[#allocation3 + $0x21] ss:$2 sm:$0xff]  ;;  %v1768_v8 = vld [vmem:[#allocation3 + $0x20] ss:$2 sm:$0xff] }
 0x4bb   :  { %v1930_v16 = vld [vmem:[#allocation3 + $0x22] ss:$2 sm:$0xff] }
 0x4bc   :  { %v1779_v61 = vld [vmem:[#allocation3 + $0x31] ss:$2 sm:$0xff]  ;;  %v1769_v10 = vld [vmem:[#allocation3 + $0x30] ss:$2 sm:$0xff] }
 0x4bd   :  { %v1784_v62 = vpack.c.bf16 %v1779_v61, %v1778_v59  ;;  %v1780_v1 = vld [vmem:[#allocation3 + $0x41] ss:$2 sm:$0x1]  ;;  %v1774_v11 = vpack.c.bf16 %v1769_v10, %v1768_v8  ;;  %v1770_v60 = vld [vmem:[#allocation3 + $0x40] ss:$2 sm:$0x1] }
 0x4be   :  { %v1785_v2 = vpack.c.bf16 %v1780_v1, %v1780_v1  ;;  %v1775_v12 = vpack.c.bf16 %v1770_v60, %v1770_v60  ;;  %v1931_v17 = vld [vmem:[#allocation3 + $0x32] ss:$2 sm:$0xff]  ;;  %v1932_v19 = vld [vmem:[#allocation3 + $0x42] ss:$2 sm:$0x1] }
 0x4bf   :  { %v1936_v18 = vpack.c.bf16 %v1931_v17, %v1930_v16  ;;  %v1937_v4 = vpack.c.bf16 %v1932_v19, %v1932_v19 }
 0x530   :  { %v1228_v36 = vpop.xlane.xlu0 %1227 }
 0x531   :  { %v1230_v38 = vmul.f32 0.03125, %v1228_v36 }
 0x533   :  { %v1231_v39 = vsub.f32 %v7118_v58, %v1230_v38 }
 0x535   :  { %v1232_v37 = vmul.f32 %v1231_v39, %v1231_v39 }
 0x537   :  { %v1233_v40 = vsel %vm850_vm6, %v1232_v37, 0.0 }
 0x538   :  { %1234 = vadd.xlane.f32.xlu0 %v1233_v40 }
 0x5c5   :  { %v1235_v43 = vpop.xlane.xlu0 %1234 }
 0x5c6   :  { %v1236_v44 = vmul.f32 0.03125, %v1235_v43 }
 0x5c8   :  { %v1237_v45 = vadd.f32 1e-05, %v1236_v44 }
 0x5ca   :  { %6436 = vrsqrt.f32 %v1237_v45 }
 0x5d4   :  { %v6437_v47 = vpop.eup %6436 }
 0x5d5   :  { %v1239_v49 = vmul.f32 %v6437_v47, %v1231_v39 }
 0x5d7   :  { %v1246_v50 = vmul.f32 %v7192_v48, %v1239_v49 }
 0x5d9   :  { %v1253_v52 = vadd.f32 %v7197_v46, %v1246_v50 }
 0x5db   :  { %v1254_v54 = vpack.c.bf16 %v1253_v52, %v1253_v52 }
 0x5dd   :  { %5770 = vmatmul.mubr.msk.bf16.vlgmr.msra.gmra.mrb[20].mxu1 %vm850_vm6, %v1254_v54 }
 0x5de   :  { %5840 = vmatpush3.bf16.msra.mxu1 %v6357_v53  ;;  %5841 = vmatprep.mubr.msk.bf16.mxu1 %vm6613_vm2, %v6612_v0 }
 0x5df   :  { %5853 = vmatprep.subr.bf16.mxu1 %v6612_v0 }
 0x5e5   :  { %5842 = vmatmul.mubr.msk.bf16.vlgmr.msra.gmra.mrb[24].mxu1 %vm530_vm4, %v1783_v57 }
 0x5e6   :  { %5854 = vmatpush3.bf16.msra.mxu1 %v6358_v56  ;;  %5845 = vmatprep.mubr.msk.bf16.mxu1 %vm6613_vm2, %v6612_v0 }
 0x5e7   :  { %5867 = vmatprep.subr.bf16.mxu1 %v6612_v0 }
 0x5ed   :  { %5846 = vmatmul.mubr.msk.bf16.gmra.mrb[28].mxu1 %vm530_vm4, %v1784_v62 }
 0x5ee   :  { %5849 = vmatprep.mubr.msk.bf16.mxu1 %vm6613_vm2, %v6612_v0 }
 0x5f5   :  { %5850 = vmatmul.mubr.msk.bf16.gmra.mrb[32].mxu1 %vm530_vm4, %v1785_v2 }
 0x5f6   :  { %5855 = vmatprep.mubr.msk.bf16.mxu1 %vm6613_vm2, %v6612_v0 }
 0x5fd   :  { %5856 = vmatmul.mubr.msk.bf16.vlgmr.msra.gmra.mrb[24].mxu1 %vm530_vm4, %v1773_v7 }
 0x5fe   :  { %5868 = vmatpush3.bf16.msra.mxu1 %v6359_v6  ;;  %5859 = vmatprep.mubr.msk.bf16.mxu1 %vm6613_vm2, %v6612_v0 }
 0x5ff   :  { %5881 = vmatprep.subr.bf16.mxu1 %v6612_v0 }
 0x605   :  { %5860 = vmatmul.mubr.msk.bf16.gmra.mrb[28].mxu1 %vm530_vm4, %v1774_v11 }
 0x606   :  { %5863 = vmatprep.mubr.msk.bf16.mxu1 %vm6613_vm2, %v6612_v0 }
 0x60d   :  { %5864 = vmatmul.mubr.msk.bf16.gmra.mrb[32].mxu1 %vm530_vm4, %v1775_v12 }
 0x60e   :  { %5869 = vmatprep.mubr.msk.bf16.mxu1 %vm6613_vm2, %v6612_v0 }
 0x615   :  { %5870 = vmatmul.mubr.msk.bf16.vlgmr.msra.gmra.mrb[24].mxu1 %vm530_vm4, %v1935_v63 }
 0x616   :  { %5873 = vmatprep.mubr.msk.bf16.mxu1 %vm6613_vm2, %v6612_v0  ;;  %5882 = vmatpush3.bf16.msra.mxu1 %v6362_v23 }
 0x617   :  { %5883 = vmatprep.subr.bf16.mxu1 %v6612_v0 }
 0x61a   :  { %5884 = vmatpush3.bf16.msra.mxu1 %v6363_v24 }
 0x61b   :  { %5889 = vmatprep.subr.bf16.mxu1 %v6612_v0 }
 0x61d   :  { %5874 = vmatmul.mubr.msk.bf16.gmra.mrb[28].mxu1 %vm530_vm4, %v1936_v18 }
 0x61e   :  { %5877 = vmatprep.mubr.msk.bf16.mxu1 %vm6613_vm2, %v6612_v0 }
 0x625   :  { %5878 = vmatmul.mubr.msk.bf16.gmra.mrb[32].mxu1 %vm530_vm4, %v1937_v4 }
 0x626   :  { %5885 = vmatprep.mubr.msk.bf16.mxu1 %vm6613_vm2, %v6612_v0 }
 0x6b0   :  { %v1310_v9 = vpop.f32.mrb[20].mxu1 }
 0x6b1   :  { %v1311_v26 = vadd.f32 %v7268_v25, %v1310_v9  ;;  %v5771_v27 = vpop.f32.mrb[21].mxu1 }
 0x6b2   :  { %v1313_v28 = vpop.f32.mrb[22].mxu1 }
 0x6b3   :  { %1316 = vst.msk [vmem:[#allocation6] sm:$0xff] %vm850_vm6, %v1311_v26  ;;  %v5772_v30 = vpop.f32.mrb[23].mxu1 }
 0x6ba   :  { %v2494_v15 = vld [vmem:[#allocation6] sm:$0xff] }
 0x6bb   :  { %v2495_v31 = vpack.c.bf16 %v2494_v15, %v2494_v15 }
 0x6bd   :  { %5934 = vmatmul.mubr.msk.bf16.vlgmr.msra.gmra.mrb[40].mxu0 %vm850_vm6, %v2495_v31 }
 0x6be   :  { %5949 = vmatprep.mubr.msk.bf16.mxu0 %vm6613_vm2, %v6612_v0 }
 0x6e8   :  { %v1987_v33 = vpop.f32.mrb[24].mxu1 }
 0x6e9   :  { %v2019_v34 = vmul.f32 0.044715, %v1987_v33  ;;  %v5871_v32 = vpop.f32.mrb[25].mxu1  ;;  %v2014_v60 = vmul.f32 0.5, %v1987_v33 }
 0x6ea   :  { %v1990_v22 = vpop.f32.mrb[26].mxu1 }
 0x6eb   :  { %v2024_v29 = vmul.f32 %v2019_v34, %v1987_v33  ;;  %v2020_v35 = vmul.f32 0.044715, %v1990_v22  ;;  %v5872_v36 = vpop.f32.mrb[27].mxu1  ;;  %v2015_v16 = vmul.f32 0.5, %v1990_v22 }
 0x6ec   :  { %v6365_v36 = vld [vmem:[%s8025_s3 + $0x8] sm:$0xff]  }
 0x6ed   :  { %v2029_v38 = vmul.f32 %v2024_v29, %v1987_v33  ;;  %v2025_v39 = vmul.f32 %v2020_v35, %v1990_v22  ;;  %v6364_v29 = vld [vmem:[%s8025_s3] sm:$0xff]  }
 0x6ef   :  { %v2034_v37 = vadd.f32 %v2029_v38, %v1987_v33  ;;  %v2030_v40 = vmul.f32 %v2025_v39, %v1990_v22 }
 0x6f0   :  { %v1995_v43 = vpop.f32.mrb[28].mxu1 }
 0x6f1   :  { %v2039_v44 = vmul.f32 0.7978846, %v2034_v37  ;;  %v2035_v45 = vadd.f32 %v2030_v40, %v1990_v22  ;;  %v2021_v47 = vmul.f32 0.044715, %v1995_v43  ;;  %v5875_v49 = vpop.f32.mrb[29].mxu1  ;;  %v2016_v23 = vmul.f32 0.5, %v1995_v43 }
 0x6f2   :  { %v1998_v50 = vpop.f32.mrb[30].mxu1  ;;  %v6366_v37 = vld [vmem:[%s8025_s3 + $0x20] sm:$0xff]  }
 0x6f3   :  { %6438 = vtanh.f32 %v2039_v44  ;;  %v2040_v52 = vmul.f32 0.7978846, %v2035_v45  ;;  %v2026_v53 = vmul.f32 %v2021_v47, %v1995_v43  ;;  %v5876_v54 = vpop.f32.mrb[31].mxu1  ;;  %v2022_v51 = vmul.f32 0.044715, %v1998_v50 }
 0x6f4   :  { %v2017_v27 = vmul.f32 0.5, %v1998_v50  ;;  %v7308_v49 = vld [vmem:[%s8032_s11] ss:$0 sm:$0xff] }
 0x6f5   :  { %6440 = vtanh.f32 %v2040_v52  ;;  %v2031_v55 = vmul.f32 %v2026_v53, %v1995_v43  ;;  %v2027_v56 = vmul.f32 %v2022_v51, %v1998_v50 }
 0x6f7   :  { %v2036_v57 = vadd.f32 %v2031_v55, %v1995_v43  ;;  %v2032_v59 = vmul.f32 %v2027_v56, %v1998_v50  ;;  %v6367_v43 = vld [vmem:[%s8025_s3 + $0x28] sm:$0xff]   ;;  %v6368_v55 = vld [vmem:[%s8026_s4 + $0x10] sm:$0xff]   ;;  %v6369_v56 = vld [vmem:[%s8026_s4 + $0x18] sm:$0xff]  }
 0x6f8   :  { %v2003_v61 = vpop.f32.mrb[32].mxu1 }
 0x6f9   :  { %v2041_v62 = vmul.f32 0.7978846, %v2036_v57  ;;  %v2023_v1 = vmul.f32 0.044715, %v2003_v61  ;;  %v5879_v2 = vpop.f32.mrb[33].mxu1  ;;  %v2037_v3 = vadd.f32 %v2032_v59, %v1998_v50  ;;  %v2018_v31 = vmul.f32 0.5, %v2003_v61 }
 0x6fa   :  { %v2006_v5 = vpop.f32.mrb[34].mxu1 }
 0x6fb   :  { %6442 = vtanh.f32 %v2041_v62  ;;  %v2028_v6 = vmul.f32 %v2023_v1, %v2003_v61  ;;  %v5880_v7 = vpop.f32.mrb[35].mxu1  ;;  %v2042_v8 = vmul.f32 0.7978846, %v2037_v3 }
 0x6fd   :  { %v6439_v10 = vpop.eup %6438  ;;  %v2033_v11 = vmul.f32 %v2028_v6, %v2003_v61  ;;  %6444 = vtanh.f32 %v2042_v8 }
 0x6fe   :  { %v2049_v12 = vadd.f32 1.0, %v6439_v10 }
 0x6ff   :  { %v6441_v13 = vpop.eup %6440  ;;  %v2038_v14 = vadd.f32 %v2033_v11, %v2003_v61 }
 0x700   :  { %v2054_v63 = vmul.f32 %v2049_v12, %v2014_v60  ;;  %v2050_v17 = vadd.f32 1.0, %v6441_v13 }
 0x701   :  { %v2043_v18 = vmul.f32 0.7978846, %v2038_v14 }
 0x702   :  { %2059 = vst.msk [vmem:[#allocation4] sm:$0xff] %vm850_vm6, %v2054_v63  ;;  %v2055_v19 = vmul.f32 %v2050_v17, %v2015_v16 }
 0x703   :  { %6446 = vtanh.f32 %v2043_v18 }
 0x704   :  { %2060 = vst.msk [vmem:[#allocation4 + $0x8] sm:$0xff] %vm850_vm6, %v2055_v19 }
 0x705   :  { %v6443_v4 = vpop.eup %6442 }
 0x706   :  { %v2051_v24 = vadd.f32 1.0, %v6443_v4 }
 0x707   :  { %v6445_v9 = vpop.eup %6444 }
 0x708   :  { %v2056_v26 = vmul.f32 %v2051_v24, %v2016_v23  ;;  %v2052_v28 = vadd.f32 1.0, %v6445_v9  ;;  %v6370_v23 = vld [vmem:[%s8026_s4] sm:$0xff]   ;;  %v6371_v9 = vld [vmem:[%s8026_s4 + $0x8] sm:$0xff]  }
 0x70a   :  { %2061 = vst.msk [vmem:[#allocation4 + $0x10] sm:$0xff] %vm850_vm6, %v2056_v26  ;;  %v2057_v30 = vmul.f32 %v2052_v28, %v2017_v27 }
 0x70b   :  { %v2071_v32 = vld [vmem:[#allocation4 + $0x1] ss:$2 sm:$0xff]  ;;  %v2064_v39 = vld [vmem:[#allocation4] ss:$2 sm:$0xff] }
 0x70c   :  { %2062 = vst.msk [vmem:[#allocation4 + $0x18] sm:$0xff] %vm850_vm6, %v2057_v30 }
 0x70d   :  { %v6447_v15 = vpop.eup %6446 }
 0x70e   :  { %v2053_v33 = vadd.f32 1.0, %v6447_v15 }
 0x710   :  { %v2058_v34 = vmul.f32 %v2053_v33, %v2018_v31 }
 0x711   :  { %v2190_v45 = vld [vmem:[#allocation4 + $0x2] ss:$2 sm:$0xff] }
 0x712   :  { %2063 = vst.msk [vmem:[#allocation4 + $0x20] sm:$0x1] %vm855_vm7, %v2058_v34 }
 0x713   :  { %v2072_v22 = vld [vmem:[#allocation4 + $0x11] ss:$2 sm:$0xff]  ;;  %v2065_v38 = vld [vmem:[#allocation4 + $0x10] ss:$2 sm:$0xff] }
 0x714   :  { %v2077_v35 = vpack.c.bf16 %v2072_v22, %v2071_v32  ;;  %v2070_v40 = vpack.c.bf16 %v2065_v38, %v2064_v39 }
 0x716   :  { %5886 = vmatmul.mubr.msk.bf16.vlgmr.msra.gmra.mrb[36].mxu1 %vm850_vm6, %v2077_v35 }
 0x717   :  { %5890 = vmatpush3.bf16.msra.mxu1 %v6364_v29  ;;  %5893 = vmatprep.mubr.msk.bf16.mxu1 %vm6613_vm2, %v6612_v0 }
 0x718   :  { %5891 = vmatprep.subr.bf16.mxu1 %v6612_v0 }
 0x719   :  { %v2191_v44 = vld [vmem:[#allocation4 + $0x12] ss:$2 sm:$0xff] }
 0x71a   :  { %v2196_v47 = vpack.c.bf16 %v2191_v44, %v2190_v45  ;;  %v7349_v45 = vld [vmem:[%s8033_s10] sm:$0xff]  }
 0x71b   :  { %5892 = vmatpush3.bf16.msra.mxu1 %v6365_v36  ;;  %5946 = vmatpush3.bf16.msra.mxu0 %v7349_v45 }
 0x71c   :  { %5897 = vmatprep.subr.bf16.mxu1 %v6612_v0  ;;  %5947 = vmatprep.subr.bf16.mxu0 %v6612_v0 }
 0x722   :  { %5894 = vmatmul.mubr.msk.bf16.vlgmr.msra.gmra.mrb[36].mxu1 %vm850_vm6, %v2070_v40 }
 0x723   :  { %5898 = vmatpush3.bf16.msra.mxu1 %v6366_v37  ;;  %5901 = vmatprep.mubr.msk.bf16.mxu1 %vm6613_vm2, %v6612_v0 }
 0x724   :  { %5899 = vmatprep.subr.bf16.mxu1 %v6612_v0 }
 0x727   :  { %5900 = vmatpush3.bf16.msra.mxu1 %v6367_v43 }
 0x728   :  { %5905 = vmatprep.subr.bf16.mxu1 %v6612_v0 }
 0x72e   :  { %5902 = vmatmul.mubr.msk.bf16.vlgmr.msra.gmra.mrb[36].mxu1 %vm850_vm6, %v2196_v47  ;;  %v6614_v47 = vmov 0  }
 0x72f   :  { %5909 = vmatprep.mubr.msk.bf16.mxu1 %vm6613_vm2, %v6612_v0  ;;  %5906 = vmatpush3.bf16.msra.mxu1 %v6368_v55 }
 0x730   :  { %5907 = vmatprep.subr.bf16.mxu1 %v6612_v0  ;;  %6340 = vset.pattern.permute.xlu1 %v6614_v47 }
 0x731   :  { %6341 = vset.pattern.permute.xlu0 %v6614_v47 }
 0x733   :  { %5908 = vmatpush3.bf16.msra.mxu1 %v6369_v56 }
 0x734   :  { %5913 = vmatprep.subr.bf16.mxu1 %v6612_v0 }
 0x790   :  { %v2551_v50 = vpop.f32.mrb[40].mxu0 }
 0x791   :  { %v2552_v52 = vadd.f32 %v7308_v49, %v2551_v50  ;;  %v5935_v53 = vpop.f32.mrb[41].mxu0  ;;  %v7356_v50 = vld [vmem:[%s8033_s10 + $0x8] sm:$0xff]  }
 0x792   :  { %v2554_v54 = vpop.f32.mrb[42].mxu0  ;;  %5948 = vmatpush3.bf16.msra.mxu0 %v7356_v50 }
 0x793   :  { %2558 = vst.msk [vmem:[#allocation10] sm:$0xff] %vm2557_vm8, %v2552_v52  ;;  %v5936_v51 = vpop.f32.mrb[43].mxu0  ;;  %5961 = vmatprep.subr.bf16.mxu0 %v6612_v0 }
 0x795   :  { %5950 = vmatmul.mubr.bf16.vlgmr.msra.gmra.mrb[44].mxu0 %v6614_v47 }
 0x796   :  { %5962 = vmatpush3.bf16.msra.mxu0 %v7349_v45  ;;  %5965 = vmatprep.mubr.msk.bf16.mxu0 %vm6613_vm2, %v6612_v0 }
 0x797   :  { %5963 = vmatprep.subr.bf16.mxu0 %v6612_v0 }
 0x79a   :  { %5964 = vmatpush3.bf16.msra.mxu0 %v7356_v50 }
 0x79b   :  { %5977 = vmatprep.subr.bf16.mxu0 %v6612_v0 }
 0x801   :  { %v2246_v57 = vpop.f32.mrb[36].mxu1 }
 0x802   :  { %v2257_v59 = vmul.f32 0.044715, %v2246_v57  ;;  %v5903_v61 = vpop.f32.mrb[37].mxu1  ;;  %v2255_v13 = vmul.f32 0.5, %v2246_v57 }
 0x803   :  { %v2249_v62 = vpop.f32.mrb[38].mxu1 }
 0x804   :  { %v2259_v1 = vmul.f32 %v2257_v59, %v2246_v57  ;;  %v2258_v2 = vmul.f32 0.044715, %v2249_v62  ;;  %v5904_v3 = vpop.f32.mrb[39].mxu1  ;;  %v2256_v17 = vmul.f32 0.5, %v2249_v62 }
 0x806   :  { %v2261_v5 = vmul.f32 %v2259_v1, %v2246_v57  ;;  %v2260_v6 = vmul.f32 %v2258_v2, %v2249_v62 }
 0x808   :  { %v2263_v7 = vadd.f32 %v2261_v5, %v2246_v57  ;;  %v2262_v8 = vmul.f32 %v2260_v6, %v2249_v62 }
 0x80a   :  { %v2265_v10 = vmul.f32 0.7978846, %v2263_v7  ;;  %v2264_v11 = vadd.f32 %v2262_v8, %v2249_v62 }
 0x80c   :  { %6448 = vtanh.f32 %v2265_v10  ;;  %v2266_v60 = vmul.f32 0.7978846, %v2264_v11 }
 0x80e   :  { %6450 = vtanh.f32 %v2266_v60 }
 0x816   :  { %v6449_v12 = vpop.eup %6448 }
 0x817   :  { %v2269_v14 = vadd.f32 1.0, %v6449_v12 }
 0x818   :  { %v6451_v63 = vpop.eup %6450 }
 0x819   :  { %v2271_v16 = vmul.f32 %v2269_v14, %v2255_v13  ;;  %v2270_v18 = vadd.f32 1.0, %v6451_v63  ;;  %v2605_v63 = vld [vmem:[#allocation10] sm:$0x1] }
 0x81b   :  { %2273 = vst.msk [vmem:[#allocation5] sm:$0xff] %vm850_vm6, %v2271_v16  ;;  %v2272_v19 = vmul.f32 %v2270_v18, %v2256_v17 }
 0x81d   :  { %2274 = vst.msk [vmem:[#allocation5 + $0x8] sm:$0xff] %vm850_vm6, %v2272_v19 }
 0x824   :  { %v2281_v4 = vld [vmem:[#allocation5 + $0x1] ss:$2 sm:$0xff]  ;;  %v2275_v26 = vld [vmem:[#allocation5] ss:$2 sm:$0xff] }
 0x825   :  { %v2286_v24 = vpack.c.bf16 %v2281_v4, %v2281_v4  ;;  %v2280_v27 = vpack.c.bf16 %v2275_v26, %v2275_v26 }
 0x827   :  { %5910 = vmatmul.mubr.msk.bf16.vlgmr.msra.gmra.mrb[40].mxu1 %vm850_vm6, %v2286_v24 }
 0x828   :  { %5914 = vmatpush3.bf16.msra.mxu1 %v6370_v23  ;;  %5917 = vmatprep.mubr.msk.bf16.mxu1 %vm6613_vm2, %v6612_v0 }
 0x829   :  { %5915 = vmatprep.subr.bf16.mxu1 %v6612_v0 }
 0x82c   :  { %5916 = vmatpush3.bf16.msra.mxu1 %v6371_v9 }
 0x82d   :  { %5921 = vmatprep.subr.bf16.mxu1 %v6612_v0 }
 0x833   :  { %5918 = vmatmul.mubr.msk.bf16.vlgmr.msra.gmra.mrb[40].mxu1 %vm850_vm6, %v2280_v27 }
 0x834   :  { %5922 = vmatpush3.bf16.msra.mxu1 %v7178_v41  ;;  %5925 = vmatprep.mubr.msk.bf16.mxu1 %vm6613_vm2, %v6612_v0 }
 0x835   :  { %5923 = vmatprep.subr.bf16.mxu1 %v6612_v0 }
 0x838   :  { %5924 = vmatpush3.bf16.msra.mxu1 %v7184_v42 }
 0x839   :  { %5937 = vmatprep.subr.bf16.mxu1 %v6612_v0 }
 0x868   :  { %v2667_v61 = vpop.f32.mrb[44].mxu0 }
 0x906   :  { %v2391_v28 = vpop.f32.mrb[40].mxu1 }
 0x907   :  { %v2398_v30 = vmul.f32 0.044715, %v2391_v28  ;;  %v5919_v15 = vpop.f32.mrb[41].mxu1  ;;  %v2397_v35 = vmul.f32 0.5, %v2391_v28 }
 0x908   :  { %v2394_v31 = vpop.f32.mrb[42].mxu1 }
 0x909   :  { %v2399_v33 = vmul.f32 %v2398_v30, %v2391_v28  ;;  %v5920_v34 = vpop.f32.mrb[43].mxu1 }
 0x90b   :  { %v2400_v32 = vmul.f32 %v2399_v33, %v2391_v28 }
 0x90d   :  { %v2401_v22 = vadd.f32 %v2400_v32, %v2391_v28 }
 0x90f   :  { %v2402_v29 = vmul.f32 0.7978846, %v2401_v22 }
 0x911   :  { %6452 = vtanh.f32 %v2402_v29 }
 0x91b   :  { %v6453_v41 = vpop.eup %6452 }
 0x91c   :  { %v2404_v36 = vadd.f32 1.0, %v6453_v41 }
 0x91e   :  { %v7340_v38 = vmul.f32 %v2404_v36, %v2397_v35 }
 0x920   :  { %v2424_v42 = vsel %vm850_vm6, %v7340_v38, 0.0 }
 0x921   :  { %2425 = vadd.xlane.f32.xlu1 %v2424_v42 }
 0x9ae   :  { %v2426_v39 = vpop.xlane.xlu1 %2425 }
 0x9af   :  { %v2427_v37 = vmul.f32 0.03125, %v2426_v39 }
 0x9b1   :  { %v2428_v40 = vsub.f32 %v7340_v38, %v2427_v37  ;;  %v2706_v37 = vld [vmem:[#allocation10 + $0x1] sm:$0x1] }
 0x9b3   :  { %v2429_v43 = vmul.f32 %v2428_v40, %v2428_v40 }
 0x9b5   :  { %v2430_v44 = vsel %vm850_vm6, %v2429_v43, 0.0 }
 0x9b6   :  { %2431 = vadd.xlane.f32.xlu1 %v2430_v44 }
 0xa43   :  { %v2432_v52 = vpop.xlane.xlu1 %2431 }
 0xa44   :  { %v2433_v53 = vmul.f32 0.03125, %v2432_v52 }
 0xa46   :  { %v2434_v54 = vadd.f32 1e-05, %v2433_v53 }
 0xa48   :  { %6454 = vrsqrt.f32 %v2434_v54 }
 0xa52   :  { %v6455_v51 = vpop.eup %6454 }
 0xa53   :  { %v2436_v55 = vmul.f32 %v6455_v51, %v2428_v40 }
 0xa55   :  { %v2437_v56 = vmul.f32 %v7192_v48, %v2436_v55  ;;  %v7381_v48 = vld [vmem:[%s8034_s12] ss:$0 sm:$0xff] }
 0xa56   :  { %v2668_v62 = vadd.f32 %v7381_v48, %v2667_v61 }
 0xa57   :  { %v2438_v57 = vadd.f32 %v7197_v46, %v2437_v56  ;;  %v5951_v46 = vpop.f32.mrb[45].mxu0 }
 0xa58   :  { %v2670_v1 = vpop.f32.mrb[46].mxu0  ;;  %2681 = vrot.lane.b32.xlu0 %v2668_v62, %s6615_s30 }
 0xa59   :  { %v2439_v59 = vpack.c.bf16 %v2438_v57, %v2438_v57 }
 0xa5b   :  { %5926 = vmatmul.mubr.msk.bf16.vlgmr.msra.gmra.mrb[44].mxu1 %vm850_vm6, %v2439_v59 }
 0xa5c   :  { %5938 = vmatpush3.bf16.msra.mxu1 %v7246_v20  ;;  %5941 = vmatprep.mubr.msk.bf16.mxu1 %vm6613_vm2, %v6612_v0  ;;  %v5952_v20 = vpop.f32.mrb[47].mxu0 }
 0xa5d   :  { %5939 = vmatprep.subr.bf16.mxu1 %v6612_v0 }
 0xa60   :  { %5940 = vmatpush3.bf16.msra.mxu1 %v7251_v21 }
 0xa61   :  { %5953 = vmatprep.subr.bf16.mxu1 %v6612_v0 }
 0xaca   :  { %v2682_v23 = vpop.permute.xlu0 %2681 }
 0xb2e   :  { %v2477_v2 = vpop.f32.mrb[44].mxu1 }
 0xb2f   :  { %v2478_v3 = vadd.f32 %v7268_v25, %v2477_v2  ;;  %v5927_v21 = vpop.f32.mrb[45].mxu1 }
 0xb30   :  { %v2480_v5 = vpop.f32.mrb[46].mxu1 }
 0xb31   :  { %2483 = vst.msk [vmem:[#allocation7] sm:$0xff] %vm850_vm6, %v2478_v3  ;;  %v5928_v6 = vpop.f32.mrb[47].mxu1 }
 0xb38   :  { %v2559_v7 = vld [vmem:[#allocation7] sm:$0xff] }
 0xb39   :  { %v2560_v8 = vpack.c.bf16 %v2559_v7, %v2559_v7 }
 0xb3b   :  { %5942 = vmatmul.mubr.msk.bf16.vlgmr.msra.gmra.mrb[48].mxu1 %vm850_vm6, %v2560_v8 }
 0xb3c   :  { %5954 = vmatpush3.bf16.msra.mxu1 %v7349_v45  ;;  %5957 = vmatprep.mubr.msk.bf16.mxu1 %vm6613_vm2, %v6612_v0 }
 0xb3d   :  { %5955 = vmatprep.subr.bf16.mxu1 %v6612_v0 }
 0xb40   :  { %5956 = vmatpush3.bf16.msra.mxu1 %v7356_v50 }
 0xb41   :  { %5969 = vmatprep.subr.bf16.mxu1 %v6612_v0 }
 0xc0e   :  { %v2598_v25 = vpop.f32.mrb[48].mxu1 }
 0xc0f   :  { %v2599_v10 = vadd.f32 %v7308_v49, %v2598_v25  ;;  %v5943_v11 = vpop.f32.mrb[49].mxu1 }
 0xc10   :  { %v2601_v60 = vpop.f32.mrb[50].mxu1  ;;  %v2791_v11 = vld [vmem:[#allocation10 + $0x2] sm:$0x1] }
 0xc11   :  { %2604 = vst.msk [vmem:[#allocation11] sm:$0xff] %vm2557_vm8, %v2599_v10  ;;  %v5944_v12 = vpop.f32.mrb[51].mxu1 }
 0xc18   :  { %v2606_v13 = vld [vmem:[#allocation11] sm:$0x1]  ;;  %v2707_v42 = vld [vmem:[#allocation11 + $0x1] sm:$0x1]  ;;  %v2792_v25 = vld [vmem:[#allocation11 + $0x2] sm:$0x1] }
 0xc19   :  { %v2608_v14 = vrot.slane %v2606_v13, 7  ;;  %v2709_v39 = vrot.slane %v2707_v42, 7  ;;  %v2794_v10 = vrot.slane %v2792_v25, 7 }
 0xc1b   :  { %v2611_v16 = vsel %vm2610_vm9, %v2605_v63, %v2608_v14  ;;  %v2711_v40 = vsel %vm2610_vm9, %v2706_v37, %v2709_v39  ;;  %v2796_v60 = vsel %vm2610_vm9, %v2791_v11, %v2794_v10 }
 0xc1c   :  { %v2673_v17 = vadd.f32 %v2668_v62, %v2611_v16 }
 0xc1e   :  { %v5334_v18 = vmul.f32 -1.442695, %v2673_v17 }
 0xc20   :  { %6456 = vpow2.f32 %v5334_v18 }
 0xc2a   :  { %v6457_v19 = vpop.eup %6456 }
 0xc2b   :  { %v2677_v4 = vadd.f32 1.0, %v6457_v19 }
 0xc2d   :  { %6458 = vrcp.f32 %v2677_v4 }
 0xc37   :  { %v6459_v24 = vpop.eup %6458 }
 0xc38   :  { %v2684_v49 = vmul.f32 %v6459_v24, %v2682_v23  ;;  %v2691_v28 = vsub.f32 1.0, %v6459_v24  ;;  %v2697_v15 = vmul.f32 0.0, %v6459_v24 }
 0xc3a   :  { %2686 = vrot.lane.b32.xlu1 %v2684_v49, %s6615_s30 }
 0xcac   :  { %v2687_v9 = vpop.permute.xlu1 %2686 }
 0xcad   :  { %v2689_v26 = vadd.f32 %v2687_v9, %v2611_v16 }
 0xcaf   :  { %6460 = vtanh.f32 %v2689_v26 }
 0xcb9   :  { %v6461_v27 = vpop.eup %6460 }
 0xcba   :  { %2693 = vrot.lane.b32.xlu1 %v6461_v27, %s6616_s1 }
 0xd2c   :  { %v2694_v30 = vpop.permute.xlu1 %2693 }
 0xd2d   :  { %v2696_v31 = vmul.f32 %v2694_v30, %v2691_v28 }
 0xd2f   :  { %v7399_v33 = vadd.f32 %v2697_v15, %v2696_v31 }
 0xd31   :  { %v2712_v34 = vpack.c.bf16 %v7399_v33, %v7399_v33 }
 0xd33   :  { %2714 = vrot.lane.b32.xlu1 %v2712_v34, %s6616_s1 }
 0xda5   :  { %v2715_v32 = vpop.permute.xlu1 %2714 }
 0xda6   :  { %5958 = vmatmul.mubr.msk.bf16.vlgmr.msra.gmra.mrb[52].mxu1 %vm850_vm6, %v2715_v32 }
 0xda7   :  { %5970 = vmatpush3.bf16.msra.mxu1 %v7349_v45  ;;  %5973 = vmatprep.mubr.msk.bf16.mxu1 %vm6613_vm2, %v6612_v0 }
 0xda8   :  { %5971 = vmatprep.subr.bf16.mxu1 %v6612_v0 }
 0xdab   :  { %5972 = vmatpush3.bf16.msra.mxu1 %v7356_v50 }
 0xdac   :  { %5985 = vmatprep.subr.bf16.mxu1 %v6612_v0 }
 0xe79   :  { %v2753_v22 = vpop.f32.mrb[52].mxu1 }
 0xe7a   :  { %v2754_v29 = vadd.f32 %v7381_v48, %v2753_v22  ;;  %v5959_v41 = vpop.f32.mrb[53].mxu1 }
 0xe7b   :  { %v2756_v35 = vpop.f32.mrb[54].mxu1 }
 0xe7c   :  { %2767 = vrot.lane.b32.xlu0 %v2754_v29, %s6615_s30  ;;  %v5960_v36 = vpop.f32.mrb[55].mxu1  ;;  %v2759_v43 = vadd.f32 %v2754_v29, %v2711_v40  ;;  %v2877_v29 = vld [vmem:[#allocation11 + $0x3] sm:$0x1]  ;;  %v2876_v35 = vld [vmem:[#allocation10 + $0x3] sm:$0x1] }
 0xe7d   :  { %v2879_v41 = vrot.slane %v2877_v29, 7 }
 0xe7e   :  { %v5336_v44 = vmul.f32 -1.442695, %v2759_v43 }
 0xe7f   :  { %v2881_v36 = vsel %vm2610_vm9, %v2876_v35, %v2879_v41 }
 0xe80   :  { %6462 = vpow2.f32 %v5336_v44 }
 0xe8a   :  { %v6463_v52 = vpop.eup %6462 }
 0xe8b   :  { %v2763_v53 = vadd.f32 1.0, %v6463_v52 }
 0xe8d   :  { %6464 = vrcp.f32 %v2763_v53 }
 0xe97   :  { %v6465_v54 = vpop.eup %6464 }
 0xe98   :  { %v2777_v61 = vsub.f32 1.0, %v6465_v54  ;;  %v2783_v62 = vmul.f32 %v6465_v54, %v7399_v33 }
 0xeee   :  { %v2768_v51 = vpop.permute.xlu0 %2767 }
 0xeef   :  { %v2770_v55 = vmul.f32 %v6465_v54, %v2768_v51 }
 0xef1   :  { %2772 = vrot.lane.b32.xlu1 %v2770_v55, %s6615_s30 }
 0xf63   :  { %v2773_v56 = vpop.permute.xlu1 %2772 }
 0xf64   :  { %v2775_v57 = vadd.f32 %v2773_v56, %v2711_v40 }
 0xf66   :  { %6466 = vtanh.f32 %v2775_v57 }
 0xf70   :  { %v6467_v59 = vpop.eup %6466 }
 0xf71   :  { %2779 = vrot.lane.b32.xlu0 %v6467_v59, %s6616_s1 }
 0xfe3   :  { %v2780_v46 = vpop.permute.xlu0 %2779 }
 0xfe4   :  { %v2782_v1 = vmul.f32 %v2780_v46, %v2777_v61 }
 0xfe6   :  { %v7417_v20 = vadd.f32 %v2783_v62, %v2782_v1 }
 0xfe8   :  { %v2797_v2 = vpack.c.bf16 %v7417_v20, %v7417_v20 }
 0xfea   :  { %2799 = vrot.lane.b32.xlu1 %v2797_v2, %s6616_s1 }
0x105c   :  { %v2800_v3 = vpop.permute.xlu1 %2799 }
0x105d   :  { %5966 = vmatmul.mubr.msk.bf16.vlgmr.msra.gmra.mrb[48].mxu0 %vm850_vm6, %v2800_v3 }
0x105e   :  { %5978 = vmatpush3.bf16.msra.mxu0 %v7349_v45  ;;  %5981 = vmatprep.mubr.msk.bf16.mxu0 %vm6613_vm2, %v6612_v0 }
0x105f   :  { %5979 = vmatprep.subr.bf16.mxu0 %v6612_v0 }
0x1062   :  { %5980 = vmatpush3.bf16.msra.mxu0 %v7356_v50 }
0x1063   :  { %5993 = vmatprep.subr.bf16.mxu0 %v6612_v0 }
0x1130   :  { %v2838_v21 = vpop.f32.mrb[48].mxu0 }
0x1131   :  { %v2839_v5 = vadd.f32 %v7381_v48, %v2838_v21  ;;  %v5967_v6 = vpop.f32.mrb[49].mxu0 }
0x1132   :  { %v2841_v7 = vpop.f32.mrb[50].mxu0  ;;  %v2962_v6 = vld [vmem:[#allocation11 + $0x4] sm:$0x1] }
0x1133   :  { %2852 = vrot.lane.b32.xlu0 %v2839_v5, %s6615_s30  ;;  %v5968_v8 = vpop.f32.mrb[51].mxu0  ;;  %v2844_v12 = vadd.f32 %v2839_v5, %v2796_v60  ;;  %v2964_v7 = vrot.slane %v2962_v6, 7 }
0x1134   :  { %v2961_v8 = vld [vmem:[#allocation10 + $0x4] sm:$0x1] }
0x1135   :  { %v5338_v13 = vmul.f32 -1.442695, %v2844_v12  ;;  %v2966_v25 = vsel %vm2610_vm9, %v2961_v8, %v2964_v7 }
0x1137   :  { %6468 = vpow2.f32 %v5338_v13 }
0x1141   :  { %v6469_v14 = vpop.eup %6468 }
0x1142   :  { %v2848_v63 = vadd.f32 1.0, %v6469_v14 }
0x1144   :  { %6470 = vrcp.f32 %v2848_v63 }
0x114e   :  { %v6471_v16 = vpop.eup %6470 }
0x114f   :  { %v2862_v24 = vsub.f32 1.0, %v6471_v16  ;;  %v2868_v9 = vmul.f32 %v6471_v16, %v7417_v20 }
0x11a5   :  { %v2853_v17 = vpop.permute.xlu0 %2852 }
0x11a6   :  { %v2855_v18 = vmul.f32 %v6471_v16, %v2853_v17 }
0x11a8   :  { %2857 = vrot.lane.b32.xlu1 %v2855_v18, %s6615_s30 }
0x121a   :  { %v2858_v19 = vpop.permute.xlu1 %2857 }
0x121b   :  { %v2860_v4 = vadd.f32 %v2858_v19, %v2796_v60 }
0x121d   :  { %6472 = vtanh.f32 %v2860_v4 }
0x1227   :  { %v6473_v23 = vpop.eup %6472 }
0x1228   :  { %2864 = vrot.lane.b32.xlu0 %v6473_v23, %s6616_s1 }
0x129a   :  { %v2865_v49 = vpop.permute.xlu0 %2864 }
0x129b   :  { %v2867_v26 = vmul.f32 %v2865_v49, %v2862_v24 }
0x129d   :  { %v7435_v27 = vadd.f32 %v2868_v9, %v2867_v26 }
0x129f   :  { %v2882_v28 = vpack.c.bf16 %v7435_v27, %v7435_v27 }
0x12a1   :  { %2884 = vrot.lane.b32.xlu1 %v2882_v28, %s6616_s1 }
0x1313   :  { %v2885_v30 = vpop.permute.xlu1 %2884 }
0x1314   :  { %5974 = vmatmul.mubr.msk.bf16.vlgmr.msra.gmra.mrb[56].mxu1 %vm850_vm6, %v2885_v30 }
0x1315   :  { %5986 = vmatpush3.bf16.msra.mxu1 %v7349_v45  ;;  %5989 = vmatprep.mubr.msk.bf16.mxu1 %vm6613_vm2, %v6612_v0 }
0x1316   :  { %5987 = vmatprep.subr.bf16.mxu1 %v6612_v0 }
0x1319   :  { %5988 = vmatpush3.bf16.msra.mxu1 %v7356_v50 }
0x131a   :  { %6001 = vmatprep.subr.bf16.mxu1 %v6612_v0 }
0x13e7   :  { %v2923_v15 = vpop.f32.mrb[56].mxu1 }
0x13e8   :  { %v2924_v31 = vadd.f32 %v7381_v48, %v2923_v15  ;;  %v5975_v34 = vpop.f32.mrb[57].mxu1 }
0x13e9   :  { %v2926_v32 = vpop.f32.mrb[58].mxu1 }
0x13ea   :  { %2937 = vrot.lane.b32.xlu0 %v2924_v31, %s6615_s30  ;;  %v5976_v22 = vpop.f32.mrb[59].mxu1  ;;  %v2929_v42 = vadd.f32 %v2924_v31, %v2881_v36  ;;  %v3047_v32 = vld [vmem:[#allocation11 + $0x5] sm:$0x1] }
0x13eb   :  { %v3049_v22 = vrot.slane %v3047_v32, 7  ;;  %v3216_v32 = vld [vmem:[#allocation10 + $0x7] sm:$0x1] }
0x13ec   :  { %v5340_v39 = vmul.f32 -1.442695, %v2929_v42 }
0x13ee   :  { %6474 = vpow2.f32 %v5340_v39 }
0x13f8   :  { %v6475_v37 = vpop.eup %6474 }
0x13f9   :  { %v2933_v40 = vadd.f32 1.0, %v6475_v37 }
0x13fb   :  { %6476 = vrcp.f32 %v2933_v40 }
0x1405   :  { %v6477_v43 = vpop.eup %6476 }
0x1406   :  { %v2947_v55 = vsub.f32 1.0, %v6477_v43  ;;  %v2953_v57 = vmul.f32 %v6477_v43, %v7435_v27 }
0x145c   :  { %v2938_v44 = vpop.permute.xlu0 %2937 }
0x145d   :  { %v2940_v52 = vmul.f32 %v6477_v43, %v2938_v44 }
0x145f   :  { %2942 = vrot.lane.b32.xlu1 %v2940_v52, %s6615_s30 }
0x14d1   :  { %v2943_v53 = vpop.permute.xlu1 %2942 }
0x14d2   :  { %v2945_v54 = vadd.f32 %v2943_v53, %v2881_v36 }
0x14d4   :  { %6478 = vtanh.f32 %v2945_v54 }
0x14de   :  { %v6479_v51 = vpop.eup %6478 }
0x14df   :  { %2949 = vrot.lane.b32.xlu0 %v6479_v51, %s6616_s1 }
0x1551   :  { %v2950_v56 = vpop.permute.xlu0 %2949 }
0x1552   :  { %v2952_v59 = vmul.f32 %v2950_v56, %v2947_v55 }
0x1554   :  { %v7453_v61 = vadd.f32 %v2953_v57, %v2952_v59 }
0x1556   :  { %v2967_v46 = vpack.c.bf16 %v7453_v61, %v7453_v61 }
0x1558   :  { %2969 = vrot.lane.b32.xlu1 %v2967_v46, %s6616_s1 }
0x15ca   :  { %v2970_v62 = vpop.permute.xlu1 %2969 }
0x15cb   :  { %5982 = vmatmul.mubr.msk.bf16.vlgmr.msra.gmra.mrb[52].mxu0 %vm850_vm6, %v2970_v62 }
0x15cc   :  { %5994 = vmatpush3.bf16.msra.mxu0 %v7349_v45  ;;  %5997 = vmatprep.mubr.msk.bf16.mxu0 %vm6613_vm2, %v6612_v0 }
0x15cd   :  { %5995 = vmatprep.subr.bf16.mxu0 %v6612_v0 }
0x15d0   :  { %5996 = vmatpush3.bf16.msra.mxu0 %v7356_v50 }
0x15d1   :  { %6009 = vmatprep.subr.bf16.mxu0 %v6612_v0 }
0x169e   :  { %v3008_v1 = vpop.f32.mrb[52].mxu0 }
0x169f   :  { %v3009_v2 = vadd.f32 %v7381_v48, %v3008_v1  ;;  %v5983_v3 = vpop.f32.mrb[53].mxu0 }
0x16a0   :  { %v3011_v21 = vpop.f32.mrb[54].mxu0  ;;  %v3132_v3 = vld [vmem:[#allocation11 + $0x6] sm:$0x1] }
0x16a1   :  { %3022 = vrot.lane.b32.xlu0 %v3009_v2, %s6615_s30  ;;  %v5984_v5 = vpop.f32.mrb[55].mxu0  ;;  %v3014_v10 = vadd.f32 %v3009_v2, %v2966_v25  ;;  %v3134_v21 = vrot.slane %v3132_v3, 7  ;;  %v7563_v3 = vld [vmem:[%s8033_s10 + $0x18] sm:$0xff]  }
0x16a2   :  { %v3131_v5 = vld [vmem:[#allocation10 + $0x6] sm:$0x1] }
0x16a3   :  { %v5342_v11 = vmul.f32 -1.442695, %v3014_v10  ;;  %v3136_v6 = vsel %vm2610_vm9, %v3131_v5, %v3134_v21  ;;  %v5359_v21 = vld [vmem:[%s8032_s11 + $0x1] ss:$0 sm:$0xff] }
0x16a5   :  { %6480 = vpow2.f32 %v5342_v11 }
0x16af   :  { %v6481_v60 = vpop.eup %6480 }
0x16b0   :  { %v3018_v12 = vadd.f32 1.0, %v6481_v60 }
0x16b2   :  { %6482 = vrcp.f32 %v3018_v12 }
0x16bc   :  { %v6483_v13 = vpop.eup %6482 }
0x16bd   :  { %v3032_v19 = vsub.f32 1.0, %v6483_v13  ;;  %v3038_v23 = vmul.f32 %v6483_v13, %v7453_v61 }
0x1713   :  { %v3023_v14 = vpop.permute.xlu0 %3022 }
0x1714   :  { %v3025_v63 = vmul.f32 %v6483_v13, %v3023_v14 }
0x1716   :  { %3027 = vrot.lane.b32.xlu1 %v3025_v63, %s6615_s30 }
0x1788   :  { %v3028_v16 = vpop.permute.xlu1 %3027 }
0x1789   :  { %v3030_v17 = vadd.f32 %v3028_v16, %v2966_v25 }
0x178b   :  { %6484 = vtanh.f32 %v3030_v17 }
0x1795   :  { %v6485_v18 = vpop.eup %6484 }
0x1796   :  { %3034 = vrot.lane.b32.xlu0 %v6485_v18, %s6616_s1 }
0x1808   :  { %v3035_v4 = vpop.permute.xlu0 %3034 }
0x1809   :  { %v3037_v24 = vmul.f32 %v3035_v4, %v3032_v19 }
0x180b   :  { %v7471_v49 = vadd.f32 %v3038_v23, %v3037_v24 }
0x180d   :  { %v3052_v9 = vpack.c.bf16 %v7471_v49, %v7471_v49 }
0x180f   :  { %3054 = vrot.lane.b32.xlu1 %v3052_v9, %s6616_s1 }
0x1881   :  { %v3055_v26 = vpop.permute.xlu1 %3054 }
0x1882   :  { %5990 = vmatmul.mubr.msk.bf16.vlgmr.msra.gmra.mrb[60].mxu1 %vm850_vm6, %v3055_v26 }
0x1883   :  { %6002 = vmatpush3.bf16.msra.mxu1 %v7349_v45  ;;  %6005 = vmatprep.mubr.msk.bf16.mxu1 %vm6613_vm2, %v6612_v0  ;;  %v3046_v45 = vld [vmem:[#allocation10 + $0x5] sm:$0x1] }
0x1884   :  { %6003 = vmatprep.subr.bf16.mxu1 %v6612_v0  ;;  %v3051_v29 = vsel %vm2610_vm9, %v3046_v45, %v3049_v22 }
0x1887   :  { %6004 = vmatpush3.bf16.msra.mxu1 %v7356_v50 }
0x1888   :  { %6017 = vmatprep.subr.bf16.mxu1 %v6612_v0 }
0x1955   :  { %v3093_v28 = vpop.f32.mrb[60].mxu1 }
0x1956   :  { %v3094_v30 = vadd.f32 %v7381_v48, %v3093_v28  ;;  %v5991_v15 = vpop.f32.mrb[61].mxu1 }
0x1957   :  { %v3096_v31 = vpop.f32.mrb[62].mxu1 }
0x1958   :  { %3107 = vrot.lane.b32.xlu0 %v3094_v30, %s6615_s30  ;;  %v5992_v34 = vpop.f32.mrb[63].mxu1  ;;  %v3099_v41 = vadd.f32 %v3094_v30, %v3051_v29  ;;  %v3217_v31 = vld [vmem:[#allocation11 + $0x7] sm:$0x1] }
0x1959   :  { %v3219_v34 = vrot.slane %v3217_v31, 7 }
0x195a   :  { %v5344_v35 = vmul.f32 -1.442695, %v3099_v41 }
0x195b   :  { %v3221_v22 = vsel %vm2610_vm9, %v3216_v32, %v3219_v34 }
0x195c   :  { %6486 = vpow2.f32 %v5344_v35 }
0x1966   :  { %v6487_v36 = vpop.eup %6486 }
0x1967   :  { %v3103_v50 = vadd.f32 1.0, %v6487_v36 }
0x1969   :  { %6488 = vrcp.f32 %v3103_v50 }
0x1973   :  { %v6489_v42 = vpop.eup %6488 }
0x1974   :  { %v3117_v52 = vsub.f32 1.0, %v6489_v42  ;;  %v3123_v54 = vmul.f32 %v6489_v42, %v7471_v49 }
0x19ca   :  { %v3108_v39 = vpop.permute.xlu0 %3107 }
0x19cb   :  { %v3110_v37 = vmul.f32 %v6489_v42, %v3108_v39 }
0x19cd   :  { %3112 = vrot.lane.b32.xlu1 %v3110_v37, %s6615_s30 }
0x1a3f   :  { %v3113_v40 = vpop.permute.xlu1 %3112 }
0x1a40   :  { %v3115_v43 = vadd.f32 %v3113_v40, %v3051_v29 }
0x1a42   :  { %6490 = vtanh.f32 %v3115_v43  ;;  %v6374_v43 = vld [vmem:[%s8030_s9 + $0x10] sm:$0xff]  }
0x1a4c   :  { %v6491_v44 = vpop.eup %6490 }
0x1a4d   :  { %3119 = vrot.lane.b32.xlu0 %v6491_v44, %s6616_s1 }
0x1abf   :  { %v3120_v53 = vpop.permute.xlu0 %3119 }
0x1ac0   :  { %v3122_v51 = vmul.f32 %v3120_v53, %v3117_v52  ;;  %v6375_v52 = vld [vmem:[%s8030_s9 + $0x18] sm:$0xff]  }
0x1ac2   :  { %v7489_v55 = vadd.f32 %v3123_v54, %v3122_v51 }
0x1ac4   :  { %v3137_v56 = vpack.c.bf16 %v7489_v55, %v7489_v55 }
0x1ac6   :  { %3139 = vrot.lane.b32.xlu1 %v3137_v56, %s6616_s1 }
0x1b38   :  { %v3140_v57 = vpop.permute.xlu1 %3139 }
0x1b39   :  { %5998 = vmatmul.mubr.msk.bf16.vlgmr.msra.gmra.mrb[56].mxu0 %vm850_vm6, %v3140_v57 }
0x1b3a   :  { %6013 = vmatprep.mubr.msk.bf16.mxu0 %vm6613_vm2, %v6612_v0  ;;  %6010 = vmatpush3.bf16.msra.mxu0 %v6374_v43 }
0x1b3b   :  { %6011 = vmatprep.subr.bf16.mxu0 %v6612_v0 }
0x1b3e   :  { %6012 = vmatpush3.bf16.msra.mxu0 %v6375_v52 }
0x1b3f   :  { %6025 = vmatprep.subr.bf16.mxu0 %v6612_v0 }
0x1c0c   :  { %v3178_v59 = vpop.f32.mrb[56].mxu0 }
0x1c0d   :  { %v3179_v46 = vadd.f32 %v7381_v48, %v3178_v59  ;;  %v5999_v62 = vpop.f32.mrb[57].mxu0 }
0x1c0e   :  { %v3181_v1 = vpop.f32.mrb[58].mxu0  ;;  %v7555_v62 = vld [vmem:[%s8033_s10 + $0x10] sm:$0xff]  }
0x1c0f   :  { %3192 = vrot.lane.b32.xlu0 %v3179_v46, %s6615_s30  ;;  %v6000_v2 = vpop.f32.mrb[59].mxu0  ;;  %v3184_v7 = vadd.f32 %v3179_v46, %v3136_v6 }
0x1c11   :  { %v5346_v8 = vmul.f32 -1.442695, %v3184_v7 }
0x1c13   :  { %6492 = vpow2.f32 %v5346_v8 }
0x1c1d   :  { %v6493_v25 = vpop.eup %6492 }
0x1c1e   :  { %v3188_v10 = vadd.f32 1.0, %v6493_v25 }
0x1c20   :  { %6494 = vrcp.f32 %v3188_v10 }
0x1c2a   :  { %v6495_v11 = vpop.eup %6494 }
0x1c2b   :  { %v3202_v16 = vsub.f32 1.0, %v6495_v11  ;;  %v3208_v18 = vmul.f32 %v6495_v11, %v7489_v55 }
0x1c81   :  { %v3193_v60 = vpop.permute.xlu0 %3192 }
0x1c82   :  { %v3195_v12 = vmul.f32 %v6495_v11, %v3193_v60 }
0x1c84   :  { %3197 = vrot.lane.b32.xlu1 %v3195_v12, %s6615_s30 }
0x1cf6   :  { %v3198_v13 = vpop.permute.xlu1 %3197 }
0x1cf7   :  { %v3200_v14 = vadd.f32 %v3198_v13, %v3136_v6 }
0x1cf9   :  { %6496 = vtanh.f32 %v3200_v14  ;;  %v7591_v14 = vld [vmem:[%s8034_s12 + $0x1] ss:$0 sm:$0xff] }
0x1d03   :  { %v6497_v63 = vpop.eup %6496 }
0x1d04   :  { %3204 = vrot.lane.b32.xlu0 %v6497_v63, %s6616_s1 }
0x1d76   :  { %v3205_v17 = vpop.permute.xlu0 %3204 }
0x1d77   :  { %v3207_v19 = vmul.f32 %v3205_v17, %v3202_v16 }
0x1d79   :  { %v3209_v4 = vadd.f32 %v3208_v18, %v3207_v19 }
0x1d7b   :  { %v3222_v23 = vpack.c.bf16 %v3209_v4, %v3209_v4 }
0x1d7d   :  { %3224 = vrot.lane.b32.xlu1 %v3222_v23, %s6616_s1 }
0x1def   :  { %v3225_v24 = vpop.permute.xlu1 %3224 }
0x1df0   :  { %6006 = vmatmul.mubr.msk.bf16.vlgmr.msra.gmra.mrb[64].mxu1 %vm850_vm6, %v3225_v24 }
0x1df1   :  { %6021 = vmatprep.mubr.msk.bf16.mxu1 %vm6613_vm2, %v6612_v0  ;;  %6018 = vmatpush3.bf16.msra.mxu1 %v6374_v43 }
0x1df2   :  { %6019 = vmatprep.subr.bf16.mxu1 %v6612_v0 }
0x1df5   :  { %6020 = vmatpush3.bf16.msra.mxu1 %v6375_v52 }
0x1df6   :  { %6033 = vmatprep.subr.bf16.mxu1 %v6612_v0 }
0x1ec3   :  { %v3263_v9 = vpop.f32.mrb[64].mxu1 }
0x1ec4   :  { %v3264_v26 = vadd.f32 %v7381_v48, %v3263_v9  ;;  %v6007_v28 = vpop.f32.mrb[65].mxu1 }
0x1ec5   :  { %v3266_v30 = vpop.f32.mrb[66].mxu1 }
0x1ec6   :  { %3277 = vrot.lane.b32.xlu0 %v3264_v26, %s6615_s30  ;;  %v6008_v15 = vpop.f32.mrb[67].mxu1  ;;  %v3269_v45 = vadd.f32 %v3264_v26, %v3221_v22 }
0x1ec8   :  { %v5348_v29 = vmul.f32 -1.442695, %v3269_v45 }
0x1eca   :  { %6498 = vpow2.f32 %v5348_v29 }
0x1ed4   :  { %v6499_v41 = vpop.eup %6498 }
0x1ed5   :  { %v3273_v35 = vadd.f32 1.0, %v6499_v41 }
0x1ed7   :  { %6500 = vrcp.f32 %v3273_v35 }
0x1ee1   :  { %v6501_v36 = vpop.eup %6500 }
0x1ee2   :  { %v3287_v44 = vsub.f32 1.0, %v6501_v36 }
0x1f38   :  { %v3278_v50 = vpop.permute.xlu0 %3277 }
0x1f39   :  { %v3280_v42 = vmul.f32 %v6501_v36, %v3278_v50 }
0x1f3b   :  { %3282 = vrot.lane.b32.xlu1 %v3280_v42, %s6615_s30 }
0x1f3f   :  { %2700 = vrot.lane.b32.xlu1 %v7399_v33, %s6616_s1 }
0x1f43   :  { %2871 = vrot.lane.b32.xlu1 %v7435_v27, %s6616_s1 }
0x1f47   :  { %3041 = vrot.lane.b32.xlu1 %v7471_v49, %s6616_s1 }
0x1f4b   :  { %3211 = vrot.lane.b32.xlu1 %v3209_v4, %s6616_s1 }
0x1fad   :  { %v3283_v48 = vpop.permute.xlu1 %3282 }
0x1fae   :  { %v3285_v39 = vadd.f32 %v3283_v48, %v3221_v22 }
0x1fb0   :  { %6502 = vtanh.f32 %v3285_v39 }
0x1fb1   :  { %v2701_v37 = vpop.permute.xlu1 %2700 }
0x1fb2   :  { %2703 = vst.msk [vmem:[#allocation8] sm:$0x1] %vm855_vm7, %v2701_v37 }
0x1fb3   :  { %2705 = vst.msk [vmem:[#allocation9 - $0x1] sm:$0x2] %vm2704_vm10, %v2701_v37 }
0x1fb5   :  { %v2872_v40 = vpop.permute.xlu1 %2871 }
0x1fb6   :  { %2874 = vst.msk [vmem:[#allocation8 + $0x2] sm:$0x1] %vm855_vm7, %v2872_v40 }
0x1fb7   :  { %2875 = vst.msk [vmem:[#allocation9 + $0x1] sm:$0x2] %vm2704_vm10, %v2872_v40 }
0x1fb9   :  { %v3042_v33 = vpop.permute.xlu1 %3041 }
0x1fba   :  { %v6503_v27 = vpop.eup %6502  ;;  %3044 = vst.msk [vmem:[#allocation8 + $0x4] sm:$0x1] %vm855_vm7, %v3042_v33 }
0x1fbb   :  { %3045 = vst.msk [vmem:[#allocation9 + $0x3] sm:$0x2] %vm2704_vm10, %v3042_v33  ;;  %3289 = vrot.lane.b32.xlu0 %v6503_v27, %s6616_s1 }
0x1fbd   :  { %v3212_v49 = vpop.permute.xlu1 %3211 }
0x1fbe   :  { %3214 = vst.msk [vmem:[#allocation8 + $0x6] sm:$0x1] %vm855_vm7, %v3212_v49 }
0x1fbf   :  { %3215 = vst.msk [vmem:[#allocation9 + $0x5] sm:$0x2] %vm2704_vm10, %v3212_v49  ;;  %2786 = vrot.lane.b32.xlu0 %v7417_v20, %s6616_s1  ;;  %v3293_v20 = vmul.f32 %v6501_v36, %v3209_v4 }
0x1fc3   :  { %2956 = vrot.lane.b32.xlu0 %v7453_v61, %s6616_s1 }
0x1fc7   :  { %3126 = vrot.lane.b32.xlu0 %v7489_v55, %s6616_s1 }
0x202d   :  { %v3290_v53 = vpop.permute.xlu0 %3289 }
0x202e   :  { %v3292_v61 = vmul.f32 %v3290_v53, %v3287_v44 }
0x2030   :  { %v3294_v54 = vadd.f32 %v3293_v20, %v3292_v61 }
0x2031   :  { %v2787_v51 = vpop.permute.xlu0 %2786 }
0x2032   :  { %2789 = vst.msk [vmem:[#allocation8 + $0x1] sm:$0x1] %vm855_vm7, %v2787_v51  ;;  %3296 = vrot.lane.b32.xlu0 %v3294_v54, %s6616_s1 }
0x2033   :  { %2790 = vst.msk [vmem:[#allocation9] sm:$0x2] %vm2704_vm10, %v2787_v51 }
0x2035   :  { %v2957_v55 = vpop.permute.xlu0 %2956 }
0x2036   :  { %2959 = vst.msk [vmem:[#allocation8 + $0x3] sm:$0x1] %vm855_vm7, %v2957_v55 }
0x2037   :  { %2960 = vst.msk [vmem:[#allocation9 + $0x2] sm:$0x2] %vm2704_vm10, %v2957_v55 }
0x2039   :  { %v3127_v56 = vpop.permute.xlu0 %3126 }
0x203a   :  { %3129 = vst.msk [vmem:[#allocation8 + $0x5] sm:$0x1] %vm855_vm7, %v3127_v56 }
0x203b   :  { %3130 = vst.msk [vmem:[#allocation9 + $0x4] sm:$0x2] %vm2704_vm10, %v3127_v56 }
0x20a4   :  { %v3297_v57 = vpop.permute.xlu0 %3296 }
0x20a5   :  { %3299 = vst.msk [vmem:[#allocation8 + $0x7] sm:$0x1] %vm855_vm7, %v3297_v57 }
0x20a6   :  { %3300 = vst.msk [vmem:[#allocation9 + $0x6] sm:$0x2] %vm2704_vm10, %v3297_v57 }
0x20ac   :  { %v3315_v59 = vld [vmem:[#allocation8] sm:$0xff] }
0x20ad   :  { %v3379_v46 = vld [vmem:[#allocation9] sm:$0xff]  ;;  %v3316_v1 = vpack.c.bf16 %v3315_v59, %v3315_v59 }
0x20ae   :  { %v3380_v2 = vpack.c.bf16 %v3379_v46, %v3379_v46 }
0x20af   :  { %6014 = vmatmul.mubr.msk.bf16.vlgmr.msra.gmra.mrb[60].mxu0 %vm850_vm6, %v3316_v1 }
0x20b0   :  { %6022 = vmatmul.mubr.msk.bf16.vlgmr.msra.gmra.mrb[68].mxu1 %vm850_vm6, %v3380_v2  ;;  %6026 = vmatpush3.bf16.msra.mxu0 %v7555_v62 }
0x20b1   :  { %6029 = vmatprep.mubr.msk.bf16.mxu0 %vm6613_vm2, %v6612_v0  ;;  %6027 = vmatprep.subr.bf16.mxu0 %v6612_v0 }
0x20b2   :  { %6034 = vmatpush3.bf16.msra.mxu1 %v7555_v62  ;;  %6037 = vmatprep.mubr.msk.bf16.mxu1 %vm6613_vm2, %v6612_v0 }
0x20b3   :  { %6035 = vmatprep.subr.bf16.mxu1 %v6612_v0 }
0x20b4   :  { %6028 = vmatpush3.bf16.msra.mxu0 %v7563_v3 }
0x20b5   :  { %6041 = vmatprep.subr.bf16.mxu0 %v6612_v0 }
0x20b6   :  { %6036 = vmatpush3.bf16.msra.mxu1 %v7563_v3 }
0x20b7   :  { %6049 = vmatprep.subr.bf16.mxu1 %v6612_v0  ;;  %6030 = vmatmul.mubr.bf16.vlgmr.msra.gmra.mrb[64].mxu0 %v6614_v47 }
0x20b8   :  { %6042 = vmatpush3.bf16.msra.mxu0 %v7555_v62  ;;  %6045 = vmatprep.mubr.msk.bf16.mxu0 %vm6613_vm2, %v6612_v0 }
0x20b9   :  { %6043 = vmatprep.subr.bf16.mxu0 %v6612_v0 }
0x20bc   :  { %6044 = vmatpush3.bf16.msra.mxu0 %v7563_v3 }
0x20bd   :  { %6057 = vmatprep.subr.bf16.mxu0 %v6612_v0 }
0x2182   :  { %v3372_v5 = vpop.f32.mrb[60].mxu0 }
0x2183   :  { %v3418_v6 = vpop.f32.mrb[68].mxu1  ;;  %v3373_v7 = vadd.f32 %v5359_v21, %v3372_v5  ;;  %v6015_v25 = vpop.f32.mrb[61].mxu0 }
0x2184   :  { %v3419_v8 = vadd.f32 %v5359_v21, %v3418_v6  ;;  %v6023_v10 = vpop.f32.mrb[69].mxu1  ;;  %v3375_v11 = vpop.f32.mrb[62].mxu0 }
0x2185   :  { %v3421_v60 = vpop.f32.mrb[70].mxu1  ;;  %3378 = vst.msk [vmem:[#allocation10] sm:$0xff] %vm2557_vm8, %v3373_v7  ;;  %v6016_v12 = vpop.f32.mrb[63].mxu0 }
0x2186   :  { %3424 = vst.msk [vmem:[#allocation11] sm:$0xff] %vm2557_vm8, %v3419_v8  ;;  %v6024_v13 = vpop.f32.mrb[71].mxu1 }
0x218a   :  { %v3483_v63 = vpop.f32.mrb[64].mxu0 }
0x218b   :  { %v3484_v16 = vadd.f32 %v7591_v14, %v3483_v63  ;;  %v6031_v17 = vpop.f32.mrb[65].mxu0 }
0x218c   :  { %v3486_v18 = vpop.f32.mrb[66].mxu0  ;;  %v3425_v24 = vld [vmem:[#allocation10] sm:$0x1]  ;;  %v3521_v52 = vld [vmem:[#allocation10 + $0x1] sm:$0x1] }
0x218d   :  { %3497 = vrot.lane.b32.xlu1 %v3484_v16, %s6615_s30  ;;  %v6032_v19 = vpop.f32.mrb[67].mxu0  ;;  %v3426_v4 = vld [vmem:[#allocation11] sm:$0x1]  ;;  %v3522_v43 = vld [vmem:[#allocation11 + $0x1] sm:$0x1] }
0x218e   :  { %v3428_v23 = vrot.slane %v3426_v4, 7  ;;  %v3524_v44 = vrot.slane %v3522_v43, 7  ;;  %v3607_v63 = vld [vmem:[#allocation11 + $0x2] sm:$0x1]  ;;  %v3606_v17 = vld [vmem:[#allocation10 + $0x2] sm:$0x1] }
0x2190   :  { %v3430_v9 = vsel %vm2610_vm9, %v3425_v24, %v3428_v23  ;;  %v3526_v53 = vsel %vm2610_vm9, %v3521_v52, %v3524_v44 }
0x2191   :  { %v3489_v26 = vadd.f32 %v3484_v16, %v3430_v9  ;;  %v3609_v16 = vrot.slane %v3607_v63, 7 }
0x2193   :  { %v5367_v28 = vmul.f32 -1.442695, %v3489_v26  ;;  %v3611_v18 = vsel %vm2610_vm9, %v3606_v17, %v3609_v16 }
0x2195   :  { %6504 = vpow2.f32 %v5367_v28 }
0x219f   :  { %v6505_v30 = vpop.eup %6504 }
0x21a0   :  { %v3493_v15 = vadd.f32 1.0, %v6505_v30 }
0x21a2   :  { %6506 = vrcp.f32 %v3493_v15 }
0x21ac   :  { %v6507_v31 = vpop.eup %6506 }
0x21ad   :  { %v3507_v41 = vsub.f32 1.0, %v6507_v31  ;;  %v3513_v36 = vmul.f32 0.0, %v6507_v31 }
0x21ff   :  { %v3498_v34 = vpop.permute.xlu1 %3497 }
0x2200   :  { %v3500_v32 = vmul.f32 %v6507_v31, %v3498_v34 }
0x2202   :  { %3502 = vrot.lane.b32.xlu0 %v3500_v32, %s6615_s30 }
0x2274   :  { %v3503_v22 = vpop.permute.xlu0 %3502 }
0x2275   :  { %v3505_v45 = vadd.f32 %v3503_v22, %v3430_v9 }
0x2277   :  { %6508 = vtanh.f32 %v3505_v45 }
0x2281   :  { %v6509_v29 = vpop.eup %6508 }
0x2282   :  { %3509 = vrot.lane.b32.xlu1 %v6509_v29, %s6616_s1 }
0x22f4   :  { %v3510_v35 = vpop.permute.xlu1 %3509 }
0x22f5   :  { %v3512_v50 = vmul.f32 %v3510_v35, %v3507_v41 }
0x22f7   :  { %v7598_v42 = vadd.f32 %v3513_v36, %v3512_v50 }
0x22f9   :  { %v3527_v48 = vpack.c.bf16 %v7598_v42, %v7598_v42 }
0x22fb   :  { %3529 = vrot.lane.b32.xlu0 %v3527_v48, %s6616_s1 }
0x236d   :  { %v3530_v39 = vpop.permute.xlu0 %3529 }
0x236e   :  { %6038 = vmatmul.mubr.msk.bf16.vlgmr.msra.gmra.mrb[72].mxu1 %vm850_vm6, %v3530_v39 }
0x236f   :  { %6050 = vmatpush3.bf16.msra.mxu1 %v7555_v62  ;;  %6053 = vmatprep.mubr.msk.bf16.mxu1 %vm6613_vm2, %v6612_v0 }
0x2370   :  { %6051 = vmatprep.subr.bf16.mxu1 %v6612_v0 }
0x2373   :  { %6052 = vmatpush3.bf16.msra.mxu1 %v7563_v3 }
0x2374   :  { %6065 = vmatprep.subr.bf16.mxu1 %v6612_v0 }
0x2441   :  { %v3568_v37 = vpop.f32.mrb[72].mxu1 }
0x2442   :  { %v3569_v40 = vadd.f32 %v7591_v14, %v3568_v37  ;;  %v6039_v33 = vpop.f32.mrb[73].mxu1 }
0x2443   :  { %v3571_v27 = vpop.f32.mrb[74].mxu1 }
0x2444   :  { %3582 = vrot.lane.b32.xlu1 %v3569_v40, %s6615_s30  ;;  %v6040_v49 = vpop.f32.mrb[75].mxu1  ;;  %v3574_v20 = vadd.f32 %v3569_v40, %v3526_v53  ;;  %v3692_v40 = vld [vmem:[#allocation11 + $0x3] sm:$0x1]  ;;  %v3691_v27 = vld [vmem:[#allocation10 + $0x3] sm:$0x1] }
0x2445   :  { %v3694_v33 = vrot.slane %v3692_v40, 7 }
0x2446   :  { %v5369_v61 = vmul.f32 -1.442695, %v3574_v20 }
0x2447   :  { %v3696_v49 = vsel %vm2610_vm9, %v3691_v27, %v3694_v33 }
0x2448   :  { %6510 = vpow2.f32 %v5369_v61 }
0x2452   :  { %v6511_v54 = vpop.eup %6510 }
0x2453   :  { %v3578_v51 = vadd.f32 1.0, %v6511_v54 }
0x2455   :  { %6512 = vrcp.f32 %v3578_v51 }
0x245f   :  { %v6513_v55 = vpop.eup %6512 }
0x2460   :  { %v3592_v2 = vsub.f32 1.0, %v6513_v55  ;;  %v3598_v5 = vmul.f32 %v6513_v55, %v7598_v42 }
0x24b6   :  { %v3583_v56 = vpop.permute.xlu1 %3582 }
0x24b7   :  { %v3585_v57 = vmul.f32 %v6513_v55, %v3583_v56 }
0x24b9   :  { %3587 = vrot.lane.b32.xlu0 %v3585_v57, %s6615_s30 }
0x252b   :  { %v3588_v59 = vpop.permute.xlu0 %3587 }
0x252c   :  { %v3590_v46 = vadd.f32 %v3588_v59, %v3526_v53 }
0x252e   :  { %6514 = vtanh.f32 %v3590_v46 }
0x2538   :  { %v6515_v1 = vpop.eup %6514 }
0x2539   :  { %3594 = vrot.lane.b32.xlu1 %v6515_v1, %s6616_s1 }
0x25ab   :  { %v3595_v21 = vpop.permute.xlu1 %3594 }
0x25ac   :  { %v3597_v6 = vmul.f32 %v3595_v21, %v3592_v2 }
0x25ae   :  { %v7616_v7 = vadd.f32 %v3598_v5, %v3597_v6 }
0x25b0   :  { %v3612_v8 = vpack.c.bf16 %v7616_v7, %v7616_v7 }
0x25b2   :  { %3614 = vrot.lane.b32.xlu0 %v3612_v8, %s6616_s1 }
0x2624   :  { %v3615_v25 = vpop.permute.xlu0 %3614 }
0x2625   :  { %6046 = vmatmul.mubr.msk.bf16.vlgmr.msra.gmra.mrb[68].mxu0 %vm850_vm6, %v3615_v25 }
0x2626   :  { %6058 = vmatpush3.bf16.msra.mxu0 %v7555_v62  ;;  %6061 = vmatprep.mubr.msk.bf16.mxu0 %vm6613_vm2, %v6612_v0 }
0x2627   :  { %6059 = vmatprep.subr.bf16.mxu0 %v6612_v0 }
0x262a   :  { %6060 = vmatpush3.bf16.msra.mxu0 %v7563_v3 }
0x262b   :  { %6073 = vmatprep.subr.bf16.mxu0 %v6612_v0 }
0x26f8   :  { %v3653_v10 = vpop.f32.mrb[68].mxu0 }
0x26f9   :  { %v3654_v11 = vadd.f32 %v7591_v14, %v3653_v10  ;;  %v6047_v60 = vpop.f32.mrb[69].mxu0 }
0x26fa   :  { %v3656_v12 = vpop.f32.mrb[70].mxu0  ;;  %v3777_v60 = vld [vmem:[#allocation11 + $0x4] sm:$0x1] }
0x26fb   :  { %3667 = vrot.lane.b32.xlu1 %v3654_v11, %s6615_s30  ;;  %v6048_v13 = vpop.f32.mrb[71].mxu0  ;;  %v3659_v19 = vadd.f32 %v3654_v11, %v3611_v18  ;;  %v3779_v12 = vrot.slane %v3777_v60, 7 }
0x26fc   :  { %v3776_v13 = vld [vmem:[#allocation10 + $0x4] sm:$0x1] }
0x26fd   :  { %v5371_v4 = vmul.f32 -1.442695, %v3659_v19  ;;  %v3781_v63 = vsel %vm2610_vm9, %v3776_v13, %v3779_v12 }
0x26ff   :  { %6516 = vpow2.f32 %v5371_v4 }
0x2709   :  { %v6517_v23 = vpop.eup %6516 }
0x270a   :  { %v3663_v24 = vadd.f32 1.0, %v6517_v23 }
0x270c   :  { %6518 = vrcp.f32 %v3663_v24 }
0x2716   :  { %v6519_v9 = vpop.eup %6518 }
0x2717   :  { %v3677_v34 = vsub.f32 1.0, %v6519_v9  ;;  %v3683_v22 = vmul.f32 %v6519_v9, %v7616_v7 }
0x276d   :  { %v3668_v26 = vpop.permute.xlu1 %3667 }
0x276e   :  { %v3670_v28 = vmul.f32 %v6519_v9, %v3668_v26 }
0x2770   :  { %3672 = vrot.lane.b32.xlu0 %v3670_v28, %s6615_s30 }
0x27e2   :  { %v3673_v30 = vpop.permute.xlu0 %3672 }
0x27e3   :  { %v3675_v15 = vadd.f32 %v3673_v30, %v3611_v18 }
0x27e5   :  { %6520 = vtanh.f32 %v3675_v15 }
0x27ef   :  { %v6521_v31 = vpop.eup %6520 }
0x27f0   :  { %3679 = vrot.lane.b32.xlu1 %v6521_v31, %s6616_s1 }
0x2862   :  { %v3680_v32 = vpop.permute.xlu1 %3679 }
0x2863   :  { %v3682_v45 = vmul.f32 %v3680_v32, %v3677_v34 }
0x2865   :  { %v7634_v29 = vadd.f32 %v3683_v22, %v3682_v45 }
0x2867   :  { %v3697_v41 = vpack.c.bf16 %v7634_v29, %v7634_v29 }
0x2869   :  { %3699 = vrot.lane.b32.xlu0 %v3697_v41, %s6616_s1 }
0x28db   :  { %v3700_v35 = vpop.permute.xlu0 %3699 }
0x28dc   :  { %6054 = vmatmul.mubr.msk.bf16.vlgmr.msra.gmra.mrb[76].mxu1 %vm850_vm6, %v3700_v35 }
0x28dd   :  { %6066 = vmatpush3.bf16.msra.mxu1 %v7555_v62  ;;  %6069 = vmatprep.mubr.msk.bf16.mxu1 %vm6613_vm2, %v6612_v0 }
0x28de   :  { %6067 = vmatprep.subr.bf16.mxu1 %v6612_v0 }
0x28e1   :  { %6068 = vmatpush3.bf16.msra.mxu1 %v7563_v3 }
0x28e2   :  { %6081 = vmatprep.subr.bf16.mxu1 %v6612_v0 }
0x29af   :  { %v3738_v36 = vpop.f32.mrb[76].mxu1 }
0x29b0   :  { %v3739_v50 = vadd.f32 %v7591_v14, %v3738_v36  ;;  %v6055_v48 = vpop.f32.mrb[77].mxu1 }
0x29b1   :  { %v3741_v39 = vpop.f32.mrb[78].mxu1 }
0x29b2   :  { %3752 = vrot.lane.b32.xlu1 %v3739_v50, %s6615_s30  ;;  %v6056_v37 = vpop.f32.mrb[79].mxu1  ;;  %v3744_v43 = vadd.f32 %v3739_v50, %v3696_v49  ;;  %v3862_v39 = vld [vmem:[#allocation11 + $0x5] sm:$0x1] }
0x29b3   :  { %v3864_v37 = vrot.slane %v3862_v39, 7  ;;  %v4031_v39 = vld [vmem:[#allocation10 + $0x7] sm:$0x1] }
0x29b4   :  { %v5373_v44 = vmul.f32 -1.442695, %v3744_v43 }
0x29b6   :  { %6522 = vpow2.f32 %v5373_v44 }
0x29c0   :  { %v6523_v52 = vpop.eup %6522 }
0x29c1   :  { %v3748_v53 = vadd.f32 1.0, %v6523_v52 }
0x29c3   :  { %6524 = vrcp.f32 %v3748_v53 }
0x29cd   :  { %v6525_v20 = vpop.eup %6524 }
0x29ce   :  { %v3762_v57 = vsub.f32 1.0, %v6525_v20  ;;  %v3768_v46 = vmul.f32 %v6525_v20, %v7634_v29 }
0x2a24   :  { %v3753_v61 = vpop.permute.xlu1 %3752 }
0x2a25   :  { %v3755_v54 = vmul.f32 %v6525_v20, %v3753_v61 }
0x2a27   :  { %3757 = vrot.lane.b32.xlu0 %v3755_v54, %s6615_s30 }
0x2a99   :  { %v3758_v51 = vpop.permute.xlu0 %3757 }
0x2a9a   :  { %v3760_v55 = vadd.f32 %v3758_v51, %v3696_v49 }
0x2a9c   :  { %6526 = vtanh.f32 %v3760_v55 }
0x2aa6   :  { %v6527_v56 = vpop.eup %6526 }
0x2aa7   :  { %3764 = vrot.lane.b32.xlu1 %v6527_v56, %s6616_s1 }
0x2b19   :  { %v3765_v59 = vpop.permute.xlu1 %3764 }
0x2b1a   :  { %v3767_v1 = vmul.f32 %v3765_v59, %v3762_v57 }
0x2b1c   :  { %v7652_v2 = vadd.f32 %v3768_v46, %v3767_v1 }
0x2b1e   :  { %v3782_v21 = vpack.c.bf16 %v7652_v2, %v7652_v2 }
0x2b20   :  { %3784 = vrot.lane.b32.xlu0 %v3782_v21, %s6616_s1 }
0x2b92   :  { %v3785_v5 = vpop.permute.xlu0 %3784 }
0x2b93   :  { %6062 = vmatmul.mubr.msk.bf16.vlgmr.msra.gmra.mrb[72].mxu0 %vm850_vm6, %v3785_v5 }
0x2b94   :  { %6074 = vmatpush3.bf16.msra.mxu0 %v7555_v62  ;;  %6077 = vmatprep.mubr.msk.bf16.mxu0 %vm6613_vm2, %v6612_v0 }
0x2b95   :  { %6075 = vmatprep.subr.bf16.mxu0 %v6612_v0 }
0x2b98   :  { %6076 = vmatpush3.bf16.msra.mxu0 %v7563_v3 }
0x2b99   :  { %6089 = vmatprep.subr.bf16.mxu0 %v6612_v0 }
0x2c66   :  { %v3823_v6 = vpop.f32.mrb[72].mxu0 }
0x2c67   :  { %v3824_v8 = vadd.f32 %v7591_v14, %v3823_v6  ;;  %v6063_v25 = vpop.f32.mrb[73].mxu0 }
0x2c68   :  { %v3826_v10 = vpop.f32.mrb[74].mxu0  ;;  %v3947_v25 = vld [vmem:[#allocation11 + $0x6] sm:$0x1] }
0x2c69   :  { %3837 = vrot.lane.b32.xlu1 %v3824_v8, %s6615_s30  ;;  %v6064_v11 = vpop.f32.mrb[75].mxu0  ;;  %v3829_v16 = vadd.f32 %v3824_v8, %v3781_v63  ;;  %v3949_v10 = vrot.slane %v3947_v25, 7  ;;  %v7762_v25 = vld [vmem:[%s8033_s10 + $0x28] sm:$0xff]  }
0x2c6a   :  { %v3946_v11 = vld [vmem:[#allocation10 + $0x6] sm:$0x1] }
0x2c6b   :  { %v5375_v17 = vmul.f32 -1.442695, %v3829_v16  ;;  %v3951_v60 = vsel %vm2610_vm9, %v3946_v11, %v3949_v10  ;;  %v5392_v10 = vld [vmem:[%s8032_s11 + $0x2] ss:$0 sm:$0xff] }
0x2c6d   :  { %6528 = vpow2.f32 %v5375_v17 }
0x2c77   :  { %v6529_v18 = vpop.eup %6528 }
0x2c78   :  { %v3833_v19 = vadd.f32 1.0, %v6529_v18 }
0x2c7a   :  { %6530 = vrcp.f32 %v3833_v19 }
0x2c84   :  { %v6531_v4 = vpop.eup %6530 }
0x2c85   :  { %v3847_v30 = vsub.f32 1.0, %v6531_v4  ;;  %v3853_v31 = vmul.f32 %v6531_v4, %v7652_v2 }
0x2cdb   :  { %v3838_v23 = vpop.permute.xlu1 %3837 }
0x2cdc   :  { %v3840_v24 = vmul.f32 %v6531_v4, %v3838_v23 }
0x2cde   :  { %3842 = vrot.lane.b32.xlu0 %v3840_v24, %s6615_s30 }
0x2d50   :  { %v3843_v9 = vpop.permute.xlu0 %3842 }
0x2d51   :  { %v3845_v26 = vadd.f32 %v3843_v9, %v3781_v63 }
0x2d53   :  { %6532 = vtanh.f32 %v3845_v26 }
0x2d5d   :  { %v6533_v28 = vpop.eup %6532 }
0x2d5e   :  { %3849 = vrot.lane.b32.xlu1 %v6533_v28, %s6616_s1 }
0x2dd0   :  { %v3850_v15 = vpop.permute.xlu1 %3849 }
0x2dd1   :  { %v3852_v34 = vmul.f32 %v3850_v15, %v3847_v30 }
0x2dd3   :  { %v7670_v32 = vadd.f32 %v3853_v31, %v3852_v34 }
0x2dd5   :  { %v3867_v22 = vpack.c.bf16 %v7670_v32, %v7670_v32 }
0x2dd7   :  { %3869 = vrot.lane.b32.xlu0 %v3867_v22, %s6616_s1 }
0x2e49   :  { %v3870_v45 = vpop.permute.xlu0 %3869 }
0x2e4a   :  { %6070 = vmatmul.mubr.msk.bf16.vlgmr.msra.gmra.mrb[80].mxu1 %vm850_vm6, %v3870_v45 }
0x2e4b   :  { %6082 = vmatpush3.bf16.msra.mxu1 %v7555_v62  ;;  %6085 = vmatprep.mubr.msk.bf16.mxu1 %vm6613_vm2, %v6612_v0  ;;  %v3861_v62 = vld [vmem:[#allocation10 + $0x5] sm:$0x1] }
0x2e4c   :  { %6083 = vmatprep.subr.bf16.mxu1 %v6612_v0  ;;  %v3866_v40 = vsel %vm2610_vm9, %v3861_v62, %v3864_v37 }
0x2e4f   :  { %6084 = vmatpush3.bf16.msra.mxu1 %v7563_v3 }
0x2e50   :  { %6097 = vmatprep.subr.bf16.mxu1 %v6612_v0 }
0x2f1d   :  { %v3908_v41 = vpop.f32.mrb[80].mxu1 }
0x2f1e   :  { %v3909_v35 = vadd.f32 %v7591_v14, %v3908_v41  ;;  %v6071_v36 = vpop.f32.mrb[81].mxu1 }
0x2f1f   :  { %v3911_v50 = vpop.f32.mrb[82].mxu1 }
0x2f20   :  { %3922 = vrot.lane.b32.xlu1 %v3909_v35, %s6615_s30  ;;  %v6072_v48 = vpop.f32.mrb[83].mxu1  ;;  %v3914_v33 = vadd.f32 %v3909_v35, %v3866_v40  ;;  %v4032_v50 = vld [vmem:[#allocation11 + $0x7] sm:$0x1] }
0x2f21   :  { %v4034_v48 = vrot.slane %v4032_v50, 7 }
0x2f22   :  { %v5377_v27 = vmul.f32 -1.442695, %v3914_v33 }
0x2f23   :  { %v4036_v37 = vsel %vm2610_vm9, %v4031_v39, %v4034_v48 }
0x2f24   :  { %6534 = vpow2.f32 %v5377_v27 }
0x2f2e   :  { %v6535_v49 = vpop.eup %6534 }
0x2f2f   :  { %v3918_v3 = vadd.f32 1.0, %v6535_v49 }
0x2f31   :  { %6536 = vrcp.f32 %v3918_v3 }
0x2f3b   :  { %v6537_v43 = vpop.eup %6536 }
0x2f3c   :  { %v3932_v54 = vsub.f32 1.0, %v6537_v43  ;;  %v3938_v55 = vmul.f32 %v6537_v43, %v7670_v32 }
0x2f92   :  { %v3923_v44 = vpop.permute.xlu1 %3922 }
0x2f93   :  { %v3925_v52 = vmul.f32 %v6537_v43, %v3923_v44 }
0x2f95   :  { %3927 = vrot.lane.b32.xlu0 %v3925_v52, %s6615_s30 }
0x3007   :  { %v3928_v53 = vpop.permute.xlu0 %3927 }
0x3008   :  { %v3930_v20 = vadd.f32 %v3928_v53, %v3866_v40 }
0x300a   :  { %6538 = vtanh.f32 %v3930_v20  ;;  %v6378_v20 = vld [vmem:[%s8030_s9 + $0x20] sm:$0xff]  }
0x3014   :  { %v6539_v61 = vpop.eup %6538 }
0x3015   :  { %3934 = vrot.lane.b32.xlu1 %v6539_v61, %s6616_s1  ;;  %v6379_v61 = vld [vmem:[%s8030_s9 + $0x28] sm:$0xff]  }
0x3087   :  { %v3935_v51 = vpop.permute.xlu1 %3934 }
0x3088   :  { %v3937_v56 = vmul.f32 %v3935_v51, %v3932_v54 }
0x308a   :  { %v7688_v57 = vadd.f32 %v3938_v55, %v3937_v56 }
0x308c   :  { %v3952_v59 = vpack.c.bf16 %v7688_v57, %v7688_v57 }
0x308e   :  { %3954 = vrot.lane.b32.xlu0 %v3952_v59, %s6616_s1 }
0x3100   :  { %v3955_v46 = vpop.permute.xlu0 %3954 }
0x3101   :  { %6078 = vmatmul.mubr.msk.bf16.vlgmr.msra.gmra.mrb[76].mxu0 %vm850_vm6, %v3955_v46 }
0x3102   :  { %6093 = vmatprep.mubr.msk.bf16.mxu0 %vm6613_vm2, %v6612_v0  ;;  %6090 = vmatpush3.bf16.msra.mxu0 %v6378_v20 }
0x3103   :  { %6091 = vmatprep.subr.bf16.mxu0 %v6612_v0 }
0x3106   :  { %6092 = vmatpush3.bf16.msra.mxu0 %v6379_v61 }
0x3107   :  { %6105 = vmatprep.subr.bf16.mxu0 %v6612_v0 }
0x31d4   :  { %v3993_v1 = vpop.f32.mrb[76].mxu0 }
0x31d5   :  { %v3994_v21 = vadd.f32 %v7591_v14, %v3993_v1  ;;  %v6079_v5 = vpop.f32.mrb[77].mxu0 }
0x31d6   :  { %v3996_v6 = vpop.f32.mrb[78].mxu0  ;;  %v7754_v5 = vld [vmem:[%s8033_s10 + $0x20] sm:$0xff]  }
0x31d7   :  { %4007 = vrot.lane.b32.xlu1 %v3994_v21, %s6615_s30  ;;  %v6080_v8 = vpop.f32.mrb[79].mxu0  ;;  %v3999_v12 = vadd.f32 %v3994_v21, %v3951_v60 }
0x31d9   :  { %v5379_v13 = vmul.f32 -1.442695, %v3999_v12 }
0x31db   :  { %6540 = vpow2.f32 %v5379_v13 }
0x31e5   :  { %v6541_v63 = vpop.eup %6540 }
0x31e6   :  { %v4003_v16 = vadd.f32 1.0, %v6541_v63 }
0x31e8   :  { %6542 = vrcp.f32 %v4003_v16 }
0x31f2   :  { %v6543_v17 = vpop.eup %6542 }
0x31f3   :  { %v4017_v9 = vsub.f32 1.0, %v6543_v17  ;;  %v4023_v28 = vmul.f32 %v6543_v17, %v7688_v57 }
0x3249   :  { %v4008_v18 = vpop.permute.xlu1 %4007 }
0x324a   :  { %v4010_v19 = vmul.f32 %v6543_v17, %v4008_v18 }
0x324c   :  { %4012 = vrot.lane.b32.xlu0 %v4010_v19, %s6615_s30 }
0x32be   :  { %v4013_v4 = vpop.permute.xlu0 %4012 }
0x32bf   :  { %v4015_v23 = vadd.f32 %v4013_v4, %v3951_v60  ;;  %v7790_v4 = vld [vmem:[%s8034_s12 + $0x2] ss:$0 sm:$0xff] }
0x32c1   :  { %6544 = vtanh.f32 %v4015_v23 }
0x32cb   :  { %v6545_v24 = vpop.eup %6544 }
0x32cc   :  { %4019 = vrot.lane.b32.xlu1 %v6545_v24, %s6616_s1 }
0x333e   :  { %v4020_v26 = vpop.permute.xlu1 %4019 }
0x333f   :  { %v4022_v30 = vmul.f32 %v4020_v26, %v4017_v9 }
0x3341   :  { %v4024_v15 = vadd.f32 %v4023_v28, %v4022_v30 }
0x3343   :  { %v4037_v31 = vpack.c.bf16 %v4024_v15, %v4024_v15 }
0x3345   :  { %4039 = vrot.lane.b32.xlu0 %v4037_v31, %s6616_s1 }
0x33b7   :  { %v4040_v34 = vpop.permute.xlu0 %4039 }
0x33b8   :  { %6086 = vmatmul.mubr.msk.bf16.vlgmr.msra.gmra.mrb[84].mxu1 %vm850_vm6, %v4040_v34 }
0x33b9   :  { %6101 = vmatprep.mubr.msk.bf16.mxu1 %vm6613_vm2, %v6612_v0  ;;  %6098 = vmatpush3.bf16.msra.mxu1 %v6378_v20 }
0x33ba   :  { %6099 = vmatprep.subr.bf16.mxu1 %v6612_v0 }
0x33bd   :  { %6100 = vmatpush3.bf16.msra.mxu1 %v6379_v61 }
0x33be   :  { %6113 = vmatprep.subr.bf16.mxu1 %v6612_v0 }
0x348b   :  { %v4078_v22 = vpop.f32.mrb[84].mxu1 }
0x348c   :  { %v4079_v45 = vadd.f32 %v7591_v14, %v4078_v22  ;;  %v6087_v41 = vpop.f32.mrb[85].mxu1 }
0x348d   :  { %v4081_v35 = vpop.f32.mrb[86].mxu1 }
0x348e   :  { %4092 = vrot.lane.b32.xlu1 %v4079_v45, %s6615_s30  ;;  %v6088_v36 = vpop.f32.mrb[87].mxu1  ;;  %v4084_v62 = vadd.f32 %v4079_v45, %v4036_v37 }
0x3490   :  { %v5381_v40 = vmul.f32 -1.442695, %v4084_v62 }
0x3492   :  { %6546 = vpow2.f32 %v5381_v40 }
0x349c   :  { %v6547_v33 = vpop.eup %6546 }
0x349d   :  { %v4088_v27 = vadd.f32 1.0, %v6547_v33 }
0x349f   :  { %6548 = vrcp.f32 %v4088_v27 }
0x34a9   :  { %v6549_v49 = vpop.eup %6548 }
0x34aa   :  { %v4108_v54 = vmul.f32 %v6549_v49, %v4024_v15 }
0x3500   :  { %v4093_v3 = vpop.permute.xlu1 %4092 }
0x3501   :  { %v4095_v43 = vmul.f32 %v6549_v49, %v4093_v3 }
0x3503   :  { %4097 = vrot.lane.b32.xlu0 %v4095_v43, %s6615_s30 }
0x3507   :  { %3516 = vrot.lane.b32.xlu0 %v7598_v42, %s6616_s1 }
0x350b   :  { %3686 = vrot.lane.b32.xlu0 %v7634_v29, %s6616_s1 }
0x350f   :  { %3856 = vrot.lane.b32.xlu0 %v7670_v32, %s6616_s1 }
0x3513   :  { %4026 = vrot.lane.b32.xlu0 %v4024_v15, %s6616_s1 }
0x3575   :  { %v4098_v14 = vpop.permute.xlu0 %4097 }
0x3576   :  { %v4100_v44 = vadd.f32 %v4098_v14, %v4036_v37 }
0x3578   :  { %6550 = vtanh.f32 %v4100_v44 }
0x3579   :  { %v3517_v52 = vpop.permute.xlu0 %3516 }
0x357a   :  { %3519 = vst.msk [vmem:[#allocation8] sm:$0x1] %vm855_vm7, %v3517_v52 }
0x357b   :  { %3520 = vst.msk [vmem:[#allocation9 - $0x1] sm:$0x2] %vm2704_vm10, %v3517_v52 }
0x357d   :  { %v3687_v53 = vpop.permute.xlu0 %3686 }
0x357e   :  { %3689 = vst.msk [vmem:[#allocation8 + $0x2] sm:$0x1] %vm855_vm7, %v3687_v53 }
0x357f   :  { %3690 = vst.msk [vmem:[#allocation9 + $0x1] sm:$0x2] %vm2704_vm10, %v3687_v53 }
0x3581   :  { %v3857_v42 = vpop.permute.xlu0 %3856 }
0x3582   :  { %v6551_v29 = vpop.eup %6550  ;;  %3859 = vst.msk [vmem:[#allocation8 + $0x4] sm:$0x1] %vm855_vm7, %v3857_v42 }
0x3583   :  { %3860 = vst.msk [vmem:[#allocation9 + $0x3] sm:$0x2] %vm2704_vm10, %v3857_v42  ;;  %4104 = vrot.lane.b32.xlu1 %v6551_v29, %s6616_s1 }
0x3585   :  { %v4027_v32 = vpop.permute.xlu0 %4026 }
0x3586   :  { %4029 = vst.msk [vmem:[#allocation8 + $0x6] sm:$0x1] %vm855_vm7, %v4027_v32 }
0x3587   :  { %4030 = vst.msk [vmem:[#allocation9 + $0x5] sm:$0x2] %vm2704_vm10, %v4027_v32  ;;  %3601 = vrot.lane.b32.xlu1 %v7616_v7, %s6616_s1  ;;  %v4102_v7 = vsub.f32 1.0, %v6549_v49 }
0x358b   :  { %3771 = vrot.lane.b32.xlu1 %v7652_v2, %s6616_s1 }
0x358f   :  { %3941 = vrot.lane.b32.xlu1 %v7688_v57, %s6616_s1 }
0x35f5   :  { %v4105_v2 = vpop.permute.xlu1 %4104 }
0x35f6   :  { %v4107_v51 = vmul.f32 %v4105_v2, %v4102_v7 }
0x35f8   :  { %v4109_v55 = vadd.f32 %v4108_v54, %v4107_v51 }
0x35f9   :  { %v3602_v56 = vpop.permute.xlu1 %3601 }
0x35fa   :  { %3604 = vst.msk [vmem:[#allocation8 + $0x1] sm:$0x1] %vm855_vm7, %v3602_v56  ;;  %4111 = vrot.lane.b32.xlu1 %v4109_v55, %s6616_s1 }
0x35fb   :  { %3605 = vst.msk [vmem:[#allocation9] sm:$0x2] %vm2704_vm10, %v3602_v56 }
0x35fd   :  { %v3772_v57 = vpop.permute.xlu1 %3771 }
0x35fe   :  { %3774 = vst.msk [vmem:[#allocation8 + $0x3] sm:$0x1] %vm855_vm7, %v3772_v57 }
0x35ff   :  { %3775 = vst.msk [vmem:[#allocation9 + $0x2] sm:$0x2] %vm2704_vm10, %v3772_v57 }
0x3601   :  { %v3942_v59 = vpop.permute.xlu1 %3941 }
0x3602   :  { %3944 = vst.msk [vmem:[#allocation8 + $0x5] sm:$0x1] %vm855_vm7, %v3942_v59 }
0x3603   :  { %3945 = vst.msk [vmem:[#allocation9 + $0x4] sm:$0x2] %vm2704_vm10, %v3942_v59 }
0x366c   :  { %v4112_v46 = vpop.permute.xlu1 %4111 }
0x366d   :  { %4114 = vst.msk [vmem:[#allocation8 + $0x7] sm:$0x1] %vm855_vm7, %v4112_v46 }
0x366e   :  { %4115 = vst.msk [vmem:[#allocation9 + $0x6] sm:$0x2] %vm2704_vm10, %v4112_v46 }
0x3674   :  { %v4130_v1 = vld [vmem:[#allocation8] sm:$0xff] }
0x3675   :  { %v4194_v21 = vld [vmem:[#allocation9] sm:$0xff]  ;;  %v4131_v6 = vpack.c.bf16 %v4130_v1, %v4130_v1 }
0x3676   :  { %v4195_v8 = vpack.c.bf16 %v4194_v21, %v4194_v21 }
0x3677   :  { %6094 = vmatmul.mubr.msk.bf16.vlgmr.msra.gmra.mrb[80].mxu0 %vm850_vm6, %v4131_v6 }
0x3678   :  { %6102 = vmatmul.mubr.msk.bf16.vlgmr.msra.gmra.mrb[88].mxu1 %vm850_vm6, %v4195_v8  ;;  %6106 = vmatpush3.bf16.msra.mxu0 %v7754_v5 }
0x3679   :  { %6109 = vmatprep.mubr.msk.bf16.mxu0 %vm6613_vm2, %v6612_v0  ;;  %6107 = vmatprep.subr.bf16.mxu0 %v6612_v0 }
0x367a   :  { %6114 = vmatpush3.bf16.msra.mxu1 %v7754_v5  ;;  %6117 = vmatprep.mubr.msk.bf16.mxu1 %vm6613_vm2, %v6612_v0 }
0x367b   :  { %6115 = vmatprep.subr.bf16.mxu1 %v6612_v0 }
0x367c   :  { %6108 = vmatpush3.bf16.msra.mxu0 %v7762_v25 }
0x367d   :  { %6121 = vmatprep.subr.bf16.mxu0 %v6612_v0 }
0x367e   :  { %6116 = vmatpush3.bf16.msra.mxu1 %v7762_v25 }
0x367f   :  { %6129 = vmatprep.subr.bf16.mxu1 %v6612_v0  ;;  %6110 = vmatmul.mubr.bf16.vlgmr.msra.gmra.mrb[84].mxu0 %v6614_v47 }
0x3680   :  { %6122 = vmatpush3.bf16.msra.mxu0 %v7754_v5  ;;  %6125 = vmatprep.mubr.msk.bf16.mxu0 %vm6613_vm2, %v6612_v0 }
0x3681   :  { %6123 = vmatprep.subr.bf16.mxu0 %v6612_v0 }
0x3684   :  { %6124 = vmatpush3.bf16.msra.mxu0 %v7762_v25 }
0x3685   :  { %6137 = vmatprep.subr.bf16.mxu0 %v6612_v0 }
0x374a   :  { %v4187_v11 = vpop.f32.mrb[80].mxu0 }
0x374b   :  { %v4233_v60 = vpop.f32.mrb[88].mxu1  ;;  %v4188_v12 = vadd.f32 %v5392_v10, %v4187_v11  ;;  %v6095_v47 = vpop.f32.mrb[81].mxu0 }
0x374c   :  { %v4234_v13 = vadd.f32 %v5392_v10, %v4233_v60  ;;  %v6103_v63 = vpop.f32.mrb[89].mxu1  ;;  %v4190_v16 = vpop.f32.mrb[82].mxu0 }
0x374d   :  { %v4236_v17 = vpop.f32.mrb[90].mxu1  ;;  %4193 = vst.msk [vmem:[#allocation10] sm:$0xff] %vm2557_vm8, %v4188_v12  ;;  %v6096_v18 = vpop.f32.mrb[83].mxu0 }
0x374e   :  { %4239 = vst.msk [vmem:[#allocation11] sm:$0xff] %vm2557_vm8, %v4234_v13  ;;  %v6104_v19 = vpop.f32.mrb[91].mxu1 }
0x3752   :  { %v4298_v23 = vpop.f32.mrb[84].mxu0 }
0x3753   :  { %v4299_v24 = vadd.f32 %v7790_v4, %v4298_v23  ;;  %v6111_v9 = vpop.f32.mrb[85].mxu0 }
0x3754   :  { %v4301_v26 = vpop.f32.mrb[86].mxu0  ;;  %v4240_v31 = vld [vmem:[#allocation10] sm:$0x1]  ;;  %v4336_v61 = vld [vmem:[#allocation10 + $0x1] sm:$0x1] }
0x3755   :  { %4312 = vrot.lane.b32.xlu0 %v4299_v24, %s6615_s30  ;;  %v6112_v28 = vpop.f32.mrb[87].mxu0  ;;  %v4241_v30 = vld [vmem:[#allocation11] sm:$0x1]  ;;  %v4337_v32 = vld [vmem:[#allocation11 + $0x1] sm:$0x1] }
0x3756   :  { %v4243_v15 = vrot.slane %v4241_v30, 7  ;;  %v4339_v20 = vrot.slane %v4337_v32, 7  ;;  %v4422_v19 = vld [vmem:[#allocation11 + $0x2] sm:$0x1] }
0x3757   :  { %v4424_v23 = vrot.slane %v4422_v19, 7 }
0x3758   :  { %v4245_v34 = vsel %vm2610_vm9, %v4240_v31, %v4243_v15  ;;  %v4341_v7 = vsel %vm2610_vm9, %v4336_v61, %v4339_v20 }
0x3759   :  { %v4304_v22 = vadd.f32 %v4299_v24, %v4245_v34  ;;  %v4421_v24 = vld [vmem:[#allocation10 + $0x2] sm:$0x1] }
0x375a   :  { %v4426_v9 = vsel %vm2610_vm9, %v4421_v24, %v4424_v23 }
0x375b   :  { %v5400_v45 = vmul.f32 -1.442695, %v4304_v22 }
0x375d   :  { %6552 = vpow2.f32 %v5400_v45 }
0x3767   :  { %v6553_v41 = vpop.eup %6552 }
0x3768   :  { %v4308_v35 = vadd.f32 1.0, %v6553_v41 }
0x376a   :  { %6554 = vrcp.f32 %v4308_v35 }
0x3774   :  { %v6555_v36 = vpop.eup %6554 }
0x3775   :  { %v4322_v40 = vsub.f32 1.0, %v6555_v36  ;;  %v4328_v27 = vmul.f32 0.0, %v6555_v36 }
0x37c7   :  { %v4313_v50 = vpop.permute.xlu0 %4312 }
0x37c8   :  { %v4315_v48 = vmul.f32 %v6555_v36, %v4313_v50 }
0x37ca   :  { %4317 = vrot.lane.b32.xlu1 %v4315_v48, %s6615_s30 }
0x383c   :  { %v4318_v39 = vpop.permute.xlu1 %4317 }
0x383d   :  { %v4320_v37 = vadd.f32 %v4318_v39, %v4245_v34 }
0x383f   :  { %6556 = vtanh.f32 %v4320_v37 }
0x3849   :  { %v6557_v62 = vpop.eup %6556 }
0x384a   :  { %4324 = vrot.lane.b32.xlu0 %v6557_v62, %s6616_s1 }
0x38bc   :  { %v4325_v33 = vpop.permute.xlu0 %4324 }
0x38bd   :  { %v4327_v49 = vmul.f32 %v4325_v33, %v4322_v40 }
0x38bf   :  { %v7797_v3 = vadd.f32 %v4328_v27, %v4327_v49 }
0x38c1   :  { %v4342_v43 = vpack.c.bf16 %v7797_v3, %v7797_v3 }
0x38c3   :  { %4344 = vrot.lane.b32.xlu1 %v4342_v43, %s6616_s1 }
0x3935   :  { %v4345_v14 = vpop.permute.xlu1 %4344 }
0x3936   :  { %6118 = vmatmul.mubr.msk.bf16.vlgmr.msra.gmra.mrb[92].mxu1 %vm850_vm6, %v4345_v14 }
0x3937   :  { %6130 = vmatpush3.bf16.msra.mxu1 %v7754_v5  ;;  %6133 = vmatprep.mubr.msk.bf16.mxu1 %vm6613_vm2, %v6612_v0 }
0x3938   :  { %6131 = vmatprep.subr.bf16.mxu1 %v6612_v0 }
0x393b   :  { %6132 = vmatpush3.bf16.msra.mxu1 %v7762_v25 }
0x393c   :  { %6145 = vmatprep.subr.bf16.mxu1 %v6612_v0 }
0x3a09   :  { %v4383_v44 = vpop.f32.mrb[92].mxu1 }
0x3a0a   :  { %v4384_v52 = vadd.f32 %v7790_v4, %v4383_v44  ;;  %v6119_v53 = vpop.f32.mrb[93].mxu1  ;;  %v4507_v44 = vld [vmem:[#allocation11 + $0x3] sm:$0x1] }
0x3a0b   :  { %v4386_v42 = vpop.f32.mrb[94].mxu1  ;;  %v4506_v53 = vld [vmem:[#allocation10 + $0x3] sm:$0x1] }
0x3a0c   :  { %4397 = vrot.lane.b32.xlu0 %v4384_v52, %s6615_s30  ;;  %v6120_v29 = vpop.f32.mrb[95].mxu1  ;;  %v4389_v2 = vadd.f32 %v4384_v52, %v4341_v7  ;;  %v4509_v52 = vrot.slane %v4507_v44, 7 }
0x3a0e   :  { %v5402_v54 = vmul.f32 -1.442695, %v4389_v2  ;;  %v4511_v42 = vsel %vm2610_vm9, %v4506_v53, %v4509_v52 }
0x3a10   :  { %6558 = vpow2.f32 %v5402_v54 }
0x3a1a   :  { %v6559_v51 = vpop.eup %6558 }
0x3a1b   :  { %v4393_v55 = vadd.f32 1.0, %v6559_v51 }
0x3a1d   :  { %6560 = vrcp.f32 %v4393_v55 }
0x3a27   :  { %v6561_v56 = vpop.eup %6560 }
0x3a28   :  { %v4407_v6 = vsub.f32 1.0, %v6561_v56  ;;  %v4413_v10 = vmul.f32 %v6561_v56, %v7797_v3 }
0x3a7e   :  { %v4398_v57 = vpop.permute.xlu0 %4397 }
0x3a7f   :  { %v4400_v59 = vmul.f32 %v6561_v56, %v4398_v57 }
0x3a81   :  { %4402 = vrot.lane.b32.xlu1 %v4400_v59, %s6615_s30 }
0x3af3   :  { %v4403_v46 = vpop.permute.xlu1 %4402 }
0x3af4   :  { %v4405_v1 = vadd.f32 %v4403_v46, %v4341_v7 }
0x3af6   :  { %6562 = vtanh.f32 %v4405_v1 }
0x3b00   :  { %v6563_v21 = vpop.eup %6562 }
0x3b01   :  { %4409 = vrot.lane.b32.xlu0 %v6563_v21, %s6616_s1 }
0x3b73   :  { %v4410_v8 = vpop.permute.xlu0 %4409 }
0x3b74   :  { %v4412_v11 = vmul.f32 %v4410_v8, %v4407_v6 }
0x3b76   :  { %v7815_v60 = vadd.f32 %v4413_v10, %v4412_v11 }
0x3b78   :  { %v4427_v12 = vpack.c.bf16 %v7815_v60, %v7815_v60 }
0x3b7a   :  { %4429 = vrot.lane.b32.xlu1 %v4427_v12, %s6616_s1 }
0x3bec   :  { %v4430_v13 = vpop.permute.xlu1 %4429 }
0x3bed   :  { %6126 = vmatmul.mubr.msk.bf16.vlgmr.msra.gmra.mrb[88].mxu0 %vm850_vm6, %v4430_v13 }
0x3bee   :  { %6138 = vmatpush3.bf16.msra.mxu0 %v7754_v5  ;;  %6141 = vmatprep.mubr.msk.bf16.mxu0 %vm6613_vm2, %v6612_v0 }
0x3bef   :  { %6139 = vmatprep.subr.bf16.mxu0 %v6612_v0 }
0x3bf2   :  { %6140 = vmatpush3.bf16.msra.mxu0 %v7762_v25 }
0x3bf3   :  { %6153 = vmatprep.subr.bf16.mxu0 %v6612_v0 }
0x3cc0   :  { %v4468_v47 = vpop.f32.mrb[88].mxu0 }
0x3cc1   :  { %v4469_v63 = vadd.f32 %v7790_v4, %v4468_v47  ;;  %v6127_v16 = vpop.f32.mrb[89].mxu0 }
0x3cc2   :  { %v4471_v17 = vpop.f32.mrb[90].mxu0 }
0x3cc3   :  { %4482 = vrot.lane.b32.xlu0 %v4469_v63, %s6615_s30  ;;  %v6128_v18 = vpop.f32.mrb[91].mxu0  ;;  %v4474_v26 = vadd.f32 %v4469_v63, %v4426_v9  ;;  %v4592_v63 = vld [vmem:[#allocation11 + $0x4] sm:$0x1]  ;;  %v4591_v17 = vld [vmem:[#allocation10 + $0x4] sm:$0x1] }
0x3cc4   :  { %v4594_v16 = vrot.slane %v4592_v63, 7 }
0x3cc5   :  { %v5404_v28 = vmul.f32 -1.442695, %v4474_v26 }
0x3cc6   :  { %v4596_v18 = vsel %vm2610_vm9, %v4591_v17, %v4594_v16 }
0x3cc7   :  { %6564 = vpow2.f32 %v5404_v28 }
0x3cd1   :  { %v6565_v30 = vpop.eup %6564 }
0x3cd2   :  { %v4478_v15 = vadd.f32 1.0, %v6565_v30 }
0x3cd4   :  { %6566 = vrcp.f32 %v4478_v15 }
0x3cde   :  { %v6567_v31 = vpop.eup %6566 }
0x3cdf   :  { %v4492_v36 = vsub.f32 1.0, %v6567_v31  ;;  %v4498_v48 = vmul.f32 %v6567_v31, %v7815_v60 }
0x3d35   :  { %v4483_v34 = vpop.permute.xlu0 %4482 }
0x3d36   :  { %v4485_v22 = vmul.f32 %v6567_v31, %v4483_v34 }
0x3d38   :  { %4487 = vrot.lane.b32.xlu1 %v4485_v22, %s6615_s30 }
0x3daa   :  { %v4488_v45 = vpop.permute.xlu1 %4487 }
0x3dab   :  { %v4490_v41 = vadd.f32 %v4488_v45, %v4426_v9 }
0x3dad   :  { %6568 = vtanh.f32 %v4490_v41 }
0x3db7   :  { %v6569_v35 = vpop.eup %6568 }
0x3db8   :  { %4494 = vrot.lane.b32.xlu0 %v6569_v35, %s6616_s1 }
0x3e2a   :  { %v4495_v50 = vpop.permute.xlu0 %4494 }
0x3e2b   :  { %v4497_v39 = vmul.f32 %v4495_v50, %v4492_v36 }
0x3e2d   :  { %v7833_v37 = vadd.f32 %v4498_v48, %v4497_v39 }
0x3e2f   :  { %v4512_v62 = vpack.c.bf16 %v7833_v37, %v7833_v37 }
0x3e31   :  { %4514 = vrot.lane.b32.xlu1 %v4512_v62, %s6616_s1 }
0x3ea3   :  { %v4515_v40 = vpop.permute.xlu1 %4514 }
0x3ea4   :  { %6134 = vmatmul.mubr.msk.bf16.vlgmr.msra.gmra.mrb[96].mxu1 %vm850_vm6, %v4515_v40 }
0x3ea5   :  { %6146 = vmatpush3.bf16.msra.mxu1 %v7754_v5  ;;  %6149 = vmatprep.mubr.msk.bf16.mxu1 %vm6613_vm2, %v6612_v0 }
0x3ea6   :  { %6147 = vmatprep.subr.bf16.mxu1 %v6612_v0 }
0x3ea9   :  { %6148 = vmatpush3.bf16.msra.mxu1 %v7762_v25 }
0x3eaa   :  { %6161 = vmatprep.subr.bf16.mxu1 %v6612_v0 }
0x3f77   :  { %v4553_v33 = vpop.f32.mrb[96].mxu1 }
0x3f78   :  { %v4554_v27 = vadd.f32 %v7790_v4, %v4553_v33  ;;  %v6135_v49 = vpop.f32.mrb[97].mxu1 }
0x3f79   :  { %v4556_v43 = vpop.f32.mrb[98].mxu1  ;;  %v4677_v49 = vld [vmem:[#allocation11 + $0x5] sm:$0x1] }
0x3f7a   :  { %4567 = vrot.lane.b32.xlu0 %v4554_v27, %s6615_s30  ;;  %v6136_v14 = vpop.f32.mrb[99].mxu1  ;;  %v4559_v29 = vadd.f32 %v4554_v27, %v4511_v42  ;;  %v4679_v43 = vrot.slane %v4677_v49, 7 }
0x3f7b   :  { %v4676_v14 = vld [vmem:[#allocation10 + $0x5] sm:$0x1] }
0x3f7c   :  { %v5406_v32 = vmul.f32 -1.442695, %v4559_v29 }
0x3f7e   :  { %6570 = vpow2.f32 %v5406_v32 }
0x3f88   :  { %v6571_v20 = vpop.eup %6570 }
0x3f89   :  { %v4563_v61 = vadd.f32 1.0, %v6571_v20 }
0x3f8b   :  { %6572 = vrcp.f32 %v4563_v61 }
0x3f95   :  { %v6573_v7 = vpop.eup %6572 }
0x3f96   :  { %v4577_v57 = vsub.f32 1.0, %v6573_v7  ;;  %v4583_v46 = vmul.f32 %v6573_v7, %v7833_v37 }
0x3fec   :  { %v4568_v2 = vpop.permute.xlu0 %4567 }
0x3fed   :  { %v4570_v54 = vmul.f32 %v6573_v7, %v4568_v2 }
0x3fef   :  { %4572 = vrot.lane.b32.xlu1 %v4570_v54, %s6615_s30 }
0x4061   :  { %v4573_v51 = vpop.permute.xlu1 %4572 }
0x4062   :  { %v4575_v55 = vadd.f32 %v4573_v51, %v4511_v42 }
0x4064   :  { %6574 = vtanh.f32 %v4575_v55 }
0x406e   :  { %v6575_v56 = vpop.eup %6574 }
0x406f   :  { %4579 = vrot.lane.b32.xlu0 %v6575_v56, %s6616_s1 }
0x40e1   :  { %v4580_v59 = vpop.permute.xlu0 %4579 }
0x40e2   :  { %v4582_v1 = vmul.f32 %v4580_v59, %v4577_v57 }
0x40e4   :  { %v7851_v21 = vadd.f32 %v4583_v46, %v4582_v1 }
0x40e6   :  { %v4597_v6 = vpack.c.bf16 %v7851_v21, %v7851_v21 }
0x40e8   :  { %4599 = vrot.lane.b32.xlu1 %v4597_v6, %s6616_s1 }
0x415a   :  { %v4600_v8 = vpop.permute.xlu1 %4599 }
0x415b   :  { %6142 = vmatmul.mubr.msk.bf16.vlgmr.msra.gmra.mrb[92].mxu0 %vm850_vm6, %v4600_v8 }
0x415c   :  { %6154 = vmatpush3.bf16.msra.mxu0 %v7754_v5  ;;  %6157 = vmatprep.mubr.msk.bf16.mxu0 %vm6613_vm2, %v6612_v0 }
0x415d   :  { %6155 = vmatprep.subr.bf16.mxu0 %v6612_v0 }
0x4160   :  { %6156 = vmatpush3.bf16.msra.mxu0 %v7762_v25 }
0x422e   :  { %v4638_v10 = vpop.f32.mrb[92].mxu0 }
0x422f   :  { %v4639_v11 = vadd.f32 %v7790_v4, %v4638_v10  ;;  %v6143_v12 = vpop.f32.mrb[93].mxu0  ;;  %v4762_v10 = vld [vmem:[#allocation11 + $0x6] sm:$0x1] }
0x4230   :  { %v4641_v13 = vpop.f32.mrb[94].mxu0  ;;  %v4761_v12 = vld [vmem:[#allocation10 + $0x6] sm:$0x1] }
0x4231   :  { %4652 = vrot.lane.b32.xlu0 %v4639_v11, %s6615_s30  ;;  %v6144_v47 = vpop.f32.mrb[95].mxu0  ;;  %v4644_v19 = vadd.f32 %v4639_v11, %v4596_v18  ;;  %v4764_v11 = vrot.slane %v4762_v10, 7 }
0x4233   :  { %v5408_v23 = vmul.f32 -1.442695, %v4644_v19  ;;  %v4766_v13 = vsel %vm2610_vm9, %v4761_v12, %v4764_v11  ;;  %v5072_v11 = vld [vmem:[#allocation7] sm:$0xff] }
0x4235   :  { %6576 = vpow2.f32 %v5408_v23 }
0x423f   :  { %v6577_v24 = vpop.eup %6576 }
0x4240   :  { %v4648_v9 = vadd.f32 1.0, %v6577_v24 }
0x4242   :  { %6578 = vrcp.f32 %v4648_v9 }
0x424c   :  { %v6579_v26 = vpop.eup %6578 }
0x424d   :  { %v4662_v22 = vsub.f32 1.0, %v6579_v26  ;;  %v4668_v41 = vmul.f32 %v6579_v26, %v7851_v21 }
0x42a3   :  { %v4653_v28 = vpop.permute.xlu0 %4652 }
0x42a4   :  { %v4655_v30 = vmul.f32 %v6579_v26, %v4653_v28 }
0x42a6   :  { %4657 = vrot.lane.b32.xlu1 %v4655_v30, %s6615_s30 }
0x4318   :  { %v4658_v15 = vpop.permute.xlu1 %4657 }
0x4319   :  { %v4660_v31 = vadd.f32 %v4658_v15, %v4596_v18 }
0x431b   :  { %6580 = vtanh.f32 %v4660_v31 }
0x4325   :  { %v6581_v34 = vpop.eup %6580 }
0x4326   :  { %4664 = vrot.lane.b32.xlu0 %v6581_v34, %s6616_s1 }
0x4398   :  { %v4665_v45 = vpop.permute.xlu0 %4664 }
0x4399   :  { %v4667_v35 = vmul.f32 %v4665_v45, %v4662_v22 }
0x439b   :  { %v7868_v36 = vadd.f32 %v4668_v41, %v4667_v35 }
0x439d   :  { %v4682_v50 = vpack.c.bf16 %v7868_v36, %v7868_v36 }
0x439f   :  { %4684 = vrot.lane.b32.xlu1 %v4682_v50, %s6616_s1 }
0x4411   :  { %v4685_v48 = vpop.permute.xlu1 %4684 }
0x4412   :  { %6150 = vmatmul.mubr.msk.bf16.vlgmr.msra.gmra.mrb[100].mxu1 %vm850_vm6, %v4685_v48 }
0x4413   :  { %6162 = vmatpush3.bf16.msra.mxu1 %v7754_v5  ;;  %6165 = vmatprep.mubr.msk.bf16.mxu1 %vm6613_vm2, %v6612_v0  ;;  %v4681_v5 = vsel %vm2610_vm9, %v4676_v14, %v4679_v43 }
0x4414   :  { %6163 = vmatprep.subr.bf16.mxu1 %v6612_v0 }
0x4417   :  { %6164 = vmatpush3.bf16.msra.mxu1 %v7762_v25 }
0x44e5   :  { %v4723_v39 = vpop.f32.mrb[100].mxu1 }
0x44e6   :  { %v4724_v62 = vadd.f32 %v7790_v4, %v4723_v39  ;;  %v6151_v40 = vpop.f32.mrb[101].mxu1 }
0x44e7   :  { %v4726_v33 = vpop.f32.mrb[102].mxu1 }
0x44e8   :  { %4737 = vrot.lane.b32.xlu0 %v4724_v62, %s6615_s30  ;;  %v6152_v27 = vpop.f32.mrb[103].mxu1  ;;  %v4729_v44 = vadd.f32 %v4724_v62, %v4681_v5  ;;  %v4847_v62 = vld [vmem:[#allocation11 + $0x7] sm:$0x1]  ;;  %v4846_v33 = vld [vmem:[#allocation10 + $0x7] sm:$0x1] }
0x44e9   :  { %v4849_v40 = vrot.slane %v4847_v62, 7 }
0x44ea   :  { %v5410_v52 = vmul.f32 -1.442695, %v4729_v44 }
0x44eb   :  { %v4851_v27 = vsel %vm2610_vm9, %v4846_v33, %v4849_v40 }
0x44ec   :  { %6582 = vpow2.f32 %v5410_v52 }
0x44f6   :  { %v6583_v53 = vpop.eup %6582 }
0x44f7   :  { %v4733_v0 = vadd.f32 1.0, %v6583_v53 }
0x44f9   :  { %6584 = vrcp.f32 %v4733_v0  ;;  %v4937_v0 = vld [vmem:[%s8035_s14 + $0x10] sm:$0xff] }
0x4503   :  { %v6585_v25 = vpop.eup %6584 }
0x4504   :  { %v4747_v7 = vsub.f32 1.0, %v6585_v25  ;;  %v4753_v54 = vmul.f32 %v6585_v25, %v7868_v36 }
0x455a   :  { %v4738_v42 = vpop.permute.xlu0 %4737 }
0x455b   :  { %v4740_v29 = vmul.f32 %v6585_v25, %v4738_v42 }
0x455d   :  { %4742 = vrot.lane.b32.xlu1 %v4740_v29, %s6615_s30 }
0x45cf   :  { %v4743_v32 = vpop.permute.xlu1 %4742 }
0x45d0   :  { %v4745_v20 = vadd.f32 %v4743_v32, %v4681_v5 }
0x45d2   :  { %6586 = vtanh.f32 %v4745_v20 }
0x45dc   :  { %v6587_v61 = vpop.eup %6586 }
0x45dd   :  { %4749 = vrot.lane.b32.xlu0 %v6587_v61, %s6616_s1 }
0x464f   :  { %v4750_v2 = vpop.permute.xlu0 %4749 }
0x4650   :  { %v4752_v51 = vmul.f32 %v4750_v2, %v4747_v7 }
0x4652   :  { %v7885_v55 = vadd.f32 %v4753_v54, %v4752_v51 }
0x4654   :  { %v4767_v56 = vpack.c.bf16 %v7885_v55, %v7885_v55 }
0x4656   :  { %4769 = vrot.lane.b32.xlu1 %v4767_v56, %s6616_s1 }
0x46c8   :  { %v4770_v57 = vpop.permute.xlu1 %4769 }
0x46c9   :  { %6158 = vmatmul.mubr.msk.bf16.vlgmr.msra.gmra.mrb[96].mxu0 %vm850_vm6, %v4770_v57 }
0x479c   :  { %v4808_v59 = vpop.f32.mrb[96].mxu0 }
0x479d   :  { %v4809_v46 = vadd.f32 %v7790_v4, %v4808_v59  ;;  %v6159_v1 = vpop.f32.mrb[97].mxu0  ;;  %v6382_v59 = vld [vmem:[%s8036_s13] sm:$0xff]  }
0x479e   :  { %v4811_v6 = vpop.f32.mrb[98].mxu0  ;;  %6171 = vmatprep.mubr.msk.bf16.mxu0 %vm850_vm6, %v6382_v59 }
0x479f   :  { %4822 = vrot.lane.b32.xlu0 %v4809_v46, %s6615_s30  ;;  %v6160_v8 = vpop.f32.mrb[99].mxu0  ;;  %v4814_v47 = vadd.f32 %v4809_v46, %v4766_v13  ;;  %v1208_v46 = vmul.f32 %v7118_v58, %v7118_v58 }
0x47a0   :  { %v4939_v8 = vld [vmem:[#allocation6] sm:$0xff] }
0x47a1   :  { %v5412_v63 = vmul.f32 -1.442695, %v4814_v47  ;;  %v1209_v1 = vsel %vm850_vm6, %v1208_v46, 0.0 }
0x47a3   :  { %6588 = vpow2.f32 %v5412_v63 }
0x47ad   :  { %v6589_v16 = vpop.eup %6588 }
0x47ae   :  { %v4818_v17 = vadd.f32 1.0, %v6589_v16 }
0x47b0   :  { %6590 = vrcp.f32 %v4818_v17 }
0x47ba   :  { %v6591_v18 = vpop.eup %6590 }
0x47bb   :  { %v4832_v28 = vsub.f32 1.0, %v6591_v18  ;;  %v4838_v15 = vmul.f32 %v6591_v18, %v7885_v55 }
0x4811   :  { %v4823_v19 = vpop.permute.xlu0 %4822 }
0x4812   :  { %v4825_v23 = vmul.f32 %v6591_v18, %v4823_v19 }
0x4814   :  { %4827 = vrot.lane.b32.xlu1 %v4825_v23, %s6615_s30 }
0x4886   :  { %v4828_v24 = vpop.permute.xlu1 %4827 }
0x4887   :  { %v4830_v9 = vadd.f32 %v4828_v24, %v4766_v13 }
0x4889   :  { %6592 = vtanh.f32 %v4830_v9 }
0x4893   :  { %v6593_v26 = vpop.eup %6592 }
0x4894   :  { %4834 = vrot.lane.b32.xlu0 %v6593_v26, %s6616_s1 }
0x4906   :  { %v4835_v30 = vpop.permute.xlu0 %4834 }
0x4907   :  { %v4837_v31 = vmul.f32 %v4835_v30, %v4832_v28 }
0x4909   :  { %v4839_v34 = vadd.f32 %v4838_v15, %v4837_v31 }
0x490b   :  { %v4852_v22 = vpack.c.bf16 %v4839_v34, %v4839_v34 }
0x490d   :  { %4854 = vrot.lane.b32.xlu1 %v4852_v22, %s6616_s1 }
0x497f   :  { %v4855_v45 = vpop.permute.xlu1 %4854 }
0x4980   :  { %6166 = vmatmul.mubr.msk.bf16.vlgmr.msra.gmra.mrb[104].mxu1 %vm850_vm6, %v4855_v45 }
0x4981   :  { %6177 = vmatprep.mubr.msk.bf16.mxu1 %vm850_vm6, %v6382_v59 }
0x4a53   :  { %v4893_v41 = vpop.f32.mrb[104].mxu1 }
0x4a54   :  { %v4894_v35 = vadd.f32 %v7790_v4, %v4893_v41  ;;  %v6167_v50 = vpop.f32.mrb[105].mxu1  ;;  %v4935_v4 = vld [vmem:[%s8035_s14] sm:$0xff] }
0x4a55   :  { %v4896_v48 = vpop.f32.mrb[106].mxu1 }
0x4a56   :  { %4907 = vrot.lane.b32.xlu0 %v4894_v35, %s6615_s30  ;;  %v6168_v39 = vpop.f32.mrb[107].mxu1  ;;  %v4899_v49 = vadd.f32 %v4894_v35, %v4851_v27 }
0x4a58   :  { %v5414_v43 = vmul.f32 -1.442695, %v4899_v49  ;;  %v6383_v49 = vld [vmem:[%s8036_s13 + $0x8] sm:$0xff]  }
0x4a5a   :  { %6594 = vpow2.f32 %v5414_v43 }
0x4a64   :  { %v6595_v14 = vpop.eup %6594 }
0x4a65   :  { %v4903_v5 = vadd.f32 1.0, %v6595_v14 }
0x4a67   :  { %6596 = vrcp.f32 %v4903_v5 }
0x4a71   :  { %v6597_v44 = vpop.eup %6596 }
0x4a72   :  { %v4917_v7 = vsub.f32 1.0, %v6597_v44  ;;  %v4923_v54 = vmul.f32 %v6597_v44, %v4839_v34 }
0x4ac8   :  { %v4908_v52 = vpop.permute.xlu0 %4907 }
0x4ac9   :  { %v4910_v53 = vmul.f32 %v6597_v44, %v4908_v52 }
0x4acb   :  { %4912 = vrot.lane.b32.xlu1 %v4910_v53, %s6615_s30 }
0x4acf   :  { %4331 = vrot.lane.b32.xlu1 %v7797_v3, %s6616_s1  ;;  %v4938_v3 = vld [vmem:[%s8035_s14 + $0x18] sm:$0xff] }
0x4ad3   :  { %4501 = vrot.lane.b32.xlu1 %v7833_v37, %s6616_s1  ;;  %v2406_v37 = vmul.f32 %v7340_v38, %v7340_v38 }
0x4ad7   :  { %4671 = vrot.lane.b32.xlu1 %v7868_v36, %s6616_s1  ;;  %v2407_v36 = vsel %vm850_vm6, %v2406_v37, 0.0 }
0x4adb   :  { %4841 = vrot.lane.b32.xlu1 %v4839_v34, %s6616_s1 }
0x4adf   :  { %4954 = vperm.xlu1 %6340, %v4935_v4  }
0x4ae3   :  { %4964 = vperm.xlu1 %6340, %v4937_v0  }
0x4ae7   :  { %4969 = vperm.xlu1 %6340, %v4938_v3  }
0x4b0b   :  { %2408 = vadd.xlane.f32.xlu1 %v2407_v36 }
0x4b3d   :  { %v4913_v25 = vpop.permute.xlu1 %4912 }
0x4b3e   :  { %v4915_v42 = vadd.f32 %v4913_v25, %v4851_v27 }
0x4b40   :  { %6598 = vtanh.f32 %v4915_v42 }
0x4b41   :  { %v4332_v29 = vpop.permute.xlu1 %4331 }
0x4b42   :  { %4334 = vst.msk [vmem:[#allocation8] sm:$0x1] %vm855_vm7, %v4332_v29 }
0x4b43   :  { %4335 = vst.msk [vmem:[#allocation9 - $0x1] sm:$0x2] %vm2704_vm10, %v4332_v29 }
0x4b45   :  { %v4502_v32 = vpop.permute.xlu1 %4501 }
0x4b46   :  { %4504 = vst.msk [vmem:[#allocation8 + $0x2] sm:$0x1] %vm855_vm7, %v4502_v32 }
0x4b47   :  { %4505 = vst.msk [vmem:[#allocation9 + $0x1] sm:$0x2] %vm2704_vm10, %v4502_v32 }
0x4b49   :  { %v4672_v20 = vpop.permute.xlu1 %4671 }
0x4b4a   :  { %v6599_v61 = vpop.eup %6598  ;;  %4674 = vst.msk [vmem:[#allocation8 + $0x4] sm:$0x1] %vm855_vm7, %v4672_v20 }
0x4b4b   :  { %4675 = vst.msk [vmem:[#allocation9 + $0x3] sm:$0x2] %vm2704_vm10, %v4672_v20  ;;  %4919 = vrot.lane.b32.xlu0 %v6599_v61, %s6616_s1 }
0x4b4d   :  { %v4842_v38 = vpop.permute.xlu1 %4841 }
0x4b4e   :  { %4844 = vst.msk [vmem:[#allocation8 + $0x6] sm:$0x1] %vm855_vm7, %v4842_v38 }
0x4b4f   :  { %4845 = vst.msk [vmem:[#allocation9 + $0x5] sm:$0x2] %vm2704_vm10, %v4842_v38  ;;  %4416 = vrot.lane.b32.xlu0 %v7815_v60, %s6616_s1  ;;  %v4936_v60 = vld [vmem:[%s8035_s14 + $0x8] sm:$0xff] }
0x4b53   :  { %4586 = vrot.lane.b32.xlu0 %v7851_v21, %s6616_s1 }
0x4b57   :  { %4756 = vrot.lane.b32.xlu0 %v7885_v55, %s6616_s1 }
0x4b5e   :  { %v7957_v28 = vpop.permute.xlu1 %4954 }
0x4b62   :  { %v4965_v30 = vpop.permute.xlu1 %4964 }
0x4b66   :  { %v7959_v48 = vpop.permute.xlu1 %4969 }
0x4b98   :  { %v2409_v27 = vpop.xlane.xlu1 %2408 }
0x4b99   :  { %vm2412_vm11 = vcmp.eq.f32.partialorder %v2409_v27, inf  ;;  %v2415_v53 = vand.u32 2147483648, %v2409_v27  ;;  %vm2414_vm12 = vcmp.eq.f32.partialorder %v2409_v27, 0.0 }
0x4bbd   :  { %v4920_v2 = vpop.permute.xlu0 %4919 }
0x4bbe   :  { %v4922_v51 = vmul.f32 %v4920_v2, %v4917_v7 }
0x4bc0   :  { %v4924_v56 = vadd.f32 %v4923_v54, %v4922_v51 }
0x4bc1   :  { %v4417_v57 = vpop.permute.xlu0 %4416 }
0x4bc2   :  { %4419 = vst.msk [vmem:[#allocation8 + $0x1] sm:$0x1] %vm855_vm7, %v4417_v57  ;;  %4926 = vrot.lane.b32.xlu0 %v4924_v56, %s6616_s1 }
0x4bc3   :  { %4420 = vst.msk [vmem:[#allocation9] sm:$0x2] %vm2704_vm10, %v4417_v57 }
0x4bc5   :  { %v4587_v21 = vpop.permute.xlu0 %4586 }
0x4bc6   :  { %4589 = vst.msk [vmem:[#allocation8 + $0x3] sm:$0x1] %vm855_vm7, %v4587_v21  ;;  %4959 = vperm.xlu0 %6341, %v4936_v60  }
0x4bc7   :  { %4590 = vst.msk [vmem:[#allocation9 + $0x2] sm:$0x2] %vm2704_vm10, %v4587_v21 }
0x4bc9   :  { %v4757_v55 = vpop.permute.xlu0 %4756 }
0x4bca   :  { %4759 = vst.msk [vmem:[#allocation8 + $0x5] sm:$0x1] %vm855_vm7, %v4757_v55 }
0x4bcb   :  { %4760 = vst.msk [vmem:[#allocation9 + $0x4] sm:$0x2] %vm2704_vm10, %v4757_v55 }
0x4be5   :  { %1210 = vadd.xlane.f32.xlu0 %v1209_v1 }
0x4c34   :  { %v4927_v6 = vpop.permute.xlu0 %4926 }
0x4c35   :  { %4929 = vst.msk [vmem:[#allocation8 + $0x7] sm:$0x1] %vm855_vm7, %v4927_v6 }
0x4c36   :  { %4930 = vst.msk [vmem:[#allocation9 + $0x6] sm:$0x2] %vm2704_vm10, %v4927_v6 }
0x4c3c   :  { %v4940_v10 = vld [vmem:[#allocation8] sm:$0xff] }
0x4c3d   :  { %v5073_v12 = vld [vmem:[#allocation9] sm:$0xff]  ;;  %v4941_v13 = vadd.f32 %v4940_v10, %v4939_v8 }
0x4c3e   :  { %v5074_v47 = vadd.f32 %v5073_v12, %v5072_v11 }
0x4c3f   :  { %v4943_v63 = vmul.f32 0.044715, %v4941_v13  ;;  %v4942_v34 = vmul.f32 0.5, %v4941_v13 }
0x4c40   :  { %v5076_v16 = vmul.f32 0.044715, %v5074_v47  ;;  %v5075_v45 = vmul.f32 0.5, %v5074_v47 }
0x4c41   :  { %v4944_v17 = vmul.f32 %v4943_v63, %v4941_v13 }
0x4c42   :  { %v5077_v18 = vmul.f32 %v5076_v16, %v5074_v47 }
0x4c43   :  { %v4945_v19 = vmul.f32 %v4944_v17, %v4941_v13 }
0x4c44   :  { %v5078_v58 = vmul.f32 %v5077_v18, %v5074_v47 }
0x4c45   :  { %v4946_v23 = vadd.f32 %v4945_v19, %v4941_v13  ;;  %v4960_v14 = vpop.permute.xlu0 %4959 }
0x4c46   :  { %v5079_v24 = vadd.f32 %v5078_v58, %v5074_v47 }
0x4c47   :  { %v4947_v9 = vmul.f32 0.7978846, %v4946_v23 }
0x4c48   :  { %v5080_v26 = vmul.f32 0.7978846, %v5079_v24 }
0x4c49   :  { %6600 = vtanh.f32 %v4947_v9 }
0x4c4a   :  { %6602 = vtanh.f32 %v5080_v26 }
0x4c4b   :  { %6604 = vrsqrt.f32 %v2409_v27 }
0x4c53   :  { %v6601_v15 = vpop.eup %6600 }
0x4c54   :  { %v6603_v31 = vpop.eup %6602  ;;  %v4949_v22 = vadd.f32 1.0, %v6601_v15 }
0x4c55   :  { %v5082_v41 = vadd.f32 1.0, %v6603_v31  ;;  %v6605_v43 = vpop.eup %6604 }
0x4c56   :  { %v4950_v35 = vmul.f32 %v4949_v22, %v4942_v34  ;;  %v2411_v5 = vmul.f32 %v6605_v43, %v2409_v27 }
0x4c57   :  { %v5083_v50 = vmul.f32 %v5082_v41, %v5075_v45 }
0x4c58   :  { %v4951_v39 = vpack.c.bf16 %v4950_v35, %v4950_v35  ;;  %v2413_v44 = vsel %vm2412_vm11, %v2409_v27, %v2411_v5 }
0x4c59   :  { %v5084_v62 = vpack.c.bf16 %v5083_v50, %v5083_v50  ;;  %v2416_v4 = vsel %vm2414_vm12, %v2415_v53, %v2413_v44 }
0x4c5a   :  { %6333 = vmatprep.subr.msk.bf16.mxu0 %vm850_vm6, %v4951_v39  ;;  %v4989_v40 = vsel %vm850_vm6, %v4951_v39, 0  ;;  %v2417_v0 = vrot.slane %v2416_v4, 4 }
0x4c5b   :  { %6334 = vmatprep.subr.msk.bf16.mxu1 %vm850_vm6, %v5084_v62  ;;  %6170 = vmatpush3.bf16.xpose.msra.mxu0 %v4989_v40  ;;  %v5086_v33 = vsel %vm850_vm6, %v5084_v62, 0 }
0x4c5c   :  { %6176 = vmatpush3.bf16.xpose.msra.mxu1 %v5086_v33  ;;  %v2418_v3 = vadd.f32 %v2417_v0, %v2416_v4 }
0x4c5e   :  { %v2419_v42 = vrot.slane %v2418_v3, 2 }
0x4c60   :  { %v2420_v61 = vadd.f32 %v2419_v42, %v2418_v3 }
0x4c62   :  { %6172 = vmatmul.mubr.msk.bf16.vlgmr.msra.gmra.mrb[100].mxu0 %vm850_vm6, %v6383_v49  ;;  %v2421_v2 = vrot.slane %v2420_v61, 1 }
0x4c63   :  { %6178 = vmatmul.mubr.msk.bf16.vlgmr.msra.gmra.mrb[108].mxu1 %vm850_vm6, %v6383_v49 }
0x4c64   :  { %v2422_v56 = vadd.f32 %v2421_v2, %v2420_v61 }
0x4c72   :  { %v1211_v52 = vpop.xlane.xlu0 %1210 }
0x4c73   :  { %6606 = vrsqrt.f32 %v1211_v52  ;;  %vm1214_vm13 = vcmp.eq.f32.partialorder %v1211_v52, inf  ;;  %v1217_v25 = vand.u32 2147483648, %v1211_v52  ;;  %vm1216_vm14 = vcmp.eq.f32.partialorder %v1211_v52, 0.0 }
0x4c7d   :  { %v6607_v37 = vpop.eup %6606 }
0x4c7e   :  { %v1213_v36 = vmul.f32 %v6607_v37, %v1211_v52 }
0x4c80   :  { %v1215_v29 = vsel %vm1214_vm13, %v1211_v52, %v1213_v36 }
0x4c81   :  { %v1218_v32 = vsel %vm1216_vm14, %v1217_v25, %v1215_v29 }
0x4c82   :  { %v1219_v20 = vrot.slane %v1218_v32, 4 }
0x4c84   :  { %v1220_v38 = vadd.f32 %v1219_v20, %v1218_v32 }
0x4c86   :  { %v1221_v7 = vrot.slane %v1220_v38, 2 }
0x4c88   :  { %v1222_v54 = vadd.f32 %v1221_v7, %v1220_v38 }
0x4c8a   :  { %v1223_v51 = vrot.slane %v1222_v54, 1 }
0x4c8c   :  { %v1224_v57 = vadd.f32 %v1223_v51, %v1222_v54 }
0x4c8e   :  { %v2423_v60 = vadd.f32 %v2422_v56, %v1224_v57 }
0x4c90   :  { %5171 = vst.msk [vmem:[%s8037_s16] sm:$0x1] %vm5170_vm15, %v2423_v60 }
0x4d35   :  { %v6173_v21 = vpop.f32.mrb[100].mxu0 }
0x4d36   :  { %v5034_v55 = vadd.f32 %v6173_v21, %v4965_v30  ;;  %v6179_v59 = vpop.f32.mrb[108].mxu1  ;;  %v5025_v46 = vpop.f32.mrb[101].mxu0 }
0x4d37   :  { %v5131_v1 = vadd.f32 %v6179_v59, %v4965_v30  ;;  %v5026_v6 = vadd.f32 %v5025_v46, %v7957_v28  ;;  %v5122_v8 = vpop.f32.mrb[109].mxu1  ;;  %v6174_v10 = vpop.f32.mrb[102].mxu0 }
0x4d38   :  { %5042 = vst.msk [vmem:[%s8038_s15 + $0x10] sm:$0xff] %vm77_vm1, %v5034_v55  ;;  %v5123_v11 = vadd.f32 %v5122_v8, %v7957_v28  ;;  %v5037_v12 = vadd.f32 %v6174_v10, %v7959_v48  ;;  %v6180_v13 = vpop.f32.mrb[110].mxu1  ;;  %v5028_v47 = vpop.f32.mrb[103].mxu0  ;;  %v5046_v23 = vmul.f32 %v5034_v55, %v5034_v55 }
0x4d39   :  { %5423 = vst.msk [vmem:[%s8038_s15 + $0x30] sm:$0xff] %vm77_vm1, %v5131_v1  ;;  %5040 = vst.msk [vmem:[%s8038_s15] sm:$0xff] %vm77_vm1, %v5026_v6  ;;  %v5044_v63 = vmul.f32 %v5026_v6, %v5026_v6  ;;  %v5134_v16 = vadd.f32 %v6180_v13, %v7959_v48  ;;  %v5029_v17 = vadd.f32 %v5028_v47, %v4960_v14  ;;  %v5125_v18 = vpop.f32.mrb[111].mxu1 }
0x4d3a   :  { %5421 = vst.msk [vmem:[%s8038_s15 + $0x20] sm:$0xff] %vm77_vm1, %v5123_v11  ;;  %v5142_v19 = vmul.f32 %v5123_v11, %v5123_v11  ;;  %5043 = vst.msk [vmem:[%s8038_s15 + $0x18] sm:$0xff] %vm77_vm1, %v5037_v12  ;;  %v5126_v58 = vadd.f32 %v5125_v18, %v4960_v14  ;;  %v5144_v9 = vmul.f32 %v5131_v1, %v5131_v1  ;;  %v5051_v41 = vsel %vm77_vm1, %v5046_v23, 0.0 }
0x4d3b   :  { %5424 = vst.msk [vmem:[%s8038_s15 + $0x38] sm:$0xff] %vm77_vm1, %v5134_v16  ;;  %5041 = vst.msk [vmem:[%s8038_s15 + $0x8] sm:$0xff] %vm77_vm1, %v5029_v17  ;;  %v5045_v24 = vmul.f32 %v5029_v17, %v5029_v17  ;;  %v5048_v28 = vsel %vm77_vm1, %v5044_v63, 0.0  ;;  %v5047_v30 = vmul.f32 %v5037_v12, %v5037_v12  ;;  %v5145_v34 = vmul.f32 %v5134_v16, %v5134_v16 }
0x4d3c   :  { %5422 = vst.msk [vmem:[%s8038_s15 + $0x28] sm:$0xff] %vm77_vm1, %v5126_v58  ;;  %v5143_v26 = vmul.f32 %v5126_v58, %v5126_v58  ;;  %v5146_v31 = vsel %vm77_vm1, %v5142_v19, 0.0  ;;  %v5149_v50 = vsel %vm77_vm1, %v5144_v9, 0.0 }
0x4d3d   :  { %v5049_v15 = vsel %vm77_vm1, %v5045_v24, 0.0  ;;  %v5053_v39 = vsel %vm77_vm1, %v5047_v30, 0.0  ;;  %v5151_v40 = vsel %vm77_vm1, %v5145_v34, 0.0 }
0x4d3e   :  { %v5050_v22 = vadd.f32 %v5049_v15, %v5048_v28  ;;  %v5147_v45 = vsel %vm77_vm1, %v5143_v26, 0.0 }
0x4d3f   :  { %v5148_v35 = vadd.f32 %v5147_v45, %v5146_v31 }
0x4d40   :  { %v5052_v48 = vadd.f32 %v5051_v41, %v5050_v22 }
0x4d41   :  { %v5150_v62 = vadd.f32 %v5149_v50, %v5148_v35 }
0x4d42   :  { %v5054_v33 = vadd.f32 %v5053_v39, %v5052_v48 }
0x4d43   :  { %v5152_v27 = vadd.f32 %v5151_v40, %v5150_v62 }
0x4d44   :  { %v5055_v49 = vrot.slane %v5054_v33, 4 }
0x4d45   :  { %v5153_v43 = vrot.slane %v5152_v27, 4 }
0x4d46   :  { %v5056_v14 = vadd.f32 %v5055_v49, %v5054_v33 }
0x4d47   :  { %v5154_v5 = vadd.f32 %v5153_v43, %v5152_v27 }
0x4d48   :  { %v5057_v44 = vrot.slane %v5056_v14, 2 }
0x4d49   :  { %v5155_v52 = vrot.slane %v5154_v5, 2 }
0x4d4a   :  { %v5058_v53 = vadd.f32 %v5057_v44, %v5056_v14 }
0x4d4b   :  { %v5156_v4 = vadd.f32 %v5155_v52, %v5154_v5 }
0x4d4c   :  { %v5059_v0 = vrot.slane %v5058_v53, 1 }
0x4d4d   :  { %v5157_v3 = vrot.slane %v5156_v4, 1 }
0x4d4e   :  { %v5060_v37 = vadd.f32 %v5059_v0, %v5058_v53 }
0x4d4f   :  { %v5158_v36 = vadd.f32 %v5157_v3, %v5156_v4 }
0x4d50   :  { %6608 = vrsqrt.f32 %v5060_v37  ;;  %vm5063_vm0 = vcmp.eq.f32.partialorder %v5060_v37, inf  ;;  %v5066_v32 = vand.u32 2147483648, %v5060_v37  ;;  %vm5065_vm2 = vcmp.eq.f32.partialorder %v5060_v37, 0.0 }
0x4d51   :  { %6610 = vrsqrt.f32 %v5158_v36  ;;  %vm5161_vm3 = vcmp.eq.f32.partialorder %v5158_v36, inf  ;;  %v5164_v2 = vand.u32 2147483648, %v5158_v36  ;;  %vm5163_vm4 = vcmp.eq.f32.partialorder %v5158_v36, 0.0 }
0x4d5a   :  { %v6609_v25 = vpop.eup %6608 }
0x4d5b   :  { %v6611_v42 = vpop.eup %6610  ;;  %v5062_v29 = vmul.f32 %v6609_v25, %v5060_v37 }
0x4d5c   :  { %v5160_v20 = vmul.f32 %v6611_v42, %v5158_v36 }
0x4d5d   :  { %v5064_v61 = vsel %vm5063_vm0, %v5060_v37, %v5062_v29 }
0x4d5e   :  { %v5067_v38 = vsel %vm5065_vm2, %v5066_v32, %v5064_v61  ;;  %v5162_v7 = vsel %vm5161_vm3, %v5158_v36, %v5160_v20 }
0x4d5f   :  { %v5068_v54 = vsel %vm77_vm1, %v5067_v38, 0.0  ;;  %v5165_v51 = vsel %vm5163_vm4, %v5164_v2, %v5162_v7 }
0x4d60   :  { %5069 = vadd.xlane.f32.xlu0 %v5068_v54  ;;  %v5166_v56 = vsel %vm77_vm1, %v5165_v51, 0.0 }
0x4d64   :  { %5167 = vadd.xlane.f32.xlu0 %v5166_v56 }
0x4ded   :  { %v5070_v57 = vpop.xlane.xlu0 %5069 }
0x4df1   :  { %v5168_v60 = vpop.xlane.xlu0 %5167 }
0x4df2   :  { %v5169_v21 = vadd.f32 %v5168_v60, %v5070_v57 }
0x4df4   :  { %5173 = vst.msk [vmem:[%s8037_s16] sm:$0x1] %vm5172_vm5, %v5169_v21 }

</bundles_post_ra>
